<compile_context>
chip_gen: v7x
topology: tpu7x:2x2x1
jax: 0.10.0
libtpu: 0.0.40
codegen_flags: <defaults>
</compile_context>

<pallas_src>
import jax
import jax.numpy as jnp
from jax import lax
from jax.experimental import pallas as pl
from jax.experimental.pallas import tpu as pltpu

EPS = 1e-5          # torch BatchNorm2d default
NEG_SLOPE = 0.01    # torch LeakyReLU default negative_slope


# ----------------------------- Pallas kernels ------------------------------

def _fused_conv_bn_lrelu_kernel(p_ref, w_ref, b_ref, g_ref, beta_ref, o_ref):
    """Whole layer in one shot: (M,Kd)@(Kd,Co) + bias, then training-mode
    BatchNorm over the M rows (batch statistics), then LeakyReLU."""
    conv = jnp.dot(p_ref[...], w_ref[...],
                   preferred_element_type=jnp.float32) + b_ref[...]
    inv_m = 1.0 / conv.shape[0]
    mean = jnp.sum(conv, axis=0, keepdims=True) * inv_m
    var = jnp.sum(conv * conv, axis=0, keepdims=True) * inv_m - mean * mean
    var = jnp.maximum(var, 0.0)            # guard tiny negative from rounding
    inv_std = lax.rsqrt(var + EPS)
    scale = g_ref[...] * inv_std
    shift = beta_ref[...] - mean * scale
    y = conv * scale + shift
    o_ref[...] = jnp.where(y > 0, y, NEG_SLOPE * y)


def _conv_bias_kernel(p_ref, w_ref, b_ref, o_ref):
    o_ref[...] = (jnp.dot(p_ref[...], w_ref[...],
                          preferred_element_type=jnp.float32) + b_ref[...])


# ----------------------------- Pallas wrappers ------------------------------

def _full_block_specs(M, Kd, Co, n_vec):
    in_specs = [pl.BlockSpec((M, Kd), lambda i: (0, 0)),
                pl.BlockSpec((Kd, Co), lambda i: (0, 0))]
    in_specs += [pl.BlockSpec((1, Co), lambda i: (0, 0)) for _ in range(n_vec)]
    out_specs = pl.BlockSpec((M, Co), lambda i: (0, 0))
    return in_specs, out_specs


def _pallas_fused_conv_bn_lrelu(patches, w_mat, bias, gamma, beta):
    M, Kd = patches.shape
    Co = w_mat.shape[1]
    in_specs, out_specs = _full_block_specs(M, Kd, Co, 3)
    return pl.pallas_call(
        _fused_conv_bn_lrelu_kernel,
        out_shape=jax.ShapeDtypeStruct((M, Co), jnp.float32),
        grid_spec=pltpu.PrefetchScalarGridSpec(
            num_scalar_prefetch=0,
            grid=(1,),
            in_specs=in_specs,
            out_specs=out_specs),
        compiler_params=pltpu.CompilerParams(
            dimension_semantics=("arbitrary",)),
    )(patches, w_mat, bias.reshape(1, Co), gamma.reshape(1, Co),
      beta.reshape(1, Co))


def _pallas_conv_bias(patches, w_mat, bias):
    M, Kd = patches.shape
    Co = w_mat.shape[1]
    in_specs, out_specs = _full_block_specs(M, Kd, Co, 1)
    return pl.pallas_call(
        _conv_bias_kernel,
        out_shape=jax.ShapeDtypeStruct((M, Co), jnp.float32),
        grid_spec=pltpu.PrefetchScalarGridSpec(
            num_scalar_prefetch=0,
            grid=(1,),
            in_specs=in_specs,
            out_specs=out_specs),
        compiler_params=pltpu.CompilerParams(
            dimension_semantics=("arbitrary",)),
    )(patches, w_mat, bias.reshape(1, Co))


# -------------------------------- glue (JAX) --------------------------------

def _im2col(x_nhwc, ksize, stride, pad):
    N, H, W, C = x_nhwc.shape
    xp = jnp.pad(x_nhwc, ((0, 0), (pad, pad), (pad, pad), (0, 0)))
    Ho = (H + 2 * pad - ksize) // stride + 1
    Wo = (W + 2 * pad - ksize) // stride + 1
    cols = []
    for kh in range(ksize):
        for kw in range(ksize):
            cols.append(xp[:, kh:kh + stride * Ho:stride,
                           kw:kw + stride * Wo:stride, :])
    patches = jnp.stack(cols, axis=3)                    # (N, Ho, Wo, K*K, C)
    return patches.reshape(N * Ho * Wo, ksize * ksize * C), N, Ho, Wo


def _weight_to_mat(w, *, ci_pad=None, co_pad=None):
    """torch Conv2d weight (Co, Ci, KH, KW) -> (KH*KW*Ci, Co) matching im2col
    order; optionally zero-pad input channels / output channels and round the
    contraction dim up to a multiple of 128 with zero rows."""
    Co, Ci, KH, KW = w.shape
    if ci_pad is not None and ci_pad > Ci:
        w = jnp.pad(w, ((0, 0), (0, ci_pad - Ci), (0, 0), (0, 0)))
        Ci = ci_pad
    m = jnp.transpose(w, (2, 3, 1, 0)).reshape(KH * KW * Ci, Co)
    if co_pad is not None and co_pad > Co:
        m = jnp.pad(m, ((0, 0), (0, co_pad - Co)))
    Kd = m.shape[0]
    Kdp = pl.cdiv(Kd, 128) * 128
    if Kdp != Kd:
        m = jnp.pad(m, ((0, Kdp - Kd), (0, 0)))
    return m


def _pad_patches_kd(patches, Kdp):
    Kd = patches.shape[1]
    if Kdp != Kd:
        patches = jnp.pad(patches, ((0, 0), (0, Kdp - Kd)))
    return patches


def conv_bn_lrelu(x_nhwc, w, b, gamma, beta, *, ksize, stride, pad,
                  ci_pad=None, co_pad=None):
    patches, N, Ho, Wo = _im2col(x_nhwc, ksize, stride, pad)
    w_mat = _weight_to_mat(w, ci_pad=ci_pad, co_pad=co_pad)
    Kdp, Cop = w_mat.shape
    patches = _pad_patches_kd(patches, Kdp)
    Co = w.shape[0]
    if Cop != Co:
        # lane-dense padding: zero conv output, gamma=1/beta=0 keeps it zero
        b = jnp.pad(b, (0, Cop - Co))
        gamma = jnp.pad(gamma, (0, Cop - Co), constant_values=1.0)
        beta = jnp.pad(beta, (0, Cop - Co))
    out = _pallas_fused_conv_bn_lrelu(patches.astype(jnp.bfloat16),
                                      w_mat.astype(jnp.bfloat16),
                                      b, gamma, beta)
    return out.reshape(N, Ho, Wo, Cop)


def conv_plain(x_nhwc, w, b, *, ksize, stride, pad, ci_pad=None):
    patches, N, Ho, Wo = _im2col(x_nhwc, ksize, stride, pad)
    w_mat = _weight_to_mat(w, ci_pad=ci_pad)
    Kdp, Co = w_mat.shape
    patches = _pad_patches_kd(patches, Kdp)
    out = _pallas_conv_bias(patches.astype(jnp.bfloat16),
                            w_mat.astype(jnp.bfloat16), b)
    return out.reshape(N, Ho, Wo, Co)


# ------------------------------- the module ---------------------------------

def init_params(key):
    ks = jax.random.split(key, 3)

    def conv_init(k, co, ci, ksz):
        kw, kb = jax.random.split(k)
        fan_in = ci * ksz * ksz
        bound = 1.0 / jnp.sqrt(jnp.float32(fan_in))
        w = jax.random.uniform(kw, (co, ci, ksz, ksz), jnp.float32, -bound, bound)
        b = jax.random.uniform(kb, (co,), jnp.float32, -bound, bound)
        return w, b

    w1, b1 = conv_init(ks[0], 64, 3, 7)
    w2, b2 = conv_init(ks[1], 128, 64, 3)
    w3, b3 = conv_init(ks[2], 128, 128, 3)
    return dict(
        w1=w1, b1=b1, g1=jnp.ones((64,), jnp.float32), be1=jnp.zeros((64,), jnp.float32),
        w2=w2, b2=b2, g2=jnp.ones((128,), jnp.float32), be2=jnp.zeros((128,), jnp.float32),
        w3=w3, b3=b3,
    )


@jax.jit
def base_feature_extraction(x_nchw, params):
    x = jnp.transpose(x_nchw, (0, 2, 3, 1)).astype(jnp.float32)   # NCHW -> NHWC
    # conv1: Co padded 64 -> 128 for lane-dense stores; the extra zero channels
    # are carried into conv2 and consumed by zero weight rows (exact no-op).
    x = conv_bn_lrelu(x, params["w1"], params["b1"], params["g1"], params["be1"],
                      ksize=7, stride=1, pad=3, co_pad=128)
    x = conv_bn_lrelu(x, params["w2"], params["b2"], params["g2"], params["be2"],
                      ksize=3, stride=1, pad=1, ci_pad=128)
    x = conv_plain(x, params["w3"], params["b3"], ksize=3, stride=2, pad=1)
    return jnp.transpose(x, (0, 3, 1, 2))                         # NHWC -> NCHW


if __name__ == "__main__":
    key = jax.random.PRNGKey(0)
    k_x, k_p = jax.random.split(key)
    x = jax.random.normal(k_x, (2, 3, 16, 16), jnp.float32)       # NCHW, like torch
    params = init_params(k_p)

    out = base_feature_extraction(x, params)
    out = jax.block_until_ready(out)

    assert out.shape == (2, 128, 8, 8), out.shape
    assert jnp.all(jnp.isfinite(out))
    print("KERNEL_OK")
</pallas_src>

<mosaic_0001>
module attributes {stable_mosaic.version = 11 : i64} {
  func.func @_fused_conv_bn_lrelu_kernel(%arg0: i32, %arg1: memref<512x256xbf16, #tpu.memory_space<vmem>>, %arg2: memref<256x128xbf16, #tpu.memory_space<vmem>>, %arg3: memref<1x128xf32, #tpu.memory_space<vmem>>, %arg4: memref<1x128xf32, #tpu.memory_space<vmem>>, %arg5: memref<1x128xf32, #tpu.memory_space<vmem>>, %arg6: memref<512x128xf32, #tpu.memory_space<vmem>>) attributes {dimension_semantics = [#tpu.dimension_semantics<arbitrary>], iteration_bounds = array<i64: 1>, scalar_prefetch = 0 : i64, scratch_operands = 0 : i64, tpu.core_type = #tpu.core_type<tc>, window_params = [{pipeline_mode = #tpu.pipeline_mode<synchronous>, transform_indices = @transform_0, window_bounds = array<i64: 512, 256>}, {pipeline_mode = #tpu.pipeline_mode<synchronous>, transform_indices = @transform_1, window_bounds = array<i64: 256, 128>}, {pipeline_mode = #tpu.pipeline_mode<synchronous>, transform_indices = @transform_2, window_bounds = array<i64: 1, 128>}, {pipeline_mode = #tpu.pipeline_mode<synchronous>, transform_indices = @transform_3, window_bounds = array<i64: 1, 128>}, {pipeline_mode = #tpu.pipeline_mode<synchronous>, transform_indices = @transform_4, window_bounds = array<i64: 1, 128>}, {pipeline_mode = #tpu.pipeline_mode<synchronous>, transform_indices = @transform_5, window_bounds = array<i64: 512, 128>}]} {
    %c0 = arith.constant 0 : index
    %c0_0 = arith.constant 0 : index
    %0 = vector.load %arg1[%c0, %c0_0] : memref<512x256xbf16, #tpu.memory_space<vmem>>, vector<512x256xbf16>
    %c0_1 = arith.constant 0 : index
    %c0_2 = arith.constant 0 : index
    %1 = vector.load %arg2[%c0_1, %c0_2] : memref<256x128xbf16, #tpu.memory_space<vmem>>, vector<256x128xbf16>
    %cst = arith.constant dense<0.000000e+00> : vector<512x128xf32>
    %2 = tpu.matmul %0, %1, %cst {dimension_numbers = #tpu.dot_dimension_numbers<[1], [0], [0], [1], [0, 0, 1, 1], [], []>} : vector<512x256xbf16>, vector<256x128xbf16>, vector<512x128xf32> -> vector<512x128xf32>
    %c0_3 = arith.constant 0 : index
    %c0_4 = arith.constant 0 : index
    %3 = vector.load %arg3[%c0_3, %c0_4] : memref<1x128xf32, #tpu.memory_space<vmem>>, vector<1x128xf32>
    %4 = vector.broadcast %3 : vector<1x128xf32> to vector<512x128xf32>
    %5 = arith.addf %2, %4 : vector<512x128xf32>
    %cst_5 = arith.constant dense<0.000000e+00> : vector<128xf32>
    %6 = vector.multi_reduction <add>, %5, %cst_5 [0] : vector<512x128xf32> to vector<128xf32>
    %7 = vector.shape_cast %6 : vector<128xf32> to vector<1x128xf32>
    %cst_6 = arith.constant 0.001953125 : f32
    %8 = vector.broadcast %cst_6 : f32 to vector<1x128xf32>
    %9 = arith.mulf %7, %8 : vector<1x128xf32>
    %10 = arith.mulf %5, %5 : vector<512x128xf32>
    %cst_7 = arith.constant dense<0.000000e+00> : vector<128xf32>
    %11 = vector.multi_reduction <add>, %10, %cst_7 [0] : vector<512x128xf32> to vector<128xf32>
    %12 = vector.shape_cast %11 : vector<128xf32> to vector<1x128xf32>
    %cst_8 = arith.constant 0.001953125 : f32
    %13 = vector.broadcast %cst_8 : f32 to vector<1x128xf32>
    %14 = arith.mulf %12, %13 : vector<1x128xf32>
    %15 = arith.mulf %9, %9 : vector<1x128xf32>
    %16 = arith.subf %14, %15 : vector<1x128xf32>
    %cst_9 = arith.constant 0.000000e+00 : f32
    %17 = vector.broadcast %cst_9 : f32 to vector<1x128xf32>
    %18 = arith.maximumf %16, %17 : vector<1x128xf32>
    %cst_10 = arith.constant 9.99999974E-6 : f32
    %19 = vector.broadcast %cst_10 : f32 to vector<1x128xf32>
    %20 = arith.addf %18, %19 : vector<1x128xf32>
    %21 = math.rsqrt %20 : vector<1x128xf32>
    %c0_11 = arith.constant 0 : index
    %c0_12 = arith.constant 0 : index
    %22 = vector.load %arg4[%c0_11, %c0_12] : memref<1x128xf32, #tpu.memory_space<vmem>>, vector<1x128xf32>
    %23 = arith.mulf %22, %21 : vector<1x128xf32>
    %c0_13 = arith.constant 0 : index
    %c0_14 = arith.constant 0 : index
    %24 = vector.load %arg5[%c0_13, %c0_14] : memref<1x128xf32, #tpu.memory_space<vmem>>, vector<1x128xf32>
    %25 = arith.mulf %9, %23 : vector<1x128xf32>
    %26 = arith.subf %24, %25 : vector<1x128xf32>
    %27 = vector.broadcast %23 : vector<1x128xf32> to vector<512x128xf32>
    %28 = arith.mulf %5, %27 : vector<512x128xf32>
    %29 = vector.broadcast %26 : vector<1x128xf32> to vector<512x128xf32>
    %30 = arith.addf %28, %29 : vector<512x128xf32>
    %cst_15 = arith.constant 0.000000e+00 : f32
    %31 = vector.broadcast %cst_15 : f32 to vector<512x128xf32>
    %32 = arith.cmpf ogt, %30, %31 : vector<512x128xf32>
    %cst_16 = arith.constant 0.00999999977 : f32
    %33 = vector.broadcast %cst_16 : f32 to vector<512x128xf32>
    %34 = arith.mulf %33, %30 : vector<512x128xf32>
    %35 = arith.select %32, %30, %34 : vector<512x128xi1>, vector<512x128xf32>
    %c0_17 = arith.constant 0 : index
    %c0_18 = arith.constant 0 : index
    %36 = vector.load %arg6[%c0_17, %c0_18] : memref<512x128xf32, #tpu.memory_space<vmem>>, vector<512x128xf32>
    tpu.vector_store %arg6[%c0_17, %c0_18], %35 {strides = array<i32>} : memref<512x128xf32, #tpu.memory_space<vmem>>, vector<512x128xf32>,
    return
  }
  func.func @transform_0(%arg0: i32) -> (i32, i32) {
    %c0_i32 = arith.constant 0 : i32
    %c0_i32_0 = arith.constant 0 : i32
    %c0_i32_1 = arith.constant 0 : i32
    return %c0_i32, %c0_i32_0 : i32, i32
  }
  func.func @transform_1(%arg0: i32) -> (i32, i32) {
    %c0_i32 = arith.constant 0 : i32
    %c0_i32_0 = arith.constant 0 : i32
    %c0_i32_1 = arith.constant 0 : i32
    return %c0_i32, %c0_i32_0 : i32, i32
  }
  func.func @transform_2(%arg0: i32) -> (i32, i32) {
    %c0_i32 = arith.constant 0 : i32
    %c0_i32_0 = arith.constant 0 : i32
    %c0_i32_1 = arith.constant 0 : i32
    return %c0_i32, %c0_i32_0 : i32, i32
  }
  func.func @transform_3(%arg0: i32) -> (i32, i32) {
    %c0_i32 = arith.constant 0 : i32
    %c0_i32_0 = arith.constant 0 : i32
    %c0_i32_1 = arith.constant 0 : i32
    return %c0_i32, %c0_i32_0 : i32, i32
  }
  func.func @transform_4(%arg0: i32) -> (i32, i32) {
    %c0_i32 = arith.constant 0 : i32
    %c0_i32_0 = arith.constant 0 : i32
    %c0_i32_1 = arith.constant 0 : i32
    return %c0_i32, %c0_i32_0 : i32, i32
  }
  func.func @transform_5(%arg0: i32) -> (i32, i32) {
    %c0_i32 = arith.constant 0 : i32
    %c0_i32_0 = arith.constant 0 : i32
    %c0_i32_1 = arith.constant 0 : i32
    return %c0_i32, %c0_i32_0 : i32, i32
  }
}

module attributes {stable_mosaic.version = 11 : i64} {
  func.func @_fused_conv_bn_lrelu_kernel(%arg0: i32, %arg1: memref<512x1152xbf16, #tpu.memory_space<vmem>>, %arg2: memref<1152x128xbf16, #tpu.memory_space<vmem>>, %arg3: memref<1x128xf32, #tpu.memory_space<vmem>>, %arg4: memref<1x128xf32, #tpu.memory_space<vmem>>, %arg5: memref<1x128xf32, #tpu.memory_space<vmem>>, %arg6: memref<512x128xf32, #tpu.memory_space<vmem>>) attributes {dimension_semantics = [#tpu.dimension_semantics<arbitrary>], iteration_bounds = array<i64: 1>, scalar_prefetch = 0 : i64, scratch_operands = 0 : i64, tpu.core_type = #tpu.core_type<tc>, window_params = [{pipeline_mode = #tpu.pipeline_mode<synchronous>, transform_indices = @transform_0, window_bounds = array<i64: 512, 1152>}, {pipeline_mode = #tpu.pipeline_mode<synchronous>, transform_indices = @transform_1, window_bounds = array<i64: 1152, 128>}, {pipeline_mode = #tpu.pipeline_mode<synchronous>, transform_indices = @transform_2, window_bounds = array<i64: 1, 128>}, {pipeline_mode = #tpu.pipeline_mode<synchronous>, transform_indices = @transform_3, window_bounds = array<i64: 1, 128>}, {pipeline_mode = #tpu.pipeline_mode<synchronous>, transform_indices = @transform_4, window_bounds = array<i64: 1, 128>}, {pipeline_mode = #tpu.pipeline_mode<synchronous>, transform_indices = @transform_5, window_bounds = array<i64: 512, 128>}]} {
    %c0 = arith.constant 0 : index
    %c0_0 = arith.constant 0 : index
    %0 = vector.load %arg1[%c0, %c0_0] : memref<512x1152xbf16, #tpu.memory_space<vmem>>, vector<512x1152xbf16>
    %c0_1 = arith.constant 0 : index
    %c0_2 = arith.constant 0 : index
    %1 = vector.load %arg2[%c0_1, %c0_2] : memref<1152x128xbf16, #tpu.memory_space<vmem>>, vector<1152x128xbf16>
    %cst = arith.constant dense<0.000000e+00> : vector<512x128xf32>
    %2 = tpu.matmul %0, %1, %cst {dimension_numbers = #tpu.dot_dimension_numbers<[1], [0], [0], [1], [0, 0, 1, 1], [], []>} : vector<512x1152xbf16>, vector<1152x128xbf16>, vector<512x128xf32> -> vector<512x128xf32>
    %c0_3 = arith.constant 0 : index
    %c0_4 = arith.constant 0 : index
    %3 = vector.load %arg3[%c0_3, %c0_4] : memref<1x128xf32, #tpu.memory_space<vmem>>, vector<1x128xf32>
    %4 = vector.broadcast %3 : vector<1x128xf32> to vector<512x128xf32>
    %5 = arith.addf %2, %4 : vector<512x128xf32>
    %cst_5 = arith.constant dense<0.000000e+00> : vector<128xf32>
    %6 = vector.multi_reduction <add>, %5, %cst_5 [0] : vector<512x128xf32> to vector<128xf32>
    %7 = vector.shape_cast %6 : vector<128xf32> to vector<1x128xf32>
    %cst_6 = arith.constant 0.001953125 : f32
    %8 = vector.broadcast %cst_6 : f32 to vector<1x128xf32>
    %9 = arith.mulf %7, %8 : vector<1x128xf32>
    %10 = arith.mulf %5, %5 : vector<512x128xf32>
    %cst_7 = arith.constant dense<0.000000e+00> : vector<128xf32>
    %11 = vector.multi_reduction <add>, %10, %cst_7 [0] : vector<512x128xf32> to vector<128xf32>
    %12 = vector.shape_cast %11 : vector<128xf32> to vector<1x128xf32>
    %cst_8 = arith.constant 0.001953125 : f32
    %13 = vector.broadcast %cst_8 : f32 to vector<1x128xf32>
    %14 = arith.mulf %12, %13 : vector<1x128xf32>
    %15 = arith.mulf %9, %9 : vector<1x128xf32>
    %16 = arith.subf %14, %15 : vector<1x128xf32>
    %cst_9 = arith.constant 0.000000e+00 : f32
    %17 = vector.broadcast %cst_9 : f32 to vector<1x128xf32>
    %18 = arith.maximumf %16, %17 : vector<1x128xf32>
    %cst_10 = arith.constant 9.99999974E-6 : f32
    %19 = vector.broadcast %cst_10 : f32 to vector<1x128xf32>
    %20 = arith.addf %18, %19 : vector<1x128xf32>
    %21 = math.rsqrt %20 : vector<1x128xf32>
    %c0_11 = arith.constant 0 : index
    %c0_12 = arith.constant 0 : index
    %22 = vector.load %arg4[%c0_11, %c0_12] : memref<1x128xf32, #tpu.memory_space<vmem>>, vector<1x128xf32>
    %23 = arith.mulf %22, %21 : vector<1x128xf32>
    %c0_13 = arith.constant 0 : index
    %c0_14 = arith.constant 0 : index
    %24 = vector.load %arg5[%c0_13, %c0_14] : memref<1x128xf32, #tpu.memory_space<vmem>>, vector<1x128xf32>
    %25 = arith.mulf %9, %23 : vector<1x128xf32>
    %26 = arith.subf %24, %25 : vector<1x128xf32>
    %27 = vector.broadcast %23 : vector<1x128xf32> to vector<512x128xf32>
    %28 = arith.mulf %5, %27 : vector<512x128xf32>
    %29 = vector.broadcast %26 : vector<1x128xf32> to vector<512x128xf32>
    %30 = arith.addf %28, %29 : vector<512x128xf32>
    %cst_15 = arith.constant 0.000000e+00 : f32
    %31 = vector.broadcast %cst_15 : f32 to vector<512x128xf32>
    %32 = arith.cmpf ogt, %30, %31 : vector<512x128xf32>
    %cst_16 = arith.constant 0.00999999977 : f32
    %33 = vector.broadcast %cst_16 : f32 to vector<512x128xf32>
    %34 = arith.mulf %33, %30 : vector<512x128xf32>
    %35 = arith.select %32, %30, %34 : vector<512x128xi1>, vector<512x128xf32>
    %c0_17 = arith.constant 0 : index
    %c0_18 = arith.constant 0 : index
    %36 = vector.load %arg6[%c0_17, %c0_18] : memref<512x128xf32, #tpu.memory_space<vmem>>, vector<512x128xf32>
    tpu.vector_store %arg6[%c0_17, %c0_18], %35 {strides = array<i32>} : memref<512x128xf32, #tpu.memory_space<vmem>>, vector<512x128xf32>,
    return
  }
  func.func @transform_0(%arg0: i32) -> (i32, i32) {
    %c0_i32 = arith.constant 0 : i32
    %c0_i32_0 = arith.constant 0 : i32
    %c0_i32_1 = arith.constant 0 : i32
    return %c0_i32, %c0_i32_0 : i32, i32
  }
  func.func @transform_1(%arg0: i32) -> (i32, i32) {
    %c0_i32 = arith.constant 0 : i32
    %c0_i32_0 = arith.constant 0 : i32
    %c0_i32_1 = arith.constant 0 : i32
    return %c0_i32, %c0_i32_0 : i32, i32
  }
  func.func @transform_2(%arg0: i32) -> (i32, i32) {
    %c0_i32 = arith.constant 0 : i32
    %c0_i32_0 = arith.constant 0 : i32
    %c0_i32_1 = arith.constant 0 : i32
    return %c0_i32, %c0_i32_0 : i32, i32
  }
  func.func @transform_3(%arg0: i32) -> (i32, i32) {
    %c0_i32 = arith.constant 0 : i32
    %c0_i32_0 = arith.constant 0 : i32
    %c0_i32_1 = arith.constant 0 : i32
    return %c0_i32, %c0_i32_0 : i32, i32
  }
  func.func @transform_4(%arg0: i32) -> (i32, i32) {
    %c0_i32 = arith.constant 0 : i32
    %c0_i32_0 = arith.constant 0 : i32
    %c0_i32_1 = arith.constant 0 : i32
    return %c0_i32, %c0_i32_0 : i32, i32
  }
  func.func @transform_5(%arg0: i32) -> (i32, i32) {
    %c0_i32 = arith.constant 0 : i32
    %c0_i32_0 = arith.constant 0 : i32
    %c0_i32_1 = arith.constant 0 : i32
    return %c0_i32, %c0_i32_0 : i32, i32
  }
}

module attributes {stable_mosaic.version = 11 : i64} {
  func.func @_conv_bias_kernel(%arg0: i32, %arg1: memref<128x1152xbf16, #tpu.memory_space<vmem>>, %arg2: memref<1152x128xbf16, #tpu.memory_space<vmem>>, %arg3: memref<1x128xf32, #tpu.memory_space<vmem>>, %arg4: memref<128x128xf32, #tpu.memory_space<vmem>>) attributes {dimension_semantics = [#tpu.dimension_semantics<arbitrary>], iteration_bounds = array<i64: 1>, scalar_prefetch = 0 : i64, scratch_operands = 0 : i64, tpu.core_type = #tpu.core_type<tc>, window_params = [{pipeline_mode = #tpu.pipeline_mode<synchronous>, transform_indices = @transform_0, window_bounds = array<i64: 128, 1152>}, {pipeline_mode = #tpu.pipeline_mode<synchronous>, transform_indices = @transform_1, window_bounds = array<i64: 1152, 128>}, {pipeline_mode = #tpu.pipeline_mode<synchronous>, transform_indices = @transform_2, window_bounds = array<i64: 1, 128>}, {pipeline_mode = #tpu.pipeline_mode<synchronous>, transform_indices = @transform_3, window_bounds = array<i64: 128, 128>}]} {
    %c0 = arith.constant 0 : index
    %c0_0 = arith.constant 0 : index
    %0 = vector.load %arg1[%c0, %c0_0] : memref<128x1152xbf16, #tpu.memory_space<vmem>>, vector<128x1152xbf16>
    %c0_1 = arith.constant 0 : index
    %c0_2 = arith.constant 0 : index
    %1 = vector.load %arg2[%c0_1, %c0_2] : memref<1152x128xbf16, #tpu.memory_space<vmem>>, vector<1152x128xbf16>
    %cst = arith.constant dense<0.000000e+00> : vector<128x128xf32>
    %2 = tpu.matmul %0, %1, %cst {dimension_numbers = #tpu.dot_dimension_numbers<[1], [0], [0], [1], [0, 0, 1, 1], [], []>} : vector<128x1152xbf16>, vector<1152x128xbf16>, vector<128x128xf32> -> vector<128x128xf32>
    %c0_3 = arith.constant 0 : index
    %c0_4 = arith.constant 0 : index
    %3 = vector.load %arg3[%c0_3, %c0_4] : memref<1x128xf32, #tpu.memory_space<vmem>>, vector<1x128xf32>
    %4 = vector.broadcast %3 : vector<1x128xf32> to vector<128x128xf32>
    %5 = arith.addf %2, %4 : vector<128x128xf32>
    %c0_5 = arith.constant 0 : index
    %c0_6 = arith.constant 0 : index
    %6 = vector.load %arg4[%c0_5, %c0_6] : memref<128x128xf32, #tpu.memory_space<vmem>>, vector<128x128xf32>
    tpu.vector_store %arg4[%c0_5, %c0_6], %5 {strides = array<i32>} : memref<128x128xf32, #tpu.memory_space<vmem>>, vector<128x128xf32>,
    return
  }
  func.func @transform_0(%arg0: i32) -> (i32, i32) {
    %c0_i32 = arith.constant 0 : i32
    %c0_i32_0 = arith.constant 0 : i32
    %c0_i32_1 = arith.constant 0 : i32
    return %c0_i32, %c0_i32_0 : i32, i32
  }
  func.func @transform_1(%arg0: i32) -> (i32, i32) {
    %c0_i32 = arith.constant 0 : i32
    %c0_i32_0 = arith.constant 0 : i32
    %c0_i32_1 = arith.constant 0 : i32
    return %c0_i32, %c0_i32_0 : i32, i32
  }
  func.func @transform_2(%arg0: i32) -> (i32, i32) {
    %c0_i32 = arith.constant 0 : i32
    %c0_i32_0 = arith.constant 0 : i32
    %c0_i32_1 = arith.constant 0 : i32
    return %c0_i32, %c0_i32_0 : i32, i32
  }
  func.func @transform_3(%arg0: i32) -> (i32, i32) {
    %c0_i32 = arith.constant 0 : i32
    %c0_i32_0 = arith.constant 0 : i32
    %c0_i32_1 = arith.constant 0 : i32
    return %c0_i32, %c0_i32_0 : i32, i32
  }
}

</mosaic_0001>

<bundles_post_ra>
// kernel: base_feature_extraction.3
= control target key start
LH: loop header
LB: loop body
LE: loop exit
PB: predicated region body
PF: predicated region fallthrough
CT: control target
= control target key end

     0   :  { %v1671_v0 = vmov 0   ;;  %s3655_s1 = inlined_call_operand.vmem [shape: bf16[256,128], index: 1, kind: input, shape index: {}]   ;;  %s3656_s0 = inlined_call_operand.vmem [shape: bf16[512,256], index: 0, kind: input, shape index: {}]   ;;  %s3657_s2 = inlined_call_operand.vmem [shape: f32[1,128], index: 2, kind: input, shape index: {}]   ;;  %s3658_s3 = inlined_call_operand.vmem [shape: f32[1,128], index: 3, kind: input, shape index: {}]   ;;  %s3659_s4 = inlined_call_operand.vmem [shape: f32[1,128], index: 4, kind: input, shape index: {}]   ;;  %s3660_s5 = inlined_call_operand.vmem [shape: f32[512,128], index: 5, kind: output, shape index: {}]  }
   0x1   :  { %540 = vmatprep.subr.bf16.mxu0 %v1671_v0  ;;  %v1557_v1 = vld [vmem:[%s3655_s1] sm:$0xff]   ;;  %1524 = vmatprep.subr.bf16.mxu1 %v1671_v0  ;;  %v1558_v2 = vld [vmem:[%s3655_s1 + $0x8] sm:$0xff]   ;;  %v1559_v3 = vld [vmem:[%s3655_s1 + $0x10] sm:$0xff]  }
   0x2   :  { %541 = vmatpush1.bf16.msra.mxu0 %v1557_v1  ;;  %1540 = vmatpush1.bf16.msra.mxu1 %v1557_v1  ;;  %v1560_v4 = vld [vmem:[%s3655_s1 + $0x18] sm:$0xff]   ;;  %v1561_v5 = vld [vmem:[%s3655_s1 + $0x20] sm:$0xff]   ;;  %v1562_v7 = vld [vmem:[%s3655_s1 + $0x28] sm:$0xff]  }
   0x3   :  { %542 = vmatprep.subr.bf16.mxu0 %v1671_v0  ;;  %1525 = vmatprep.subr.bf16.mxu1 %v1671_v0  ;;  %v1575_v6 = vld [vmem:[%s3656_s0 + $0x4] ss:$8 sps:$4 sm:$0xff]   ;;  %v1563_v8 = vld [vmem:[%s3655_s1 + $0x30] sm:$0xff]   ;;  %v1564_v9 = vld [vmem:[%s3655_s1 + $0x38] sm:$0xff]  }
   0x4   :  { %572 = vmatprep.mubr.bf16.mxu0 %v1575_v6  ;;  %v1599_v10 = vld [vmem:[%s3656_s0 + $0x104] ss:$8 sps:$4 sm:$0xff]   ;;  %v1567_v13 = vld [vmem:[%s3655_s1 + $0x50] sm:$0xff]   ;;  %v1568_v14 = vld [vmem:[%s3655_s1 + $0x58] sm:$0xff]  }
   0x5   :  { %700 = vmatprep.mubr.bf16.mxu1 %v1599_v10  ;;  %v1565_v11 = vld [vmem:[%s3655_s1 + $0x40] sm:$0xff]   ;;  %v1566_v12 = vld [vmem:[%s3655_s1 + $0x48] sm:$0xff]   ;;  %v1571_v17 = vld [vmem:[%s3655_s1 + $0x70] sm:$0xff]  }
   0x6   :  { %543 = vmatpush1.bf16.msra.mxu0 %v1558_v2  ;;  %1541 = vmatpush1.bf16.msra.mxu1 %v1558_v2  ;;  %v1569_v15 = vld [vmem:[%s3655_s1 + $0x60] sm:$0xff]   ;;  %v1570_v16 = vld [vmem:[%s3655_s1 + $0x68] sm:$0xff]   ;;  %v1572_v18 = vld [vmem:[%s3655_s1 + $0x78] sm:$0xff]  }
   0x7   :  { %544 = vmatprep.subr.bf16.mxu0 %v1671_v0  ;;  %1526 = vmatprep.subr.bf16.mxu1 %v1671_v0  ;;  %v1573_v19 = vld [vmem:[%s3656_s0] ss:$8 sps:$4 sm:$0xff]   ;;  %v1576_v21 = vld [vmem:[%s3656_s0 + $0x14] ss:$8 sps:$4 sm:$0xff]   ;;  %v1578_v23 = vld [vmem:[%s3656_s0 + $0x10] ss:$8 sps:$4 sm:$0xff]  }
   0x8   :  { %v1597_v20 = vld [vmem:[%s3656_s0 + $0x100] ss:$8 sps:$4 sm:$0xff]   ;;  %v1603_v22 = vld [vmem:[%s3656_s0 + $0x114] ss:$8 sps:$4 sm:$0xff]   ;;  %v1605_v24 = vld [vmem:[%s3656_s0 + $0x110] ss:$8 sps:$4 sm:$0xff]  }
   0x9   :  { %v1579_v25 = vld [vmem:[%s3656_s0 + $0x24] ss:$8 sps:$4 sm:$0xff]   ;;  %v1581_v27 = vld [vmem:[%s3656_s0 + $0x20] ss:$8 sps:$4 sm:$0xff]   ;;  %v1582_v29 = vld [vmem:[%s3656_s0 + $0x34] ss:$8 sps:$4 sm:$0xff]  }
   0xa   :  { %545 = vmatpush1.bf16.msra.mxu0 %v1559_v3  ;;  %1542 = vmatpush1.bf16.msra.mxu1 %v1559_v3  ;;  %v1609_v26 = vld [vmem:[%s3656_s0 + $0x124] ss:$8 sps:$4 sm:$0xff]   ;;  %v1611_v28 = vld [vmem:[%s3656_s0 + $0x120] ss:$8 sps:$4 sm:$0xff]   ;;  %v1615_v30 = vld [vmem:[%s3656_s0 + $0x134] ss:$8 sps:$4 sm:$0xff]  }
   0xb   :  { %546 = vmatprep.subr.bf16.mxu0 %v1671_v0  ;;  %1527 = vmatprep.subr.bf16.mxu1 %v1671_v0  ;;  %v1584_v31 = vld [vmem:[%s3656_s0 + $0x30] ss:$8 sps:$4 sm:$0xff]   ;;  %v1585_v33 = vld [vmem:[%s3656_s0 + $0x44] ss:$8 sps:$4 sm:$0xff]   ;;  %v1587_v35 = vld [vmem:[%s3656_s0 + $0x40] ss:$8 sps:$4 sm:$0xff]  }
   0xc   :  { %v1617_v32 = vld [vmem:[%s3656_s0 + $0x130] ss:$8 sps:$4 sm:$0xff]   ;;  %v1621_v34 = vld [vmem:[%s3656_s0 + $0x144] ss:$8 sps:$4 sm:$0xff]   ;;  %v1623_v36 = vld [vmem:[%s3656_s0 + $0x140] ss:$8 sps:$4 sm:$0xff]  }
   0xd   :  { %v1588_v37 = vld [vmem:[%s3656_s0 + $0x54] ss:$8 sps:$4 sm:$0xff]   ;;  %v1590_v39 = vld [vmem:[%s3656_s0 + $0x50] ss:$8 sps:$4 sm:$0xff]   ;;  %v1591_v41 = vld [vmem:[%s3656_s0 + $0x64] ss:$8 sps:$4 sm:$0xff]  }
   0xe   :  { %547 = vmatpush1.bf16.msra.mxu0 %v1560_v4  ;;  %1543 = vmatpush1.bf16.msra.mxu1 %v1560_v4  ;;  %v1627_v38 = vld [vmem:[%s3656_s0 + $0x154] ss:$8 sps:$4 sm:$0xff]   ;;  %v1629_v40 = vld [vmem:[%s3656_s0 + $0x150] ss:$8 sps:$4 sm:$0xff]   ;;  %v1633_v42 = vld [vmem:[%s3656_s0 + $0x164] ss:$8 sps:$4 sm:$0xff]  }
   0xf   :  { %548 = vmatprep.subr.bf16.mxu0 %v1671_v0  ;;  %1528 = vmatprep.subr.bf16.mxu1 %v1671_v0  ;;  %v1593_v43 = vld [vmem:[%s3656_s0 + $0x60] ss:$8 sps:$4 sm:$0xff]   ;;  %v1594_v45 = vld [vmem:[%s3656_s0 + $0x74] ss:$8 sps:$4 sm:$0xff]   ;;  %v1596_v47 = vld [vmem:[%s3656_s0 + $0x70] ss:$8 sps:$4 sm:$0xff]  }
  0x10   :  { %v1635_v44 = vld [vmem:[%s3656_s0 + $0x160] ss:$8 sps:$4 sm:$0xff]   ;;  %v1639_v46 = vld [vmem:[%s3656_s0 + $0x174] ss:$8 sps:$4 sm:$0xff]   ;;  %v1641_v48 = vld [vmem:[%s3656_s0 + $0x170] ss:$8 sps:$4 sm:$0xff]  }
  0x11   :  { %v1600_v49 = vld [vmem:[%s3656_s0 + $0x84] ss:$8 sps:$4 sm:$0xff]   ;;  %v1602_v51 = vld [vmem:[%s3656_s0 + $0x80] ss:$8 sps:$4 sm:$0xff]   ;;  %v1606_v53 = vld [vmem:[%s3656_s0 + $0x94] ss:$8 sps:$4 sm:$0xff]  }
  0x12   :  { %549 = vmatpush1.bf16.msra.mxu0 %v1561_v5  ;;  %1544 = vmatpush1.bf16.msra.mxu1 %v1561_v5  ;;  %v1645_v50 = vld [vmem:[%s3656_s0 + $0x184] ss:$8 sps:$4 sm:$0xff]   ;;  %v1647_v52 = vld [vmem:[%s3656_s0 + $0x180] ss:$8 sps:$4 sm:$0xff]   ;;  %v1648_v54 = vld [vmem:[%s3656_s0 + $0x194] ss:$8 sps:$4 sm:$0xff]  }
  0x13   :  { %550 = vmatprep.subr.bf16.mxu0 %v1671_v0  ;;  %1529 = vmatprep.subr.bf16.mxu1 %v1671_v0  ;;  %v1608_v55 = vld [vmem:[%s3656_s0 + $0x90] ss:$8 sps:$4 sm:$0xff]   ;;  %v1612_v57 = vld [vmem:[%s3656_s0 + $0xa4] ss:$8 sps:$4 sm:$0xff]   ;;  %v1614_v59 = vld [vmem:[%s3656_s0 + $0xa0] ss:$8 sps:$4 sm:$0xff]  }
  0x14   :  { %v1650_v56 = vld [vmem:[%s3656_s0 + $0x190] ss:$8 sps:$4 sm:$0xff]   ;;  %v1651_v58 = vld [vmem:[%s3656_s0 + $0x1a4] ss:$8 sps:$4 sm:$0xff]   ;;  %v1653_v60 = vld [vmem:[%s3656_s0 + $0x1a0] ss:$8 sps:$4 sm:$0xff]  }
  0x15   :  { %v1618_v61 = vld [vmem:[%s3656_s0 + $0xb4] ss:$8 sps:$4 sm:$0xff]   ;;  %v1620_v63 = vld [vmem:[%s3656_s0 + $0xb0] ss:$8 sps:$4 sm:$0xff]   ;;  %v1624_v1 = vld [vmem:[%s3656_s0 + $0xc4] ss:$8 sps:$4 sm:$0xff]  }
  0x16   :  { %551 = vmatpush1.bf16.msra.mxu0 %v1562_v7  ;;  %1545 = vmatpush1.bf16.msra.mxu1 %v1562_v7  ;;  %v1654_v62 = vld [vmem:[%s3656_s0 + $0x1b4] ss:$8 sps:$4 sm:$0xff]   ;;  %v1657_v2 = vld [vmem:[%s3656_s0 + $0x1c4] ss:$8 sps:$4 sm:$0xff]   ;;  %v1626_v3 = vld [vmem:[%s3656_s0 + $0xc0] ss:$8 sps:$4 sm:$0xff]  }
  0x17   :  { %552 = vmatprep.subr.bf16.mxu0 %v1671_v0  ;;  %1530 = vmatprep.subr.bf16.mxu1 %v1671_v0  ;;  %v1659_v4 = vld [vmem:[%s3656_s0 + $0x1c0] ss:$8 sps:$4 sm:$0xff]   ;;  %v1630_v5 = vld [vmem:[%s3656_s0 + $0xd4] ss:$8 sps:$4 sm:$0xff]   ;;  %v1632_v7 = vld [vmem:[%s3656_s0 + $0xd0] ss:$8 sps:$4 sm:$0xff]  }
  0x18   :  { %v1660_v6 = vld [vmem:[%s3656_s0 + $0x1d4] ss:$8 sps:$4 sm:$0xff]   ;;  %v1663_v10 = vld [vmem:[%s3656_s0 + $0x1e4] ss:$8 sps:$4 sm:$0xff]  }
  0x1a   :  { %553 = vmatpush1.bf16.msra.mxu0 %v1563_v8  ;;  %1546 = vmatpush1.bf16.msra.mxu1 %v1563_v8  ;;  %v1662_v8 = vld [vmem:[%s3656_s0 + $0x1d0] ss:$8 sps:$4 sm:$0xff]  }
  0x1b   :  { %554 = vmatprep.subr.bf16.mxu0 %v1671_v0  ;;  %1531 = vmatprep.subr.bf16.mxu1 %v1671_v0 }
  0x1e   :  { %555 = vmatpush1.bf16.msra.mxu0 %v1564_v9  ;;  %1547 = vmatpush1.bf16.msra.mxu1 %v1564_v9  ;;  %v1636_v9 = vld [vmem:[%s3656_s0 + $0xe4] ss:$8 sps:$4 sm:$0xff]  }
  0x1f   :  { %556 = vmatprep.subr.bf16.mxu0 %v1671_v0  ;;  %1532 = vmatprep.subr.bf16.mxu1 %v1671_v0 }
  0x22   :  { %557 = vmatpush1.bf16.msra.mxu0 %v1565_v11  ;;  %1548 = vmatpush1.bf16.msra.mxu1 %v1565_v11  ;;  %v1638_v11 = vld [vmem:[%s3656_s0 + $0xe0] ss:$8 sps:$4 sm:$0xff]  }
  0x23   :  { %558 = vmatprep.subr.bf16.mxu0 %v1671_v0  ;;  %1533 = vmatprep.subr.bf16.mxu1 %v1671_v0 }
  0x26   :  { %559 = vmatpush1.bf16.msra.mxu0 %v1566_v12  ;;  %1549 = vmatpush1.bf16.msra.mxu1 %v1566_v12  ;;  %v1665_v12 = vld [vmem:[%s3656_s0 + $0x1e0] ss:$8 sps:$4 sm:$0xff]  }
  0x27   :  { %560 = vmatprep.subr.bf16.mxu0 %v1671_v0  ;;  %1534 = vmatprep.subr.bf16.mxu1 %v1671_v0 }
  0x2a   :  { %561 = vmatpush1.bf16.msra.mxu0 %v1567_v13  ;;  %1550 = vmatpush1.bf16.msra.mxu1 %v1567_v13  ;;  %v1642_v13 = vld [vmem:[%s3656_s0 + $0xf4] ss:$8 sps:$4 sm:$0xff]  }
  0x2b   :  { %562 = vmatprep.subr.bf16.mxu0 %v1671_v0  ;;  %1535 = vmatprep.subr.bf16.mxu1 %v1671_v0 }
  0x2e   :  { %563 = vmatpush1.bf16.msra.mxu0 %v1568_v14  ;;  %1551 = vmatpush1.bf16.msra.mxu1 %v1568_v14  ;;  %v1666_v14 = vld [vmem:[%s3656_s0 + $0x1f4] ss:$8 sps:$4 sm:$0xff]  }
  0x2f   :  { %564 = vmatprep.subr.bf16.mxu0 %v1671_v0  ;;  %1536 = vmatprep.subr.bf16.mxu1 %v1671_v0 }
  0x32   :  { %565 = vmatpush1.bf16.msra.mxu0 %v1569_v15  ;;  %1552 = vmatpush1.bf16.msra.mxu1 %v1569_v15  ;;  %v1644_v15 = vld [vmem:[%s3656_s0 + $0xf0] ss:$8 sps:$4 sm:$0xff]  }
  0x33   :  { %566 = vmatprep.subr.bf16.mxu0 %v1671_v0  ;;  %1537 = vmatprep.subr.bf16.mxu1 %v1671_v0 }
  0x36   :  { %567 = vmatpush1.bf16.msra.mxu0 %v1570_v16  ;;  %1553 = vmatpush1.bf16.msra.mxu1 %v1570_v16  ;;  %v1668_v16 = vld [vmem:[%s3656_s0 + $0x1f0] ss:$8 sps:$4 sm:$0xff]  }
  0x37   :  { %568 = vmatprep.subr.bf16.mxu0 %v1671_v0  ;;  %1538 = vmatprep.subr.bf16.mxu1 %v1671_v0 }
  0x3a   :  { %569 = vmatpush1.bf16.msra.mxu0 %v1571_v17  ;;  %1554 = vmatpush1.bf16.msra.mxu1 %v1571_v17 }
  0x3b   :  { %570 = vmatprep.subr.bf16.mxu0 %v1671_v0  ;;  %1539 = vmatprep.subr.bf16.mxu1 %v1671_v0  ;;  %v1656_v0 = vld [vmem:[%s3656_s0 + $0x1b0] ss:$8 sps:$4 sm:$0xff]  }
  0x3e   :  { %571 = vmatpush1.bf16.msra.mxu0 %v1572_v18  ;;  %1555 = vmatpush1.bf16.msra.mxu1 %v1572_v18 }
  0x41   :  { %573 = vmatmul.mubr.bf16.vlgmr.msra.gmra.mrb[0].mxu0 %v1573_v19  ;;  %701 = vmatmul.mubr.bf16.vlgmr.msra.gmra.mrb[0].mxu1 %v1597_v20 }
  0x42   :  { %580 = vmatprep.mubr.bf16.mxu0 %v1576_v21  ;;  %708 = vmatprep.mubr.bf16.mxu1 %v1603_v22 }
  0x49   :  { %581 = vmatmul.mubr.bf16.gmra.mrb[4].mxu0 %v1578_v23  ;;  %709 = vmatmul.mubr.bf16.gmra.mrb[4].mxu1 %v1605_v24 }
  0x4a   :  { %588 = vmatprep.mubr.bf16.mxu0 %v1579_v25  ;;  %716 = vmatprep.mubr.bf16.mxu1 %v1609_v26 }
  0x51   :  { %589 = vmatmul.mubr.bf16.gmra.mrb[8].mxu0 %v1581_v27  ;;  %717 = vmatmul.mubr.bf16.gmra.mrb[8].mxu1 %v1611_v28 }
  0x52   :  { %596 = vmatprep.mubr.bf16.mxu0 %v1582_v29  ;;  %724 = vmatprep.mubr.bf16.mxu1 %v1615_v30 }
  0x59   :  { %597 = vmatmul.mubr.bf16.gmra.mrb[12].mxu0 %v1584_v31  ;;  %725 = vmatmul.mubr.bf16.gmra.mrb[12].mxu1 %v1617_v32 }
  0x5a   :  { %604 = vmatprep.mubr.bf16.mxu0 %v1585_v33  ;;  %732 = vmatprep.mubr.bf16.mxu1 %v1621_v34 }
  0x61   :  { %605 = vmatmul.mubr.bf16.gmra.mrb[16].mxu0 %v1587_v35  ;;  %733 = vmatmul.mubr.bf16.gmra.mrb[16].mxu1 %v1623_v36 }
  0x62   :  { %612 = vmatprep.mubr.bf16.mxu0 %v1588_v37  ;;  %740 = vmatprep.mubr.bf16.mxu1 %v1627_v38 }
  0x69   :  { %613 = vmatmul.mubr.bf16.gmra.mrb[20].mxu0 %v1590_v39  ;;  %741 = vmatmul.mubr.bf16.gmra.mrb[20].mxu1 %v1629_v40 }
  0x6a   :  { %620 = vmatprep.mubr.bf16.mxu0 %v1591_v41  ;;  %748 = vmatprep.mubr.bf16.mxu1 %v1633_v42 }
  0x71   :  { %621 = vmatmul.mubr.bf16.gmra.mrb[24].mxu0 %v1593_v43  ;;  %749 = vmatmul.mubr.bf16.gmra.mrb[24].mxu1 %v1635_v44 }
  0x72   :  { %628 = vmatprep.mubr.bf16.mxu0 %v1594_v45  ;;  %756 = vmatprep.mubr.bf16.mxu1 %v1639_v46 }
  0x79   :  { %629 = vmatmul.mubr.bf16.gmra.mrb[28].mxu0 %v1596_v47  ;;  %757 = vmatmul.mubr.bf16.gmra.mrb[28].mxu1 %v1641_v48 }
  0x7a   :  { %636 = vmatprep.mubr.bf16.mxu0 %v1600_v49  ;;  %764 = vmatprep.mubr.bf16.mxu1 %v1645_v50  ;;  %v1993_v49 = vld [vmem:[%s3657_s2] ss:$0 sm:$0xff] }
  0x81   :  { %637 = vmatmul.mubr.bf16.gmra.mrb[32].mxu0 %v1602_v51  ;;  %765 = vmatmul.mubr.bf16.gmra.mrb[32].mxu1 %v1647_v52 }
  0x82   :  { %644 = vmatprep.mubr.bf16.mxu0 %v1606_v53  ;;  %772 = vmatprep.mubr.bf16.mxu1 %v1648_v54 }
  0x89   :  { %645 = vmatmul.mubr.bf16.gmra.mrb[36].mxu0 %v1608_v55  ;;  %773 = vmatmul.mubr.bf16.gmra.mrb[36].mxu1 %v1650_v56 }
  0x8a   :  { %652 = vmatprep.mubr.bf16.mxu0 %v1612_v57  ;;  %780 = vmatprep.mubr.bf16.mxu1 %v1651_v58 }
  0x91   :  { %653 = vmatmul.mubr.bf16.gmra.mrb[40].mxu0 %v1614_v59  ;;  %781 = vmatmul.mubr.bf16.gmra.mrb[40].mxu1 %v1653_v60 }
  0x92   :  { %660 = vmatprep.mubr.bf16.mxu0 %v1618_v61  ;;  %788 = vmatprep.mubr.bf16.mxu1 %v1654_v62 }
  0x99   :  { %661 = vmatmul.mubr.bf16.gmra.mrb[44].mxu0 %v1620_v63  ;;  %789 = vmatmul.mubr.bf16.gmra.mrb[44].mxu1 %v1656_v0 }
  0x9a   :  { %668 = vmatprep.mubr.bf16.mxu0 %v1624_v1  ;;  %796 = vmatprep.mubr.bf16.mxu1 %v1657_v2 }
  0xa1   :  { %669 = vmatmul.mubr.bf16.gmra.mrb[48].mxu0 %v1626_v3  ;;  %797 = vmatmul.mubr.bf16.gmra.mrb[48].mxu1 %v1659_v4 }
  0xa2   :  { %676 = vmatprep.mubr.bf16.mxu0 %v1630_v5  ;;  %804 = vmatprep.mubr.bf16.mxu1 %v1660_v6 }
  0xa9   :  { %677 = vmatmul.mubr.bf16.gmra.mrb[52].mxu0 %v1632_v7  ;;  %805 = vmatmul.mubr.bf16.gmra.mrb[52].mxu1 %v1662_v8 }
  0xaa   :  { %684 = vmatprep.mubr.bf16.mxu0 %v1636_v9  ;;  %812 = vmatprep.mubr.bf16.mxu1 %v1663_v10 }
  0xb1   :  { %685 = vmatmul.mubr.bf16.gmra.mrb[56].mxu0 %v1638_v11  ;;  %813 = vmatmul.mubr.bf16.gmra.mrb[56].mxu1 %v1665_v12 }
  0xb2   :  { %692 = vmatprep.mubr.bf16.mxu0 %v1642_v13  ;;  %820 = vmatprep.mubr.bf16.mxu1 %v1666_v14 }
  0xb9   :  { %693 = vmatmul.mubr.bf16.gmra.mrb[60].mxu0 %v1644_v15  ;;  %821 = vmatmul.mubr.bf16.gmra.mrb[60].mxu1 %v1668_v16 }
 0x114   :  { %v574_v17 = vpop.f32.mrb[0].mxu0  ;;  %v1974_v18 = vpop.f32.mrb[0].mxu1 }
 0x115   :  { %v576_v19 = vpop.f32.mrb[1].mxu0  ;;  %v704_v20 = vpop.f32.mrb[1].mxu1  ;;  %v2001_v53 = vadd.f32 %v1993_v49, %v574_v17 }
 0x116   :  { %v577_v21 = vpop.f32.mrb[2].mxu0  ;;  %v1976_v22 = vpop.f32.mrb[2].mxu1 }
 0x117   :  { %v579_v23 = vpop.f32.mrb[3].mxu0  ;;  %v707_v24 = vpop.f32.mrb[3].mxu1  ;;  %v1996_v50 = vadd.f32 %v1993_v49, %v577_v21  ;;  %v899_v62 = vmul.f32 %v2001_v53, %v2001_v53 }
 0x119   :  { %v900_v59 = vmul.f32 %v1996_v50, %v1996_v50  ;;  %v829_v63 = vadd.f32 %v1996_v50, %v2001_v53 }
 0x11b   :  { %v963_v2 = vadd.f32 %v900_v59, %v899_v62 }
 0x11c   :  { %v582_v25 = vpop.f32.mrb[4].mxu0  ;;  %v1978_v26 = vpop.f32.mrb[4].mxu1 }
 0x11d   :  { %v584_v27 = vpop.f32.mrb[5].mxu0  ;;  %v712_v28 = vpop.f32.mrb[5].mxu1  ;;  %v2004_v54 = vadd.f32 %v1993_v49, %v582_v25 }
 0x11e   :  { %v585_v29 = vpop.f32.mrb[6].mxu0  ;;  %v1980_v30 = vpop.f32.mrb[6].mxu1 }
 0x11f   :  { %v587_v31 = vpop.f32.mrb[7].mxu0  ;;  %v715_v32 = vpop.f32.mrb[7].mxu1  ;;  %v901_v0 = vmul.f32 %v2004_v54, %v2004_v54  ;;  %v2017_v1 = vadd.f32 %v1993_v49, %v585_v29  ;;  %v830_v3 = vadd.f32 %v829_v63, %v2004_v54 }
 0x121   :  { %v964_v7 = vadd.f32 %v963_v2, %v901_v0  ;;  %v902_v8 = vmul.f32 %v2017_v1, %v2017_v1  ;;  %v831_v13 = vadd.f32 %v830_v3, %v2017_v1 }
 0x123   :  { %v965_v19 = vadd.f32 %v964_v7, %v902_v8 }
 0x124   :  { %v590_v33 = vpop.f32.mrb[8].mxu0  ;;  %v1982_v34 = vpop.f32.mrb[8].mxu1 }
 0x125   :  { %v592_v35 = vpop.f32.mrb[9].mxu0  ;;  %v720_v36 = vpop.f32.mrb[9].mxu1  ;;  %v2021_v4 = vadd.f32 %v1993_v49, %v590_v33 }
 0x126   :  { %v593_v37 = vpop.f32.mrb[10].mxu0  ;;  %v1984_v38 = vpop.f32.mrb[10].mxu1 }
 0x127   :  { %v595_v39 = vpop.f32.mrb[11].mxu0  ;;  %v723_v40 = vpop.f32.mrb[11].mxu1  ;;  %v903_v14 = vmul.f32 %v2021_v4, %v2021_v4  ;;  %v2033_v15 = vadd.f32 %v1993_v49, %v593_v37  ;;  %v832_v20 = vadd.f32 %v831_v13, %v2021_v4 }
 0x129   :  { %v966_v23 = vadd.f32 %v965_v19, %v903_v14  ;;  %v904_v24 = vmul.f32 %v2033_v15, %v2033_v15  ;;  %v833_v28 = vadd.f32 %v832_v20, %v2033_v15 }
 0x12b   :  { %v967_v37 = vadd.f32 %v966_v23, %v904_v24 }
 0x12c   :  { %v598_v41 = vpop.f32.mrb[12].mxu0  ;;  %v1986_v42 = vpop.f32.mrb[12].mxu1 }
 0x12d   :  { %v600_v43 = vpop.f32.mrb[13].mxu0  ;;  %v728_v44 = vpop.f32.mrb[13].mxu1  ;;  %v2037_v21 = vadd.f32 %v1993_v49, %v598_v41 }
 0x12e   :  { %v601_v45 = vpop.f32.mrb[14].mxu0  ;;  %v1988_v46 = vpop.f32.mrb[14].mxu1 }
 0x12f   :  { %v603_v47 = vpop.f32.mrb[15].mxu0  ;;  %v731_v48 = vpop.f32.mrb[15].mxu1  ;;  %v905_v29 = vmul.f32 %v2037_v21, %v2037_v21  ;;  %v2047_v31 = vadd.f32 %v1993_v49, %v601_v45  ;;  %v834_v39 = vadd.f32 %v833_v28, %v2037_v21 }
 0x131   :  { %v968_v44 = vadd.f32 %v967_v37, %v905_v29  ;;  %v906_v47 = vmul.f32 %v2047_v31, %v2047_v31  ;;  %v835_v45 = vadd.f32 %v834_v39, %v2047_v31 }
 0x134   :  { %v606_v51 = vpop.f32.mrb[16].mxu0  ;;  %v1998_v52 = vpop.f32.mrb[16].mxu1 }
 0x135   :  { %v608_v55 = vpop.f32.mrb[17].mxu0  ;;  %v736_v56 = vpop.f32.mrb[17].mxu1  ;;  %v2053_v40 = vadd.f32 %v1993_v49, %v606_v51 }
 0x136   :  { %v609_v57 = vpop.f32.mrb[18].mxu0  ;;  %v2006_v58 = vpop.f32.mrb[18].mxu1 }
 0x137   :  { %v611_v60 = vpop.f32.mrb[19].mxu0  ;;  %v739_v61 = vpop.f32.mrb[19].mxu1  ;;  %v907_v48 = vmul.f32 %v2053_v40, %v2053_v40  ;;  %v2061_v55 = vadd.f32 %v1993_v49, %v609_v57  ;;  %v836_v51 = vadd.f32 %v835_v45, %v2053_v40 }
 0x138   :  { %v969_v60 = vadd.f32 %v968_v44, %v906_v47 }
 0x139   :  { %v908_v7 = vmul.f32 %v2061_v55, %v2061_v55 }
 0x13a   :  { %v970_v3 = vadd.f32 %v969_v60, %v907_v48 }
 0x13c   :  { %v614_v5 = vpop.f32.mrb[20].mxu0  ;;  %v2023_v6 = vpop.f32.mrb[20].mxu1 }
 0x13d   :  { %v616_v9 = vpop.f32.mrb[21].mxu0  ;;  %v744_v10 = vpop.f32.mrb[21].mxu1  ;;  %v2067_v61 = vadd.f32 %v1993_v49, %v614_v5  ;;  %v971_v5 = vadd.f32 %v970_v3, %v908_v7 }
 0x13e   :  { %v617_v11 = vpop.f32.mrb[22].mxu0  ;;  %v2027_v12 = vpop.f32.mrb[22].mxu1  ;;  %v837_v9 = vadd.f32 %v836_v51, %v2061_v55 }
 0x13f   :  { %v619_v16 = vpop.f32.mrb[23].mxu0  ;;  %v747_v17 = vpop.f32.mrb[23].mxu1  ;;  %v909_v10 = vmul.f32 %v2067_v61, %v2067_v61  ;;  %v2077_v13 = vadd.f32 %v1993_v49, %v617_v11 }
 0x140   :  { %v838_v14 = vadd.f32 %v837_v9, %v2067_v61 }
 0x141   :  { %v972_v20 = vadd.f32 %v971_v5, %v909_v10  ;;  %v910_v23 = vmul.f32 %v2077_v13, %v2077_v13 }
 0x142   :  { %v839_v11 = vadd.f32 %v838_v14, %v2077_v13 }
 0x144   :  { %v622_v25 = vpop.f32.mrb[24].mxu0  ;;  %v2041_v27 = vpop.f32.mrb[24].mxu1 }
 0x145   :  { %v624_v32 = vpop.f32.mrb[25].mxu0  ;;  %v752_v33 = vpop.f32.mrb[25].mxu1  ;;  %v2081_v16 = vadd.f32 %v1993_v49, %v622_v25 }
 0x146   :  { %v625_v35 = vpop.f32.mrb[26].mxu0  ;;  %v2049_v36 = vpop.f32.mrb[26].mxu1 }
 0x147   :  { %v627_v41 = vpop.f32.mrb[27].mxu0  ;;  %v755_v43 = vpop.f32.mrb[27].mxu1  ;;  %v911_v33 = vmul.f32 %v2081_v16, %v2081_v16  ;;  %v2093_v25 = vadd.f32 %v1993_v49, %v625_v35 }
 0x148   :  { %v973_v41 = vadd.f32 %v972_v20, %v910_v23  ;;  %v840_v43 = vadd.f32 %v839_v11, %v2081_v16 }
 0x149   :  { %v912_v45 = vmul.f32 %v2093_v25, %v2093_v25 }
 0x14a   :  { %v974_v47 = vadd.f32 %v973_v41, %v911_v33  ;;  %v841_v51 = vadd.f32 %v840_v43, %v2093_v25 }
 0x14c   :  { %v630_v56 = vpop.f32.mrb[28].mxu0  ;;  %v2063_v59 = vpop.f32.mrb[28].mxu1 }
 0x14d   :  { %v632_v62 = vpop.f32.mrb[29].mxu0  ;;  %v760_v63 = vpop.f32.mrb[29].mxu1  ;;  %v2097_v44 = vadd.f32 %v1993_v49, %v630_v56 }
 0x14e   :  { %v633_v0 = vpop.f32.mrb[30].mxu0  ;;  %v2069_v2 = vpop.f32.mrb[30].mxu1 }
 0x14f   :  { %v635_v57 = vpop.f32.mrb[31].mxu0  ;;  %v763_v8 = vpop.f32.mrb[31].mxu1  ;;  %v913_v35 = vmul.f32 %v2097_v44, %v2097_v44  ;;  %v2107_v62 = vadd.f32 %v1993_v49, %v633_v0 }
 0x150   :  { %v975_v57 = vadd.f32 %v974_v47, %v912_v45  ;;  %v842_v8 = vadd.f32 %v841_v51, %v2097_v44 }
 0x151   :  { %3709 = vst [vmem:[#allocation2_spill] sm:$0xff] %v2107_v62  ;;  %v914_v20 = vmul.f32 %v2107_v62, %v2107_v62 }
 0x152   :  { %v976_v14 = vadd.f32 %v975_v57, %v913_v35  ;;  %v843_v0 = vadd.f32 %v842_v8, %v2107_v62 }
 0x154   :  { %v638_v17 = vpop.f32.mrb[32].mxu0  ;;  %v2083_v19 = vpop.f32.mrb[32].mxu1  ;;  %v977_v33 = vadd.f32 %v976_v14, %v914_v20 }
 0x155   :  { %v640_v24 = vpop.f32.mrb[33].mxu0  ;;  %v768_v28 = vpop.f32.mrb[33].mxu1  ;;  %v2113_v9 = vadd.f32 %v1993_v49, %v638_v17 }
 0x156   :  { %v641_v29 = vpop.f32.mrb[34].mxu0  ;;  %v2087_v32 = vpop.f32.mrb[34].mxu1 }
 0x157   :  { %v643_v37 = vpop.f32.mrb[35].mxu0  ;;  %v771_v39 = vpop.f32.mrb[35].mxu1  ;;  %3710 = vst [vmem:[#allocation3_spill] sm:$0xff] %v2113_v9  ;;  %v915_v23 = vmul.f32 %v2113_v9, %v2113_v9  ;;  %v2121_v24 = vadd.f32 %v1993_v49, %v641_v29  ;;  %v844_v17 = vadd.f32 %v843_v0, %v2113_v9 }
 0x159   :  { %3711 = vst [vmem:[#allocation4_spill] sm:$0xff] %v2121_v24  ;;  %v978_v45 = vadd.f32 %v977_v33, %v915_v23  ;;  %v916_v51 = vmul.f32 %v2121_v24, %v2121_v24 }
 0x15c   :  { %v646_v48 = vpop.f32.mrb[36].mxu0  ;;  %v2101_v60 = vpop.f32.mrb[36].mxu1 }
 0x15d   :  { %v648_v63 = vpop.f32.mrb[37].mxu0  ;;  %v776_v3 = vpop.f32.mrb[37].mxu1  ;;  %v2127_v37 = vadd.f32 %v1993_v49, %v646_v48  ;;  %v979_v48 = vadd.f32 %v978_v45, %v916_v51 }
 0x15e   :  { %v649_v7 = vpop.f32.mrb[38].mxu0  ;;  %v2109_v56 = vpop.f32.mrb[38].mxu1  ;;  %v845_v63 = vadd.f32 %v844_v17, %v2121_v24 }
 0x15f   :  { %v651_v10 = vpop.f32.mrb[39].mxu0  ;;  %v779_v5 = vpop.f32.mrb[39].mxu1  ;;  %3712 = vst [vmem:[#allocation5_spill] sm:$0xff] %v2127_v37  ;;  %v917_v3 = vmul.f32 %v2127_v37, %v2127_v37  ;;  %v2137_v57 = vadd.f32 %v1993_v49, %v649_v7 }
 0x160   :  { %v846_v8 = vadd.f32 %v845_v63, %v2127_v37 }
 0x161   :  { %3713 = vst [vmem:[#allocation6_spill] sm:$0xff] %v2137_v57  ;;  %v980_v20 = vadd.f32 %v979_v48, %v917_v3  ;;  %v918_v0 = vmul.f32 %v2137_v57, %v2137_v57 }
 0x162   :  { %v847_v7 = vadd.f32 %v846_v8, %v2137_v57 }
 0x164   :  { %v654_v28 = vpop.f32.mrb[40].mxu0  ;;  %v2123_v11 = vpop.f32.mrb[40].mxu1 }
 0x165   :  { %v656_v39 = vpop.f32.mrb[41].mxu0  ;;  %v784_v41 = vpop.f32.mrb[41].mxu1  ;;  %v2141_v10 = vadd.f32 %v1993_v49, %v654_v28 }
 0x166   :  { %v657_v43 = vpop.f32.mrb[42].mxu0  ;;  %v2129_v47 = vpop.f32.mrb[42].mxu1 }
 0x167   :  { %v659_v29 = vpop.f32.mrb[43].mxu0  ;;  %v787_v35 = vpop.f32.mrb[43].mxu1  ;;  %3714 = vst [vmem:[#allocation7_spill] sm:$0xff] %v2141_v10  ;;  %v919_v41 = vmul.f32 %v2141_v10, %v2141_v10  ;;  %v2153_v28 = vadd.f32 %v1993_v49, %v657_v43 }
 0x168   :  { %v981_v29 = vadd.f32 %v980_v20, %v918_v0  ;;  %v848_v35 = vadd.f32 %v847_v7, %v2141_v10 }
 0x169   :  { %3715 = vst [vmem:[#allocation8_spill] sm:$0xff] %v2153_v28  ;;  %v920_v48 = vmul.f32 %v2153_v28, %v2153_v28 }
 0x16a   :  { %v982_v3 = vadd.f32 %v981_v29, %v919_v41 }
 0x16c   :  { %v662_v5 = vpop.f32.mrb[44].mxu0  ;;  %v2143_v14 = vpop.f32.mrb[44].mxu1  ;;  %v983_v41 = vadd.f32 %v982_v3, %v920_v48 }
 0x16d   :  { %v664_v23 = vpop.f32.mrb[45].mxu0  ;;  %v792_v33 = vpop.f32.mrb[45].mxu1  ;;  %v2157_v63 = vadd.f32 %v1993_v49, %v662_v5 }
 0x16e   :  { %v665_v17 = vpop.f32.mrb[46].mxu0  ;;  %v2147_v39 = vpop.f32.mrb[46].mxu1  ;;  %v849_v33 = vadd.f32 %v848_v35, %v2153_v28 }
 0x16f   :  { %v667_v45 = vpop.f32.mrb[47].mxu0  ;;  %v795_v51 = vpop.f32.mrb[47].mxu1  ;;  %3716 = vst [vmem:[#allocation9_spill] sm:$0xff] %v2157_v63  ;;  %v921_v43 = vmul.f32 %v2157_v63, %v2157_v63 }
 0x170   :  { %v2167_v45 = vadd.f32 %v1993_v49, %v665_v17  ;;  %v850_v51 = vadd.f32 %v849_v33, %v2157_v63 }
 0x171   :  { %v984_v35 = vadd.f32 %v983_v41, %v921_v43 }
 0x172   :  { %3717 = vst [vmem:[#allocation10_spill] sm:$0xff] %v2167_v45  ;;  %v922_v28 = vmul.f32 %v2167_v45, %v2167_v45  ;;  %v851_v17 = vadd.f32 %v850_v51, %v2167_v45 }
 0x174   :  { %v670_v23 = vpop.f32.mrb[48].mxu0  ;;  %v2161_v8 = vpop.f32.mrb[48].mxu1  ;;  %v985_v33 = vadd.f32 %v984_v35, %v922_v28 }
 0x175   :  { %v672_v20 = vpop.f32.mrb[49].mxu0  ;;  %v800_v0 = vpop.f32.mrb[49].mxu1  ;;  %v2173_v29 = vadd.f32 %v1993_v49, %v670_v23 }
 0x176   :  { %v673_v7 = vpop.f32.mrb[50].mxu0  ;;  %v2169_v5 = vpop.f32.mrb[50].mxu1 }
 0x177   :  { %3718 = vst [vmem:[#allocation11_spill] sm:$0xff] %v2173_v29  ;;  %v675_v10 = vpop.f32.mrb[51].mxu0  ;;  %v803_v57 = vpop.f32.mrb[51].mxu1  ;;  %v923_v20 = vmul.f32 %v2173_v29, %v2173_v29  ;;  %v2181_v0 = vadd.f32 %v1993_v49, %v673_v7  ;;  %v852_v23 = vadd.f32 %v851_v17, %v2173_v29 }
 0x179   :  { %3719 = vst [vmem:[#allocation12_spill] sm:$0xff] %v2181_v0  ;;  %v986_v51 = vadd.f32 %v985_v33, %v923_v20  ;;  %v924_v45 = vmul.f32 %v2181_v0, %v2181_v0  ;;  %v853_v24 = vadd.f32 %v852_v23, %v2181_v0 }
 0x17b   :  { %v987_v17 = vadd.f32 %v986_v51, %v924_v45 }
 0x17c   :  { %v678_v3 = vpop.f32.mrb[52].mxu0  ;;  %v2183_v48 = vpop.f32.mrb[52].mxu1 }
 0x17d   :  { %v2187_v57 = vadd.f32 %v1993_v49, %v678_v3  ;;  %v680_v10 = vpop.f32.mrb[53].mxu0  ;;  %v808_v43 = vpop.f32.mrb[53].mxu1 }
 0x17e   :  { %v681_v41 = vpop.f32.mrb[54].mxu0  ;;  %v2189_v63 = vpop.f32.mrb[54].mxu1 }
 0x17f   :  { %3720 = vst [vmem:[#allocation13_spill] sm:$0xff] %v2187_v57  ;;  %v683_v7 = vpop.f32.mrb[55].mxu0  ;;  %v811_v37 = vpop.f32.mrb[55].mxu1  ;;  %v925_v28 = vmul.f32 %v2187_v57, %v2187_v57  ;;  %v2197_v35 = vadd.f32 %v1993_v49, %v681_v41  ;;  %v854_v3 = vadd.f32 %v853_v24, %v2187_v57 }
 0x181   :  { %3721 = vst [vmem:[#allocation14_spill] sm:$0xff] %v2197_v35  ;;  %v988_v20 = vadd.f32 %v987_v17, %v925_v28  ;;  %v926_v33 = vmul.f32 %v2197_v35, %v2197_v35  ;;  %v855_v41 = vadd.f32 %v854_v3, %v2197_v35 }
 0x183   :  { %v989_v17 = vadd.f32 %v988_v20, %v926_v33 }
 0x184   :  { %v686_v10 = vpop.f32.mrb[56].mxu0  ;;  %v2200_v43 = vpop.f32.mrb[56].mxu1 }
 0x185   :  { %v2205_v37 = vadd.f32 %v1993_v49, %v686_v10  ;;  %v688_v23 = vpop.f32.mrb[57].mxu0  ;;  %v816_v7 = vpop.f32.mrb[57].mxu1 }
 0x186   :  { %v689_v0 = vpop.f32.mrb[58].mxu0  ;;  %v2207_v29 = vpop.f32.mrb[58].mxu1 }
 0x187   :  { %v927_v24 = vmul.f32 %v2205_v37, %v2205_v37  ;;  %v2213_v45 = vadd.f32 %v1993_v49, %v689_v0  ;;  %v691_v51 = vpop.f32.mrb[59].mxu0  ;;  %v819_v28 = vpop.f32.mrb[59].mxu1  ;;  %v856_v57 = vadd.f32 %v855_v41, %v2205_v37 }
 0x188   :  { %v2226_v51 = vadd.f32 %v1993_v49, %v1974_v18 }
 0x189   :  { %v990_v10 = vadd.f32 %v989_v17, %v927_v24  ;;  %v928_v23 = vmul.f32 %v2213_v45, %v2213_v45  ;;  %v857_v3 = vadd.f32 %v856_v57, %v2213_v45 }
 0x18b   :  { %v991_v41 = vadd.f32 %v990_v10, %v928_v23  ;;  %v931_v23 = vmul.f32 %v2226_v51, %v2226_v51 }
 0x18c   :  { %v694_v7 = vpop.f32.mrb[60].mxu0  ;;  %v2218_v9 = vpop.f32.mrb[60].mxu1 }
 0x18d   :  { %v2222_v35 = vadd.f32 %v1993_v49, %v694_v7  ;;  %v696_v62 = vpop.f32.mrb[61].mxu0  ;;  %v824_v0 = vpop.f32.mrb[61].mxu1 }
 0x18e   :  { %v697_v20 = vpop.f32.mrb[62].mxu0  ;;  %v2228_v33 = vpop.f32.mrb[62].mxu1  ;;  %v2238_v62 = vadd.f32 %v1993_v49, %v1976_v22 }
 0x18f   :  { %v858_v24 = vadd.f32 %v857_v3, %v2222_v35  ;;  %v929_v28 = vmul.f32 %v2222_v35, %v2222_v35  ;;  %v2234_v57 = vadd.f32 %v1993_v49, %v697_v20  ;;  %v699_v17 = vpop.f32.mrb[63].mxu0  ;;  %v827_v7 = vpop.f32.mrb[63].mxu1  ;;  %v2247_v3 = vadd.f32 %v1993_v49, %v1978_v26 }
 0x190   :  { %v932_v22 = vmul.f32 %v2238_v62, %v2238_v62  ;;  %v2261_v26 = vadd.f32 %v1993_v49, %v1982_v34  ;;  %v2275_v34 = vadd.f32 %v1993_v49, %v1986_v42  ;;  %v2289_v42 = vadd.f32 %v1993_v49, %v1998_v52 }
 0x191   :  { %v992_v18 = vadd.f32 %v991_v41, %v929_v28  ;;  %v859_v0 = vadd.f32 %v858_v24, %v2234_v57  ;;  %v930_v10 = vmul.f32 %v2234_v57, %v2234_v57  ;;  %v2254_v41 = vadd.f32 %v1993_v49, %v1980_v30 }
 0x192   :  { %v933_v7 = vmul.f32 %v2247_v3, %v2247_v3  ;;  %v2268_v30 = vadd.f32 %v1993_v49, %v1984_v38  ;;  %v2282_v38 = vadd.f32 %v1993_v49, %v1988_v46  ;;  %v2296_v46 = vadd.f32 %v1993_v49, %v2006_v58 }
 0x193   :  { %v860_v20 = vadd.f32 %v859_v0, %v2226_v51  ;;  %v993_v17 = vadd.f32 %v992_v18, %v930_v10  ;;  %v934_v10 = vmul.f32 %v2254_v41, %v2254_v41  ;;  %v2303_v52 = vadd.f32 %v1993_v49, %v2023_v6 }
 0x194   :  { %3722 = vst [vmem:[#allocation15_spill] sm:$0xff] %v2268_v30  ;;  %v2310_v58 = vadd.f32 %v1993_v49, %v2027_v12  ;;  %v2317_v6 = vadd.f32 %v1993_v49, %v2041_v27  ;;  %v2324_v12 = vadd.f32 %v1993_v49, %v2049_v36  ;;  %v2331_v27 = vadd.f32 %v1993_v49, %v2063_v59 }
 0x195   :  { %v861_v24 = vadd.f32 %v860_v20, %v2238_v62  ;;  %v994_v28 = vadd.f32 %v993_v17, %v931_v23  ;;  %v935_v17 = vmul.f32 %v2261_v26, %v2261_v26  ;;  %v2338_v36 = vadd.f32 %v1993_v49, %v2069_v2 }
 0x196   :  { %v2345_v59 = vadd.f32 %v1993_v49, %v2083_v19 }
 0x197   :  { %v862_v0 = vadd.f32 %v861_v24, %v2247_v3  ;;  %v995_v18 = vadd.f32 %v994_v28, %v932_v22  ;;  %v936_v28 = vmul.f32 %v2268_v30, %v2268_v30 }
 0x199   :  { %v863_v20 = vadd.f32 %v862_v0, %v2254_v41  ;;  %v996_v23 = vadd.f32 %v995_v18, %v933_v7  ;;  %v937_v18 = vmul.f32 %v2275_v34, %v2275_v34 }
 0x19b   :  { %v864_v24 = vadd.f32 %v863_v20, %v2261_v26  ;;  %v997_v22 = vadd.f32 %v996_v23, %v934_v10  ;;  %v938_v23 = vmul.f32 %v2282_v38, %v2282_v38 }
 0x19d   :  { %v865_v0 = vadd.f32 %v864_v24, %v2268_v30  ;;  %v998_v7 = vadd.f32 %v997_v22, %v935_v17  ;;  %v939_v22 = vmul.f32 %v2289_v42, %v2289_v42 }
 0x19f   :  { %v866_v20 = vadd.f32 %v865_v0, %v2275_v34  ;;  %v999_v10 = vadd.f32 %v998_v7, %v936_v28  ;;  %v940_v0 = vmul.f32 %v2296_v46, %v2296_v46 }
 0x1a1   :  { %v867_v24 = vadd.f32 %v866_v20, %v2282_v38  ;;  %v1000_v17 = vadd.f32 %v999_v10, %v937_v18  ;;  %v941_v20 = vmul.f32 %v2303_v52, %v2303_v52 }
 0x1a3   :  { %v1001_v30 = vadd.f32 %v1000_v17, %v938_v23  ;;  %v868_v28 = vadd.f32 %v867_v24, %v2289_v42  ;;  %v942_v24 = vmul.f32 %v2310_v58, %v2310_v58 }
 0x1a5   :  { %v869_v7 = vadd.f32 %v868_v28, %v2296_v46  ;;  %v1002_v18 = vadd.f32 %v1001_v30, %v939_v22  ;;  %v943_v22 = vmul.f32 %v2317_v6, %v2317_v6 }
 0x1a7   :  { %v870_v10 = vadd.f32 %v869_v7, %v2303_v52  ;;  %v1003_v23 = vadd.f32 %v1002_v18, %v940_v0  ;;  %v944_v7 = vmul.f32 %v2324_v12, %v2324_v12 }
 0x1a9   :  { %v871_v17 = vadd.f32 %v870_v10, %v2310_v58  ;;  %v1004_v30 = vadd.f32 %v1003_v23, %v941_v20  ;;  %v945_v10 = vmul.f32 %v2331_v27, %v2331_v27 }
 0x1ab   :  { %v872_v28 = vadd.f32 %v871_v17, %v2317_v6  ;;  %v1005_v0 = vadd.f32 %v1004_v30, %v942_v24  ;;  %v946_v17 = vmul.f32 %v2338_v36, %v2338_v36 }
 0x1ad   :  { %v873_v18 = vadd.f32 %v872_v28, %v2324_v12  ;;  %v1006_v20 = vadd.f32 %v1005_v0, %v943_v22  ;;  %v2353_v28 = vadd.f32 %v1993_v49, %v2087_v32  ;;  %v947_v0 = vmul.f32 %v2345_v59, %v2345_v59 }
 0x1ae   :  { %v2367_v32 = vadd.f32 %v1993_v49, %v2109_v56  ;;  %v2381_v56 = vadd.f32 %v1993_v49, %v2129_v47  ;;  %v2395_v47 = vadd.f32 %v1993_v49, %v2147_v39  ;;  %v2409_v39 = vadd.f32 %v1993_v49, %v2169_v5 }
 0x1af   :  { %v874_v23 = vadd.f32 %v873_v18, %v2331_v27  ;;  %v1007_v24 = vadd.f32 %v1006_v20, %v944_v7  ;;  %v2360_v18 = vadd.f32 %v1993_v49, %v2101_v60  ;;  %v2374_v60 = vadd.f32 %v1993_v49, %v2123_v11 }
 0x1b0   :  { %v2388_v11 = vadd.f32 %v1993_v49, %v2143_v14  ;;  %3723 = vst [vmem:[#allocation16_spill] sm:$0xff] %v2395_v47  ;;  %v2402_v14 = vadd.f32 %v1993_v49, %v2161_v8  ;;  %3725 = vst [vmem:[#allocation18_spill] sm:$0xff] %v2409_v39  ;;  %v2416_v8 = vadd.f32 %v1993_v49, %v2183_v48 }
 0x1b1   :  { %v875_v30 = vadd.f32 %v874_v23, %v2338_v36  ;;  %v1008_v2 = vadd.f32 %v1007_v24, %v945_v10  ;;  %v948_v10 = vmul.f32 %v2353_v28, %v2353_v28  ;;  %v2423_v5 = vadd.f32 %v1993_v49, %v2189_v63 }
 0x1b2   :  { %3724 = vst [vmem:[#allocation17_spill] sm:$0xff] %v2402_v14  ;;  %3726 = vst [vmem:[#allocation19_spill] sm:$0xff] %v2416_v8  ;;  %v2430_v48 = vadd.f32 %v1993_v49, %v2200_v43 }
 0x1b3   :  { %v876_v22 = vadd.f32 %v875_v30, %v2345_v59  ;;  %v1009_v19 = vadd.f32 %v1008_v2, %v946_v17  ;;  %v949_v17 = vmul.f32 %v2360_v18, %v2360_v18  ;;  %3727 = vst [vmem:[#allocation20_spill] sm:$0xff] %v2423_v5  ;;  %v958_v63 = vmul.f32 %v2423_v5, %v2423_v5 }
 0x1b4   :  { %3728 = vst [vmem:[#allocation21_spill] sm:$0xff] %v2430_v48  ;;  %v959_v43 = vmul.f32 %v2430_v48, %v2430_v48 }
 0x1b5   :  { %v1010_v7 = vadd.f32 %v1009_v19, %v947_v0  ;;  %v877_v20 = vadd.f32 %v876_v22, %v2353_v28  ;;  %v950_v22 = vmul.f32 %v2367_v32, %v2367_v32 }
 0x1b7   :  { %v1011_v23 = vadd.f32 %v1010_v7, %v948_v10  ;;  %v878_v24 = vadd.f32 %v877_v20, %v2360_v18  ;;  %v951_v7 = vmul.f32 %v2374_v60, %v2374_v60 }
 0x1b9   :  { %v1012_v30 = vadd.f32 %v1011_v23, %v949_v17  ;;  %v879_v2 = vadd.f32 %v878_v24, %v2367_v32  ;;  %v952_v23 = vmul.f32 %v2381_v56, %v2381_v56 }
 0x1bb   :  { %v1013_v0 = vadd.f32 %v1012_v30, %v950_v22  ;;  %v880_v19 = vadd.f32 %v879_v2, %v2374_v60  ;;  %v953_v30 = vmul.f32 %v2388_v11, %v2388_v11 }
 0x1bd   :  { %v1014_v20 = vadd.f32 %v1013_v0, %v951_v7  ;;  %v881_v10 = vadd.f32 %v880_v19, %v2381_v56  ;;  %v954_v0 = vmul.f32 %v2395_v47, %v2395_v47 }
 0x1bf   :  { %v1015_v24 = vadd.f32 %v1014_v20, %v952_v23  ;;  %v882_v17 = vadd.f32 %v881_v10, %v2388_v11  ;;  %v955_v20 = vmul.f32 %v2402_v14, %v2402_v14 }
 0x1c1   :  { %v1016_v2 = vadd.f32 %v1015_v24, %v953_v30  ;;  %v883_v22 = vadd.f32 %v882_v17, %v2395_v47  ;;  %v956_v24 = vmul.f32 %v2409_v39, %v2409_v39 }
 0x1c3   :  { %v1017_v19 = vadd.f32 %v1016_v2, %v954_v0  ;;  %v884_v7 = vadd.f32 %v883_v22, %v2402_v14  ;;  %v957_v2 = vmul.f32 %v2416_v8, %v2416_v8  ;;  %v2434_v22 = vadd.f32 %v1993_v49, %v2207_v29 }
 0x1c5   :  { %v1018_v10 = vadd.f32 %v1017_v19, %v955_v20  ;;  %v885_v23 = vadd.f32 %v884_v7, %v2409_v39  ;;  %3729 = vst [vmem:[#allocation22_spill] sm:$0xff] %v2434_v22  ;;  %v2441_v7 = vadd.f32 %v1993_v49, %v2218_v9  ;;  %v960_v29 = vmul.f32 %v2434_v22, %v2434_v22 }
 0x1c7   :  { %v1019_v17 = vadd.f32 %v1018_v10, %v956_v24  ;;  %v886_v30 = vadd.f32 %v885_v23, %v2416_v8  ;;  %3730 = vst [vmem:[#allocation23_spill] sm:$0xff] %v2441_v7 }
 0x1c9   :  { %v1020_v0 = vadd.f32 %v1019_v17, %v957_v2  ;;  %v887_v19 = vadd.f32 %v886_v30, %v2423_v5  ;;  %v961_v17 = vmul.f32 %v2441_v7, %v2441_v7  ;;  %v2453_v30 = vadd.f32 %v1993_v49, %v2228_v33 }
 0x1cb   :  { %v1021_v20 = vadd.f32 %v1020_v0, %v958_v63  ;;  %v888_v10 = vadd.f32 %v887_v19, %v2430_v48  ;;  %3731 = vst [vmem:[#allocation24_spill] sm:$0xff] %v2453_v30  ;;  %v962_v63 = vmul.f32 %v2453_v30, %v2453_v30 }
 0x1cd   :  { %v1022_v23 = vadd.f32 %v1021_v20, %v959_v43  ;;  %v889_v24 = vadd.f32 %v888_v10, %v2434_v22 }
 0x1cf   :  { %v1023_v9 = vadd.f32 %v1022_v23, %v960_v29  ;;  %v890_v2 = vadd.f32 %v889_v24, %v2441_v7 }
 0x1d1   :  { %v1024_v0 = vadd.f32 %v1023_v9, %v961_v17  ;;  %v891_v19 = vadd.f32 %v890_v2, %v2453_v30  ;;  %v1044_v30 = vlaneseq }
 0x1d3   :  { %v892_v48 = vrot.slane %v891_v19, 4  ;;  %v1025_v20 = vadd.f32 %v1024_v0, %v962_v63 }
 0x1d5   :  { %v893_v43 = vadd.f32 %v892_v48, %v891_v19  ;;  %v1026_v10 = vrot.slane %v1025_v20, 4  ;;  %v1038_v48 = vld [vmem:[%s3658_s3] sm:$0x1] }
 0x1d7   :  { %v894_v22 = vrot.slane %v893_v43, 2  ;;  %v1027_v5 = vadd.f32 %v1026_v10, %v1025_v20  ;;  %v3732_v10 = vld [vmem:[#allocation2_spill] sm:$0xff] }
 0x1d9   :  { %v895_v8 = vadd.f32 %v894_v22, %v893_v43  ;;  %v1028_v39 = vrot.slane %v1027_v5, 2  ;;  %v1045_v22 = vshrl.u32 %v1044_v30, 7 }
 0x1db   :  { %v896_v14 = vrot.slane %v895_v8, 1  ;;  %v1029_v49 = vadd.f32 %v1028_v39, %v1027_v5  ;;  %v1046_v63 = vsub.s32 0, %v1045_v22  ;;  %v3740_v22 = vld [vmem:[#allocation10_spill] sm:$0xff] }
 0x1dd   :  { %v897_v33 = vadd.f32 %v896_v14, %v895_v8  ;;  %v1030_v29 = vrot.slane %v1029_v49, 1  ;;  %v1040_v14 = vld [vmem:[%s3659_s4] sm:$0x1] }
 0x1df   :  { %v898_v23 = vmul.f32 0.001953125, %v897_v33  ;;  %v1031_v24 = vadd.f32 %v1030_v29, %v1029_v49  ;;  %v3733_v49 = vld [vmem:[#allocation3_spill] sm:$0xff]  ;;  %v3734_v33 = vld [vmem:[#allocation4_spill] sm:$0xff]  ;;  %v3735_v29 = vld [vmem:[#allocation5_spill] sm:$0xff] }
 0x1e1   :  { %v1032_v17 = vmul.f32 0.001953125, %v1031_v24  ;;  %v1033_v9 = vmul.f32 %v898_v23, %v898_v23  ;;  %v3737_v24 = vld [vmem:[#allocation7_spill] sm:$0xff] }
 0x1e3   :  { %v1034_v2 = vsub.f32 %v1032_v17, %v1033_v9  ;;  %v3738_v9 = vld [vmem:[#allocation8_spill] sm:$0xff] }
 0x1e5   :  { %v1035_v7 = vmax.f32 %v1034_v2, 0.0 }
 0x1e7   :  { %v1036_v47 = vadd.f32 1e-05, %v1035_v7 }
 0x1e9   :  { %1669 = vrsqrt.f32 %v1036_v47 }
 0x1f3   :  { %v1670_v0 = vpop.eup %1669 }
 0x1f4   :  { %v1039_v19 = vmul.f32 %v1670_v0, %v1038_v48  ;;  %v3739_v0 = vld [vmem:[#allocation9_spill] sm:$0xff] }
 0x1f6   :  { %v1041_v39 = vmul.f32 %v1039_v19, %v898_v23  ;;  %v2465_v8 = vrot.slane %v1039_v19, %v1046_v63  ;;  %v3736_v23 = vld [vmem:[#allocation6_spill] sm:$0xff] }
 0x1f8   :  { %v1042_v5 = vsub.f32 %v1040_v14, %v1041_v39  ;;  %v2469_v47 = vmul.f32 %v2465_v8, %v2001_v53  ;;  %v2473_v7 = vmul.f32 %v2465_v8, %v1996_v50  ;;  %v2477_v30 = vmul.f32 %v2465_v8, %v2004_v54  ;;  %v3741_v39 = vld [vmem:[#allocation11_spill] sm:$0xff] }
 0x1f9   :  { %v2481_v20 = vmul.f32 %v2465_v8, %v2017_v1  ;;  %v2485_v43 = vmul.f32 %v2465_v8, %v2021_v4  ;;  %v2489_v53 = vmul.f32 %v2465_v8, %v2033_v15  ;;  %v2493_v50 = vmul.f32 %v2465_v8, %v2037_v21 }
 0x1fa   :  { %v2497_v54 = vmul.f32 %v2465_v8, %v2047_v31  ;;  %v2501_v1 = vmul.f32 %v2465_v8, %v2053_v40  ;;  %v2505_v4 = vmul.f32 %v2465_v8, %v2061_v55  ;;  %v2509_v15 = vmul.f32 %v2465_v8, %v2067_v61 }
 0x1fb   :  { %v2513_v21 = vmul.f32 %v2465_v8, %v2077_v13  ;;  %v2517_v31 = vmul.f32 %v2465_v8, %v2081_v16  ;;  %v2521_v40 = vmul.f32 %v2465_v8, %v2093_v25  ;;  %v2525_v55 = vmul.f32 %v2465_v8, %v2097_v44 }
 0x1fc   :  { %v2529_v61 = vmul.f32 %v2465_v8, %v3732_v10  ;;  %v2533_v13 = vmul.f32 %v2465_v8, %v3733_v49  ;;  %v2537_v16 = vmul.f32 %v2465_v8, %v3734_v33  ;;  %v2541_v25 = vmul.f32 %v2465_v8, %v3735_v29  ;;  %v3742_v10 = vld [vmem:[#allocation12_spill] sm:$0xff]  ;;  %v3743_v33 = vld [vmem:[#allocation13_spill] sm:$0xff] }
 0x1fd   :  { %v2545_v44 = vmul.f32 %v2465_v8, %v3736_v23  ;;  %v2549_v17 = vmul.f32 %v2465_v8, %v3737_v24  ;;  %v2553_v2 = vmul.f32 %v2465_v8, %v3738_v9  ;;  %v2557_v48 = vmul.f32 %v2465_v8, %v3739_v0  ;;  %v3744_v23 = vld [vmem:[#allocation14_spill] sm:$0xff] }
 0x1fe   :  { %v2561_v19 = vmul.f32 %v2465_v8, %v3740_v22  ;;  %v2565_v14 = vmul.f32 %v2465_v8, %v3741_v39  ;;  %v2569_v49 = vmul.f32 %v2465_v8, %v3742_v10  ;;  %v2573_v29 = vmul.f32 %v2465_v8, %v3743_v33  ;;  %v3745_v33 = vld [vmem:[#allocation15_spill] sm:$0xff] }
 0x1ff   :  { %v2577_v24 = vmul.f32 %v2465_v8, %v3744_v23  ;;  %v2581_v9 = vmul.f32 %v2465_v8, %v2205_v37  ;;  %v2585_v0 = vmul.f32 %v2465_v8, %v2213_v45  ;;  %v2589_v22 = vmul.f32 %v2465_v8, %v2222_v35 }
 0x200   :  { %v2593_v39 = vmul.f32 %v2465_v8, %v2234_v57  ;;  %v2597_v10 = vmul.f32 %v2465_v8, %v2226_v51  ;;  %v2601_v37 = vmul.f32 %v2465_v8, %v2238_v62  ;;  %v2605_v45 = vmul.f32 %v2465_v8, %v2247_v3 }
 0x201   :  { %v2609_v35 = vmul.f32 %v2465_v8, %v2254_v41  ;;  %v2613_v57 = vmul.f32 %v2465_v8, %v2261_v26  ;;  %v2617_v51 = vmul.f32 %v2465_v8, %v3745_v33  ;;  %v2621_v62 = vmul.f32 %v2465_v8, %v2275_v34 }
 0x202   :  { %v2625_v3 = vmul.f32 %v2465_v8, %v2282_v38  ;;  %v2629_v41 = vmul.f32 %v2465_v8, %v2289_v42  ;;  %v2633_v26 = vmul.f32 %v2465_v8, %v2296_v46  ;;  %v2637_v23 = vmul.f32 %v2465_v8, %v2303_v52 }
 0x203   :  { %v2641_v34 = vmul.f32 %v2465_v8, %v2310_v58  ;;  %v2645_v38 = vmul.f32 %v2465_v8, %v2317_v6  ;;  %v2649_v42 = vmul.f32 %v2465_v8, %v2324_v12  ;;  %v2653_v46 = vmul.f32 %v2465_v8, %v2331_v27 }
 0x204   :  { %v2657_v52 = vmul.f32 %v2465_v8, %v2338_v36  ;;  %v2661_v58 = vmul.f32 %v2465_v8, %v2345_v59  ;;  %v2665_v6 = vmul.f32 %v2465_v8, %v2353_v28  ;;  %v2669_v12 = vmul.f32 %v2465_v8, %v2360_v18  ;;  %v3750_v18 = vld [vmem:[#allocation16_spill] sm:$0xff] }
 0x205   :  { %v2671_v33 = vrot.slane %v1042_v5, %v1046_v63  ;;  %v2675_v27 = vmul.f32 %v2465_v8, %v2367_v32  ;;  %v2679_v36 = vmul.f32 %v2465_v8, %v2374_v60  ;;  %v2683_v59 = vmul.f32 %v2465_v8, %v2381_v56  ;;  %v3752_v5 = vld [vmem:[#allocation17_spill] sm:$0xff] }
 0x206   :  { %v2687_v28 = vmul.f32 %v2465_v8, %v2388_v11  ;;  %v2691_v63 = vmul.f32 %v2465_v8, %v3750_v18  ;;  %v2695_v32 = vmul.f32 %v2465_v8, %v3752_v5 }
 0x207   :  { %3746 = vst [vmem:[#allocation2_spill] sm:$0xff] %v2675_v27  ;;  %3747 = vst [vmem:[#allocation3_spill] sm:$0xff] %v2679_v36  ;;  %v3754_v27 = vld [vmem:[#allocation18_spill] sm:$0xff]  ;;  %v3756_v36 = vld [vmem:[#allocation19_spill] sm:$0xff] }
 0x208   :  { %3748 = vst [vmem:[#allocation4_spill] sm:$0xff] %v2683_v59  ;;  %3749 = vst [vmem:[#allocation5_spill] sm:$0xff] %v2687_v28  ;;  %v2699_v60 = vmul.f32 %v2465_v8, %v3754_v27  ;;  %v2703_v56 = vmul.f32 %v2465_v8, %v3756_v36  ;;  %v3757_v59 = vld [vmem:[#allocation20_spill] sm:$0xff]  ;;  %v3758_v28 = vld [vmem:[#allocation21_spill] sm:$0xff] }
 0x209   :  { %3751 = vst [vmem:[#allocation6_spill] sm:$0xff] %v2691_v63  ;;  %3753 = vst [vmem:[#allocation7_spill] sm:$0xff] %v2695_v32  ;;  %v2707_v11 = vmul.f32 %v2465_v8, %v3757_v59  ;;  %v2711_v18 = vmul.f32 %v2465_v8, %v3758_v28  ;;  %v3759_v63 = vld [vmem:[#allocation22_spill] sm:$0xff]  ;;  %v3760_v32 = vld [vmem:[#allocation23_spill] sm:$0xff]  ;;  %v2727_v59 = vadd.f32 %v2671_v33, %v2469_v47 }
 0x20a   :  { %3755 = vst [vmem:[#allocation8_spill] sm:$0xff] %v2699_v60  ;;  %v2715_v5 = vmul.f32 %v2465_v8, %v3759_v63  ;;  %v2719_v27 = vmul.f32 %v2465_v8, %v3760_v32  ;;  %v3761_v60 = vld [vmem:[#allocation24_spill] sm:$0xff]  ;;  %v2731_v28 = vadd.f32 %v2671_v33, %v2473_v7  ;;  %v2735_v63 = vadd.f32 %v2671_v33, %v2477_v30 }
 0x20b   :  { %v2723_v36 = vmul.f32 %v2465_v8, %v3761_v60  ;;  %v2739_v32 = vadd.f32 %v2671_v33, %v2481_v20  ;;  %v2743_v8 = vadd.f32 %v2671_v33, %v2485_v43  ;;  %v2747_v47 = vadd.f32 %v2671_v33, %v2489_v53 }
 0x20c   :  { %v2751_v7 = vadd.f32 %v2671_v33, %v2493_v50  ;;  %v2755_v30 = vadd.f32 %v2671_v33, %v2497_v54  ;;  %v2759_v20 = vadd.f32 %v2671_v33, %v2501_v1  ;;  %v2763_v43 = vadd.f32 %v2671_v33, %v2505_v4 }
 0x20d   :  { %v2767_v53 = vadd.f32 %v2671_v33, %v2509_v15  ;;  %v2771_v50 = vadd.f32 %v2671_v33, %v2513_v21  ;;  %v2775_v54 = vadd.f32 %v2671_v33, %v2517_v31  ;;  %v2779_v1 = vadd.f32 %v2671_v33, %v2521_v40 }
 0x20e   :  { %v2783_v4 = vadd.f32 %v2671_v33, %v2525_v55  ;;  %v2787_v15 = vadd.f32 %v2671_v33, %v2529_v61  ;;  %v2791_v21 = vadd.f32 %v2671_v33, %v2533_v13  ;;  %v2795_v31 = vadd.f32 %v2671_v33, %v2537_v16  ;;  %v3768_v60 = vld [vmem:[#allocation2_spill] sm:$0xff] }
 0x20f   :  { %v2799_v40 = vadd.f32 %v2671_v33, %v2541_v25  ;;  %v2803_v55 = vadd.f32 %v2671_v33, %v2545_v44  ;;  %v2807_v61 = vadd.f32 %v2671_v33, %v2549_v17  ;;  %v2811_v13 = vadd.f32 %v2671_v33, %v2553_v2 }
 0x210   :  { %v2815_v16 = vadd.f32 %v2671_v33, %v2557_v48  ;;  %v2819_v25 = vadd.f32 %v2671_v33, %v2561_v19  ;;  %v2823_v44 = vadd.f32 %v2671_v33, %v2565_v14  ;;  %v2827_v17 = vadd.f32 %v2671_v33, %v2569_v49 }
 0x211   :  { %v2831_v2 = vadd.f32 %v2671_v33, %v2573_v29  ;;  %v2835_v48 = vadd.f32 %v2671_v33, %v2577_v24  ;;  %v2839_v19 = vadd.f32 %v2671_v33, %v2581_v9  ;;  %v2843_v14 = vadd.f32 %v2671_v33, %v2585_v0 }
 0x212   :  { %v2847_v49 = vadd.f32 %v2671_v33, %v2589_v22  ;;  %v2851_v29 = vadd.f32 %v2671_v33, %v2593_v39  ;;  %v2855_v24 = vadd.f32 %v2671_v33, %v2597_v10  ;;  %v2859_v9 = vadd.f32 %v2671_v33, %v2601_v37 }
 0x213   :  { %v2863_v0 = vadd.f32 %v2671_v33, %v2605_v45  ;;  %v2867_v22 = vadd.f32 %v2671_v33, %v2609_v35  ;;  %v2871_v39 = vadd.f32 %v2671_v33, %v2613_v57  ;;  %v2875_v10 = vadd.f32 %v2671_v33, %v2617_v51 }
 0x214   :  { %v2879_v37 = vadd.f32 %v2671_v33, %v2621_v62  ;;  %v2883_v45 = vadd.f32 %v2671_v33, %v2625_v3  ;;  %v2887_v35 = vadd.f32 %v2671_v33, %v2629_v41  ;;  %v2891_v57 = vadd.f32 %v2671_v33, %v2633_v26 }
 0x215   :  { %v2895_v51 = vadd.f32 %v2671_v33, %v2637_v23  ;;  %v2899_v62 = vadd.f32 %v2671_v33, %v2641_v34  ;;  %v2903_v3 = vadd.f32 %v2671_v33, %v2645_v38  ;;  %v2907_v41 = vadd.f32 %v2671_v33, %v2649_v42 }
 0x216   :  { %3762 = vst [vmem:[#allocation9_spill] sm:$0xff] %v2891_v57  ;;  %v2911_v26 = vadd.f32 %v2671_v33, %v2653_v46  ;;  %v2915_v23 = vadd.f32 %v2671_v33, %v2657_v52  ;;  %v2919_v34 = vadd.f32 %v2671_v33, %v2661_v58  ;;  %v2923_v38 = vadd.f32 %v2671_v33, %v2665_v6 }
 0x217   :  { %v2927_v42 = vadd.f32 %v2671_v33, %v2669_v12  ;;  %v2931_v46 = vadd.f32 %v2671_v33, %v3768_v60  ;;  %vm1183_vm0 = vcmp.gt.f32.partialorder %v2727_v59, 0.0  ;;  %vm1184_vm1 = vcmp.gt.f32.partialorder %v2731_v28, 0.0 }
 0x218   :  { %3763 = vst [vmem:[#allocation10_spill] sm:$0xff] %v2911_v26  ;;  %3764 = vst [vmem:[#allocation11_spill] sm:$0xff] %v2915_v23  ;;  %v3770_v26 = vld [vmem:[#allocation3_spill] sm:$0xff]  ;;  %v3771_v23 = vld [vmem:[#allocation4_spill] sm:$0xff]  ;;  %vm1185_vm2 = vcmp.gt.f32.partialorder %v2735_v63, 0.0  ;;  %vm1186_vm3 = vcmp.gt.f32.partialorder %v2739_v32, 0.0 }
 0x219   :  { %3765 = vst [vmem:[#allocation12_spill] sm:$0xff] %v2919_v34  ;;  %3766 = vst [vmem:[#allocation13_spill] sm:$0xff] %v2923_v38  ;;  %v2935_v52 = vadd.f32 %v2671_v33, %v3770_v26  ;;  %v2939_v58 = vadd.f32 %v2671_v33, %v3771_v23  ;;  %v3773_v34 = vld [vmem:[#allocation5_spill] sm:$0xff]  ;;  %v3775_v38 = vld [vmem:[#allocation6_spill] sm:$0xff]  ;;  %v2959_v23 = vadd.f32 %v2671_v33, %v2703_v56  ;;  %vm1187_vm4 = vcmp.gt.f32.partialorder %v2743_v8, 0.0 }
 0x21a   :  { %3767 = vst [vmem:[#allocation14_spill] sm:$0xff] %v2927_v42  ;;  %3769 = vst [vmem:[#allocation15_spill] sm:$0xff] %v2931_v46  ;;  %v2943_v6 = vadd.f32 %v2671_v33, %v3773_v34  ;;  %v2947_v12 = vadd.f32 %v2671_v33, %v3775_v38  ;;  %v3777_v42 = vld [vmem:[#allocation7_spill] sm:$0xff]  ;;  %v3779_v46 = vld [vmem:[#allocation8_spill] sm:$0xff]  ;;  %v2963_v34 = vadd.f32 %v2671_v33, %v2707_v11  ;;  %vm1188_vm5 = vcmp.gt.f32.partialorder %v2747_v47, 0.0 }
 0x21b   :  { %3772 = vst [vmem:[#allocation16_spill] sm:$0xff] %v2939_v58  ;;  %v2951_v60 = vadd.f32 %v2671_v33, %v3777_v42  ;;  %v2955_v26 = vadd.f32 %v2671_v33, %v3779_v46  ;;  %3781 = vst [vmem:[#allocation21_spill] sm:$0xff] %v2959_v23  ;;  %v2967_v38 = vadd.f32 %v2671_v33, %v2711_v18  ;;  %vm1189_vm6 = vcmp.gt.f32.partialorder %v2751_v7, 0.0 }
 0x21c   :  { %3774 = vst [vmem:[#allocation17_spill] sm:$0xff] %v2943_v6  ;;  %3776 = vst [vmem:[#allocation18_spill] sm:$0xff] %v2947_v12  ;;  %v2971_v42 = vadd.f32 %v2671_v33, %v2715_v5  ;;  %vm1190_vm7 = vcmp.gt.f32.partialorder %v2755_v30, 0.0  ;;  %vm1191_vm8 = vcmp.gt.f32.partialorder %v2759_v20, 0.0  ;;  %v2984_v56 = vadd.f32 %v2671_v33, %v2719_v27 }
 0x21d   :  { %3778 = vst [vmem:[#allocation19_spill] sm:$0xff] %v2951_v60  ;;  %3780 = vst [vmem:[#allocation20_spill] sm:$0xff] %v2955_v26  ;;  %vm1192_vm9 = vcmp.gt.f32.partialorder %v2763_v43, 0.0  ;;  %v1247_v11 = vmul.f32 0.01, %v2727_v59  ;;  %v2992_v46 = vadd.f32 %v2671_v33, %v2723_v36  ;;  %vm1193_vm10 = vcmp.gt.f32.partialorder %v2767_v53, 0.0 }
 0x21e   :  { %3782 = vst [vmem:[#allocation22_spill] sm:$0xff] %v2963_v34  ;;  %3783 = vst [vmem:[#allocation23_spill] sm:$0xff] %v2967_v38  ;;  %v1248_v18 = vmul.f32 0.01, %v2731_v28  ;;  %v1249_v5 = vmul.f32 0.01, %v2735_v63 }
 0x21f   :  { %3784 = vst [vmem:[#allocation24_spill] sm:$0xff] %v2971_v42  ;;  %3785 = vst [vmem:[#allocation2_spill] sm:$0xff] %v2984_v56  ;;  %v1250_v42 = vmul.f32 0.01, %v2739_v32  ;;  %v1251_v38 = vmul.f32 0.01, %v2743_v8  ;;  %v1311_v33 = vsel %vm1183_vm0, %v2727_v59, %v1247_v11 }
 0x220   :  { %3786 = vst [vmem:[#allocation3_spill] sm:$0xff] %v2992_v46  ;;  %v1252_v27 = vmul.f32 0.01, %v2747_v47  ;;  %vm1194_vm11 = vcmp.gt.f32.partialorder %v2771_v50, 0.0  ;;  %v1253_v56 = vmul.f32 0.01, %v2751_v7  ;;  %v1312_v60 = vsel %vm1184_vm1, %v2731_v28, %v1248_v18  ;;  %1375 = vst [vmem:[%s3660_s5] sm:$0xff] %v1311_v33 }
 0x221   :  { %v1254_v34 = vmul.f32 0.01, %v2755_v30  ;;  %v1255_v23 = vmul.f32 0.01, %v2759_v20  ;;  %vm1195_vm12 = vcmp.gt.f32.partialorder %v2775_v54, 0.0  ;;  %vm1196_vm13 = vcmp.gt.f32.partialorder %v2779_v1, 0.0 }
 0x222   :  { %v1256_v36 = vmul.f32 0.01, %v2763_v43  ;;  %v3008_v46 = vmul.f32 0.01, %v2767_v53  ;;  %v3011_v26 = vmul.f32 0.01, %v2771_v50  ;;  %v1313_v6 = vsel %vm1185_vm2, %v2735_v63, %v1249_v5 }
 0x223   :  { %v3021_v59 = vmul.f32 0.01, %v2775_v54  ;;  %v3024_v11 = vmul.f32 0.01, %v2779_v1  ;;  %v3027_v12 = vmul.f32 0.01, %v2783_v4  ;;  %v1314_v58 = vsel %vm1186_vm3, %v2739_v32, %v1250_v42 }
 0x224   :  { %1376 = vst [vmem:[%s3660_s5 + $0x8] sm:$0xff] %v1312_v60  ;;  %vm1197_vm14 = vcmp.gt.f32.partialorder %v2783_v4, 0.0  ;;  %v3037_v28 = vmul.f32 0.01, %v2787_v15  ;;  %v3040_v18 = vmul.f32 0.01, %v2791_v21 }
 0x225   :  { %v3043_v33 = vmul.f32 0.01, %v2795_v31  ;;  %1377 = vst [vmem:[%s3660_s5 + $0x10] sm:$0xff] %v1313_v6  ;;  %vm1198_vm15 = vcmp.gt.f32.partialorder %v2787_v15, 0.0  ;;  %v3053_v63 = vmul.f32 0.01, %v2799_v40 }
 0x226   :  { %v3056_v60 = vmul.f32 0.01, %v2803_v55  ;;  %v3059_v5 = vmul.f32 0.01, %v2807_v61  ;;  %1378 = vst [vmem:[%s3660_s5 + $0x18] sm:$0xff] %v1314_v58  ;;  %vm1199_vm0 = vcmp.gt.f32.partialorder %v2791_v21, 0.0 }
 0x227   :  { %3787 = vst [vmem:[#allocation4_spill] sm:$0xff] %v3043_v33  ;;  %v1315_v33 = vsel %vm1187_vm4, %v2743_v8, %v1251_v38  ;;  %v3069_v32 = vmul.f32 0.01, %v2811_v13  ;;  %v3072_v6 = vmul.f32 0.01, %v2815_v16  ;;  %vm1200_vm1 = vcmp.gt.f32.partialorder %v2795_v31, 0.0 }
 0x228   :  { %3788 = vst [vmem:[#allocation5_spill] sm:$0xff] %v3059_v5  ;;  %v3075_v42 = vmul.f32 0.01, %v2819_v25  ;;  %v1316_v5 = vsel %vm1188_vm5, %v2747_v47, %v1252_v27  ;;  %1379 = vst [vmem:[%s3660_s5 + $0x20] sm:$0xff] %v1315_v33  ;;  %v3085_v8 = vmul.f32 0.01, %v2823_v44 }
 0x229   :  { %v3088_v58 = vmul.f32 0.01, %v2827_v17  ;;  %v3091_v38 = vmul.f32 0.01, %v2831_v2  ;;  %1380 = vst [vmem:[%s3660_s5 + $0x28] sm:$0xff] %v1316_v5  ;;  %vm1201_vm2 = vcmp.gt.f32.partialorder %v2799_v40, 0.0 }
 0x22a   :  { %3789 = vst [vmem:[#allocation6_spill] sm:$0xff] %v3075_v42  ;;  %v1317_v42 = vsel %vm1189_vm6, %v2751_v7, %v1253_v56  ;;  %v3101_v47 = vmul.f32 0.01, %v2835_v48  ;;  %v3104_v27 = vmul.f32 0.01, %v2839_v19  ;;  %vm1202_vm3 = vcmp.gt.f32.partialorder %v2803_v55, 0.0 }
 0x22b   :  { %3790 = vst [vmem:[#allocation7_spill] sm:$0xff] %v3091_v38  ;;  %v3107_v33 = vmul.f32 0.01, %v2843_v14  ;;  %v1318_v38 = vsel %vm1190_vm7, %v2755_v30, %v1254_v34  ;;  %1381 = vst [vmem:[%s3660_s5 + $0x30] sm:$0xff] %v1317_v42  ;;  %v3119_v7 = vmul.f32 0.01, %v2847_v49  ;;  %v1319_v30 = vsel %vm1191_vm8, %v2759_v20, %v1255_v23 }
 0x22c   :  { %v3122_v56 = vmul.f32 0.01, %v2851_v29  ;;  %v3125_v5 = vmul.f32 0.01, %v2855_v24  ;;  %1382 = vst [vmem:[%s3660_s5 + $0x38] sm:$0xff] %v1318_v38  ;;  %vm1205_vm6 = vcmp.gt.f32.partialorder %v2815_v16, 0.0  ;;  %v1320_v23 = vsel %vm1192_vm9, %v2763_v43, %v1256_v36 }
 0x22d   :  { %v3138_v34 = vmul.f32 0.01, %v2859_v9  ;;  %v3141_v42 = vmul.f32 0.01, %v2863_v0  ;;  %v3144_v20 = vmul.f32 0.01, %v2867_v22  ;;  %v1321_v36 = vsel %vm1193_vm10, %v2767_v53, %v3008_v46 }
 0x22e   :  { %1383 = vst [vmem:[%s3660_s5 + $0x40] sm:$0xff] %v1319_v30  ;;  %vm1209_vm8 = vcmp.gt.f32.partialorder %v2831_v2, 0.0  ;;  %v3157_v38 = vmul.f32 0.01, %v2871_v39  ;;  %v3163_v43 = vmul.f32 0.01, %v2879_v37  ;;  %v1322_v46 = vsel %vm1194_vm11, %v2771_v50, %v3011_v26 }
 0x22f   :  { %3791 = vst [vmem:[#allocation8_spill] sm:$0xff] %v3144_v20  ;;  %v3160_v20 = vmul.f32 0.01, %v2875_v10  ;;  %1384 = vst [vmem:[%s3660_s5 + $0x48] sm:$0xff] %v1320_v23  ;;  %vm1213_vm9 = vcmp.gt.f32.partialorder %v2847_v49, 0.0  ;;  %vm1217_vm10 = vcmp.gt.f32.partialorder %v2863_v0, 0.0  ;;  %v1323_v26 = vsel %vm1195_vm12, %v2775_v54, %v3021_v59 }
 0x230   :  { %3792 = vst [vmem:[#allocation25_spill] sm:$0xff] %v3163_v43  ;;  %v3177_v30 = vmul.f32 0.01, %v2883_v45  ;;  %v3180_v43 = vmul.f32 0.01, %v2887_v35  ;;  %1385 = vst [vmem:[%s3660_s5 + $0x50] sm:$0xff] %v1321_v36  ;;  %v1324_v59 = vsel %vm1196_vm13, %v2779_v1, %v3024_v11  ;;  %v1325_v11 = vsel %vm1197_vm14, %v2783_v4, %v3027_v12 }
 0x231   :  { %v3183_v53 = vmul.f32 0.01, %v2891_v57  ;;  %v3197_v23 = vmul.f32 0.01, %v2895_v51  ;;  %v3203_v50 = vmul.f32 0.01, %v2903_v3  ;;  %v1326_v12 = vsel %vm1198_vm15, %v2787_v15, %v3037_v28 }
 0x232   :  { %1386 = vst [vmem:[%s3660_s5 + $0x58] sm:$0xff] %v1322_v46  ;;  %vm1221_vm11 = vcmp.gt.f32.partialorder %v2879_v37, 0.0  ;;  %v3217_v36 = vmul.f32 0.01, %v2907_v41  ;;  %1387 = vst [vmem:[%s3660_s5 + $0x60] sm:$0xff] %v1323_v26  ;;  %vm1225_vm12 = vcmp.gt.f32.partialorder %v2895_v51, 0.0  ;;  %v1327_v28 = vsel %vm1199_vm0, %v2791_v21, %v3040_v18 }
 0x233   :  { %3793 = vst [vmem:[#allocation26_spill] sm:$0xff] %v3183_v53  ;;  %3794 = vst [vmem:[#allocation27_spill] sm:$0xff] %v3197_v23  ;;  %v3200_v53 = vmul.f32 0.01, %v2899_v62  ;;  %v3800_v23 = vld [vmem:[#allocation11_spill] sm:$0xff]  ;;  %v3802_v46 = vld [vmem:[#allocation12_spill] sm:$0xff] }
 0x234   :  { %3796 = vst [vmem:[#allocation29_spill] sm:$0xff] %v3203_v50  ;;  %3797 = vst [vmem:[#allocation30_spill] sm:$0xff] %v3217_v36  ;;  %v3798_v50 = vld [vmem:[#allocation10_spill] sm:$0xff]  ;;  %v3223_v54 = vmul.f32 0.01, %v3800_v23  ;;  %v3808_v26 = vld [vmem:[#allocation15_spill] sm:$0xff] }
 0x235   :  { %3795 = vst [vmem:[#allocation28_spill] sm:$0xff] %v3200_v53  ;;  %v3220_v53 = vmul.f32 0.01, %v3798_v50  ;;  %v3806_v57 = vld [vmem:[#allocation14_spill] sm:$0xff]  ;;  %1388 = vst [vmem:[%s3660_s5 + $0x68] sm:$0xff] %v1324_v59  ;;  %vm1229_vm13 = vcmp.gt.f32.partialorder %v3798_v50, 0.0 }
 0x236   :  { %3801 = vst [vmem:[#allocation11_spill] sm:$0xff] %v3223_v54  ;;  %v3804_v54 = vld [vmem:[#allocation13_spill] sm:$0xff]  ;;  %v3243_v1 = vmul.f32 0.01, %v3806_v57  ;;  %1389 = vst [vmem:[%s3660_s5 + $0x70] sm:$0xff] %v1325_v11  ;;  %vm1233_vm14 = vcmp.gt.f32.partialorder %v3806_v57, 0.0 }
 0x237   :  { %3799 = vst [vmem:[#allocation10_spill] sm:$0xff] %v3220_v53  ;;  %v3237_v53 = vmul.f32 0.01, %v3802_v46  ;;  %v3240_v36 = vmul.f32 0.01, %v3804_v54  ;;  %v3813_v59 = vld [vmem:[#allocation17_spill] sm:$0xff] }
 0x238   :  { %3807 = vst [vmem:[#allocation14_spill] sm:$0xff] %v3243_v1  ;;  %v3260_v1 = vmul.f32 0.01, %v2935_v52  ;;  %v3817_v54 = vld [vmem:[#allocation19_spill] sm:$0xff]  ;;  %1390 = vst [vmem:[%s3660_s5 + $0x78] sm:$0xff] %v1326_v12  ;;  %vm1237_vm15 = vcmp.gt.f32.partialorder %v3813_v59, 0.0 }
 0x239   :  { %3803 = vst [vmem:[#allocation12_spill] sm:$0xff] %v3237_v53  ;;  %3805 = vst [vmem:[#allocation31_spill] sm:$0xff] %v3240_v36  ;;  %v3257_v36 = vmul.f32 0.01, %v3808_v26  ;;  %v3811_v53 = vld [vmem:[#allocation16_spill] sm:$0xff]  ;;  %vm3833_vm5 = vcmp.gt.f32.partialorder %v2811_v13, 0.0 }
 0x23a   :  { %3810 = vst [vmem:[#allocation32_spill] sm:$0xff] %v3260_v1  ;;  %v3263_v4 = vmul.f32 0.01, %v3811_v53  ;;  %v3277_v1 = vmul.f32 0.01, %v3813_v59  ;;  %v3819_v11 = vld [vmem:[#allocation20_spill] sm:$0xff] }
 0x23b   :  { %3809 = vst [vmem:[#allocation15_spill] sm:$0xff] %v3257_v36  ;;  %v3283_v15 = vmul.f32 0.01, %v3817_v54  ;;  %v3823_v53 = vld [vmem:[#allocation22_spill] sm:$0xff]  ;;  %v3825_v18 = vld [vmem:[#allocation4_spill] sm:$0xff]  ;;  %1391 = vst [vmem:[%s3660_s5 + $0x80] sm:$0xff] %v1327_v28  ;;  %v1329_v28 = vsel %vm1201_vm2, %v2799_v40, %v3053_v63  ;;  %v1332_v63 = vsel %vm3833_vm5, %v2811_v13, %v3069_v32 }
 0x23c   :  { %3812 = vst [vmem:[#allocation33_spill] sm:$0xff] %v3263_v4  ;;  %3814 = vst [vmem:[#allocation17_spill] sm:$0xff] %v3277_v1  ;;  %v3815_v4 = vld [vmem:[#allocation18_spill] sm:$0xff]  ;;  %v3303_v21 = vmul.f32 0.01, %v3823_v53  ;;  %v1328_v12 = vsel %vm1200_vm1, %v2795_v31, %v3825_v18  ;;  %vm1242_vm4 = vcmp.gt.f32.partialorder %v3823_v53, 0.0 }
 0x23d   :  { %v3280_v36 = vmul.f32 0.01, %v3815_v4  ;;  %3818 = vst [vmem:[#allocation34_spill] sm:$0xff] %v3283_v15  ;;  %v3821_v15 = vld [vmem:[#allocation21_spill] sm:$0xff]  ;;  %v3828_v54 = vld [vmem:[#allocation2_spill] sm:$0xff]  ;;  %1392 = vst [vmem:[%s3660_s5 + $0x88] sm:$0xff] %v1328_v12  ;;  %v1333_v12 = vsel %vm1205_vm6, %v2815_v16, %v3072_v6 }
 0x23e   :  { %v3300_v1 = vmul.f32 0.01, %v3821_v15  ;;  %3824 = vst [vmem:[#allocation22_spill] sm:$0xff] %v3303_v21  ;;  %vm1241_vm0 = vcmp.gt.f32.partialorder %v3821_v15, 0.0  ;;  %v3323_v31 = vmul.f32 0.01, %v3828_v54 }
 0x23f   :  { %3816 = vst [vmem:[#allocation18_spill] sm:$0xff] %v3280_v36  ;;  %v3297_v36 = vmul.f32 0.01, %v3819_v11  ;;  %v3826_v11 = vld [vmem:[#allocation23_spill] sm:$0xff]  ;;  %vm1245_vm1 = vcmp.gt.f32.partialorder %v3828_v54, 0.0  ;;  %vm3832_vm2 = vcmp.gt.f32.partialorder %v2807_v61, 0.0 }
 0x240   :  { %3822 = vst [vmem:[#allocation21_spill] sm:$0xff] %v3300_v1  ;;  %v3317_v1 = vmul.f32 0.01, %v3826_v11  ;;  %3829 = vst [vmem:[#allocation4_spill] sm:$0xff] %v3323_v31  ;;  %v3830_v18 = vld [vmem:[#allocation3_spill] sm:$0xff]  ;;  %v1330_v31 = vsel %vm1202_vm3, %v2803_v55, %v3056_v60  ;;  %v3834_v55 = vld [vmem:[#allocation6_spill] sm:$0xff] }
 0x241   :  { %3820 = vst [vmem:[#allocation35_spill] sm:$0xff] %v3297_v36  ;;  %v3827_v36 = vld [vmem:[#allocation24_spill] sm:$0xff]  ;;  %vm1246_vm7 = vcmp.gt.f32.partialorder %v3830_v18, 0.0  ;;  %v3335_v11 = vmul.f32 0.01, %v3830_v18  ;;  %1393 = vst [vmem:[%s3660_s5 + $0x90] sm:$0xff] %v1329_v28 }
 0x242   :  { %v3320_v21 = vmul.f32 0.01, %v3827_v36  ;;  %v3831_v36 = vld [vmem:[#allocation5_spill] sm:$0xff]  ;;  %vm3835_vm3 = vcmp.gt.f32.partialorder %v2819_v25, 0.0  ;;  %vm3837_vm5 = vcmp.gt.f32.partialorder %v2827_v17, 0.0  ;;  %1394 = vst [vmem:[%s3660_s5 + $0x98] sm:$0xff] %v1330_v31 }
 0x243   :  { %v1331_v40 = vsel %vm3832_vm2, %v2807_v61, %v3831_v36  ;;  %v1334_v60 = vsel %vm3835_vm3, %v2819_v25, %v3834_v55  ;;  %vm3836_vm2 = vcmp.gt.f32.partialorder %v2823_v44, 0.0  ;;  %v1336_v13 = vsel %vm3837_vm5, %v2827_v17, %v3088_v58  ;;  %1396 = vst [vmem:[%s3660_s5 + $0xa8] sm:$0xff] %v1332_v63  ;;  %v3838_v16 = vld [vmem:[#allocation7_spill] sm:$0xff]  ;;  %1397 = vst [vmem:[%s3660_s5 + $0xb0] sm:$0xff] %v1333_v12  ;;  %v3853_v58 = vld [vmem:[#allocation9_spill] sm:$0xff] }
 0x244   :  { %v1335_v61 = vsel %vm3836_vm2, %v2823_v44, %v3085_v8  ;;  %1395 = vst [vmem:[%s3660_s5 + $0xa0] sm:$0xff] %v1331_v40  ;;  %v1337_v25 = vsel %vm1209_vm8, %v2831_v2, %v3838_v16  ;;  %vm3839_vm6 = vcmp.gt.f32.partialorder %v2835_v48, 0.0  ;;  %vm3840_vm3 = vcmp.gt.f32.partialorder %v2839_v19, 0.0  ;;  %1398 = vst [vmem:[%s3660_s5 + $0xb8] sm:$0xff] %v1334_v60  ;;  %v3852_v8 = vld [vmem:[#allocation26_spill] sm:$0xff]  ;;  %v3875_v28 = vld [vmem:[#allocation33_spill] sm:$0xff] }
 0x245   :  { %v1338_v44 = vsel %vm3839_vm6, %v2835_v48, %v3101_v47  ;;  %v1339_v17 = vsel %vm3840_vm3, %v2839_v19, %v3104_v27  ;;  %vm3841_vm2 = vcmp.gt.f32.partialorder %v2843_v14, 0.0  ;;  %1399 = vst [vmem:[%s3660_s5 + $0xc0] sm:$0xff] %v1335_v61  ;;  %1400 = vst [vmem:[%s3660_s5 + $0xc8] sm:$0xff] %v1336_v13  ;;  %v1341_v2 = vsel %vm1213_vm9, %v2847_v49, %v3119_v7  ;;  %v3876_v40 = vld [vmem:[#allocation16_spill] sm:$0xff]  ;;  %v3881_v55 = vld [vmem:[#allocation34_spill] sm:$0xff] }
 0x246   :  { %v1340_v32 = vsel %vm3841_vm2, %v2843_v14, %v3107_v33  ;;  %vm3842_vm8 = vcmp.gt.f32.partialorder %v2851_v29, 0.0  ;;  %vm3843_vm5 = vcmp.gt.f32.partialorder %v2855_v24, 0.0  ;;  %vm3844_vm6 = vcmp.gt.f32.partialorder %v2859_v9, 0.0  ;;  %1401 = vst [vmem:[%s3660_s5 + $0xd0] sm:$0xff] %v1337_v25  ;;  %1402 = vst [vmem:[%s3660_s5 + $0xd8] sm:$0xff] %v1338_v44  ;;  %v3858_v33 = vld [vmem:[#allocation29_spill] sm:$0xff] }
 0x247   :  { %v1342_v48 = vsel %vm3842_vm8, %v2851_v29, %v3122_v56  ;;  %v1343_v19 = vsel %vm3843_vm5, %v2855_v24, %v3125_v5  ;;  %v1344_v14 = vsel %vm3844_vm6, %v2859_v9, %v3138_v34  ;;  %1403 = vst [vmem:[%s3660_s5 + $0xe0] sm:$0xff] %v1339_v17  ;;  %1404 = vst [vmem:[%s3660_s5 + $0xe8] sm:$0xff] %v1340_v32  ;;  %v3845_v29 = vld [vmem:[#allocation8_spill] sm:$0xff]  ;;  %vm3846_vm9 = vcmp.gt.f32.partialorder %v2867_v22, 0.0  ;;  %v3860_v56 = vld [vmem:[#allocation30_spill] sm:$0xff] }
 0x248   :  { %v1345_v49 = vsel %vm1217_vm10, %v2863_v0, %v3141_v42  ;;  %v1346_v24 = vsel %vm3846_vm9, %v2867_v22, %v3845_v29  ;;  %vm3847_vm3 = vcmp.gt.f32.partialorder %v2871_v39, 0.0  ;;  %vm3848_vm2 = vcmp.gt.f32.partialorder %v2875_v10, 0.0  ;;  %1405 = vst [vmem:[%s3660_s5 + $0xf0] sm:$0xff] %v1341_v2  ;;  %1406 = vst [vmem:[%s3660_s5 + $0xf8] sm:$0xff] %v1342_v48  ;;  %v3849_v0 = vld [vmem:[#allocation25_spill] sm:$0xff]  ;;  %v3865_v34 = vld [vmem:[#allocation12_spill] sm:$0xff] }
 0x249   :  { %v1347_v9 = vsel %vm3847_vm3, %v2871_v39, %v3157_v38  ;;  %v1348_v6 = vsel %vm3848_vm2, %v2875_v10, %v3160_v20  ;;  %1407 = vst [vmem:[%s3660_s5 + $0x100] sm:$0xff] %v1343_v19  ;;  %1408 = vst [vmem:[%s3660_s5 + $0x108] sm:$0xff] %v1344_v14  ;;  %v1349_v22 = vsel %vm1221_vm11, %v2879_v37, %v3849_v0  ;;  %vm3850_vm10 = vcmp.gt.f32.partialorder %v2883_v45, 0.0  ;;  %v3855_v37 = vld [vmem:[#allocation27_spill] sm:$0xff]  ;;  %v3868_v38 = vld [vmem:[#allocation13_spill] sm:$0xff] }
 0x24a   :  { %v1350_v39 = vsel %vm3850_vm10, %v2883_v45, %v3177_v30  ;;  %vm3851_vm8 = vcmp.gt.f32.partialorder %v2887_v35, 0.0  ;;  %vm3854_vm5 = vcmp.gt.f32.partialorder %v3853_v58, 0.0  ;;  %1409 = vst [vmem:[%s3660_s5 + $0x110] sm:$0xff] %v1345_v49  ;;  %1410 = vst [vmem:[%s3660_s5 + $0x118] sm:$0xff] %v1346_v24  ;;  %v1353_v45 = vsel %vm1225_vm12, %v2895_v51, %v3855_v37  ;;  %v3862_v51 = vld [vmem:[#allocation10_spill] sm:$0xff]  ;;  %v3867_v20 = vld [vmem:[#allocation31_spill] sm:$0xff] }
 0x24b   :  { %v1351_v10 = vsel %vm3851_vm8, %v2887_v35, %v3180_v43  ;;  %v1352_v47 = vsel %vm3854_vm5, %v3853_v58, %v3852_v8  ;;  %1411 = vst [vmem:[%s3660_s5 + $0x120] sm:$0xff] %v1347_v9  ;;  %1412 = vst [vmem:[%s3660_s5 + $0x128] sm:$0xff] %v1348_v6  ;;  %v3856_v35 = vld [vmem:[#allocation28_spill] sm:$0xff]  ;;  %vm3857_vm11 = vcmp.gt.f32.partialorder %v2899_v62, 0.0  ;;  %vm3859_vm6 = vcmp.gt.f32.partialorder %v2903_v3, 0.0  ;;  %v3870_v30 = vld [vmem:[#allocation14_spill] sm:$0xff] }
 0x24c   :  { %v1354_v27 = vsel %vm3857_vm11, %v2899_v62, %v3856_v35  ;;  %v1355_v7 = vsel %vm3859_vm6, %v2903_v3, %v3858_v33  ;;  %vm3861_vm9 = vcmp.gt.f32.partialorder %v2907_v41, 0.0  ;;  %1413 = vst [vmem:[%s3660_s5 + $0x130] sm:$0xff] %v1349_v22  ;;  %1414 = vst [vmem:[%s3660_s5 + $0x138] sm:$0xff] %v1350_v39  ;;  %v1357_v62 = vsel %vm1229_vm13, %v3798_v50, %v3862_v51  ;;  %v3863_v3 = vld [vmem:[#allocation11_spill] sm:$0xff]  ;;  %v3885_v16 = vld [vmem:[#allocation20_spill] sm:$0xff] }
 0x24d   :  { %v1356_v5 = vsel %vm3861_vm9, %v2907_v41, %v3860_v56  ;;  %1415 = vst [vmem:[%s3660_s5 + $0x140] sm:$0xff] %v1351_v10  ;;  %1416 = vst [vmem:[%s3660_s5 + $0x148] sm:$0xff] %v1352_v47  ;;  %vm3864_vm12 = vcmp.gt.f32.partialorder %v3800_v23, 0.0  ;;  %vm3866_vm3 = vcmp.gt.f32.partialorder %v3802_v46, 0.0  ;;  %vm3869_vm2 = vcmp.gt.f32.partialorder %v3868_v38, 0.0  ;;  %v3871_v50 = vld [vmem:[#allocation15_spill] sm:$0xff] }
 0x24e   :  { %v1358_v41 = vsel %vm3864_vm12, %v3800_v23, %v3863_v3  ;;  %v1359_v42 = vsel %vm3866_vm3, %v3802_v46, %v3865_v34  ;;  %v1360_v43 = vsel %vm3869_vm2, %v3868_v38, %v3867_v20  ;;  %1417 = vst [vmem:[%s3660_s5 + $0x150] sm:$0xff] %v1353_v45  ;;  %1418 = vst [vmem:[%s3660_s5 + $0x158] sm:$0xff] %v1354_v27  ;;  %vm3872_vm13 = vcmp.gt.f32.partialorder %v3808_v26, 0.0  ;;  %v3873_v46 = vld [vmem:[#allocation32_spill] sm:$0xff]  ;;  %v3882_v60 = vld [vmem:[#allocation19_spill] sm:$0xff] }
 0x24f   :  { %1419 = vst [vmem:[%s3660_s5 + $0x160] sm:$0xff] %v1355_v7  ;;  %1420 = vst [vmem:[%s3660_s5 + $0x168] sm:$0xff] %v1356_v5  ;;  %v1361_v23 = vsel %vm1233_vm14, %v3806_v57, %v3870_v30  ;;  %v1362_v36 = vsel %vm3872_vm13, %v3808_v26, %v3871_v50  ;;  %vm3874_vm10 = vcmp.gt.f32.partialorder %v2935_v52, 0.0  ;;  %vm3877_vm8 = vcmp.gt.f32.partialorder %v3876_v40, 0.0  ;;  %v3878_v57 = vld [vmem:[#allocation17_spill] sm:$0xff]  ;;  %v3879_v26 = vld [vmem:[#allocation18_spill] sm:$0xff] }
 0x250   :  { %v1363_v31 = vsel %vm3874_vm10, %v2935_v52, %v3873_v46  ;;  %v1364_v63 = vsel %vm3877_vm8, %v3876_v40, %v3875_v28  ;;  %1421 = vst [vmem:[%s3660_s5 + $0x170] sm:$0xff] %v1357_v62  ;;  %1422 = vst [vmem:[%s3660_s5 + $0x178] sm:$0xff] %v1358_v41  ;;  %v1365_v52 = vsel %vm1237_vm15, %v3813_v59, %v3878_v57  ;;  %vm3880_vm14 = vcmp.gt.f32.partialorder %v3815_v4, 0.0  ;;  %v3884_v13 = vld [vmem:[#allocation35_spill] sm:$0xff]  ;;  %v3888_v44 = vld [vmem:[#allocation22_spill] sm:$0xff] }
 0x251   :  { %1423 = vst [vmem:[%s3660_s5 + $0x180] sm:$0xff] %v1359_v42  ;;  %1424 = vst [vmem:[%s3660_s5 + $0x188] sm:$0xff] %v1360_v43  ;;  %v1366_v12 = vsel %vm3880_vm14, %v3815_v4, %v3879_v26  ;;  %vm3883_vm5 = vcmp.gt.f32.partialorder %v3882_v60, 0.0  ;;  %vm3886_vm11 = vcmp.gt.f32.partialorder %v3885_v16, 0.0  ;;  %v3887_v4 = vld [vmem:[#allocation21_spill] sm:$0xff]  ;;  %v1370_v17 = vsel %vm1242_vm4, %v3823_v53, %v3888_v44  ;;  %v3889_v32 = vld [vmem:[#allocation23_spill] sm:$0xff] }
 0x252   :  { %v1367_v61 = vsel %vm3883_vm5, %v3882_v60, %v3881_v55  ;;  %v1368_v25 = vsel %vm3886_vm11, %v3885_v16, %v3884_v13  ;;  %1425 = vst [vmem:[%s3660_s5 + $0x190] sm:$0xff] %v1361_v23  ;;  %1426 = vst [vmem:[%s3660_s5 + $0x198] sm:$0xff] %v1362_v36  ;;  %v1369_v59 = vsel %vm1241_vm0, %v3821_v15, %v3887_v4  ;;  %vm3890_vm15 = vcmp.gt.f32.partialorder %v3889_v32, 0.0  ;;  %v3891_v48 = vld [vmem:[#allocation24_spill] sm:$0xff] }
 0x253   :  { %1427 = vst [vmem:[%s3660_s5 + $0x1a0] sm:$0xff] %v1363_v31  ;;  %1428 = vst [vmem:[%s3660_s5 + $0x1a8] sm:$0xff] %v1364_v63  ;;  %v1371_v2 = vsel %vm3890_vm15, %v3889_v32, %v3317_v1  ;;  %vm3892_vm6 = vcmp.gt.f32.partialorder %v3891_v48, 0.0  ;;  %v3893_v53 = vld [vmem:[#allocation4_spill] sm:$0xff]  ;;  %v1374_v15 = vsel %vm1246_vm7, %v3830_v18, %v3335_v11 }
 0x254   :  { %v1372_v19 = vsel %vm3892_vm6, %v3891_v48, %v3320_v21  ;;  %1429 = vst [vmem:[%s3660_s5 + $0x1b0] sm:$0xff] %v1365_v52  ;;  %1430 = vst [vmem:[%s3660_s5 + $0x1b8] sm:$0xff] %v1366_v12  ;;  %v1373_v1 = vsel %vm1245_vm1, %v3828_v54, %v3893_v53 }
 0x255   :  { %1431 = vst [vmem:[%s3660_s5 + $0x1c0] sm:$0xff] %v1367_v61  ;;  %1432 = vst [vmem:[%s3660_s5 + $0x1c8] sm:$0xff] %v1368_v25 }
 0x256   :  { %1433 = vst [vmem:[%s3660_s5 + $0x1d0] sm:$0xff] %v1369_v59  ;;  %1434 = vst [vmem:[%s3660_s5 + $0x1d8] sm:$0xff] %v1370_v17 }
 0x257   :  { %1435 = vst [vmem:[%s3660_s5 + $0x1e0] sm:$0xff] %v1371_v2  ;;  %1436 = vst [vmem:[%s3660_s5 + $0x1e8] sm:$0xff] %v1372_v19 }
 0x258   :  { %1437 = vst [vmem:[%s3660_s5 + $0x1f0] sm:$0xff] %v1373_v1  ;;  %1438 = vst [vmem:[%s3660_s5 + $0x1f8] sm:$0xff] %v1374_v15 }

// kernel: base_feature_extraction.4
= control target key start
LH: loop header
LB: loop body
LE: loop exit
PB: predicated region body
PF: predicated region fallthrough
CT: control target
= control target key end

     0   :  { %v5844_v0 = vmov 0   ;;  %s9042_s1 = inlined_call_operand.vmem [shape: bf16[1152,128], index: 1, kind: input, shape index: {}]   ;;  %s9043_s0 = inlined_call_operand.vmem [shape: bf16[512,1152], index: 0, kind: input, shape index: {}]   ;;  %s9044_s2 = inlined_call_operand.vmem [shape: f32[1,128], index: 2, kind: input, shape index: {}]   ;;  %s9045_s3 = inlined_call_operand.vmem [shape: f32[1,128], index: 3, kind: input, shape index: {}]   ;;  %s9046_s4 = inlined_call_operand.vmem [shape: f32[1,128], index: 4, kind: input, shape index: {}]   ;;  %s9047_s5 = inlined_call_operand.vmem [shape: f32[512,128], index: 5, kind: output, shape index: {}]  }
   0x1   :  { %2396 = vmatprep.subr.bf16.mxu1 %v5844_v0  ;;  %2685 = vmatprep.subr.bf16.mxu0 %v5844_v0  ;;  %v5353_v1 = vld [vmem:[%s9042_s1] sm:$0xff]   ;;  %v5355_v3 = vld [vmem:[%s9042_s1 + $0x8] sm:$0xff]   ;;  %v5357_v5 = vld [vmem:[%s9042_s1 + $0x10] sm:$0xff]  }
   0x2   :  { %v5883_v2 = vld [vmem:[%s9042_s1 + $0x80] sm:$0xff]   ;;  %2397 = vmatpush1.bf16.msra.mxu1 %v5353_v1  ;;  %v5893_v4 = vld [vmem:[%s9042_s1 + $0x88] sm:$0xff]   ;;  %v5904_v6 = vld [vmem:[%s9042_s1 + $0x90] sm:$0xff]  }
   0x3   :  { %2686 = vmatpush1.bf16.msra.mxu0 %v5883_v2  ;;  %2398 = vmatprep.subr.bf16.mxu1 %v5844_v0  ;;  %v5359_v7 = vld [vmem:[%s9042_s1 + $0x18] sm:$0xff]   ;;  %v5361_v9 = vld [vmem:[%s9042_s1 + $0x20] sm:$0xff]   ;;  %v5363_v11 = vld [vmem:[%s9042_s1 + $0x28] sm:$0xff]  }
   0x4   :  { %2687 = vmatprep.subr.bf16.mxu0 %v5844_v0  ;;  %v5915_v8 = vld [vmem:[%s9042_s1 + $0x98] sm:$0xff]   ;;  %v5926_v10 = vld [vmem:[%s9042_s1 + $0xa0] sm:$0xff]   ;;  %v5937_v12 = vld [vmem:[%s9042_s1 + $0xa8] sm:$0xff]  }
   0x5   :  { %v5365_v13 = vld [vmem:[%s9042_s1 + $0x30] sm:$0xff]   ;;  %v5367_v15 = vld [vmem:[%s9042_s1 + $0x38] sm:$0xff]   ;;  %v5369_v17 = vld [vmem:[%s9042_s1 + $0x40] sm:$0xff]  }
   0x6   :  { %2399 = vmatpush1.bf16.msra.mxu1 %v5355_v3  ;;  %v5948_v14 = vld [vmem:[%s9042_s1 + $0xb0] sm:$0xff]   ;;  %v5959_v16 = vld [vmem:[%s9042_s1 + $0xb8] sm:$0xff]   ;;  %v5970_v18 = vld [vmem:[%s9042_s1 + $0xc0] sm:$0xff]  }
   0x7   :  { %2688 = vmatpush1.bf16.msra.mxu0 %v5893_v4  ;;  %2400 = vmatprep.subr.bf16.mxu1 %v5844_v0  ;;  %v5387_v19 = vld [vmem:[%s9043_s0 + $0x4] ss:$36 sps:$4 sm:$0xff]   ;;  %v5390_v21 = vld [vmem:[%s9043_s0 + $0xc] ss:$36 sps:$4 sm:$0xff]   ;;  %v5375_v25 = vld [vmem:[%s9042_s1 + $0x58] sm:$0xff]  }
   0x8   :  { %2689 = vmatprep.subr.bf16.mxu0 %v5844_v0  ;;  %v5371_v20 = vld [vmem:[%s9042_s1 + $0x48] sm:$0xff]   ;;  %2428 = vmatprep.mubr.bf16.mxu1 %v5387_v19  ;;  %v5373_v23 = vld [vmem:[%s9042_s1 + $0x50] sm:$0xff]   ;;  %v6009_v26 = vld [vmem:[%s9042_s1 + $0xd8] sm:$0xff]  }
   0x9   :  { %v5987_v22 = vld [vmem:[%s9042_s1 + $0xc8] sm:$0xff]   ;;  %2717 = vmatprep.mubr.bf16.mxu0 %v5390_v21  ;;  %v5998_v24 = vld [vmem:[%s9042_s1 + $0xd0] sm:$0xff]   ;;  %v5377_v27 = vld [vmem:[%s9042_s1 + $0x60] sm:$0xff]  }
   0xa   :  { %2401 = vmatpush1.bf16.msra.mxu1 %v5357_v5  ;;  %v6020_v28 = vld [vmem:[%s9042_s1 + $0xe0] sm:$0xff]   ;;  %v5379_v29 = vld [vmem:[%s9042_s1 + $0x68] sm:$0xff]   ;;  %v5381_v31 = vld [vmem:[%s9042_s1 + $0x70] sm:$0xff]  }
   0xb   :  { %2690 = vmatpush1.bf16.msra.mxu0 %v5904_v6  ;;  %2402 = vmatprep.subr.bf16.mxu1 %v5844_v0  ;;  %v6031_v30 = vld [vmem:[%s9042_s1 + $0xe8] sm:$0xff]   ;;  %v6042_v32 = vld [vmem:[%s9042_s1 + $0xf0] sm:$0xff]   ;;  %v5383_v33 = vld [vmem:[%s9042_s1 + $0x78] sm:$0xff]  }
   0xc   :  { %2691 = vmatprep.subr.bf16.mxu0 %v5844_v0  ;;  %v6053_v34 = vld [vmem:[%s9042_s1 + $0xf8] sm:$0xff]   ;;  %v5385_v35 = vld [vmem:[%s9043_s0] ss:$36 sps:$4 sm:$0xff]   ;;  %v5388_v36 = vld [vmem:[%s9043_s0 + $0x8] ss:$36 sps:$4 sm:$0xff]  }
   0xd   :  { %v5391_v37 = vld [vmem:[%s9042_s1 + $0x100] sm:$0xff]   ;;  %v5393_v38 = vld [vmem:[%s9043_s0 + $0x4c] ss:$36 sps:$4 sm:$0xff]   ;;  %v5395_v39 = vld [vmem:[%s9043_s0 + $0x54] ss:$36 sps:$4 sm:$0xff]  }
   0xe   :  { %2403 = vmatpush1.bf16.msra.mxu1 %v5359_v7  ;;  %v5392_v40 = vld [vmem:[%s9042_s1 + $0x108] sm:$0xff]   ;;  %v5398_v42 = vld [vmem:[%s9043_s0 + $0x50] ss:$36 sps:$4 sm:$0xff]   ;;  %v5403_v45 = vld [vmem:[%s9043_s0 + $0x9c] ss:$36 sps:$4 sm:$0xff]  }
   0xf   :  { %2692 = vmatpush1.bf16.msra.mxu0 %v5915_v8  ;;  %2404 = vmatprep.subr.bf16.mxu1 %v5844_v0  ;;  %v5397_v41 = vld [vmem:[%s9043_s0 + $0x48] ss:$36 sps:$4 sm:$0xff]   ;;  %v5401_v43 = vld [vmem:[%s9043_s0 + $0x94] ss:$36 sps:$4 sm:$0xff]   ;;  %v5407_v49 = vld [vmem:[%s9042_s1 + $0x120] sm:$0xff]  }
  0x10   :  { %2693 = vmatprep.subr.bf16.mxu0 %v5844_v0  ;;  %v5399_v44 = vld [vmem:[%s9042_s1 + $0x110] sm:$0xff]   ;;  %v5400_v46 = vld [vmem:[%s9042_s1 + $0x118] sm:$0xff]   ;;  %v5411_v51 = vld [vmem:[%s9043_s0 + $0xe4] ss:$36 sps:$4 sm:$0xff]  }
  0x11   :  { %v5405_v47 = vld [vmem:[%s9043_s0 + $0x90] ss:$36 sps:$4 sm:$0xff]   ;;  %v5406_v48 = vld [vmem:[%s9043_s0 + $0x98] ss:$36 sps:$4 sm:$0xff]   ;;  %v5408_v52 = vld [vmem:[%s9042_s1 + $0x128] sm:$0xff]  }
  0x12   :  { %2405 = vmatpush1.bf16.msra.mxu1 %v5361_v9  ;;  %v5409_v50 = vld [vmem:[%s9043_s0 + $0xdc] ss:$36 sps:$4 sm:$0xff]   ;;  %v5417_v55 = vld [vmem:[%s9043_s0 + $0x124] ss:$36 sps:$4 sm:$0xff]   ;;  %v5415_v56 = vld [vmem:[%s9042_s1 + $0x130] sm:$0xff]  }
  0x13   :  { %2694 = vmatpush1.bf16.msra.mxu0 %v5926_v10  ;;  %2406 = vmatprep.subr.bf16.mxu1 %v5844_v0  ;;  %v5413_v53 = vld [vmem:[%s9043_s0 + $0xd8] ss:$36 sps:$4 sm:$0xff]   ;;  %v5414_v54 = vld [vmem:[%s9043_s0 + $0xe0] ss:$36 sps:$4 sm:$0xff]   ;;  %v5419_v57 = vld [vmem:[%s9043_s0 + $0x12c] ss:$36 sps:$4 sm:$0xff]  }
  0x14   :  { %2695 = vmatprep.subr.bf16.mxu0 %v5844_v0  ;;  %v5416_v58 = vld [vmem:[%s9042_s1 + $0x138] sm:$0xff]   ;;  %v5421_v59 = vld [vmem:[%s9043_s0 + $0x120] ss:$36 sps:$4 sm:$0xff]   ;;  %v5422_v60 = vld [vmem:[%s9043_s0 + $0x128] ss:$36 sps:$4 sm:$0xff]  }
  0x15   :  { %v5423_v61 = vld [vmem:[%s9042_s1 + $0x140] sm:$0xff]   ;;  %v5425_v62 = vld [vmem:[%s9043_s0 + $0x16c] ss:$36 sps:$4 sm:$0xff]   ;;  %v5427_v63 = vld [vmem:[%s9043_s0 + $0x174] ss:$36 sps:$4 sm:$0xff]  }
  0x16   :  { %2407 = vmatpush1.bf16.msra.mxu1 %v5363_v11  ;;  %v5424_v1 = vld [vmem:[%s9042_s1 + $0x148] sm:$0xff]   ;;  %v5430_v3 = vld [vmem:[%s9043_s0 + $0x170] ss:$36 sps:$4 sm:$0xff]   ;;  %v5432_v7 = vld [vmem:[%s9042_s1 + $0x158] sm:$0xff]  }
  0x17   :  { %2696 = vmatpush1.bf16.msra.mxu0 %v5937_v12  ;;  %2408 = vmatprep.subr.bf16.mxu1 %v5844_v0  ;;  %v5431_v5 = vld [vmem:[%s9042_s1 + $0x150] sm:$0xff]   ;;  %v5438_v9 = vld [vmem:[%s9043_s0 + $0x1b8] ss:$36 sps:$4 sm:$0xff]  }
  0x18   :  { %2697 = vmatprep.subr.bf16.mxu0 %v5844_v0  ;;  %v5441_v11 = vld [vmem:[%s9043_s0 + $0x1fc] ss:$36 sps:$4 sm:$0xff]   ;;  %v5451_v21 = vld [vmem:[%s9043_s0 + $0x10] ss:$36 sps:$4 sm:$0xff]  }
  0x19   :  { %v5448_v19 = vld [vmem:[%s9042_s1 + $0x178] sm:$0xff]  }
  0x1a   :  { %2409 = vmatpush1.bf16.msra.mxu1 %v5365_v13  ;;  %v5440_v13 = vld [vmem:[%s9042_s1 + $0x168] sm:$0xff]  }
  0x1b   :  { %2698 = vmatpush1.bf16.msra.mxu0 %v5948_v14  ;;  %2410 = vmatprep.subr.bf16.mxu1 %v5844_v0 }
  0x1c   :  { %2699 = vmatprep.subr.bf16.mxu0 %v5844_v0 }
  0x1e   :  { %2411 = vmatpush1.bf16.msra.mxu1 %v5367_v15  ;;  %v5446_v15 = vld [vmem:[%s9043_s0 + $0x200] ss:$36 sps:$4 sm:$0xff]  }
  0x1f   :  { %2700 = vmatpush1.bf16.msra.mxu0 %v5959_v16  ;;  %2412 = vmatprep.subr.bf16.mxu1 %v5844_v0 }
  0x20   :  { %2701 = vmatprep.subr.bf16.mxu0 %v5844_v0 }
  0x22   :  { %2413 = vmatpush1.bf16.msra.mxu1 %v5369_v17  ;;  %v5447_v17 = vld [vmem:[%s9042_s1 + $0x170] sm:$0xff]  }
  0x23   :  { %2702 = vmatpush1.bf16.msra.mxu0 %v5970_v18  ;;  %2414 = vmatprep.subr.bf16.mxu1 %v5844_v0 }
  0x24   :  { %2703 = vmatprep.subr.bf16.mxu0 %v5844_v0 }
  0x26   :  { %2415 = vmatpush1.bf16.msra.mxu1 %v5371_v20  ;;  %v5454_v20 = vld [vmem:[%s9043_s0 + $0x240] ss:$36 sps:$4 sm:$0xff]  }
  0x27   :  { %2704 = vmatpush1.bf16.msra.mxu0 %v5987_v22  ;;  %2416 = vmatprep.subr.bf16.mxu1 %v5844_v0 }
  0x28   :  { %2705 = vmatprep.subr.bf16.mxu0 %v5844_v0 }
  0x2a   :  { %2417 = vmatpush1.bf16.msra.mxu1 %v5373_v23  ;;  %v5455_v23 = vld [vmem:[%s9042_s1 + $0x180] sm:$0xff]  }
  0x2b   :  { %2706 = vmatpush1.bf16.msra.mxu0 %v5998_v24  ;;  %2418 = vmatprep.subr.bf16.mxu1 %v5844_v0 }
  0x2c   :  { %2707 = vmatprep.subr.bf16.mxu0 %v5844_v0 }
  0x2e   :  { %2419 = vmatpush1.bf16.msra.mxu1 %v5375_v25  ;;  %v5460_v25 = vld [vmem:[%s9043_s0 + $0x288] ss:$36 sps:$4 sm:$0xff]  }
  0x2f   :  { %2708 = vmatpush1.bf16.msra.mxu0 %v6009_v26  ;;  %2420 = vmatprep.subr.bf16.mxu1 %v5844_v0 }
  0x30   :  { %2709 = vmatprep.subr.bf16.mxu0 %v5844_v0 }
  0x32   :  { %2421 = vmatpush1.bf16.msra.mxu1 %v5377_v27  ;;  %v5461_v27 = vld [vmem:[%s9043_s0 + $0x58] ss:$36 sps:$4 sm:$0xff]  }
  0x33   :  { %2710 = vmatpush1.bf16.msra.mxu0 %v6020_v28  ;;  %2422 = vmatprep.subr.bf16.mxu1 %v5844_v0 }
  0x34   :  { %2711 = vmatprep.subr.bf16.mxu0 %v5844_v0 }
  0x36   :  { %2423 = vmatpush1.bf16.msra.mxu1 %v5379_v29  ;;  %v5464_v29 = vld [vmem:[%s9043_s0 + $0xa4] ss:$36 sps:$4 sm:$0xff]  }
  0x37   :  { %2712 = vmatpush1.bf16.msra.mxu0 %v6031_v30  ;;  %2424 = vmatprep.subr.bf16.mxu1 %v5844_v0 }
  0x38   :  { %2713 = vmatprep.subr.bf16.mxu0 %v5844_v0 }
  0x3a   :  { %2425 = vmatpush1.bf16.msra.mxu1 %v5381_v31  ;;  %v5466_v31 = vld [vmem:[%s9043_s0 + $0x2d0] ss:$36 sps:$4 sm:$0xff]  }
  0x3b   :  { %2714 = vmatpush1.bf16.msra.mxu0 %v6042_v32  ;;  %2426 = vmatprep.subr.bf16.mxu1 %v5844_v0 }
  0x3c   :  { %2715 = vmatprep.subr.bf16.mxu0 %v5844_v0 }
  0x3e   :  { %2427 = vmatpush1.bf16.msra.mxu1 %v5383_v33  ;;  %v5467_v33 = vld [vmem:[%s9043_s0 + $0xa0] ss:$36 sps:$4 sm:$0xff]  }
  0x3f   :  { %2716 = vmatpush1.bf16.msra.mxu0 %v6053_v34  ;;  %4936 = vmatprep.subr.bf16.mxu1 %v5844_v0 }
  0x40   :  { %2974 = vmatprep.subr.bf16.mxu0 %v5844_v0 }
  0x41   :  { %2429 = vmatmul.mubr.bf16.vlgmr.msra.gmra.mrb[0].mxu1 %v5385_v35  ;;  %v5471_v35 = vld [vmem:[%s9043_s0 + $0xec] ss:$36 sps:$4 sm:$0xff]  }
  0x42   :  { %2718 = vmatmul.mubr.bf16.vlgmr.msra.gmra.mrb[0].mxu0 %v5388_v36  ;;  %4952 = vmatpush1.bf16.msra.mxu1 %v5883_v2  ;;  %v5429_v2 = vld [vmem:[%s9043_s0 + $0x168] ss:$36 sps:$4 sm:$0xff]   ;;  %v5507_v36 = vld [vmem:[%s9042_s1 + $0x1a0] sm:$0xff]  }
  0x43   :  { %2975 = vmatpush1.bf16.msra.mxu0 %v5391_v37  ;;  %2436 = vmatprep.mubr.bf16.mxu1 %v5393_v38  ;;  %v5473_v37 = vld [vmem:[%s9043_s0 + $0x318] ss:$36 sps:$4 sm:$0xff]   ;;  %v5520_v38 = vld [vmem:[%s9042_s1 + $0x1a8] sm:$0xff]  }
  0x44   :  { %2976 = vmatprep.subr.bf16.mxu0 %v5844_v0  ;;  %2725 = vmatprep.mubr.bf16.mxu0 %v5395_v39  ;;  %v5474_v39 = vld [vmem:[%s9043_s0 + $0xe8] ss:$36 sps:$4 sm:$0xff]  }
  0x45   :  { %4937 = vmatprep.subr.bf16.mxu1 %v5844_v0 }
  0x46   :  { %4953 = vmatpush1.bf16.msra.mxu1 %v5893_v4  ;;  %v5433_v4 = vld [vmem:[%s9043_s0 + $0x1b4] ss:$36 sps:$4 sm:$0xff]  }
  0x47   :  { %2977 = vmatpush1.bf16.msra.mxu0 %v5392_v40  ;;  %4938 = vmatprep.subr.bf16.mxu1 %v5844_v0  ;;  %v5475_v40 = vld [vmem:[%s9043_s0 + $0x364] ss:$36 sps:$4 sm:$0xff]  }
  0x48   :  { %2978 = vmatprep.subr.bf16.mxu0 %v5844_v0 }
  0x49   :  { %2437 = vmatmul.mubr.bf16.gmra.mrb[4].mxu1 %v5397_v41  ;;  %v5477_v41 = vld [vmem:[%s9043_s0 + $0x134] ss:$36 sps:$4 sm:$0xff]  }
  0x4a   :  { %2726 = vmatmul.mubr.bf16.gmra.mrb[4].mxu0 %v5398_v42  ;;  %2444 = vmatprep.mubr.bf16.mxu1 %v5401_v43  ;;  %v5533_v42 = vld [vmem:[%s9042_s1 + $0x1b0] sm:$0xff]   ;;  %v5546_v43 = vld [vmem:[%s9042_s1 + $0x1b8] sm:$0xff]  }
  0x4b   :  { %2979 = vmatpush1.bf16.msra.mxu0 %v5399_v44  ;;  %2733 = vmatprep.mubr.bf16.mxu0 %v5403_v45  ;;  %v5479_v44 = vld [vmem:[%s9043_s0 + $0x360] ss:$36 sps:$4 sm:$0xff]   ;;  %v5480_v45 = vld [vmem:[%s9043_s0 + $0x130] ss:$36 sps:$4 sm:$0xff]  }
  0x4c   :  { %2980 = vmatprep.subr.bf16.mxu0 %v5844_v0  ;;  %4954 = vmatpush1.bf16.msra.mxu1 %v5904_v6  ;;  %v5435_v6 = vld [vmem:[%s9043_s0 + $0x1bc] ss:$36 sps:$4 sm:$0xff]  }
  0x4d   :  { %4939 = vmatprep.subr.bf16.mxu1 %v5844_v0 }
  0x4f   :  { %2981 = vmatpush1.bf16.msra.mxu0 %v5400_v46  ;;  %v5482_v46 = vld [vmem:[%s9043_s0 + $0x3ac] ss:$36 sps:$4 sm:$0xff]  }
  0x50   :  { %2982 = vmatprep.subr.bf16.mxu0 %v5844_v0  ;;  %4955 = vmatpush1.bf16.msra.mxu1 %v5915_v8  ;;  %v5437_v8 = vld [vmem:[%s9043_s0 + $0x1b0] ss:$36 sps:$4 sm:$0xff]  }
  0x51   :  { %2445 = vmatmul.mubr.bf16.gmra.mrb[8].mxu1 %v5405_v47  ;;  %4940 = vmatprep.subr.bf16.mxu1 %v5844_v0  ;;  %v5484_v47 = vld [vmem:[%s9043_s0 + $0x17c] ss:$36 sps:$4 sm:$0xff]  }
  0x52   :  { %2734 = vmatmul.mubr.bf16.gmra.mrb[8].mxu0 %v5406_v48  ;;  %2452 = vmatprep.mubr.bf16.mxu1 %v5409_v50  ;;  %v5559_v48 = vld [vmem:[%s9042_s1 + $0x1c0] sm:$0xff]   ;;  %v5486_v50 = vld [vmem:[%s9043_s0 + $0x3a8] ss:$36 sps:$4 sm:$0xff]  }
  0x53   :  { %2983 = vmatpush1.bf16.msra.mxu0 %v5407_v49  ;;  %2741 = vmatprep.mubr.bf16.mxu0 %v5411_v51  ;;  %v5572_v49 = vld [vmem:[%s9042_s1 + $0x1c8] sm:$0xff]   ;;  %v5487_v51 = vld [vmem:[%s9043_s0 + $0x178] ss:$36 sps:$4 sm:$0xff]  }
  0x54   :  { %2984 = vmatprep.subr.bf16.mxu0 %v5844_v0  ;;  %4956 = vmatpush1.bf16.msra.mxu1 %v5926_v10  ;;  %v5439_v10 = vld [vmem:[%s9042_s1 + $0x160] sm:$0xff]  }
  0x55   :  { %4941 = vmatprep.subr.bf16.mxu1 %v5844_v0 }
  0x57   :  { %2985 = vmatpush1.bf16.msra.mxu0 %v5408_v52  ;;  %v5488_v52 = vld [vmem:[%s9043_s0 + $0x3f4] ss:$36 sps:$4 sm:$0xff]  }
  0x58   :  { %2986 = vmatprep.subr.bf16.mxu0 %v5844_v0  ;;  %4957 = vmatpush1.bf16.msra.mxu1 %v5937_v12  ;;  %v5443_v12 = vld [vmem:[%s9043_s0 + $0x204] ss:$36 sps:$4 sm:$0xff]  }
  0x59   :  { %2453 = vmatmul.mubr.bf16.gmra.mrb[12].mxu1 %v5413_v53  ;;  %4942 = vmatprep.subr.bf16.mxu1 %v5844_v0  ;;  %v5490_v53 = vld [vmem:[%s9043_s0 + $0x1c4] ss:$36 sps:$4 sm:$0xff]  }
  0x5a   :  { %2742 = vmatmul.mubr.bf16.gmra.mrb[12].mxu0 %v5414_v54  ;;  %2460 = vmatprep.mubr.bf16.mxu1 %v5417_v55  ;;  %v5585_v54 = vld [vmem:[%s9042_s1 + $0x1d0] sm:$0xff]  }
  0x5b   :  { %2987 = vmatpush1.bf16.msra.mxu0 %v5415_v56  ;;  %2749 = vmatprep.mubr.bf16.mxu0 %v5419_v57  ;;  %v5492_v55 = vld [vmem:[%s9043_s0 + $0x3f0] ss:$36 sps:$4 sm:$0xff]   ;;  %v5493_v56 = vld [vmem:[%s9043_s0 + $0x1c0] ss:$36 sps:$4 sm:$0xff]  }
  0x5c   :  { %2988 = vmatprep.subr.bf16.mxu0 %v5844_v0  ;;  %4958 = vmatpush1.bf16.msra.mxu1 %v5948_v14  ;;  %v5445_v14 = vld [vmem:[%s9043_s0 + $0x1f8] ss:$36 sps:$4 sm:$0xff]  }
  0x5d   :  { %4943 = vmatprep.subr.bf16.mxu1 %v5844_v0  ;;  %v5495_v57 = vld [vmem:[%s9043_s0 + $0x43c] ss:$36 sps:$4 sm:$0xff]  }
  0x5f   :  { %2989 = vmatpush1.bf16.msra.mxu0 %v5416_v58  ;;  %v5497_v58 = vld [vmem:[%s9043_s0 + $0x20c] ss:$36 sps:$4 sm:$0xff]  }
  0x60   :  { %2990 = vmatprep.subr.bf16.mxu0 %v5844_v0  ;;  %4959 = vmatpush1.bf16.msra.mxu1 %v5959_v16  ;;  %v5449_v16 = vld [vmem:[%s9043_s0 + $0x244] ss:$36 sps:$4 sm:$0xff]  }
  0x61   :  { %2461 = vmatmul.mubr.bf16.gmra.mrb[16].mxu1 %v5421_v59  ;;  %4944 = vmatprep.subr.bf16.mxu1 %v5844_v0  ;;  %v5499_v59 = vld [vmem:[%s9043_s0 + $0x438] ss:$36 sps:$4 sm:$0xff]  }
  0x62   :  { %2750 = vmatmul.mubr.bf16.gmra.mrb[16].mxu0 %v5422_v60  ;;  %2468 = vmatprep.mubr.bf16.mxu1 %v5425_v62  ;;  %v5500_v60 = vld [vmem:[%s9043_s0 + $0x208] ss:$36 sps:$4 sm:$0xff]   ;;  %v5598_v62 = vld [vmem:[%s9042_s1 + $0x1d8] sm:$0xff]  }
  0x63   :  { %2991 = vmatpush1.bf16.msra.mxu0 %v5423_v61  ;;  %2757 = vmatprep.mubr.bf16.mxu0 %v5427_v63  ;;  %v5501_v61 = vld [vmem:[%s9043_s0 + $0x484] ss:$36 sps:$4 sm:$0xff]   ;;  %v5503_v63 = vld [vmem:[%s9043_s0 + $0x254] ss:$36 sps:$4 sm:$0xff]  }
  0x64   :  { %2992 = vmatprep.subr.bf16.mxu0 %v5844_v0  ;;  %4960 = vmatpush1.bf16.msra.mxu1 %v5970_v18  ;;  %v5453_v18 = vld [vmem:[%s9043_s0 + $0x14] ss:$36 sps:$4 sm:$0xff]  }
  0x65   :  { %4945 = vmatprep.subr.bf16.mxu1 %v5844_v0 }
  0x67   :  { %2993 = vmatpush1.bf16.msra.mxu0 %v5424_v1  ;;  %v5505_v1 = vld [vmem:[%s9043_s0 + $0x480] ss:$36 sps:$4 sm:$0xff]  }
  0x68   :  { %2994 = vmatprep.subr.bf16.mxu0 %v5844_v0  ;;  %4961 = vmatpush1.bf16.msra.mxu1 %v5987_v22  ;;  %v5456_v22 = vld [vmem:[%s9043_s0 + $0x28c] ss:$36 sps:$4 sm:$0xff]  }
  0x69   :  { %2469 = vmatmul.mubr.bf16.gmra.mrb[20].mxu1 %v5429_v2  ;;  %4946 = vmatprep.subr.bf16.mxu1 %v5844_v0  ;;  %v5506_v2 = vld [vmem:[%s9043_s0 + $0x250] ss:$36 sps:$4 sm:$0xff]  }
  0x6a   :  { %2758 = vmatmul.mubr.bf16.gmra.mrb[20].mxu0 %v5430_v3  ;;  %2476 = vmatprep.mubr.bf16.mxu1 %v5433_v4  ;;  %v5508_v3 = vld [vmem:[%s9043_s0 + $0x4cc] ss:$36 sps:$4 sm:$0xff]   ;;  %v5510_v4 = vld [vmem:[%s9043_s0 + $0x29c] ss:$36 sps:$4 sm:$0xff]  }
  0x6b   :  { %2995 = vmatpush1.bf16.msra.mxu0 %v5431_v5  ;;  %2765 = vmatprep.mubr.bf16.mxu0 %v5435_v6  ;;  %v6409_v5 = vld [vmem:[%s9042_s1 + $0x200] sm:$0xff]   ;;  %v5512_v6 = vld [vmem:[%s9043_s0 + $0x4c8] ss:$36 sps:$4 sm:$0xff]  }
  0x6c   :  { %2996 = vmatprep.subr.bf16.mxu0 %v5844_v0  ;;  %4962 = vmatpush1.bf16.msra.mxu1 %v5998_v24  ;;  %v5458_v24 = vld [vmem:[%s9043_s0 + $0x5c] ss:$36 sps:$4 sm:$0xff]  }
  0x6d   :  { %4947 = vmatprep.subr.bf16.mxu1 %v5844_v0 }
  0x6f   :  { %2997 = vmatpush1.bf16.msra.mxu0 %v5432_v7  ;;  %v5513_v7 = vld [vmem:[%s9043_s0 + $0x298] ss:$36 sps:$4 sm:$0xff]  }
  0x70   :  { %2998 = vmatprep.subr.bf16.mxu0 %v5844_v0  ;;  %4963 = vmatpush1.bf16.msra.mxu1 %v6009_v26  ;;  %v5468_v26 = vld [vmem:[%s9042_s1 + $0x188] sm:$0xff]  }
  0x71   :  { %2477 = vmatmul.mubr.bf16.gmra.mrb[24].mxu1 %v5437_v8  ;;  %4948 = vmatprep.subr.bf16.mxu1 %v5844_v0  ;;  %v5514_v8 = vld [vmem:[%s9043_s0 + $0x514] ss:$36 sps:$4 sm:$0xff]  }
  0x72   :  { %2766 = vmatmul.mubr.bf16.gmra.mrb[24].mxu0 %v5438_v9  ;;  %2484 = vmatprep.mubr.bf16.mxu1 %v5441_v11  ;;  %v5612_v9 = vld [vmem:[%s9042_s1 + $0x1e0] sm:$0xff]   ;;  %v5518_v11 = vld [vmem:[%s9043_s0 + $0x510] ss:$36 sps:$4 sm:$0xff]  }
  0x73   :  { %2999 = vmatpush1.bf16.msra.mxu0 %v5439_v10  ;;  %2773 = vmatprep.mubr.bf16.mxu0 %v5443_v12  ;;  %v5516_v10 = vld [vmem:[%s9043_s0 + $0x2e4] ss:$36 sps:$4 sm:$0xff]  }
  0x74   :  { %3000 = vmatprep.subr.bf16.mxu0 %v5844_v0  ;;  %4964 = vmatpush1.bf16.msra.mxu1 %v6020_v28  ;;  %v5462_v28 = vld [vmem:[%s9043_s0 + $0x2d4] ss:$36 sps:$4 sm:$0xff]   ;;  %v5519_v12 = vld [vmem:[%s9043_s0 + $0x2e0] ss:$36 sps:$4 sm:$0xff]  }
  0x75   :  { %4949 = vmatprep.subr.bf16.mxu1 %v5844_v0 }
  0x77   :  { %3001 = vmatpush1.bf16.msra.mxu0 %v5440_v13  ;;  %v5521_v13 = vld [vmem:[%s9043_s0 + $0x55c] ss:$36 sps:$4 sm:$0xff]  }
  0x78   :  { %3002 = vmatprep.subr.bf16.mxu0 %v5844_v0  ;;  %4965 = vmatpush1.bf16.msra.mxu1 %v6031_v30  ;;  %v5481_v30 = vld [vmem:[%s9042_s1 + $0x190] sm:$0xff]  }
  0x79   :  { %2485 = vmatmul.mubr.bf16.gmra.mrb[28].mxu1 %v5445_v14  ;;  %4950 = vmatprep.subr.bf16.mxu1 %v5844_v0  ;;  %v5523_v14 = vld [vmem:[%s9043_s0 + $0x32c] ss:$36 sps:$4 sm:$0xff]  }
  0x7a   :  { %2774 = vmatmul.mubr.bf16.gmra.mrb[28].mxu0 %v5446_v15  ;;  %2492 = vmatprep.mubr.bf16.mxu1 %v5449_v16  ;;  %v5625_v15 = vld [vmem:[%s9042_s1 + $0x1e8] sm:$0xff]   ;;  %v5525_v16 = vld [vmem:[%s9043_s0 + $0x558] ss:$36 sps:$4 sm:$0xff]  }
  0x7b   :  { %3003 = vmatpush1.bf16.msra.mxu0 %v5447_v17  ;;  %3006 = vmatprep.mubr.bf16.mxu0 %v5453_v18  ;;  %v5526_v17 = vld [vmem:[%s9043_s0 + $0x328] ss:$36 sps:$4 sm:$0xff]  }
  0x7c   :  { %3004 = vmatprep.subr.bf16.mxu0 %v5844_v0  ;;  %4966 = vmatpush1.bf16.msra.mxu1 %v6042_v32  ;;  %v5494_v32 = vld [vmem:[%s9042_s1 + $0x198] sm:$0xff]   ;;  %v5527_v18 = vld [vmem:[%s9043_s0 + $0x5a4] ss:$36 sps:$4 sm:$0xff]  }
  0x7d   :  { %4951 = vmatprep.subr.bf16.mxu1 %v5844_v0 }
  0x7f   :  { %3005 = vmatpush1.bf16.msra.mxu0 %v5448_v19  ;;  %v5529_v19 = vld [vmem:[%s9043_s0 + $0x374] ss:$36 sps:$4 sm:$0xff]  }
  0x80   :  { %3263 = vmatprep.subr.bf16.mxu0 %v5844_v0  ;;  %4967 = vmatpush1.bf16.msra.mxu1 %v6053_v34  ;;  %v5469_v34 = vld [vmem:[%s9043_s0 + $0x31c] ss:$36 sps:$4 sm:$0xff]  }
  0x81   :  { %2493 = vmatmul.mubr.bf16.gmra.mrb[32].mxu1 %v5454_v20  ;;  %4856 = vmatprep.subr.bf16.mxu1 %v6409_v5  ;;  %v5531_v20 = vld [vmem:[%s9043_s0 + $0x5a0] ss:$36 sps:$4 sm:$0xff]  }
  0x82   :  { %3007 = vmatmul.mubr.bf16.vlgmr.msra.gmra.mrb[0].mxu0 %v5451_v21  ;;  %2500 = vmatprep.mubr.bf16.mxu1 %v5456_v22  ;;  %v5532_v21 = vld [vmem:[%s9043_s0 + $0x370] ss:$36 sps:$4 sm:$0xff]  }
  0x83   :  { %3264 = vmatpush1.bf16.msra.mxu0 %v5455_v23  ;;  %3014 = vmatprep.mubr.bf16.mxu0 %v5458_v24  ;;  %v5534_v22 = vld [vmem:[%s9043_s0 + $0x5ec] ss:$36 sps:$4 sm:$0xff]   ;;  %v5536_v23 = vld [vmem:[%s9043_s0 + $0x3bc] ss:$36 sps:$4 sm:$0xff]  }
  0x84   :  { %3265 = vmatprep.subr.bf16.mxu0 %v5844_v0  ;;  %v5639_v24 = vld [vmem:[%s9042_s1 + $0x1f0] sm:$0xff]  }
  0x87   :  { %3266 = vmatpush1.bf16.msra.mxu0 %v5468_v26  ;;  %v5539_v26 = vld [vmem:[%s9043_s0 + $0x3b8] ss:$36 sps:$4 sm:$0xff]  }
  0x88   :  { %3267 = vmatprep.subr.bf16.mxu0 %v5844_v0 }
  0x89   :  { %2501 = vmatmul.mubr.bf16.gmra.mrb[36].mxu1 %v5460_v25  ;;  %v5538_v25 = vld [vmem:[%s9043_s0 + $0x5e8] ss:$36 sps:$4 sm:$0xff]  }
  0x8a   :  { %3015 = vmatmul.mubr.bf16.gmra.mrb[4].mxu0 %v5461_v27  ;;  %2508 = vmatprep.mubr.bf16.mxu1 %v5462_v28  ;;  %v5540_v27 = vld [vmem:[%s9043_s0 + $0x634] ss:$36 sps:$4 sm:$0xff]   ;;  %v5542_v28 = vld [vmem:[%s9043_s0 + $0x404] ss:$36 sps:$4 sm:$0xff]  }
  0x8b   :  { %3022 = vmatprep.mubr.bf16.mxu0 %v5464_v29  ;;  %3268 = vmatpush1.bf16.msra.mxu0 %v5481_v30  ;;  %v5545_v29 = vld [vmem:[%s9043_s0 + $0x400] ss:$36 sps:$4 sm:$0xff]  }
  0x8c   :  { %3269 = vmatprep.subr.bf16.mxu0 %v5844_v0  ;;  %v5547_v30 = vld [vmem:[%s9043_s0 + $0x67c] ss:$36 sps:$4 sm:$0xff]  }
  0x8f   :  { %3270 = vmatpush1.bf16.msra.mxu0 %v5494_v32  ;;  %v5653_v32 = vld [vmem:[%s9042_s1 + $0x1f8] sm:$0xff]  }
  0x90   :  { %3271 = vmatprep.subr.bf16.mxu0 %v5844_v0 }
  0x91   :  { %2509 = vmatmul.mubr.bf16.gmra.mrb[40].mxu1 %v5466_v31  ;;  %v5549_v31 = vld [vmem:[%s9043_s0 + $0x44c] ss:$36 sps:$4 sm:$0xff]  }
  0x92   :  { %3023 = vmatmul.mubr.bf16.gmra.mrb[8].mxu0 %v5467_v33  ;;  %2516 = vmatprep.mubr.bf16.mxu1 %v5469_v34  ;;  %v5551_v33 = vld [vmem:[%s9043_s0 + $0x678] ss:$36 sps:$4 sm:$0xff]   ;;  %v5552_v34 = vld [vmem:[%s9043_s0 + $0x448] ss:$36 sps:$4 sm:$0xff]  }
  0x93   :  { %3030 = vmatprep.mubr.bf16.mxu0 %v5471_v35  ;;  %3272 = vmatpush1.bf16.msra.mxu0 %v5507_v36  ;;  %v5553_v35 = vld [vmem:[%s9043_s0 + $0x6c4] ss:$36 sps:$4 sm:$0xff]   ;;  %v5555_v36 = vld [vmem:[%s9043_s0 + $0x494] ss:$36 sps:$4 sm:$0xff]  }
  0x94   :  { %3273 = vmatprep.subr.bf16.mxu0 %v5844_v0 }
  0x97   :  { %3274 = vmatpush1.bf16.msra.mxu0 %v5520_v38  ;;  %v5558_v38 = vld [vmem:[%s9043_s0 + $0x490] ss:$36 sps:$4 sm:$0xff]  }
  0x98   :  { %3275 = vmatprep.subr.bf16.mxu0 %v5844_v0 }
  0x99   :  { %2517 = vmatmul.mubr.bf16.gmra.mrb[44].mxu1 %v5473_v37  ;;  %v5557_v37 = vld [vmem:[%s9043_s0 + $0x6c0] ss:$36 sps:$4 sm:$0xff]  }
  0x9a   :  { %3031 = vmatmul.mubr.bf16.gmra.mrb[12].mxu0 %v5474_v39  ;;  %2524 = vmatprep.mubr.bf16.mxu1 %v5475_v40  ;;  %v5560_v39 = vld [vmem:[%s9043_s0 + $0x70c] ss:$36 sps:$4 sm:$0xff]   ;;  %v5562_v40 = vld [vmem:[%s9043_s0 + $0x4dc] ss:$36 sps:$4 sm:$0xff]  }
  0x9b   :  { %3038 = vmatprep.mubr.bf16.mxu0 %v5477_v41  ;;  %3276 = vmatpush1.bf16.msra.mxu0 %v5533_v42  ;;  %v5564_v41 = vld [vmem:[%s9043_s0 + $0x708] ss:$36 sps:$4 sm:$0xff]   ;;  %v5565_v42 = vld [vmem:[%s9043_s0 + $0x4d8] ss:$36 sps:$4 sm:$0xff]  }
  0x9c   :  { %3277 = vmatprep.subr.bf16.mxu0 %v5844_v0 }
  0x9f   :  { %3278 = vmatpush1.bf16.msra.mxu0 %v5546_v43  ;;  %v5566_v43 = vld [vmem:[%s9043_s0 + $0x754] ss:$36 sps:$4 sm:$0xff]  }
  0xa0   :  { %3279 = vmatprep.subr.bf16.mxu0 %v5844_v0 }
  0xa1   :  { %2525 = vmatmul.mubr.bf16.gmra.mrb[48].mxu1 %v5479_v44  ;;  %v5568_v44 = vld [vmem:[%s9043_s0 + $0x524] ss:$36 sps:$4 sm:$0xff]  }
  0xa2   :  { %3039 = vmatmul.mubr.bf16.gmra.mrb[16].mxu0 %v5480_v45  ;;  %2532 = vmatprep.mubr.bf16.mxu1 %v5482_v46  ;;  %v5570_v45 = vld [vmem:[%s9043_s0 + $0x750] ss:$36 sps:$4 sm:$0xff]   ;;  %v5571_v46 = vld [vmem:[%s9043_s0 + $0x520] ss:$36 sps:$4 sm:$0xff]  }
  0xa3   :  { %3046 = vmatprep.mubr.bf16.mxu0 %v5484_v47  ;;  %3280 = vmatpush1.bf16.msra.mxu0 %v5559_v48  ;;  %v5573_v47 = vld [vmem:[%s9043_s0 + $0x79c] ss:$36 sps:$4 sm:$0xff]   ;;  %v5575_v48 = vld [vmem:[%s9043_s0 + $0x56c] ss:$36 sps:$4 sm:$0xff]  }
  0xa4   :  { %3281 = vmatprep.subr.bf16.mxu0 %v5844_v0 }
  0xa7   :  { %3282 = vmatpush1.bf16.msra.mxu0 %v5572_v49 }
  0xa8   :  { %3283 = vmatprep.subr.bf16.mxu0 %v5844_v0 }
  0xa9   :  { %2533 = vmatmul.mubr.bf16.gmra.mrb[52].mxu1 %v5486_v50 }
  0xaa   :  { %3047 = vmatmul.mubr.bf16.gmra.mrb[20].mxu0 %v5487_v51  ;;  %2540 = vmatprep.mubr.bf16.mxu1 %v5488_v52  ;;  %v5577_v51 = vld [vmem:[%s9043_s0 + $0x798] ss:$36 sps:$4 sm:$0xff]  }
  0xab   :  { %3054 = vmatprep.mubr.bf16.mxu0 %v5490_v53  ;;  %3284 = vmatpush1.bf16.msra.mxu0 %v5585_v54  ;;  %v5578_v53 = vld [vmem:[%s9043_s0 + $0x568] ss:$36 sps:$4 sm:$0xff]  }
  0xac   :  { %3285 = vmatprep.subr.bf16.mxu0 %v5844_v0  ;;  %v5579_v54 = vld [vmem:[%s9043_s0 + $0x7e4] ss:$36 sps:$4 sm:$0xff]  }
  0xaf   :  { %3286 = vmatpush1.bf16.msra.mxu0 %v5598_v62  ;;  %v5586_v62 = vld [vmem:[%s9043_s0 + $0x82c] ss:$36 sps:$4 sm:$0xff]  }
  0xb0   :  { %3287 = vmatprep.subr.bf16.mxu0 %v5844_v0 }
  0xb1   :  { %2541 = vmatmul.mubr.bf16.gmra.mrb[56].mxu1 %v5492_v55 }
  0xb2   :  { %3055 = vmatmul.mubr.bf16.gmra.mrb[24].mxu0 %v5493_v56  ;;  %2548 = vmatprep.mubr.bf16.mxu1 %v5495_v57  ;;  %v5581_v56 = vld [vmem:[%s9043_s0 + $0x5b4] ss:$36 sps:$4 sm:$0xff]  }
  0xb3   :  { %3062 = vmatprep.mubr.bf16.mxu0 %v5497_v58  ;;  %3288 = vmatpush1.bf16.msra.mxu0 %v5612_v9 }
  0xb4   :  { %3289 = vmatprep.subr.bf16.mxu0 %v5844_v0 }
  0xb7   :  { %3290 = vmatpush1.bf16.msra.mxu0 %v5625_v15  ;;  %v5597_v15 = vld [vmem:[%s9043_s0 + $0x640] ss:$36 sps:$4 sm:$0xff]  }
  0xb8   :  { %3291 = vmatprep.subr.bf16.mxu0 %v5844_v0 }
  0xb9   :  { %2549 = vmatmul.mubr.bf16.gmra.mrb[60].mxu1 %v5499_v59  ;;  %v5583_v59 = vld [vmem:[%s9043_s0 + $0x7e0] ss:$36 sps:$4 sm:$0xff]  }
  0xba   :  { %3063 = vmatmul.mubr.bf16.gmra.mrb[28].mxu0 %v5500_v60  ;;  %2556 = vmatprep.mubr.bf16.mxu1 %v5501_v61  ;;  %v5584_v61 = vld [vmem:[%s9043_s0 + $0x5b0] ss:$36 sps:$4 sm:$0xff]  }
  0xbb   :  { %3070 = vmatprep.mubr.bf16.mxu0 %v5503_v63  ;;  %3292 = vmatpush1.bf16.msra.mxu0 %v5639_v24  ;;  %v5607_v24 = vld [vmem:[%s9043_s0 + $0x24c] ss:$36 sps:$4 sm:$0xff]  }
  0xbc   :  { %3293 = vmatprep.subr.bf16.mxu0 %v5844_v0  ;;  %v5544_v0 = vld [vmem:[%s9043_s0 + $0x630] ss:$36 sps:$4 sm:$0xff]  }
  0xbf   :  { %3294 = vmatpush1.bf16.msra.mxu0 %v5653_v32  ;;  %v5613_v32 = vld [vmem:[%s9043_s0 + $0x294] ss:$36 sps:$4 sm:$0xff]  }
  0xc1   :  { %2557 = vmatmul.mubr.bf16.gmra.mrb[64].mxu1 %v5505_v1  ;;  %v5588_v1 = vld [vmem:[%s9043_s0 + $0x5fc] ss:$36 sps:$4 sm:$0xff]  }
  0xc2   :  { %3071 = vmatmul.mubr.bf16.gmra.mrb[32].mxu0 %v5506_v2  ;;  %2564 = vmatprep.mubr.bf16.mxu1 %v5508_v3 }
  0xc3   :  { %3078 = vmatprep.mubr.bf16.mxu0 %v5510_v4  ;;  %v5590_v4 = vld [vmem:[%s9043_s0 + $0x828] ss:$36 sps:$4 sm:$0xff]  }
  0xc9   :  { %2565 = vmatmul.mubr.bf16.gmra.mrb[68].mxu1 %v5512_v6 }
  0xca   :  { %3079 = vmatmul.mubr.bf16.gmra.mrb[36].mxu0 %v5513_v7  ;;  %2572 = vmatprep.mubr.bf16.mxu1 %v5514_v8  ;;  %v5591_v7 = vld [vmem:[%s9043_s0 + $0x5f8] ss:$36 sps:$4 sm:$0xff]  }
  0xcb   :  { %3086 = vmatprep.mubr.bf16.mxu0 %v5516_v10  ;;  %v5592_v8 = vld [vmem:[%s9043_s0 + $0x874] ss:$36 sps:$4 sm:$0xff]   ;;  %v5594_v10 = vld [vmem:[%s9043_s0 + $0x644] ss:$36 sps:$4 sm:$0xff]  }
  0xd1   :  { %2573 = vmatmul.mubr.bf16.gmra.mrb[72].mxu1 %v5518_v11 }
  0xd2   :  { %3087 = vmatmul.mubr.bf16.gmra.mrb[40].mxu0 %v5519_v12  ;;  %2580 = vmatprep.mubr.bf16.mxu1 %v5521_v13  ;;  %v5596_v13 = vld [vmem:[%s9043_s0 + $0x870] ss:$36 sps:$4 sm:$0xff]  }
  0xd3   :  { %3094 = vmatprep.mubr.bf16.mxu0 %v5523_v14 }
  0xd9   :  { %2581 = vmatmul.mubr.bf16.gmra.mrb[76].mxu1 %v5525_v16  ;;  %v5599_v16 = vld [vmem:[%s9043_s0 + $0x8bc] ss:$36 sps:$4 sm:$0xff]  }
  0xda   :  { %3095 = vmatmul.mubr.bf16.gmra.mrb[44].mxu0 %v5526_v17  ;;  %2588 = vmatprep.mubr.bf16.mxu1 %v5527_v18  ;;  %v5601_v18 = vld [vmem:[%s9043_s0 + $0x68c] ss:$36 sps:$4 sm:$0xff]  }
  0xdb   :  { %3102 = vmatprep.mubr.bf16.mxu0 %v5529_v19 }
  0xe1   :  { %2589 = vmatmul.mubr.bf16.gmra.mrb[80].mxu1 %v5531_v20 }
  0xe2   :  { %3103 = vmatmul.mubr.bf16.gmra.mrb[48].mxu0 %v5532_v21  ;;  %2596 = vmatprep.mubr.bf16.mxu1 %v5534_v22  ;;  %v5603_v21 = vld [vmem:[%s9043_s0 + $0x8b8] ss:$36 sps:$4 sm:$0xff]  }
  0xe3   :  { %3110 = vmatprep.mubr.bf16.mxu0 %v5536_v23  ;;  %v5604_v23 = vld [vmem:[%s9043_s0 + $0x688] ss:$36 sps:$4 sm:$0xff]  }
  0xe9   :  { %2597 = vmatmul.mubr.bf16.gmra.mrb[84].mxu1 %v5538_v25 }
  0xea   :  { %3111 = vmatmul.mubr.bf16.gmra.mrb[52].mxu0 %v5539_v26  ;;  %2604 = vmatprep.mubr.bf16.mxu1 %v5540_v27  ;;  %v5608_v26 = vld [vmem:[%s9043_s0 + $0x6d4] ss:$36 sps:$4 sm:$0xff]  }
  0xeb   :  { %3118 = vmatprep.mubr.bf16.mxu0 %v5542_v28 }
  0xf1   :  { %2605 = vmatmul.mubr.bf16.gmra.mrb[88].mxu1 %v5544_v0  ;;  %v5605_v0 = vld [vmem:[%s9043_s0 + $0x248] ss:$36 sps:$4 sm:$0xff]  }
  0xf2   :  { %3119 = vmatmul.mubr.bf16.gmra.mrb[56].mxu0 %v5545_v29  ;;  %2612 = vmatprep.mubr.bf16.mxu1 %v5547_v30  ;;  %v5610_v30 = vld [vmem:[%s9043_s0 + $0x6d0] ss:$36 sps:$4 sm:$0xff]  }
  0xf3   :  { %3126 = vmatprep.mubr.bf16.mxu0 %v5549_v31 }
  0xf9   :  { %2613 = vmatmul.mubr.bf16.gmra.mrb[92].mxu1 %v5551_v33  ;;  %v5615_v33 = vld [vmem:[%s9043_s0 + $0x71c] ss:$36 sps:$4 sm:$0xff]  }
  0xfa   :  { %3127 = vmatmul.mubr.bf16.gmra.mrb[60].mxu0 %v5552_v34  ;;  %2620 = vmatprep.mubr.bf16.mxu1 %v5553_v35  ;;  %v5632_v34 = vld [vmem:[%s9042_s1 + $0x208] sm:$0xff]   ;;  %v5652_v35 = vld [vmem:[%s9042_s1 + $0x210] sm:$0xff]  }
  0xfb   :  { %3134 = vmatprep.mubr.bf16.mxu0 %v5555_v36 }
 0x101   :  { %2621 = vmatmul.mubr.bf16.gmra.mrb[96].mxu1 %v5557_v37 }
 0x102   :  { %3135 = vmatmul.mubr.bf16.gmra.mrb[64].mxu0 %v5558_v38  ;;  %2628 = vmatprep.mubr.bf16.mxu1 %v5560_v39  ;;  %v5617_v38 = vld [vmem:[%s9043_s0 + $0x290] ss:$36 sps:$4 sm:$0xff]  }
 0x103   :  { %3142 = vmatprep.mubr.bf16.mxu0 %v5562_v40  ;;  %v5619_v40 = vld [vmem:[%s9043_s0 + $0x2dc] ss:$36 sps:$4 sm:$0xff]  }
 0x109   :  { %2629 = vmatmul.mubr.bf16.gmra.mrb[100].mxu1 %v5564_v41 }
 0x10a   :  { %3143 = vmatmul.mubr.bf16.gmra.mrb[68].mxu0 %v5565_v42  ;;  %2636 = vmatprep.mubr.bf16.mxu1 %v5566_v43  ;;  %v5621_v42 = vld [vmem:[%s9043_s0 + $0x764] ss:$36 sps:$4 sm:$0xff]   ;;  %v5672_v43 = vld [vmem:[%s9042_s1 + $0x218] sm:$0xff]  }
 0x10b   :  { %3150 = vmatprep.mubr.bf16.mxu0 %v5568_v44 }
 0x111   :  { %2637 = vmatmul.mubr.bf16.gmra.mrb[104].mxu1 %v5570_v45  ;;  %v5691_v45 = vld [vmem:[%s9042_s1 + $0x220] sm:$0xff]  }
 0x112   :  { %3151 = vmatmul.mubr.bf16.gmra.mrb[72].mxu0 %v5571_v46  ;;  %2644 = vmatprep.mubr.bf16.mxu1 %v5573_v47  ;;  %v5623_v47 = vld [vmem:[%s9043_s0 + $0x2d8] ss:$36 sps:$4 sm:$0xff]  }
 0x113   :  { %3158 = vmatprep.mubr.bf16.mxu0 %v5575_v48 }
 0x114   :  { %v6547_v49 = vpop.f32.mrb[0].mxu1 }
 0x115   :  { %v2432_v50 = vpop.f32.mrb[1].mxu1 }
 0x116   :  { %v6552_v52 = vpop.f32.mrb[2].mxu1  ;;  %v5624_v50 = vld [vmem:[%s9043_s0 + $0x760] ss:$36 sps:$4 sm:$0xff]  }
 0x117   :  { %v2435_v55 = vpop.f32.mrb[3].mxu1 }
 0x118   :  { %v5710_v55 = vld [vmem:[%s9042_s1 + $0x228] sm:$0xff]  }
 0x119   :  { %2645 = vmatmul.mubr.bf16.gmra.mrb[108].mxu1 %v5577_v51  ;;  %v5626_v51 = vld [vmem:[%s9043_s0 + $0x324] ss:$36 sps:$4 sm:$0xff]  }
 0x11a   :  { %3159 = vmatmul.mubr.bf16.gmra.mrb[76].mxu0 %v5578_v53  ;;  %2652 = vmatprep.mubr.bf16.mxu1 %v5579_v54  ;;  %v5628_v54 = vld [vmem:[%s9043_s0 + $0x7ac] ss:$36 sps:$4 sm:$0xff]  }
 0x11b   :  { %3166 = vmatprep.mubr.bf16.mxu0 %v5581_v56  ;;  %v5729_v56 = vld [vmem:[%s9042_s1 + $0x230] sm:$0xff]  }
 0x11c   :  { %v6563_v57 = vpop.f32.mrb[4].mxu1 }
 0x11d   :  { %v2440_v58 = vpop.f32.mrb[5].mxu1 }
 0x11e   :  { %v6568_v60 = vpop.f32.mrb[6].mxu1  ;;  %v5630_v58 = vld [vmem:[%s9043_s0 + $0x320] ss:$36 sps:$4 sm:$0xff]  }
 0x11f   :  { %v2443_v63 = vpop.f32.mrb[7].mxu1 }
 0x120   :  { %v5637_v63 = vld [vmem:[%s9043_s0 + $0x368] ss:$36 sps:$4 sm:$0xff]  }
 0x121   :  { %2653 = vmatmul.mubr.bf16.gmra.mrb[112].mxu1 %v5583_v59  ;;  %v5631_v59 = vld [vmem:[%s9043_s0 + $0x7a8] ss:$36 sps:$4 sm:$0xff]  }
 0x122   :  { %3167 = vmatmul.mubr.bf16.gmra.mrb[80].mxu0 %v5584_v61  ;;  %2660 = vmatprep.mubr.bf16.mxu1 %v5586_v62  ;;  %v5633_v61 = vld [vmem:[%s9043_s0 + $0x36c] ss:$36 sps:$4 sm:$0xff]   ;;  %v5635_v62 = vld [vmem:[%s9043_s0 + $0x7f4] ss:$36 sps:$4 sm:$0xff]  }
 0x123   :  { %3174 = vmatprep.mubr.bf16.mxu0 %v5588_v1  ;;  %v5638_v1 = vld [vmem:[%s9043_s0 + $0x7f0] ss:$36 sps:$4 sm:$0xff]  }
 0x124   :  { %v6579_v2 = vpop.f32.mrb[8].mxu1 }
 0x125   :  { %v2448_v3 = vpop.f32.mrb[9].mxu1 }
 0x126   :  { %v6584_v6 = vpop.f32.mrb[10].mxu1  ;;  %v5640_v3 = vld [vmem:[%s9043_s0 + $0x3b4] ss:$36 sps:$4 sm:$0xff]  }
 0x127   :  { %v2451_v9 = vpop.f32.mrb[11].mxu1 }
 0x128   :  { %v5646_v9 = vld [vmem:[%s9043_s0 + $0x3fc] ss:$36 sps:$4 sm:$0xff]  }
 0x129   :  { %2661 = vmatmul.mubr.bf16.gmra.mrb[116].mxu1 %v5590_v4  ;;  %v5642_v4 = vld [vmem:[%s9043_s0 + $0x83c] ss:$36 sps:$4 sm:$0xff]  }
 0x12a   :  { %3175 = vmatmul.mubr.bf16.gmra.mrb[84].mxu0 %v5591_v7  ;;  %2668 = vmatprep.mubr.bf16.mxu1 %v5592_v8  ;;  %v5644_v7 = vld [vmem:[%s9043_s0 + $0x3b0] ss:$36 sps:$4 sm:$0xff]   ;;  %v5645_v8 = vld [vmem:[%s9043_s0 + $0x838] ss:$36 sps:$4 sm:$0xff]  }
 0x12b   :  { %3182 = vmatprep.mubr.bf16.mxu0 %v5594_v10  ;;  %v5648_v10 = vld [vmem:[%s9043_s0 + $0x884] ss:$36 sps:$4 sm:$0xff]  }
 0x12c   :  { %v6595_v11 = vpop.f32.mrb[12].mxu1 }
 0x12d   :  { %v2456_v12 = vpop.f32.mrb[13].mxu1 }
 0x12e   :  { %v6600_v14 = vpop.f32.mrb[14].mxu1  ;;  %v5748_v12 = vld [vmem:[%s9042_s1 + $0x238] sm:$0xff]  }
 0x12f   :  { %v2459_v17 = vpop.f32.mrb[15].mxu1 }
 0x130   :  { %v5656_v17 = vld [vmem:[%s9043_s0 + $0x8cc] ss:$36 sps:$4 sm:$0xff]  }
 0x131   :  { %2669 = vmatmul.mubr.bf16.gmra.mrb[120].mxu1 %v5596_v13  ;;  %v5650_v13 = vld [vmem:[%s9043_s0 + $0x3f8] ss:$36 sps:$4 sm:$0xff]  }
 0x132   :  { %3183 = vmatmul.mubr.bf16.gmra.mrb[88].mxu0 %v5597_v15  ;;  %2676 = vmatprep.mubr.bf16.mxu1 %v5599_v16  ;;  %v5651_v15 = vld [vmem:[%s9043_s0 + $0x880] ss:$36 sps:$4 sm:$0xff]  }
 0x133   :  { %3190 = vmatprep.mubr.bf16.mxu0 %v5601_v18  ;;  %v5654_v16 = vld [vmem:[%s9043_s0 + $0x444] ss:$36 sps:$4 sm:$0xff]  }
 0x134   :  { %v6611_v19 = vpop.f32.mrb[16].mxu1  ;;  %v5658_v18 = vld [vmem:[%s9043_s0 + $0x440] ss:$36 sps:$4 sm:$0xff]  }
 0x135   :  { %v2464_v20 = vpop.f32.mrb[17].mxu1 }
 0x136   :  { %v6616_v22 = vpop.f32.mrb[18].mxu1  ;;  %v5659_v20 = vld [vmem:[%s9043_s0 + $0x8c8] ss:$36 sps:$4 sm:$0xff]  }
 0x137   :  { %v2467_v25 = vpop.f32.mrb[19].mxu1 }
 0x138   :  { %v5662_v25 = vld [vmem:[%s9043_s0 + $0x18] ss:$36 sps:$4 sm:$0xff]  }
 0x139   :  { %2677 = vmatmul.mubr.bf16.gmra.mrb[124].mxu1 %v5603_v21  ;;  %v5660_v21 = vld [vmem:[%s9043_s0 + $0x48c] ss:$36 sps:$4 sm:$0xff]  }
 0x13a   :  { %3191 = vmatmul.mubr.bf16.gmra.mrb[92].mxu0 %v5604_v23  ;;  %2781 = vmatprep.mubr.bf16.mxu1 %v5607_v24  ;;  %v5664_v23 = vld [vmem:[%s9043_s0 + $0x1c] ss:$36 sps:$4 sm:$0xff]   ;;  %v5665_v24 = vld [vmem:[%s9043_s0 + $0x488] ss:$36 sps:$4 sm:$0xff]  }
 0x13b   :  { %3198 = vmatprep.mubr.bf16.mxu0 %v5608_v26  ;;  %v5666_v26 = vld [vmem:[%s9043_s0 + $0x4d4] ss:$36 sps:$4 sm:$0xff]  }
 0x13c   :  { %v6627_v27 = vpop.f32.mrb[20].mxu1 }
 0x13d   :  { %v2472_v28 = vpop.f32.mrb[21].mxu1 }
 0x13e   :  { %v6632_v29 = vpop.f32.mrb[22].mxu1  ;;  %v5668_v28 = vld [vmem:[%s9043_s0 + $0x64] ss:$36 sps:$4 sm:$0xff]  }
 0x13f   :  { %v2475_v31 = vpop.f32.mrb[23].mxu1 }
 0x140   :  { %v5673_v31 = vld [vmem:[%s9043_s0 + $0x51c] ss:$36 sps:$4 sm:$0xff]  }
 0x141   :  { %2782 = vmatmul.mubr.bf16.vlgmr.msra.gmra.mrb[32].mxu1 %v5605_v0  ;;  %v5670_v0 = vld [vmem:[%s9043_s0 + $0x4d0] ss:$36 sps:$4 sm:$0xff]  }
 0x142   :  { %3199 = vmatmul.mubr.bf16.gmra.mrb[96].mxu0 %v5610_v30  ;;  %4857 = vmatpush3.bf16.msra.mxu1 %v6409_v5  ;;  %v5618_v5 = vld [vmem:[%s9043_s0 + $0x718] ss:$36 sps:$4 sm:$0xff]   ;;  %v5671_v30 = vld [vmem:[%s9043_s0 + $0x60] ss:$36 sps:$4 sm:$0xff]  }
 0x143   :  { %2789 = vmatprep.mubr.bf16.mxu1 %v5613_v32  ;;  %3206 = vmatprep.mubr.bf16.mxu0 %v5615_v33  ;;  %v5675_v32 = vld [vmem:[%s9043_s0 + $0xac] ss:$36 sps:$4 sm:$0xff]   ;;  %v5677_v33 = vld [vmem:[%s9043_s0 + $0x518] ss:$36 sps:$4 sm:$0xff]  }
 0x144   :  { %v6650_v36 = vpop.f32.mrb[24].mxu1  ;;  %4858 = vmatprep.subr.bf16.mxu1 %v5632_v34 }
 0x145   :  { %v2480_v37 = vpop.f32.mrb[25].mxu1 }
 0x146   :  { %v6655_v39 = vpop.f32.mrb[26].mxu1  ;;  %4859 = vmatpush3.bf16.msra.mxu1 %v5632_v34  ;;  %v5678_v34 = vld [vmem:[%s9043_s0 + $0xa8] ss:$36 sps:$4 sm:$0xff]   ;;  %v5681_v37 = vld [vmem:[%s9043_s0 + $0xf4] ss:$36 sps:$4 sm:$0xff]  }
 0x147   :  { %v2483_v41 = vpop.f32.mrb[27].mxu1  ;;  %4860 = vmatprep.subr.bf16.mxu1 %v5652_v35 }
 0x148   :  { %v5687_v41 = vld [vmem:[%s9043_s0 + $0x13c] ss:$36 sps:$4 sm:$0xff]  }
 0x149   :  { %2790 = vmatmul.mubr.bf16.gmra.mrb[36].mxu1 %v5617_v38  ;;  %v5683_v38 = vld [vmem:[%s9043_s0 + $0x560] ss:$36 sps:$4 sm:$0xff]  }
 0x14a   :  { %3207 = vmatmul.mubr.bf16.gmra.mrb[100].mxu0 %v5618_v5  ;;  %2797 = vmatprep.mubr.bf16.mxu1 %v5619_v40  ;;  %v5684_v5 = vld [vmem:[%s9043_s0 + $0xf0] ss:$36 sps:$4 sm:$0xff]  }
 0x14b   :  { %3214 = vmatprep.mubr.bf16.mxu0 %v5621_v42  ;;  %4861 = vmatpush3.bf16.msra.mxu1 %v5652_v35  ;;  %v5679_v35 = vld [vmem:[%s9043_s0 + $0x564] ss:$36 sps:$4 sm:$0xff]   ;;  %v5685_v40 = vld [vmem:[%s9043_s0 + $0x5ac] ss:$36 sps:$4 sm:$0xff]  }
 0x14c   :  { %v6669_v44 = vpop.f32.mrb[28].mxu1  ;;  %4862 = vmatprep.subr.bf16.mxu1 %v5672_v43  ;;  %v5689_v42 = vld [vmem:[%s9043_s0 + $0x5a8] ss:$36 sps:$4 sm:$0xff]  }
 0x14d   :  { %v2488_v46 = vpop.f32.mrb[29].mxu1 }
 0x14e   :  { %v6677_v48 = vpop.f32.mrb[30].mxu1  ;;  %v5694_v46 = vld [vmem:[%s9043_s0 + $0x184] ss:$36 sps:$4 sm:$0xff]  }
 0x14f   :  { %v2491_v53 = vpop.f32.mrb[31].mxu1  ;;  %4863 = vmatpush3.bf16.msra.mxu1 %v5672_v43  ;;  %v5690_v43 = vld [vmem:[%s9043_s0 + $0x138] ss:$36 sps:$4 sm:$0xff]  }
 0x150   :  { %4864 = vmatprep.subr.bf16.mxu1 %v5691_v45  ;;  %v5700_v53 = vld [vmem:[%s9043_s0 + $0x1cc] ss:$36 sps:$4 sm:$0xff]  }
 0x151   :  { %2798 = vmatmul.mubr.bf16.gmra.mrb[40].mxu1 %v5623_v47  ;;  %v5696_v47 = vld [vmem:[%s9043_s0 + $0x5f0] ss:$36 sps:$4 sm:$0xff]  }
 0x152   :  { %3215 = vmatmul.mubr.bf16.gmra.mrb[104].mxu0 %v5624_v50  ;;  %2805 = vmatprep.mubr.bf16.mxu1 %v5626_v51  ;;  %v5697_v50 = vld [vmem:[%s9043_s0 + $0x180] ss:$36 sps:$4 sm:$0xff]  }
 0x153   :  { %3222 = vmatprep.mubr.bf16.mxu0 %v5628_v54  ;;  %4865 = vmatpush3.bf16.msra.mxu1 %v5691_v45  ;;  %v5692_v45 = vld [vmem:[%s9043_s0 + $0x5f4] ss:$36 sps:$4 sm:$0xff]   ;;  %v5698_v51 = vld [vmem:[%s9043_s0 + $0x63c] ss:$36 sps:$4 sm:$0xff]  }
 0x154   :  { %4866 = vmatprep.subr.bf16.mxu1 %v5710_v55  ;;  %v5702_v54 = vld [vmem:[%s9043_s0 + $0x638] ss:$36 sps:$4 sm:$0xff]  }
 0x157   :  { %4867 = vmatpush3.bf16.msra.mxu1 %v5710_v55  ;;  %v5703_v55 = vld [vmem:[%s9043_s0 + $0x1c8] ss:$36 sps:$4 sm:$0xff]  }
 0x158   :  { %4868 = vmatprep.subr.bf16.mxu1 %v5729_v56 }
 0x159   :  { %2806 = vmatmul.mubr.bf16.gmra.mrb[44].mxu1 %v5630_v58  ;;  %v5706_v58 = vld [vmem:[%s9043_s0 + $0x214] ss:$36 sps:$4 sm:$0xff]  }
 0x15a   :  { %3223 = vmatmul.mubr.bf16.gmra.mrb[108].mxu0 %v5631_v59  ;;  %2813 = vmatprep.mubr.bf16.mxu1 %v5633_v61  ;;  %v5708_v59 = vld [vmem:[%s9043_s0 + $0x680] ss:$36 sps:$4 sm:$0xff]   ;;  %v5709_v61 = vld [vmem:[%s9043_s0 + $0x210] ss:$36 sps:$4 sm:$0xff]  }
 0x15b   :  { %3230 = vmatprep.mubr.bf16.mxu0 %v5635_v62  ;;  %4869 = vmatpush3.bf16.msra.mxu1 %v5729_v56  ;;  %v5704_v56 = vld [vmem:[%s9043_s0 + $0x684] ss:$36 sps:$4 sm:$0xff]   ;;  %v5711_v62 = vld [vmem:[%s9043_s0 + $0x6cc] ss:$36 sps:$4 sm:$0xff]  }
 0x15c   :  { %4870 = vmatprep.subr.bf16.mxu1 %v5748_v12 }
 0x15f   :  { %4871 = vmatpush3.bf16.msra.mxu1 %v5748_v12  ;;  %v5725_v12 = vld [vmem:[%s9043_s0 + $0x2ec] ss:$36 sps:$4 sm:$0xff]  }
 0x161   :  { %2814 = vmatmul.mubr.bf16.gmra.mrb[48].mxu1 %v5637_v63  ;;  %v5713_v63 = vld [vmem:[%s9043_s0 + $0x25c] ss:$36 sps:$4 sm:$0xff]  }
 0x162   :  { %3231 = vmatmul.mubr.bf16.gmra.mrb[112].mxu0 %v5638_v1  ;;  %2821 = vmatprep.mubr.bf16.mxu1 %v5640_v3  ;;  %v5715_v1 = vld [vmem:[%s9043_s0 + $0x6c8] ss:$36 sps:$4 sm:$0xff]   ;;  %v5716_v3 = vld [vmem:[%s9043_s0 + $0x258] ss:$36 sps:$4 sm:$0xff]  }
 0x163   :  { %3238 = vmatprep.mubr.bf16.mxu0 %v5642_v4  ;;  %v5717_v4 = vld [vmem:[%s9043_s0 + $0x714] ss:$36 sps:$4 sm:$0xff]  }
 0x169   :  { %2822 = vmatmul.mubr.bf16.gmra.mrb[52].mxu1 %v5644_v7  ;;  %v5719_v7 = vld [vmem:[%s9043_s0 + $0x2a4] ss:$36 sps:$4 sm:$0xff]  }
 0x16a   :  { %3239 = vmatmul.mubr.bf16.gmra.mrb[116].mxu0 %v5645_v8  ;;  %2829 = vmatprep.mubr.bf16.mxu1 %v5646_v9  ;;  %v5721_v8 = vld [vmem:[%s9043_s0 + $0x710] ss:$36 sps:$4 sm:$0xff]   ;;  %v5722_v9 = vld [vmem:[%s9043_s0 + $0x2a0] ss:$36 sps:$4 sm:$0xff]  }
 0x16b   :  { %3246 = vmatprep.mubr.bf16.mxu0 %v5648_v10  ;;  %v5723_v10 = vld [vmem:[%s9043_s0 + $0x75c] ss:$36 sps:$4 sm:$0xff]  }
 0x171   :  { %2830 = vmatmul.mubr.bf16.gmra.mrb[56].mxu1 %v5650_v13  ;;  %v5727_v13 = vld [vmem:[%s9043_s0 + $0x758] ss:$36 sps:$4 sm:$0xff]  }
 0x172   :  { %3247 = vmatmul.mubr.bf16.gmra.mrb[120].mxu0 %v5651_v15  ;;  %2837 = vmatprep.mubr.bf16.mxu1 %v5654_v16  ;;  %v5728_v15 = vld [vmem:[%s9043_s0 + $0x2e8] ss:$36 sps:$4 sm:$0xff]  }
 0x173   :  { %3254 = vmatprep.mubr.bf16.mxu0 %v5656_v17  ;;  %v5730_v16 = vld [vmem:[%s9043_s0 + $0x7a4] ss:$36 sps:$4 sm:$0xff]   ;;  %v5732_v17 = vld [vmem:[%s9043_s0 + $0x334] ss:$36 sps:$4 sm:$0xff]  }
 0x179   :  { %2838 = vmatmul.mubr.bf16.gmra.mrb[60].mxu1 %v5658_v18  ;;  %v5734_v18 = vld [vmem:[%s9043_s0 + $0x7a0] ss:$36 sps:$4 sm:$0xff]  }
 0x17a   :  { %3255 = vmatmul.mubr.bf16.gmra.mrb[124].mxu0 %v5659_v20  ;;  %2845 = vmatprep.mubr.bf16.mxu1 %v5660_v21  ;;  %v5735_v20 = vld [vmem:[%s9043_s0 + $0x330] ss:$36 sps:$4 sm:$0xff]  }
 0x17b   :  { %3295 = vmatprep.mubr.bf16.mxu0 %v5664_v23  ;;  %v5736_v21 = vld [vmem:[%s9043_s0 + $0x7ec] ss:$36 sps:$4 sm:$0xff]   ;;  %v5738_v23 = vld [vmem:[%s9043_s0 + $0x37c] ss:$36 sps:$4 sm:$0xff]  }
 0x181   :  { %2846 = vmatmul.mubr.bf16.gmra.mrb[64].mxu1 %v5665_v24  ;;  %v5740_v24 = vld [vmem:[%s9043_s0 + $0x7e8] ss:$36 sps:$4 sm:$0xff]  }
 0x182   :  { %3296 = vmatmul.mubr.bf16.vlgmr.msra.gmra.mrb[0].mxu0 %v5662_v25  ;;  %2853 = vmatprep.mubr.bf16.mxu1 %v5666_v26  ;;  %v5741_v25 = vld [vmem:[%s9043_s0 + $0x378] ss:$36 sps:$4 sm:$0xff]  }
 0x183   :  { %3303 = vmatprep.mubr.bf16.mxu0 %v5668_v28  ;;  %v5742_v26 = vld [vmem:[%s9043_s0 + $0x834] ss:$36 sps:$4 sm:$0xff]   ;;  %v5744_v28 = vld [vmem:[%s9043_s0 + $0x3c4] ss:$36 sps:$4 sm:$0xff]  }
 0x189   :  { %2854 = vmatmul.mubr.bf16.gmra.mrb[68].mxu1 %v5670_v0  ;;  %v5746_v0 = vld [vmem:[%s9043_s0 + $0x830] ss:$36 sps:$4 sm:$0xff]  }
 0x18a   :  { %3304 = vmatmul.mubr.bf16.gmra.mrb[4].mxu0 %v5671_v30  ;;  %2861 = vmatprep.mubr.bf16.mxu1 %v5673_v31  ;;  %v5747_v30 = vld [vmem:[%s9043_s0 + $0x3c0] ss:$36 sps:$4 sm:$0xff]  }
 0x18b   :  { %3311 = vmatprep.mubr.bf16.mxu0 %v5675_v32  ;;  %v5749_v31 = vld [vmem:[%s9043_s0 + $0x87c] ss:$36 sps:$4 sm:$0xff]   ;;  %v5751_v32 = vld [vmem:[%s9043_s0 + $0x40c] ss:$36 sps:$4 sm:$0xff]  }
 0x191   :  { %2862 = vmatmul.mubr.bf16.gmra.mrb[72].mxu1 %v5677_v33  ;;  %v5753_v33 = vld [vmem:[%s9043_s0 + $0x878] ss:$36 sps:$4 sm:$0xff]  }
 0x192   :  { %3312 = vmatmul.mubr.bf16.gmra.mrb[8].mxu0 %v5678_v34  ;;  %2869 = vmatprep.mubr.bf16.mxu1 %v5679_v35  ;;  %v5754_v34 = vld [vmem:[%s9043_s0 + $0x408] ss:$36 sps:$4 sm:$0xff]  }
 0x193   :  { %3319 = vmatprep.mubr.bf16.mxu0 %v5681_v37  ;;  %v5755_v35 = vld [vmem:[%s9043_s0 + $0x8c4] ss:$36 sps:$4 sm:$0xff]   ;;  %v5757_v37 = vld [vmem:[%s9043_s0 + $0x454] ss:$36 sps:$4 sm:$0xff]  }
 0x199   :  { %2870 = vmatmul.mubr.bf16.gmra.mrb[76].mxu1 %v5683_v38  ;;  %v5759_v38 = vld [vmem:[%s9043_s0 + $0x8c0] ss:$36 sps:$4 sm:$0xff]  }
 0x19a   :  { %3320 = vmatmul.mubr.bf16.gmra.mrb[12].mxu0 %v5684_v5  ;;  %2877 = vmatprep.mubr.bf16.mxu1 %v5685_v40  ;;  %v5760_v5 = vld [vmem:[%s9043_s0 + $0x450] ss:$36 sps:$4 sm:$0xff]   ;;  %v5763_v40 = vld [vmem:[%s9043_s0 + $0x20] ss:$36 sps:$4 sm:$0xff]  }
 0x19b   :  { %3327 = vmatprep.mubr.bf16.mxu0 %v5687_v41  ;;  %v5761_v41 = vld [vmem:[%s9043_s0 + $0x49c] ss:$36 sps:$4 sm:$0xff]  }
 0x1a1   :  { %2878 = vmatmul.mubr.bf16.gmra.mrb[80].mxu1 %v5689_v42  ;;  %v5765_v42 = vld [vmem:[%s9043_s0 + $0x68] ss:$36 sps:$4 sm:$0xff]  }
 0x1a2   :  { %3328 = vmatmul.mubr.bf16.gmra.mrb[16].mxu0 %v5690_v43  ;;  %2885 = vmatprep.mubr.bf16.mxu1 %v5692_v45  ;;  %v5764_v43 = vld [vmem:[%s9043_s0 + $0x498] ss:$36 sps:$4 sm:$0xff]   ;;  %v5768_v45 = vld [vmem:[%s9043_s0 + $0xb0] ss:$36 sps:$4 sm:$0xff]  }
 0x1a3   :  { %3335 = vmatprep.mubr.bf16.mxu0 %v5694_v46  ;;  %v5766_v46 = vld [vmem:[%s9043_s0 + $0x4e4] ss:$36 sps:$4 sm:$0xff]  }
 0x1a9   :  { %2886 = vmatmul.mubr.bf16.gmra.mrb[84].mxu1 %v5696_v47  ;;  %v5770_v47 = vld [vmem:[%s9043_s0 + $0xf8] ss:$36 sps:$4 sm:$0xff]  }
 0x1aa   :  { %3336 = vmatmul.mubr.bf16.gmra.mrb[20].mxu0 %v5697_v50  ;;  %2893 = vmatprep.mubr.bf16.mxu1 %v5698_v51  ;;  %v5769_v50 = vld [vmem:[%s9043_s0 + $0x4e0] ss:$36 sps:$4 sm:$0xff]  }
 0x1ab   :  { %3343 = vmatprep.mubr.bf16.mxu0 %v5700_v53  ;;  %v5773_v51 = vld [vmem:[%s9043_s0 + $0x140] ss:$36 sps:$4 sm:$0xff]   ;;  %v5771_v53 = vld [vmem:[%s9043_s0 + $0x52c] ss:$36 sps:$4 sm:$0xff]  }
 0x1b1   :  { %2894 = vmatmul.mubr.bf16.gmra.mrb[88].mxu1 %v5702_v54  ;;  %v5775_v54 = vld [vmem:[%s9043_s0 + $0x188] ss:$36 sps:$4 sm:$0xff]  }
 0x1b2   :  { %3344 = vmatmul.mubr.bf16.gmra.mrb[24].mxu0 %v5703_v55  ;;  %2901 = vmatprep.mubr.bf16.mxu1 %v5704_v56  ;;  %v5774_v55 = vld [vmem:[%s9043_s0 + $0x528] ss:$36 sps:$4 sm:$0xff]   ;;  %v5778_v56 = vld [vmem:[%s9043_s0 + $0x1d0] ss:$36 sps:$4 sm:$0xff]  }
 0x1b3   :  { %3351 = vmatprep.mubr.bf16.mxu0 %v5706_v58  ;;  %v5776_v58 = vld [vmem:[%s9043_s0 + $0x574] ss:$36 sps:$4 sm:$0xff]  }
 0x1b9   :  { %2902 = vmatmul.mubr.bf16.gmra.mrb[92].mxu1 %v5708_v59 }
 0x1ba   :  { %3352 = vmatmul.mubr.bf16.gmra.mrb[28].mxu0 %v5709_v61  ;;  %2909 = vmatprep.mubr.bf16.mxu1 %v5711_v62  ;;  %v5780_v62 = vld [vmem:[%s9043_s0 + $0x218] ss:$36 sps:$4 sm:$0xff]  }
 0x1bb   :  { %3359 = vmatprep.mubr.bf16.mxu0 %v5713_v63 }
 0x1c1   :  { %2910 = vmatmul.mubr.bf16.gmra.mrb[96].mxu1 %v5715_v1  ;;  %v5779_v1 = vld [vmem:[%s9043_s0 + $0x570] ss:$36 sps:$4 sm:$0xff]  }
 0x1c2   :  { %3360 = vmatmul.mubr.bf16.gmra.mrb[32].mxu0 %v5716_v3  ;;  %2917 = vmatprep.mubr.bf16.mxu1 %v5717_v4  ;;  %v5783_v3 = vld [vmem:[%s9043_s0 + $0x260] ss:$36 sps:$4 sm:$0xff]  }
 0x1c3   :  { %3367 = vmatprep.mubr.bf16.mxu0 %v5719_v7  ;;  %v5781_v7 = vld [vmem:[%s9043_s0 + $0x5bc] ss:$36 sps:$4 sm:$0xff]  }
 0x1c9   :  { %2918 = vmatmul.mubr.bf16.gmra.mrb[100].mxu1 %v5721_v8 }
 0x1ca   :  { %3368 = vmatmul.mubr.bf16.gmra.mrb[36].mxu0 %v5722_v9  ;;  %2925 = vmatprep.mubr.bf16.mxu1 %v5723_v10  ;;  %v5785_v10 = vld [vmem:[%s9043_s0 + $0x2a8] ss:$36 sps:$4 sm:$0xff]  }
 0x1cb   :  { %3375 = vmatprep.mubr.bf16.mxu0 %v5725_v12 }
 0x1d1   :  { %2926 = vmatmul.mubr.bf16.gmra.mrb[104].mxu1 %v5727_v13  ;;  %v5784_v13 = vld [vmem:[%s9043_s0 + $0x5b8] ss:$36 sps:$4 sm:$0xff]  }
 0x1d2   :  { %3376 = vmatmul.mubr.bf16.gmra.mrb[40].mxu0 %v5728_v15  ;;  %2933 = vmatprep.mubr.bf16.mxu1 %v5730_v16  ;;  %v5788_v15 = vld [vmem:[%s9043_s0 + $0x2f0] ss:$36 sps:$4 sm:$0xff]  }
 0x1d3   :  { %3383 = vmatprep.mubr.bf16.mxu0 %v5732_v17  ;;  %v5786_v17 = vld [vmem:[%s9043_s0 + $0x604] ss:$36 sps:$4 sm:$0xff]  }
 0x1d9   :  { %2934 = vmatmul.mubr.bf16.gmra.mrb[108].mxu1 %v5734_v18 }
 0x1da   :  { %3384 = vmatmul.mubr.bf16.gmra.mrb[44].mxu0 %v5735_v20  ;;  %2941 = vmatprep.mubr.bf16.mxu1 %v5736_v21  ;;  %v5790_v21 = vld [vmem:[%s9043_s0 + $0x338] ss:$36 sps:$4 sm:$0xff]  }
 0x1db   :  { %3391 = vmatprep.mubr.bf16.mxu0 %v5738_v23 }
 0x1e1   :  { %2942 = vmatmul.mubr.bf16.gmra.mrb[112].mxu1 %v5740_v24  ;;  %v5789_v24 = vld [vmem:[%s9043_s0 + $0x600] ss:$36 sps:$4 sm:$0xff]  }
 0x1e2   :  { %3392 = vmatmul.mubr.bf16.gmra.mrb[48].mxu0 %v5741_v25  ;;  %2949 = vmatprep.mubr.bf16.mxu1 %v5742_v26  ;;  %v5793_v25 = vld [vmem:[%s9043_s0 + $0x380] ss:$36 sps:$4 sm:$0xff]  }
 0x1e3   :  { %3399 = vmatprep.mubr.bf16.mxu0 %v5744_v28  ;;  %v5791_v28 = vld [vmem:[%s9043_s0 + $0x64c] ss:$36 sps:$4 sm:$0xff]  }
 0x1e9   :  { %2950 = vmatmul.mubr.bf16.gmra.mrb[116].mxu1 %v5746_v0 }
 0x1ea   :  { %3400 = vmatmul.mubr.bf16.gmra.mrb[52].mxu0 %v5747_v30  ;;  %2957 = vmatprep.mubr.bf16.mxu1 %v5749_v31  ;;  %v5795_v31 = vld [vmem:[%s9043_s0 + $0x3c8] ss:$36 sps:$4 sm:$0xff]  }
 0x1eb   :  { %3407 = vmatprep.mubr.bf16.mxu0 %v5751_v32 }
 0x1f1   :  { %2958 = vmatmul.mubr.bf16.gmra.mrb[120].mxu1 %v5753_v33  ;;  %v5794_v33 = vld [vmem:[%s9043_s0 + $0x648] ss:$36 sps:$4 sm:$0xff]  }
 0x1f2   :  { %3408 = vmatmul.mubr.bf16.gmra.mrb[56].mxu0 %v5754_v34  ;;  %2965 = vmatprep.mubr.bf16.mxu1 %v5755_v35  ;;  %v5798_v34 = vld [vmem:[%s9043_s0 + $0x410] ss:$36 sps:$4 sm:$0xff]  }
 0x1f3   :  { %3415 = vmatprep.mubr.bf16.mxu0 %v5757_v37  ;;  %v5796_v37 = vld [vmem:[%s9043_s0 + $0x694] ss:$36 sps:$4 sm:$0xff]  }
 0x1f9   :  { %2966 = vmatmul.mubr.bf16.gmra.mrb[124].mxu1 %v5759_v38 }
 0x1fa   :  { %3416 = vmatmul.mubr.bf16.gmra.mrb[60].mxu0 %v5760_v5  ;;  %4872 = vmatprep.mubr.bf16.mxu1 %v5763_v40  ;;  %v5800_v40 = vld [vmem:[%s9043_s0 + $0x458] ss:$36 sps:$4 sm:$0xff]  }
 0x1fb   :  { %3423 = vmatprep.mubr.bf16.mxu0 %v5761_v41 }
 0x201   :  { %4873 = vmatmul.mubr.bf16.vlgmr.msra.gmra.mrb[128].mxu1 %v5765_v42  ;;  %v5799_v42 = vld [vmem:[%s9043_s0 + $0x690] ss:$36 sps:$4 sm:$0xff]  }
 0x202   :  { %3424 = vmatmul.mubr.bf16.gmra.mrb[64].mxu0 %v5764_v43  ;;  %4876 = vmatprep.mubr.bf16.mxu1 %v5768_v45  ;;  %v5803_v43 = vld [vmem:[%s9043_s0 + $0x4a0] ss:$36 sps:$4 sm:$0xff]  }
 0x203   :  { %3431 = vmatprep.mubr.bf16.mxu0 %v5766_v46  ;;  %v5801_v46 = vld [vmem:[%s9043_s0 + $0x6dc] ss:$36 sps:$4 sm:$0xff]  }
 0x209   :  { %4877 = vmatmul.mubr.bf16.gmra.mrb[132].mxu1 %v5770_v47 }
 0x20a   :  { %3432 = vmatmul.mubr.bf16.gmra.mrb[68].mxu0 %v5769_v50  ;;  %4880 = vmatprep.mubr.bf16.mxu1 %v5773_v51  ;;  %v5805_v51 = vld [vmem:[%s9043_s0 + $0x4e8] ss:$36 sps:$4 sm:$0xff]  }
 0x20b   :  { %3439 = vmatprep.mubr.bf16.mxu0 %v5771_v53 }
 0x211   :  { %4881 = vmatmul.mubr.bf16.gmra.mrb[136].mxu1 %v5775_v54  ;;  %v5804_v54 = vld [vmem:[%s9043_s0 + $0x6d8] ss:$36 sps:$4 sm:$0xff]  }
 0x212   :  { %3440 = vmatmul.mubr.bf16.gmra.mrb[72].mxu0 %v5774_v55  ;;  %4884 = vmatprep.mubr.bf16.mxu1 %v5778_v56  ;;  %v5808_v55 = vld [vmem:[%s9043_s0 + $0x530] ss:$36 sps:$4 sm:$0xff]  }
 0x213   :  { %3447 = vmatprep.mubr.bf16.mxu0 %v5776_v58  ;;  %v5806_v58 = vld [vmem:[%s9043_s0 + $0x724] ss:$36 sps:$4 sm:$0xff]  }
 0x214   :  { %v6985_v59 = vpop.f32.mrb[32].mxu1 }
 0x215   :  { %v2785_v61 = vpop.f32.mrb[33].mxu1 }
 0x216   :  { %v6990_v63 = vpop.f32.mrb[34].mxu1 }
 0x217   :  { %v2788_v4 = vpop.f32.mrb[35].mxu1 }
 0x218   :  { %v5809_v4 = vld [vmem:[%s9043_s0 + $0x720] ss:$36 sps:$4 sm:$0xff]  }
 0x219   :  { %4885 = vmatmul.mubr.bf16.gmra.mrb[140].mxu1 %v5780_v62 }
 0x21a   :  { %3448 = vmatmul.mubr.bf16.gmra.mrb[76].mxu0 %v5779_v1  ;;  %4888 = vmatprep.mubr.bf16.mxu1 %v5783_v3  ;;  %v5810_v1 = vld [vmem:[%s9043_s0 + $0x578] ss:$36 sps:$4 sm:$0xff]  }
 0x21b   :  { %3455 = vmatprep.mubr.bf16.mxu0 %v5781_v7  ;;  %v5813_v7 = vld [vmem:[%s9043_s0 + $0x5c0] ss:$36 sps:$4 sm:$0xff]  }
 0x21c   :  { %v7001_v8 = vpop.f32.mrb[36].mxu1 }
 0x21d   :  { %v2793_v9 = vpop.f32.mrb[37].mxu1 }
 0x21e   :  { %v7006_v12 = vpop.f32.mrb[38].mxu1 }
 0x21f   :  { %v2796_v16 = vpop.f32.mrb[39].mxu1 }
 0x220   :  { %v5815_v16 = vld [vmem:[%s9043_s0 + $0x608] ss:$36 sps:$4 sm:$0xff]  }
 0x221   :  { %4889 = vmatmul.mubr.bf16.gmra.mrb[144].mxu1 %v5785_v10  ;;  %v5811_v10 = vld [vmem:[%s9043_s0 + $0x76c] ss:$36 sps:$4 sm:$0xff]  }
 0x222   :  { %3456 = vmatmul.mubr.bf16.gmra.mrb[80].mxu0 %v5784_v13  ;;  %4892 = vmatprep.mubr.bf16.mxu1 %v5788_v15 }
 0x223   :  { %3463 = vmatprep.mubr.bf16.mxu0 %v5786_v17 }
 0x224   :  { %v7017_v18 = vpop.f32.mrb[40].mxu1 }
 0x225   :  { %v2801_v20 = vpop.f32.mrb[41].mxu1 }
 0x226   :  { %v7022_v23 = vpop.f32.mrb[42].mxu1  ;;  %v5814_v20 = vld [vmem:[%s9043_s0 + $0x768] ss:$36 sps:$4 sm:$0xff]  }
 0x227   :  { %v2804_v26 = vpop.f32.mrb[43].mxu1 }
 0x228   :  { %v7116_v26 = vld [vmem:[%s9044_s2] ss:$0 sm:$0xff] }
 0x229   :  { %4893 = vmatmul.mubr.bf16.gmra.mrb[148].mxu1 %v5790_v21  ;;  %v5818_v21 = vld [vmem:[%s9043_s0 + $0x650] ss:$36 sps:$4 sm:$0xff]  }
 0x22a   :  { %3464 = vmatmul.mubr.bf16.gmra.mrb[84].mxu0 %v5789_v24  ;;  %4896 = vmatprep.mubr.bf16.mxu1 %v5793_v25  ;;  %v5816_v25 = vld [vmem:[%s9043_s0 + $0x7b4] ss:$36 sps:$4 sm:$0xff]  }
 0x22b   :  { %3471 = vmatprep.mubr.bf16.mxu0 %v5791_v28  ;;  %v2431_v28 = vadd.f32 %v7116_v26, %v6547_v49  ;;  %v5819_v49 = vld [vmem:[%s9043_s0 + $0x7b0] ss:$36 sps:$4 sm:$0xff]  }
 0x22c   :  { %v7033_v0 = vpop.f32.mrb[44].mxu1 }
 0x22d   :  { %v2809_v30 = vpop.f32.mrb[45].mxu1 }
 0x22e   :  { %v7038_v32 = vpop.f32.mrb[46].mxu1 }
 0x22f   :  { %v2812_v35 = vpop.f32.mrb[47].mxu1 }
 0x230   :  { %v2434_v35 = vadd.f32 %v7116_v26, %v6552_v52 }
 0x231   :  { %4897 = vmatmul.mubr.bf16.gmra.mrb[152].mxu1 %v5795_v31 }
 0x232   :  { %3472 = vmatmul.mubr.bf16.gmra.mrb[88].mxu0 %v5794_v33  ;;  %4900 = vmatprep.mubr.bf16.mxu1 %v5798_v34  ;;  %v5820_v34 = vld [vmem:[%s9043_s0 + $0x698] ss:$36 sps:$4 sm:$0xff]  }
 0x233   :  { %3479 = vmatprep.mubr.bf16.mxu0 %v5796_v37 }
 0x234   :  { %v7049_v38 = vpop.f32.mrb[48].mxu1 }
 0x235   :  { %v2817_v5 = vpop.f32.mrb[49].mxu1 }
 0x236   :  { %v7054_v41 = vpop.f32.mrb[50].mxu1 }
 0x237   :  { %v2820_v45 = vpop.f32.mrb[51].mxu1 }
 0x239   :  { %4901 = vmatmul.mubr.bf16.gmra.mrb[156].mxu1 %v5800_v40 }
 0x23a   :  { %3480 = vmatmul.mubr.bf16.gmra.mrb[92].mxu0 %v5799_v42  ;;  %4904 = vmatprep.mubr.bf16.mxu1 %v5803_v43  ;;  %v5823_v42 = vld [vmem:[%s9043_s0 + $0x6e0] ss:$36 sps:$4 sm:$0xff]  }
 0x23b   :  { %3487 = vmatprep.mubr.bf16.mxu0 %v5801_v46  ;;  %v5821_v46 = vld [vmem:[%s9043_s0 + $0x7fc] ss:$36 sps:$4 sm:$0xff]  }
 0x23c   :  { %v7065_v47 = vpop.f32.mrb[52].mxu1 }
 0x23d   :  { %v2825_v50 = vpop.f32.mrb[53].mxu1 }
 0x23e   :  { %v7070_v53 = vpop.f32.mrb[54].mxu1 }
 0x23f   :  { %v2828_v56 = vpop.f32.mrb[55].mxu1 }
 0x241   :  { %4905 = vmatmul.mubr.bf16.gmra.mrb[160].mxu1 %v5805_v51  ;;  %v2439_v51 = vadd.f32 %v7116_v26, %v6563_v57  ;;  %v5824_v57 = vld [vmem:[%s9043_s0 + $0x7f8] ss:$36 sps:$4 sm:$0xff]  }
 0x242   :  { %3488 = vmatmul.mubr.bf16.gmra.mrb[96].mxu0 %v5804_v54  ;;  %4908 = vmatprep.mubr.bf16.mxu1 %v5808_v55 }
 0x243   :  { %3495 = vmatprep.mubr.bf16.mxu0 %v5806_v58  ;;  %v5825_v58 = vld [vmem:[%s9043_s0 + $0x728] ss:$36 sps:$4 sm:$0xff]  }
 0x244   :  { %v7081_v61 = vpop.f32.mrb[56].mxu1 }
 0x245   :  { %v2833_v62 = vpop.f32.mrb[57].mxu1 }
 0x246   :  { %v7086_v3 = vpop.f32.mrb[58].mxu1  ;;  %v2442_v62 = vadd.f32 %v7116_v26, %v6568_v60 }
 0x247   :  { %v2836_v9 = vpop.f32.mrb[59].mxu1 }
 0x248   :  { %v5828_v9 = vld [vmem:[%s9043_s0 + $0x770] ss:$36 sps:$4 sm:$0xff]  }
 0x249   :  { %4909 = vmatmul.mubr.bf16.gmra.mrb[164].mxu1 %v5810_v1 }
 0x24a   :  { %3496 = vmatmul.mubr.bf16.gmra.mrb[100].mxu0 %v5809_v4  ;;  %4912 = vmatprep.mubr.bf16.mxu1 %v5813_v7 }
 0x24b   :  { %3503 = vmatprep.mubr.bf16.mxu0 %v5811_v10 }
 0x24c   :  { %v7097_v13 = vpop.f32.mrb[60].mxu1 }
 0x24d   :  { %v2841_v15 = vpop.f32.mrb[61].mxu1 }
 0x24e   :  { %v7102_v17 = vpop.f32.mrb[62].mxu1 }
 0x24f   :  { %v2844_v24 = vpop.f32.mrb[63].mxu1 }
 0x251   :  { %4913 = vmatmul.mubr.bf16.gmra.mrb[168].mxu1 %v5815_v16  ;;  %v5826_v16 = vld [vmem:[%s9043_s0 + $0x844] ss:$36 sps:$4 sm:$0xff]  }
 0x252   :  { %3504 = vmatmul.mubr.bf16.gmra.mrb[104].mxu0 %v5814_v20  ;;  %4916 = vmatprep.mubr.bf16.mxu1 %v5818_v21  ;;  %v2447_v21 = vadd.f32 %v7116_v26, %v6579_v2  ;;  %v5829_v2 = vld [vmem:[%s9043_s0 + $0x840] ss:$36 sps:$4 sm:$0xff]  }
 0x253   :  { %3511 = vmatprep.mubr.bf16.mxu0 %v5816_v25 }
 0x254   :  { %v7120_v30 = vpop.f32.mrb[64].mxu1 }
 0x255   :  { %v3297_v31 = vpop.f32.mrb[0].mxu0  ;;  %v2849_v33 = vpop.f32.mrb[65].mxu1 }
 0x256   :  { %v7127_v37 = vadd.f32 %v3297_v31, %v2431_v28  ;;  %v3299_v5 = vpop.f32.mrb[1].mxu0  ;;  %v7129_v40 = vpop.f32.mrb[66].mxu1  ;;  %v5830_v31 = vld [vmem:[%s9043_s0 + $0x7b8] ss:$36 sps:$4 sm:$0xff]   ;;  %v2450_v33 = vadd.f32 %v7116_v26, %v6584_v6 }
 0x257   :  { %v3300_v43 = vpop.f32.mrb[2].mxu0  ;;  %v2852_v45 = vpop.f32.mrb[67].mxu1 }
 0x258   :  { %v7140_v52 = vadd.f32 %v3300_v43, %v2434_v35  ;;  %v3302_v50 = vpop.f32.mrb[3].mxu0  ;;  %v5831_v45 = vld [vmem:[%s9043_s0 + $0x88c] ss:$36 sps:$4 sm:$0xff]  }
 0x259   :  { %4917 = vmatmul.mubr.bf16.gmra.mrb[172].mxu1 %v5820_v34  ;;  %v2455_v50 = vadd.f32 %v7116_v26, %v6595_v11  ;;  %v5834_v11 = vld [vmem:[%s9043_s0 + $0x888] ss:$36 sps:$4 sm:$0xff]  }
 0x25a   :  { %3512 = vmatmul.mubr.bf16.gmra.mrb[108].mxu0 %v5819_v49  ;;  %4920 = vmatprep.mubr.bf16.mxu1 %v5823_v42  ;;  %v5833_v49 = vld [vmem:[%s9043_s0 + $0x800] ss:$36 sps:$4 sm:$0xff]  }
 0x25b   :  { %3519 = vmatprep.mubr.bf16.mxu0 %v5821_v46 }
 0x25c   :  { %v7144_v54 = vpop.f32.mrb[68].mxu1 }
 0x25d   :  { %v3305_v55 = vpop.f32.mrb[4].mxu0  ;;  %v2857_v56 = vpop.f32.mrb[69].mxu1 }
 0x25e   :  { %v7151_v1 = vadd.f32 %v3305_v55, %v2439_v51  ;;  %v3307_v4 = vpop.f32.mrb[5].mxu0  ;;  %v7153_v7 = vpop.f32.mrb[70].mxu1 }
 0x25f   :  { %v3308_v10 = vpop.f32.mrb[6].mxu0  ;;  %v2860_v15 = vpop.f32.mrb[71].mxu1 }
 0x260   :  { %v7164_v60 = vadd.f32 %v3308_v10, %v2442_v62  ;;  %v3310_v20 = vpop.f32.mrb[7].mxu0  ;;  %v2458_v62 = vadd.f32 %v7116_v26, %v6600_v14  ;;  %v5838_v10 = vld [vmem:[%s9043_s0 + $0x890] ss:$36 sps:$4 sm:$0xff]  }
 0x261   :  { %4921 = vmatmul.mubr.bf16.gmra.mrb[176].mxu1 %v5825_v58  ;;  %v5835_v58 = vld [vmem:[%s9043_s0 + $0x848] ss:$36 sps:$4 sm:$0xff]   ;;  %v5836_v20 = vld [vmem:[%s9043_s0 + $0x8d4] ss:$36 sps:$4 sm:$0xff]  }
 0x262   :  { %3520 = vmatmul.mubr.bf16.gmra.mrb[112].mxu0 %v5824_v57  ;;  %4924 = vmatprep.mubr.bf16.mxu1 %v5828_v9 }
 0x263   :  { %3527 = vmatprep.mubr.bf16.mxu0 %v5826_v16 }
 0x264   :  { %v7168_v24 = vpop.f32.mrb[72].mxu1 }
 0x265   :  { %v3313_v25 = vpop.f32.mrb[8].mxu0  ;;  %v2865_v28 = vpop.f32.mrb[73].mxu1 }
 0x266   :  { %v7175_v34 = vadd.f32 %v3313_v25, %v2447_v21  ;;  %v3315_v35 = vpop.f32.mrb[9].mxu0  ;;  %v7177_v5 = vpop.f32.mrb[74].mxu1  ;;  %v2463_v25 = vadd.f32 %v7116_v26, %v6611_v19  ;;  %v5839_v19 = vld [vmem:[%s9043_s0 + $0x8d0] ss:$36 sps:$4 sm:$0xff]  }
 0x267   :  { %v3316_v42 = vpop.f32.mrb[10].mxu0  ;;  %v2868_v43 = vpop.f32.mrb[75].mxu1  ;;  %v5840_v35 = vld [vmem:[%s9043_s0 + $0x8d8] ss:$36 sps:$4 sm:$0xff]  }
 0x268   :  { %v7188_v6 = vadd.f32 %v3316_v42, %v2450_v33  ;;  %v3318_v46 = vpop.f32.mrb[11].mxu0 }
 0x269   :  { %4925 = vmatmul.mubr.bf16.gmra.mrb[180].mxu1 %v5830_v31 }
 0x26a   :  { %3528 = vmatmul.mubr.bf16.gmra.mrb[116].mxu0 %v5829_v2  ;;  %4928 = vmatprep.mubr.bf16.mxu1 %v5833_v49  ;;  %v2466_v2 = vadd.f32 %v7116_v26, %v6616_v22 }
 0x26b   :  { %3535 = vmatprep.mubr.bf16.mxu0 %v5831_v45 }
 0x26c   :  { %v7192_v51 = vpop.f32.mrb[76].mxu1 }
 0x26d   :  { %v3321_v55 = vpop.f32.mrb[12].mxu0  ;;  %v2873_v56 = vpop.f32.mrb[77].mxu1 }
 0x26e   :  { %v7199_v4 = vadd.f32 %v3321_v55, %v2455_v50  ;;  %v3323_v57 = vpop.f32.mrb[13].mxu0  ;;  %v7201_v9 = vpop.f32.mrb[78].mxu1  ;;  %v2471_v56 = vadd.f32 %v7116_v26, %v6627_v27  ;;  %v2479_v27 = vadd.f32 %v7116_v26, %v6650_v36  ;;  %v2487_v36 = vadd.f32 %v7116_v26, %v6669_v44 }
 0x26f   :  { %v3324_v15 = vpop.f32.mrb[14].mxu0  ;;  %v2876_v16 = vpop.f32.mrb[79].mxu1  ;;  %v2474_v57 = vadd.f32 %v7116_v26, %v6632_v29  ;;  %v2482_v29 = vadd.f32 %v7116_v26, %v6655_v39  ;;  %v2490_v39 = vadd.f32 %v7116_v26, %v6677_v48  ;;  %v5000_v44 = vadd.f32 %v7116_v26, %v6985_v59 }
 0x270   :  { %v7212_v14 = vadd.f32 %v3324_v15, %v2458_v62  ;;  %v3326_v21 = vpop.f32.mrb[15].mxu0  ;;  %v5002_v48 = vadd.f32 %v7116_v26, %v6990_v63  ;;  %v5004_v59 = vadd.f32 %v7116_v26, %v7001_v8  ;;  %v5006_v63 = vadd.f32 %v7116_v26, %v7006_v12 }
 0x271   :  { %4929 = vmatmul.mubr.bf16.gmra.mrb[184].mxu1 %v5835_v58  ;;  %v5008_v8 = vadd.f32 %v7116_v26, %v7017_v18  ;;  %v5010_v12 = vadd.f32 %v7116_v26, %v7022_v23  ;;  %v5012_v18 = vadd.f32 %v7116_v26, %v7033_v0  ;;  %v5014_v23 = vadd.f32 %v7116_v26, %v7038_v32 }
 0x272   :  { %3536 = vmatmul.mubr.bf16.gmra.mrb[120].mxu0 %v5834_v11  ;;  %4932 = vmatprep.mubr.bf16.mxu1 %v5838_v10  ;;  %v5016_v0 = vadd.f32 %v7116_v26, %v7049_v38  ;;  %v5018_v32 = vadd.f32 %v7116_v26, %v7054_v41  ;;  %v5020_v38 = vadd.f32 %v7116_v26, %v7065_v47 }
 0x273   :  { %3543 = vmatprep.mubr.bf16.mxu0 %v5836_v20  ;;  %v5022_v41 = vadd.f32 %v7116_v26, %v7070_v53  ;;  %v5024_v47 = vadd.f32 %v7116_v26, %v7081_v61  ;;  %v5026_v53 = vadd.f32 %v7116_v26, %v7086_v3  ;;  %v5028_v61 = vadd.f32 %v7116_v26, %v7097_v13 }
 0x274   :  { %v7216_v28 = vpop.f32.mrb[80].mxu1  ;;  %v5030_v3 = vadd.f32 %v7116_v26, %v7102_v17  ;;  %v5032_v13 = vadd.f32 %v7116_v26, %v7120_v30  ;;  %v5034_v17 = vadd.f32 %v7116_v26, %v7129_v40 }
 0x275   :  { %v3329_v31 = vpop.f32.mrb[16].mxu0  ;;  %v2881_v33 = vpop.f32.mrb[81].mxu1 }
 0x276   :  { %v7223_v49 = vadd.f32 %v3329_v31, %v2463_v25  ;;  %v3331_v42 = vpop.f32.mrb[17].mxu0  ;;  %v7225_v43 = vpop.f32.mrb[82].mxu1 }
 0x277   :  { %v3332_v45 = vpop.f32.mrb[18].mxu0  ;;  %v2884_v46 = vpop.f32.mrb[83].mxu1 }
 0x278   :  { %v7230_v50 = vadd.f32 %v3332_v45, %v2466_v2  ;;  %v3334_v55 = vpop.f32.mrb[19].mxu0 }
 0x279   :  { %4933 = vmatmul.mubr.bf16.gmra.mrb[188].mxu1 %v5840_v35 }
 0x27a   :  { %3544 = vmatmul.mubr.bf16.gmra.mrb[124].mxu0 %v5839_v19 }
 0x27c   :  { %v7234_v22 = vpop.f32.mrb[84].mxu1 }
 0x27d   :  { %v3337_v58 = vpop.f32.mrb[20].mxu0  ;;  %v2889_v62 = vpop.f32.mrb[85].mxu1 }
 0x27e   :  { %v7238_v11 = vadd.f32 %v3337_v58, %v2471_v56  ;;  %v3339_v10 = vpop.f32.mrb[21].mxu0  ;;  %v7240_v15 = vpop.f32.mrb[86].mxu1 }
 0x27f   :  { %v3340_v16 = vpop.f32.mrb[22].mxu0  ;;  %v2892_v20 = vpop.f32.mrb[87].mxu1 }
 0x280   :  { %v7242_v21 = vadd.f32 %v3340_v16, %v2474_v57  ;;  %v3342_v25 = vpop.f32.mrb[23].mxu0 }
 0x284   :  { %v7246_v31 = vpop.f32.mrb[88].mxu1 }
 0x285   :  { %v3345_v33 = vpop.f32.mrb[24].mxu0  ;;  %v2897_v35 = vpop.f32.mrb[89].mxu1 }
 0x286   :  { %v7250_v2 = vadd.f32 %v3345_v33, %v2479_v27  ;;  %v3347_v42 = vpop.f32.mrb[25].mxu0  ;;  %v7252_v19 = vpop.f32.mrb[90].mxu1 }
 0x287   :  { %v3348_v45 = vpop.f32.mrb[26].mxu0  ;;  %v2900_v46 = vpop.f32.mrb[91].mxu1 }
 0x288   :  { %v7254_v55 = vadd.f32 %v3348_v45, %v2482_v29  ;;  %v3350_v56 = vpop.f32.mrb[27].mxu0 }
 0x28c   :  { %v7258_v58 = vpop.f32.mrb[92].mxu1 }
 0x28d   :  { %v3353_v62 = vpop.f32.mrb[28].mxu0  ;;  %v2905_v57 = vpop.f32.mrb[93].mxu1 }
 0x28e   :  { %v7262_v10 = vadd.f32 %v3353_v62, %v2487_v36  ;;  %v3355_v16 = vpop.f32.mrb[29].mxu0  ;;  %v7264_v20 = vpop.f32.mrb[94].mxu1 }
 0x28f   :  { %v3356_v25 = vpop.f32.mrb[30].mxu0  ;;  %v2908_v27 = vpop.f32.mrb[95].mxu1 }
 0x290   :  { %v7266_v33 = vadd.f32 %v3356_v25, %v2490_v39  ;;  %v3358_v35 = vpop.f32.mrb[31].mxu0 }
 0x294   :  { %v7270_v29 = vpop.f32.mrb[96].mxu1 }
 0x295   :  { %v3361_v42 = vpop.f32.mrb[32].mxu0  ;;  %v2913_v45 = vpop.f32.mrb[97].mxu1 }
 0x296   :  { %v7274_v46 = vadd.f32 %v5000_v44, %v3361_v42  ;;  %v3363_v56 = vpop.f32.mrb[33].mxu0  ;;  %v7276_v36 = vpop.f32.mrb[98].mxu1 }
 0x297   :  { %9098 = vst [vmem:[#allocation2_spill] sm:$0xff] %v7276_v36  ;;  %v3364_v62 = vpop.f32.mrb[34].mxu0  ;;  %v2916_v57 = vpop.f32.mrb[99].mxu1 }
 0x298   :  { %v7278_v39 = vadd.f32 %v5002_v48, %v3364_v62  ;;  %v3366_v16 = vpop.f32.mrb[35].mxu0 }
 0x29c   :  { %v7282_v25 = vpop.f32.mrb[100].mxu1 }
 0x29d   :  { %9099 = vst [vmem:[#allocation3_spill] sm:$0xff] %v7282_v25  ;;  %v3369_v27 = vpop.f32.mrb[36].mxu0  ;;  %v2921_v35 = vpop.f32.mrb[101].mxu1 }
 0x29e   :  { %v7286_v44 = vadd.f32 %v5004_v59, %v3369_v27  ;;  %v3371_v42 = vpop.f32.mrb[37].mxu0  ;;  %v7288_v45 = vpop.f32.mrb[102].mxu1 }
 0x29f   :  { %9100 = vst [vmem:[#allocation4_spill] sm:$0xff] %v7288_v45  ;;  %v3372_v56 = vpop.f32.mrb[38].mxu0  ;;  %v2924_v57 = vpop.f32.mrb[103].mxu1 }
 0x2a0   :  { %v7290_v48 = vadd.f32 %v5006_v63, %v3372_v56  ;;  %v3374_v62 = vpop.f32.mrb[39].mxu0 }
 0x2a4   :  { %v7294_v16 = vpop.f32.mrb[104].mxu1 }
 0x2a5   :  { %9101 = vst [vmem:[#allocation5_spill] sm:$0xff] %v7294_v16  ;;  %v3377_v25 = vpop.f32.mrb[40].mxu0  ;;  %v2929_v35 = vpop.f32.mrb[105].mxu1 }
 0x2a6   :  { %v7298_v59 = vadd.f32 %v5008_v8, %v3377_v25  ;;  %v3379_v27 = vpop.f32.mrb[41].mxu0  ;;  %v7300_v42 = vpop.f32.mrb[106].mxu1 }
 0x2a7   :  { %9102 = vst [vmem:[#allocation6_spill] sm:$0xff] %v7300_v42  ;;  %v3380_v45 = vpop.f32.mrb[42].mxu0  ;;  %v2932_v57 = vpop.f32.mrb[107].mxu1 }
 0x2a8   :  { %v7302_v63 = vadd.f32 %v5010_v12, %v3380_v45  ;;  %v3382_v56 = vpop.f32.mrb[43].mxu0 }
 0x2ac   :  { %v7306_v62 = vpop.f32.mrb[108].mxu1 }
 0x2ad   :  { %9103 = vst [vmem:[#allocation7_spill] sm:$0xff] %v7306_v62  ;;  %v3385_v16 = vpop.f32.mrb[44].mxu0  ;;  %v2937_v35 = vpop.f32.mrb[109].mxu1 }
 0x2ae   :  { %v7310_v25 = vadd.f32 %v5012_v18, %v3385_v16  ;;  %v3387_v8 = vpop.f32.mrb[45].mxu0  ;;  %v7312_v27 = vpop.f32.mrb[110].mxu1 }
 0x2af   :  { %9104 = vst [vmem:[#allocation8_spill] sm:$0xff] %v7312_v27  ;;  %v3388_v42 = vpop.f32.mrb[46].mxu0  ;;  %v2940_v57 = vpop.f32.mrb[111].mxu1 }
 0x2b0   :  { %v7314_v45 = vadd.f32 %v5014_v23, %v3388_v42  ;;  %v3390_v12 = vpop.f32.mrb[47].mxu0 }
 0x2b4   :  { %v7318_v56 = vpop.f32.mrb[112].mxu1 }
 0x2b5   :  { %9105 = vst [vmem:[#allocation9_spill] sm:$0xff] %v7318_v56  ;;  %v3393_v62 = vpop.f32.mrb[48].mxu0  ;;  %v2945_v35 = vpop.f32.mrb[113].mxu1 }
 0x2b6   :  { %v7322_v16 = vadd.f32 %v5016_v0, %v3393_v62  ;;  %v3395_v18 = vpop.f32.mrb[49].mxu0  ;;  %v7324_v8 = vpop.f32.mrb[114].mxu1 }
 0x2b7   :  { %9106 = vst [vmem:[#allocation10_spill] sm:$0xff] %v7324_v8  ;;  %v3396_v27 = vpop.f32.mrb[50].mxu0  ;;  %v2948_v57 = vpop.f32.mrb[115].mxu1 }
 0x2b8   :  { %v7326_v42 = vadd.f32 %v5018_v32, %v3396_v27  ;;  %v3398_v23 = vpop.f32.mrb[51].mxu0 }
 0x2bc   :  { %v7330_v12 = vpop.f32.mrb[116].mxu1 }
 0x2bd   :  { %9107 = vst [vmem:[#allocation11_spill] sm:$0xff] %v7330_v12  ;;  %v3401_v56 = vpop.f32.mrb[52].mxu0  ;;  %v2953_v35 = vpop.f32.mrb[117].mxu1 }
 0x2be   :  { %v7334_v62 = vadd.f32 %v5020_v38, %v3401_v56  ;;  %v3403_v0 = vpop.f32.mrb[53].mxu0  ;;  %v7336_v18 = vpop.f32.mrb[118].mxu1 }
 0x2bf   :  { %9108 = vst [vmem:[#allocation12_spill] sm:$0xff] %v7336_v18  ;;  %v3404_v8 = vpop.f32.mrb[54].mxu0  ;;  %v2956_v57 = vpop.f32.mrb[119].mxu1 }
 0x2c0   :  { %v7338_v27 = vadd.f32 %v5022_v41, %v3404_v8  ;;  %v3406_v32 = vpop.f32.mrb[55].mxu0 }
 0x2c4   :  { %v7342_v23 = vpop.f32.mrb[120].mxu1 }
 0x2c5   :  { %9109 = vst [vmem:[#allocation13_spill] sm:$0xff] %v7342_v23  ;;  %v3409_v12 = vpop.f32.mrb[56].mxu0  ;;  %v2961_v35 = vpop.f32.mrb[121].mxu1 }
 0x2c6   :  { %v7346_v56 = vadd.f32 %v5024_v47, %v3409_v12  ;;  %v3411_v38 = vpop.f32.mrb[57].mxu0  ;;  %v7348_v0 = vpop.f32.mrb[122].mxu1 }
 0x2c7   :  { %9110 = vst [vmem:[#allocation14_spill] sm:$0xff] %v7348_v0  ;;  %v3412_v18 = vpop.f32.mrb[58].mxu0  ;;  %v2964_v57 = vpop.f32.mrb[123].mxu1 }
 0x2c8   :  { %v7350_v8 = vadd.f32 %v5026_v53, %v3412_v18  ;;  %v3414_v41 = vpop.f32.mrb[59].mxu0 }
 0x2cc   :  { %v7354_v32 = vpop.f32.mrb[124].mxu1 }
 0x2cd   :  { %9111 = vst [vmem:[#allocation15_spill] sm:$0xff] %v7354_v32  ;;  %v3417_v23 = vpop.f32.mrb[60].mxu0  ;;  %v2969_v35 = vpop.f32.mrb[125].mxu1 }
 0x2ce   :  { %v7358_v12 = vadd.f32 %v5028_v61, %v3417_v23  ;;  %v3419_v47 = vpop.f32.mrb[61].mxu0  ;;  %v7360_v38 = vpop.f32.mrb[126].mxu1 }
 0x2cf   :  { %9112 = vst [vmem:[#allocation16_spill] sm:$0xff] %v7360_v38  ;;  %v3420_v0 = vpop.f32.mrb[62].mxu0  ;;  %v2972_v57 = vpop.f32.mrb[127].mxu1 }
 0x2d0   :  { %v7362_v18 = vadd.f32 %v5030_v3, %v3420_v0  ;;  %v3422_v53 = vpop.f32.mrb[63].mxu0 }
 0x2d4   :  { %v4874_v41 = vpop.f32.mrb[128].mxu1 }
 0x2d5   :  { %v3425_v32 = vpop.f32.mrb[64].mxu0  ;;  %v7367_v35 = vadd.f32 %v7151_v1, %v4874_v41  ;;  %v3586_v36 = vpop.f32.mrb[129].mxu1 }
 0x2d6   :  { %v7371_v23 = vadd.f32 %v5032_v13, %v3425_v32  ;;  %v3427_v61 = vpop.f32.mrb[65].mxu0  ;;  %v7374_v47 = vadd.f32 %v7127_v37, %v3586_v36  ;;  %v4875_v0 = vpop.f32.mrb[130].mxu1 }
 0x2d7   :  { %9113 = vst [vmem:[#allocation17_spill] sm:$0xff] %v7367_v35  ;;  %v3428_v3 = vpop.f32.mrb[66].mxu0  ;;  %v7377_v57 = vadd.f32 %v7164_v60, %v4875_v0  ;;  %v3589_v30 = vpop.f32.mrb[131].mxu1  ;;  %v5036_v60 = vadd.f32 %v7116_v26, %v7144_v54  ;;  %v3913_v36 = vmul.f32 %v7367_v35, %v7367_v35  ;;  %v5038_v61 = vadd.f32 %v7116_v26, %v7153_v7 }
 0x2d8   :  { %9114 = vst [vmem:[#allocation18_spill] sm:$0xff] %v7374_v47  ;;  %v7379_v53 = vadd.f32 %v5034_v17, %v3428_v3  ;;  %v3430_v1 = vpop.f32.mrb[67].mxu0  ;;  %v7382_v41 = vadd.f32 %v7140_v52, %v3589_v30  ;;  %v3911_v40 = vmul.f32 %v7374_v47, %v7374_v47 }
 0x2d9   :  { %v3914_v0 = vmul.f32 %v7377_v57, %v7377_v57 }
 0x2da   :  { %9115 = vst [vmem:[#allocation19_spill] sm:$0xff] %v7379_v53  ;;  %9116 = vst [vmem:[#allocation20_spill] sm:$0xff] %v7382_v41  ;;  %v3841_v32 = vadd.f32 %v7382_v41, %v7374_v47  ;;  %v3912_v37 = vmul.f32 %v7382_v41, %v7382_v41 }
 0x2dc   :  { %v3842_v13 = vadd.f32 %v3841_v32, %v7367_v35  ;;  %v3975_v17 = vadd.f32 %v3912_v37, %v3911_v40  ;;  %v4878_v52 = vpop.f32.mrb[132].mxu1 }
 0x2dd   :  { %v3433_v3 = vpop.f32.mrb[68].mxu0  ;;  %v7400_v30 = vadd.f32 %v7199_v4, %v4878_v52  ;;  %v3602_v1 = vpop.f32.mrb[133].mxu1  ;;  %v5040_v52 = vadd.f32 %v7116_v26, %v7168_v24 }
 0x2de   :  { %v3976_v41 = vadd.f32 %v3975_v17, %v3913_v36  ;;  %v7402_v54 = vadd.f32 %v5036_v60, %v3433_v3  ;;  %v3435_v47 = vpop.f32.mrb[69].mxu0  ;;  %v7405_v38 = vadd.f32 %v7175_v34, %v3602_v1  ;;  %v3843_v40 = vadd.f32 %v3842_v13, %v7377_v57  ;;  %v4879_v32 = vpop.f32.mrb[134].mxu1 }
 0x2df   :  { %v3436_v37 = vpop.f32.mrb[70].mxu0  ;;  %v7409_v7 = vadd.f32 %v7212_v14, %v4879_v32  ;;  %v3605_v35 = vpop.f32.mrb[135].mxu1  ;;  %v3917_v1 = vmul.f32 %v7400_v30, %v7400_v30 }
 0x2e0   :  { %v3844_v53 = vadd.f32 %v3843_v40, %v7405_v38  ;;  %v3915_v4 = vmul.f32 %v7405_v38, %v7405_v38  ;;  %v3977_v36 = vadd.f32 %v3976_v41, %v3914_v0  ;;  %v7414_v60 = vadd.f32 %v5038_v61, %v3436_v37  ;;  %v3438_v47 = vpop.f32.mrb[71].mxu0 }
 0x2e1   :  { %v7417_v34 = vadd.f32 %v7188_v6, %v3605_v35 }
 0x2e2   :  { %v3978_v17 = vadd.f32 %v3977_v36, %v3915_v4  ;;  %v3918_v4 = vmul.f32 %v7409_v7, %v7409_v7 }
 0x2e3   :  { %v3845_v13 = vadd.f32 %v3844_v53, %v7417_v34  ;;  %v3916_v14 = vmul.f32 %v7417_v34, %v7417_v34  ;;  %v5042_v53 = vadd.f32 %v7116_v26, %v7177_v5 }
 0x2e4   :  { %v4882_v3 = vpop.f32.mrb[136].mxu1 }
 0x2e5   :  { %v3846_v41 = vadd.f32 %v3845_v13, %v7400_v30  ;;  %v3979_v61 = vadd.f32 %v3978_v17, %v3916_v14  ;;  %v3441_v0 = vpop.f32.mrb[72].mxu0  ;;  %v7428_v6 = vadd.f32 %v7238_v11, %v4882_v3  ;;  %v3618_v35 = vpop.f32.mrb[137].mxu1 }
 0x2e6   :  { %v7432_v40 = vadd.f32 %v5040_v52, %v3441_v0  ;;  %v3443_v32 = vpop.f32.mrb[73].mxu0  ;;  %v7435_v24 = vadd.f32 %v7223_v49, %v3618_v35  ;;  %v4883_v37 = vpop.f32.mrb[138].mxu1 }
 0x2e7   :  { %v3980_v36 = vadd.f32 %v3979_v61, %v3917_v1  ;;  %v3847_v47 = vadd.f32 %v3846_v41, %v7409_v7  ;;  %v3444_v17 = vpop.f32.mrb[74].mxu0  ;;  %v7441_v11 = vadd.f32 %v7242_v21, %v4883_v37  ;;  %v3621_v13 = vpop.f32.mrb[139].mxu1  ;;  %v5044_v61 = vadd.f32 %v7116_v26, %v7192_v51 }
 0x2e8   :  { %v3919_v5 = vmul.f32 %v7435_v24, %v7435_v24  ;;  %v7445_v14 = vadd.f32 %v5042_v53, %v3444_v17  ;;  %v3446_v52 = vpop.f32.mrb[75].mxu0  ;;  %v7448_v49 = vadd.f32 %v7230_v50, %v3621_v13  ;;  %v3921_v53 = vmul.f32 %v7428_v6, %v7428_v6 }
 0x2e9   :  { %v3848_v3 = vadd.f32 %v3847_v47, %v7435_v24  ;;  %v3981_v0 = vadd.f32 %v3980_v36, %v3918_v4  ;;  %v5046_v36 = vadd.f32 %v7116_v26, %v7201_v9  ;;  %v3922_v52 = vmul.f32 %v7441_v11, %v7441_v11 }
 0x2ea   :  { %v3920_v1 = vmul.f32 %v7448_v49, %v7448_v49 }
 0x2eb   :  { %v3982_v41 = vadd.f32 %v3981_v0, %v3919_v5  ;;  %v3849_v21 = vadd.f32 %v3848_v3, %v7448_v49 }
 0x2ec   :  { %v4886_v35 = vpop.f32.mrb[140].mxu1 }
 0x2ed   :  { %v3850_v32 = vadd.f32 %v3849_v21, %v7428_v6  ;;  %v3983_v50 = vadd.f32 %v3982_v41, %v3920_v1  ;;  %v3449_v37 = vpop.f32.mrb[76].mxu0  ;;  %v7460_v47 = vadd.f32 %v7262_v10, %v4886_v35  ;;  %v3634_v4 = vpop.f32.mrb[141].mxu1 }
 0x2ee   :  { %v7464_v17 = vadd.f32 %v5044_v61, %v3449_v37  ;;  %v3451_v13 = vpop.f32.mrb[77].mxu0  ;;  %v7467_v51 = vadd.f32 %v7250_v2, %v3634_v4  ;;  %v4887_v5 = vpop.f32.mrb[142].mxu1 }
 0x2ef   :  { %v3984_v3 = vadd.f32 %v3983_v50, %v3921_v53  ;;  %v3851_v0 = vadd.f32 %v3850_v32, %v7441_v11  ;;  %v3452_v1 = vpop.f32.mrb[78].mxu0  ;;  %v7473_v10 = vadd.f32 %v7266_v33, %v4887_v5  ;;  %v3637_v41 = vpop.f32.mrb[143].mxu1  ;;  %v5048_v50 = vadd.f32 %v7116_v26, %v7216_v28 }
 0x2f0   :  { %v3923_v9 = vmul.f32 %v7467_v51, %v7467_v51  ;;  %v7477_v21 = vadd.f32 %v5046_v36, %v3452_v1  ;;  %v3454_v61 = vpop.f32.mrb[79].mxu0  ;;  %v7480_v2 = vadd.f32 %v7254_v55, %v3637_v41  ;;  %v3925_v36 = vmul.f32 %v7460_v47, %v7460_v47 }
 0x2f1   :  { %v3852_v35 = vadd.f32 %v3851_v0, %v7467_v51  ;;  %v3985_v37 = vadd.f32 %v3984_v3, %v3922_v52  ;;  %v5050_v3 = vadd.f32 %v7116_v26, %v7225_v43  ;;  %v3926_v61 = vmul.f32 %v7473_v10, %v7473_v10 }
 0x2f2   :  { %v3924_v53 = vmul.f32 %v7480_v2, %v7480_v2 }
 0x2f3   :  { %v3986_v32 = vadd.f32 %v3985_v37, %v3923_v9  ;;  %v3853_v33 = vadd.f32 %v3852_v35, %v7480_v2 }
 0x2f4   :  { %v4890_v4 = vpop.f32.mrb[144].mxu1 }
 0x2f5   :  { %v3854_v13 = vadd.f32 %v3853_v33, %v7460_v47  ;;  %v3987_v55 = vadd.f32 %v3986_v32, %v3924_v53  ;;  %v3457_v5 = vpop.f32.mrb[80].mxu0  ;;  %v7492_v0 = vadd.f32 %v7286_v44, %v4890_v4  ;;  %v3650_v52 = vpop.f32.mrb[145].mxu1 }
 0x2f6   :  { %v7496_v1 = vadd.f32 %v5048_v50, %v3457_v5  ;;  %v3459_v41 = vpop.f32.mrb[81].mxu0  ;;  %v7499_v28 = vadd.f32 %v7274_v46, %v3650_v52  ;;  %v4891_v9 = vpop.f32.mrb[146].mxu1 }
 0x2f7   :  { %v3988_v35 = vadd.f32 %v3987_v55, %v3925_v36  ;;  %v3855_v37 = vadd.f32 %v3854_v13, %v7473_v10  ;;  %v3460_v53 = vpop.f32.mrb[82].mxu0  ;;  %v7505_v44 = vadd.f32 %v7290_v48, %v4891_v9  ;;  %v3653_v32 = vpop.f32.mrb[147].mxu1  ;;  %v5052_v55 = vadd.f32 %v7116_v26, %v7234_v22 }
 0x2f8   :  { %v3927_v43 = vmul.f32 %v7499_v28, %v7499_v28  ;;  %v7509_v33 = vadd.f32 %v5050_v3, %v3460_v53  ;;  %v3462_v50 = vpop.f32.mrb[83].mxu0  ;;  %v7512_v46 = vadd.f32 %v7278_v39, %v3653_v32  ;;  %v3929_v3 = vmul.f32 %v7492_v0, %v7492_v0 }
 0x2f9   :  { %v3856_v4 = vadd.f32 %v3855_v37, %v7499_v28  ;;  %v3989_v5 = vadd.f32 %v3988_v35, %v3926_v61  ;;  %v5054_v35 = vadd.f32 %v7116_v26, %v7240_v15  ;;  %v3930_v50 = vmul.f32 %v7505_v44, %v7505_v44 }
 0x2fa   :  { %v3928_v36 = vmul.f32 %v7512_v46, %v7512_v46 }
 0x2fb   :  { %v3990_v13 = vadd.f32 %v3989_v5, %v3927_v43  ;;  %v3857_v48 = vadd.f32 %v3856_v4, %v7512_v46 }
 0x2fc   :  { %v4894_v52 = vpop.f32.mrb[148].mxu1 }
 0x2fd   :  { %v3858_v41 = vadd.f32 %v3857_v48, %v7492_v0  ;;  %v3991_v39 = vadd.f32 %v3990_v13, %v3928_v36  ;;  %v3465_v9 = vpop.f32.mrb[84].mxu0  ;;  %v7524_v37 = vadd.f32 %v7310_v25, %v4894_v52  ;;  %v3666_v61 = vpop.f32.mrb[149].mxu1 }
 0x2fe   :  { %v7528_v53 = vadd.f32 %v5052_v55, %v3465_v9  ;;  %v3467_v32 = vpop.f32.mrb[85].mxu0  ;;  %v7531_v22 = vadd.f32 %v7298_v59, %v3666_v61  ;;  %v4895_v43 = vpop.f32.mrb[150].mxu1 }
 0x2ff   :  { %v3992_v4 = vadd.f32 %v3991_v39, %v3929_v3  ;;  %v3859_v5 = vadd.f32 %v3858_v41, %v7505_v44  ;;  %v3468_v36 = vpop.f32.mrb[86].mxu0  ;;  %v7537_v25 = vadd.f32 %v7314_v45, %v4895_v43  ;;  %v3669_v13 = vpop.f32.mrb[151].mxu1  ;;  %v5056_v39 = vadd.f32 %v7116_v26, %v7246_v31 }
 0x300   :  { %v3931_v15 = vmul.f32 %v7531_v22, %v7531_v22  ;;  %v7541_v48 = vadd.f32 %v5054_v35, %v3468_v36  ;;  %v3470_v55 = vpop.f32.mrb[87].mxu0  ;;  %v7544_v59 = vadd.f32 %v7302_v63, %v3669_v13  ;;  %v3933_v35 = vmul.f32 %v7524_v37, %v7524_v37 }
 0x301   :  { %v3860_v52 = vadd.f32 %v3859_v5, %v7531_v22  ;;  %v3993_v9 = vadd.f32 %v3992_v4, %v3930_v50  ;;  %v5058_v4 = vadd.f32 %v7116_v26, %v7252_v19  ;;  %v3934_v55 = vmul.f32 %v7537_v25, %v7537_v25 }
 0x302   :  { %v3932_v3 = vmul.f32 %v7544_v59, %v7544_v59 }
 0x303   :  { %v3994_v41 = vadd.f32 %v3993_v9, %v3931_v15  ;;  %v3861_v45 = vadd.f32 %v3860_v52, %v7544_v59 }
 0x304   :  { %v4898_v61 = vpop.f32.mrb[152].mxu1 }
 0x305   :  { %v3862_v32 = vadd.f32 %v3861_v45, %v7524_v37  ;;  %v3995_v63 = vadd.f32 %v3994_v41, %v3932_v3  ;;  %v3473_v43 = vpop.f32.mrb[88].mxu0  ;;  %v7556_v5 = vadd.f32 %v7334_v62, %v4898_v61  ;;  %v3682_v50 = vpop.f32.mrb[153].mxu1 }
 0x306   :  { %v7560_v36 = vadd.f32 %v5056_v39, %v3473_v43  ;;  %v3475_v13 = vpop.f32.mrb[89].mxu0  ;;  %v7563_v31 = vadd.f32 %v7322_v16, %v3682_v50  ;;  %v4899_v15 = vpop.f32.mrb[154].mxu1 }
 0x307   :  { %v3996_v52 = vadd.f32 %v3995_v63, %v3933_v35  ;;  %v3863_v9 = vadd.f32 %v3862_v32, %v7537_v25  ;;  %v3476_v3 = vpop.f32.mrb[90].mxu0  ;;  %v7569_v62 = vadd.f32 %v7338_v27, %v4899_v15  ;;  %v3685_v41 = vpop.f32.mrb[155].mxu1  ;;  %v5060_v63 = vadd.f32 %v7116_v26, %v7258_v58 }
 0x308   :  { %v3935_v19 = vmul.f32 %v7563_v31, %v7563_v31  ;;  %v7573_v45 = vadd.f32 %v5058_v4, %v3476_v3  ;;  %v3478_v39 = vpop.f32.mrb[91].mxu0  ;;  %v7576_v16 = vadd.f32 %v7326_v42, %v3685_v41  ;;  %v3937_v4 = vmul.f32 %v7556_v5, %v7556_v5 }
 0x309   :  { %v3864_v61 = vadd.f32 %v3863_v9, %v7563_v31  ;;  %v3997_v43 = vadd.f32 %v3996_v52, %v3934_v55  ;;  %v5062_v52 = vadd.f32 %v7116_v26, %v7264_v20  ;;  %v3938_v39 = vmul.f32 %v7569_v62, %v7569_v62 }
 0x30a   :  { %v3936_v35 = vmul.f32 %v7576_v16, %v7576_v16 }
 0x30b   :  { %v3998_v32 = vadd.f32 %v3997_v43, %v3935_v19  ;;  %v3865_v27 = vadd.f32 %v3864_v61, %v7576_v16 }
 0x30c   :  { %v4902_v50 = vpop.f32.mrb[156].mxu1 }
 0x30d   :  { %v3866_v13 = vadd.f32 %v3865_v27, %v7556_v5  ;;  %v3999_v42 = vadd.f32 %v3998_v32, %v3936_v35  ;;  %v3481_v15 = vpop.f32.mrb[92].mxu0  ;;  %v7588_v9 = vadd.f32 %v7358_v12, %v4902_v50  ;;  %v3698_v55 = vpop.f32.mrb[157].mxu1 }
 0x30e   :  { %v7592_v3 = vadd.f32 %v5060_v63, %v3481_v15  ;;  %v3483_v41 = vpop.f32.mrb[93].mxu0  ;;  %v7595_v58 = vadd.f32 %v7346_v56, %v3698_v55  ;;  %v4903_v19 = vpop.f32.mrb[158].mxu1 }
 0x30f   :  { %v4000_v61 = vadd.f32 %v3999_v42, %v3937_v4  ;;  %v3867_v43 = vadd.f32 %v3866_v13, %v7569_v62  ;;  %v3484_v35 = vpop.f32.mrb[94].mxu0  ;;  %v7601_v12 = vadd.f32 %v7362_v18, %v4903_v19  ;;  %v3701_v32 = vpop.f32.mrb[159].mxu1  ;;  %v5064_v42 = vadd.f32 %v7116_v26, %v7270_v29 }
 0x310   :  { %v3939_v20 = vmul.f32 %v7595_v58, %v7595_v58  ;;  %v7605_v27 = vadd.f32 %v5062_v52, %v3484_v35  ;;  %v3486_v63 = vpop.f32.mrb[95].mxu0  ;;  %v7608_v56 = vadd.f32 %v7350_v8, %v3701_v32  ;;  %v3941_v52 = vmul.f32 %v7588_v9, %v7588_v9 }
 0x311   :  { %9117 = vst [vmem:[#allocation21_spill] sm:$0xff] %v7601_v12  ;;  %v3868_v50 = vadd.f32 %v3867_v43, %v7595_v58  ;;  %v4001_v15 = vadd.f32 %v4000_v61, %v3938_v39  ;;  %v9118_v61 = vld [vmem:[#allocation2_spill] sm:$0xff] }
 0x312   :  { %v3940_v4 = vmul.f32 %v7608_v56, %v7608_v56  ;;  %v5066_v35 = vadd.f32 %v7116_v26, %v9118_v61 }
 0x313   :  { %v4002_v13 = vadd.f32 %v4001_v15, %v3939_v20  ;;  %v3869_v18 = vadd.f32 %v3868_v50, %v7608_v56  ;;  %v3942_v50 = vmul.f32 %v7601_v12, %v7601_v12 }
 0x314   :  { %v4906_v55 = vpop.f32.mrb[160].mxu1 }
 0x315   :  { %v3870_v41 = vadd.f32 %v3869_v18, %v7588_v9  ;;  %v4003_v8 = vadd.f32 %v4002_v13, %v3940_v4  ;;  %v3489_v19 = vpop.f32.mrb[96].mxu0  ;;  %v7620_v43 = vadd.f32 %v7402_v54, %v4906_v55  ;;  %v3714_v39 = vpop.f32.mrb[161].mxu1 }
 0x316   :  { %v7624_v32 = vadd.f32 %v5064_v42, %v3489_v19  ;;  %v3491_v20 = vpop.f32.mrb[97].mxu0  ;;  %v7627_v29 = vadd.f32 %v7371_v23, %v3714_v39  ;;  %v4907_v63 = vpop.f32.mrb[162].mxu1  ;;  %v9120_v23 = vld [vmem:[#allocation19_spill] sm:$0xff] }
 0x317   :  { %v4004_v15 = vadd.f32 %v4003_v8, %v3941_v52  ;;  %v3871_v4 = vadd.f32 %v3870_v41, %v7601_v12  ;;  %v3492_v13 = vpop.f32.mrb[98].mxu0  ;;  %v7633_v54 = vadd.f32 %v7414_v60, %v4907_v63  ;;  %v3717_v18 = vpop.f32.mrb[163].mxu1  ;;  %v9122_v8 = vld [vmem:[#allocation3_spill] sm:$0xff] }
 0x318   :  { %v3943_v42 = vmul.f32 %v7627_v29, %v7627_v29  ;;  %v7637_v55 = vadd.f32 %v5066_v35, %v3492_v13  ;;  %v3494_v19 = vpop.f32.mrb[99].mxu0  ;;  %v7640_v39 = vadd.f32 %v9120_v23, %v3717_v18  ;;  %v5068_v63 = vadd.f32 %v7116_v26, %v9122_v8 }
 0x319   :  { %9119 = vst [vmem:[#allocation2_spill] sm:$0xff] %v7633_v54  ;;  %v3872_v61 = vadd.f32 %v3871_v4, %v7627_v29  ;;  %v4005_v20 = vadd.f32 %v4004_v15, %v3942_v50  ;;  %v3945_v35 = vmul.f32 %v7620_v43, %v7620_v43  ;;  %v9124_v15 = vld [vmem:[#allocation4_spill] sm:$0xff] }
 0x31a   :  { %9121 = vst [vmem:[#allocation19_spill] sm:$0xff] %v7640_v39  ;;  %v3944_v52 = vmul.f32 %v7640_v39, %v7640_v39 }
 0x31b   :  { %v4006_v41 = vadd.f32 %v4005_v20, %v3943_v42  ;;  %v3873_v60 = vadd.f32 %v3872_v61, %v7640_v39  ;;  %v5070_v42 = vadd.f32 %v7116_v26, %v9124_v15  ;;  %v3946_v39 = vmul.f32 %v7633_v54, %v7633_v54 }
 0x31c   :  { %v4910_v12 = vpop.f32.mrb[164].mxu1 }
 0x31d   :  { %v3874_v13 = vadd.f32 %v3873_v60, %v7620_v43  ;;  %v4007_v18 = vadd.f32 %v4006_v41, %v3944_v52  ;;  %v3497_v19 = vpop.f32.mrb[100].mxu0  ;;  %v7652_v4 = vadd.f32 %v7464_v17, %v4910_v12  ;;  %v3730_v50 = vpop.f32.mrb[165].mxu1 }
 0x31e   :  { %v7656_v23 = vadd.f32 %v5068_v63, %v3497_v19  ;;  %v3499_v61 = vpop.f32.mrb[101].mxu0  ;;  %v7659_v20 = vadd.f32 %v7432_v40, %v3730_v50  ;;  %v4911_v8 = vpop.f32.mrb[166].mxu1 }
 0x31f   :  { %9123 = vst [vmem:[#allocation3_spill] sm:$0xff] %v7652_v4  ;;  %v4008_v60 = vadd.f32 %v4007_v18, %v3945_v35  ;;  %v3875_v52 = vadd.f32 %v3874_v13, %v7633_v54  ;;  %v3500_v41 = vpop.f32.mrb[102].mxu0  ;;  %v7665_v17 = vadd.f32 %v7477_v21, %v4911_v8  ;;  %v3733_v12 = vpop.f32.mrb[167].mxu1  ;;  %v9126_v18 = vld [vmem:[#allocation5_spill] sm:$0xff] }
 0x320   :  { %v3947_v63 = vmul.f32 %v7659_v20, %v7659_v20  ;;  %v7669_v19 = vadd.f32 %v5070_v42, %v3500_v41  ;;  %v3502_v15 = vpop.f32.mrb[103].mxu0  ;;  %v7672_v40 = vadd.f32 %v7445_v14, %v3733_v12  ;;  %v5072_v8 = vadd.f32 %v7116_v26, %v9126_v18 }
 0x321   :  { %9125 = vst [vmem:[#allocation4_spill] sm:$0xff] %v7665_v17  ;;  %v3876_v50 = vadd.f32 %v3875_v52, %v7659_v20  ;;  %v4009_v61 = vadd.f32 %v4008_v60, %v3946_v39  ;;  %v3949_v42 = vmul.f32 %v7652_v4, %v7652_v4  ;;  %v7689_v60 = vld [vmem:[%s9044_s2] ss:$0 sm:$0xff] }
 0x322   :  { %v3948_v35 = vmul.f32 %v7672_v40, %v7672_v40 }
 0x323   :  { %v4010_v13 = vadd.f32 %v4009_v61, %v3947_v63  ;;  %v3877_v21 = vadd.f32 %v3876_v50, %v7672_v40  ;;  %v9127_v63 = vld [vmem:[#allocation6_spill] sm:$0xff] }
 0x324   :  { %v4914_v54 = vpop.f32.mrb[168].mxu1  ;;  %v5074_v26 = vadd.f32 %v7689_v60, %v9127_v63 }
 0x325   :  { %v3878_v41 = vadd.f32 %v3877_v21, %v7652_v4  ;;  %v4011_v14 = vadd.f32 %v4010_v13, %v3948_v35  ;;  %v3505_v12 = vpop.f32.mrb[104].mxu0  ;;  %v7684_v52 = vadd.f32 %v7528_v53, %v4914_v54  ;;  %v3746_v39 = vpop.f32.mrb[169].mxu1  ;;  %v3950_v53 = vmul.f32 %v7665_v17, %v7665_v17 }
 0x326   :  { %v7693_v15 = vadd.f32 %v5072_v8, %v3505_v12  ;;  %v3507_v50 = vpop.f32.mrb[105].mxu0  ;;  %v7696_v61 = vadd.f32 %v7496_v1, %v3746_v39  ;;  %v4915_v35 = vpop.f32.mrb[170].mxu1 }
 0x327   :  { %v4012_v54 = vadd.f32 %v4011_v14, %v3949_v42  ;;  %v3879_v13 = vadd.f32 %v3878_v41, %v7665_v17  ;;  %v3508_v21 = vpop.f32.mrb[106].mxu0  ;;  %v7702_v18 = vadd.f32 %v7541_v48, %v4915_v35  ;;  %v3749_v4 = vpop.f32.mrb[171].mxu1  ;;  %v9130_v14 = vld [vmem:[#allocation7_spill] sm:$0xff] }
 0x328   :  { %9128 = vst [vmem:[#allocation5_spill] sm:$0xff] %v7696_v61  ;;  %v3951_v8 = vmul.f32 %v7696_v61, %v7696_v61  ;;  %v7706_v12 = vadd.f32 %v5074_v26, %v3508_v21  ;;  %v3510_v63 = vpop.f32.mrb[107].mxu0  ;;  %v7709_v1 = vadd.f32 %v7509_v33, %v3749_v4  ;;  %v5076_v35 = vadd.f32 %v7689_v60, %v9130_v14 }
 0x329   :  { %v3880_v39 = vadd.f32 %v3879_v13, %v7696_v61  ;;  %v4013_v50 = vadd.f32 %v4012_v54, %v3950_v53  ;;  %v3953_v26 = vmul.f32 %v7684_v52, %v7684_v52  ;;  %v9131_v54 = vld [vmem:[#allocation8_spill] sm:$0xff] }
 0x32a   :  { %9129 = vst [vmem:[#allocation6_spill] sm:$0xff] %v7709_v1  ;;  %v3952_v42 = vmul.f32 %v7709_v1, %v7709_v1 }
 0x32b   :  { %v4014_v41 = vadd.f32 %v4013_v50, %v3951_v8  ;;  %v3881_v48 = vadd.f32 %v3880_v39, %v7709_v1  ;;  %v5078_v8 = vadd.f32 %v7689_v60, %v9131_v54  ;;  %v3954_v1 = vmul.f32 %v7702_v18, %v7702_v18 }
 0x32c   :  { %v4918_v17 = vpop.f32.mrb[172].mxu1 }
 0x32d   :  { %v3882_v21 = vadd.f32 %v3881_v48, %v7684_v52  ;;  %v4015_v33 = vadd.f32 %v4014_v41, %v3952_v42  ;;  %v3513_v4 = vpop.f32.mrb[108].mxu0  ;;  %v7721_v13 = vadd.f32 %v7592_v3, %v4918_v17  ;;  %v3762_v53 = vpop.f32.mrb[173].mxu1 }
 0x32e   :  { %v5077_v63 = vadd.f32 %v5076_v35, %v3513_v4  ;;  %v3515_v39 = vpop.f32.mrb[109].mxu0  ;;  %v7726_v50 = vadd.f32 %v7560_v36, %v3762_v53  ;;  %v4919_v14 = vpop.f32.mrb[174].mxu1 }
 0x32f   :  { %v4016_v61 = vadd.f32 %v4015_v33, %v3953_v26  ;;  %v3883_v42 = vadd.f32 %v3882_v21, %v7702_v18  ;;  %v3516_v41 = vpop.f32.mrb[110].mxu0  ;;  %v7732_v3 = vadd.f32 %v7605_v27, %v4919_v14  ;;  %v3765_v17 = vpop.f32.mrb[175].mxu1  ;;  %v9134_v27 = vld [vmem:[#allocation9_spill] sm:$0xff] }
 0x330   :  { %9132 = vst [vmem:[#allocation7_spill] sm:$0xff] %v7726_v50  ;;  %v3955_v48 = vmul.f32 %v7726_v50, %v7726_v50  ;;  %v5079_v35 = vadd.f32 %v5078_v8, %v3516_v41  ;;  %v3518_v4 = vpop.f32.mrb[111].mxu0  ;;  %v7737_v36 = vadd.f32 %v7573_v45, %v3765_v17  ;;  %v5080_v39 = vadd.f32 %v7689_v60, %v9134_v27 }
 0x331   :  { %v3884_v53 = vadd.f32 %v3883_v42, %v7726_v50  ;;  %v4017_v54 = vadd.f32 %v4016_v61, %v3954_v1  ;;  %v3957_v8 = vmul.f32 %v7721_v13, %v7721_v13  ;;  %v9135_v1 = vld [vmem:[#allocation10_spill] sm:$0xff] }
 0x332   :  { %9133 = vst [vmem:[#allocation8_spill] sm:$0xff] %v7737_v36  ;;  %v3956_v26 = vmul.f32 %v7737_v36, %v7737_v36 }
 0x333   :  { %v4018_v21 = vadd.f32 %v4017_v54, %v3955_v48  ;;  %v3885_v33 = vadd.f32 %v3884_v53, %v7737_v36  ;;  %v5082_v48 = vadd.f32 %v7689_v60, %v9135_v1  ;;  %v3958_v36 = vmul.f32 %v7732_v3, %v7732_v3 }
 0x334   :  { %v4922_v14 = vpop.f32.mrb[176].mxu1 }
 0x335   :  { %v3886_v41 = vadd.f32 %v3885_v33, %v7721_v13  ;;  %v4019_v45 = vadd.f32 %v4018_v21, %v3956_v26  ;;  %v3521_v17 = vpop.f32.mrb[112].mxu0  ;;  %v7749_v42 = vadd.f32 %v7656_v23, %v4922_v14  ;;  %v3778_v61 = vpop.f32.mrb[177].mxu1 }
 0x336   :  { %v5081_v4 = vadd.f32 %v5080_v39, %v3521_v17  ;;  %v3523_v53 = vpop.f32.mrb[113].mxu0  ;;  %v7754_v54 = vadd.f32 %v7624_v32, %v3778_v61  ;;  %v4923_v27 = vpop.f32.mrb[178].mxu1 }
 0x337   :  { %v4020_v50 = vadd.f32 %v4019_v45, %v3957_v8  ;;  %v3887_v26 = vadd.f32 %v3886_v41, %v7732_v3  ;;  %v3524_v21 = vpop.f32.mrb[114].mxu0  ;;  %v7760_v23 = vadd.f32 %v7669_v19, %v4923_v27  ;;  %v3781_v33 = vpop.f32.mrb[179].mxu1  ;;  %v9139_v19 = vld [vmem:[#allocation11_spill] sm:$0xff] }
 0x338   :  { %9136 = vst [vmem:[#allocation9_spill] sm:$0xff] %v7754_v54  ;;  %v3959_v14 = vmul.f32 %v7754_v54, %v7754_v54  ;;  %v5083_v39 = vadd.f32 %v5082_v48, %v3524_v21  ;;  %v3526_v17 = vpop.f32.mrb[115].mxu0  ;;  %v7765_v32 = vadd.f32 %v7637_v55, %v3781_v33  ;;  %v5084_v53 = vadd.f32 %v7689_v60, %v9139_v19 }
 0x339   :  { %9137 = vst [vmem:[#allocation10_spill] sm:$0xff] %v7760_v23  ;;  %v3888_v61 = vadd.f32 %v3887_v26, %v7754_v54  ;;  %v4021_v1 = vadd.f32 %v4020_v50, %v3958_v36  ;;  %v3961_v48 = vmul.f32 %v7749_v42, %v7749_v42  ;;  %v9141_v36 = vld [vmem:[#allocation12_spill] sm:$0xff] }
 0x33a   :  { %9138 = vst [vmem:[#allocation22_spill] sm:$0xff] %v7765_v32  ;;  %v3960_v8 = vmul.f32 %v7765_v32, %v7765_v32  ;;  %v5086_v26 = vadd.f32 %v7689_v60, %v9141_v36 }
 0x33b   :  { %v4022_v41 = vadd.f32 %v4021_v1, %v3959_v14  ;;  %v3889_v45 = vadd.f32 %v3888_v61, %v7765_v32  ;;  %v3962_v32 = vmul.f32 %v7760_v23, %v7760_v23 }
 0x33c   :  { %v4926_v27 = vpop.f32.mrb[180].mxu1 }
 0x33d   :  { %v3890_v21 = vadd.f32 %v3889_v45, %v7749_v42  ;;  %v4023_v55 = vadd.f32 %v4022_v41, %v3960_v8  ;;  %v3529_v33 = vpop.f32.mrb[116].mxu0  ;;  %v7776_v17 = vadd.f32 %v5077_v63, %v4926_v27  ;;  %v3794_v50 = vpop.f32.mrb[181].mxu1 }
 0x33e   :  { %v5085_v14 = vadd.f32 %v5084_v53, %v3529_v33  ;;  %v3531_v1 = vpop.f32.mrb[117].mxu0  ;;  %v7781_v61 = vadd.f32 %v7693_v15, %v3794_v50  ;;  %v4927_v19 = vpop.f32.mrb[182].mxu1 }
 0x33f   :  { %9140 = vst [vmem:[#allocation11_spill] sm:$0xff] %v7776_v17  ;;  %v4024_v54 = vadd.f32 %v4023_v55, %v3961_v48  ;;  %v3891_v45 = vadd.f32 %v3890_v21, %v7760_v23  ;;  %v3532_v8 = vpop.f32.mrb[118].mxu0  ;;  %v7786_v41 = vadd.f32 %v5079_v35, %v4927_v19  ;;  %v3797_v63 = vpop.f32.mrb[183].mxu1  ;;  %v9145_v35 = vld [vmem:[#allocation13_spill] sm:$0xff] }
 0x340   :  { %9142 = vst [vmem:[#allocation12_spill] sm:$0xff] %v7781_v61  ;;  %v3963_v27 = vmul.f32 %v7781_v61, %v7781_v61  ;;  %v5087_v36 = vadd.f32 %v5086_v26, %v3532_v8  ;;  %v3534_v53 = vpop.f32.mrb[119].mxu0  ;;  %v7791_v33 = vadd.f32 %v7706_v12, %v3797_v63  ;;  %v5088_v1 = vadd.f32 %v7689_v60, %v9145_v35 }
 0x341   :  { %9143 = vst [vmem:[#allocation23_spill] sm:$0xff] %v7786_v41  ;;  %v3892_v15 = vadd.f32 %v3891_v45, %v7781_v61  ;;  %v4025_v50 = vadd.f32 %v4024_v54, %v3962_v32  ;;  %v3965_v26 = vmul.f32 %v7776_v17, %v7776_v17  ;;  %v9147_v32 = vld [vmem:[#allocation14_spill] sm:$0xff]  ;;  %v3966_v35 = vmul.f32 %v7786_v41, %v7786_v41 }
 0x342   :  { %9144 = vst [vmem:[#allocation24_spill] sm:$0xff] %v7791_v33  ;;  %v3964_v48 = vmul.f32 %v7791_v33, %v7791_v33  ;;  %v5090_v45 = vadd.f32 %v7689_v60, %v9147_v32 }
 0x343   :  { %v4026_v55 = vadd.f32 %v4025_v50, %v3963_v27  ;;  %v3893_v21 = vadd.f32 %v3892_v15, %v7791_v33 }
 0x344   :  { %v4930_v19 = vpop.f32.mrb[184].mxu1 }
 0x345   :  { %v3894_v8 = vadd.f32 %v3893_v21, %v7776_v17  ;;  %v4027_v12 = vadd.f32 %v4026_v55, %v3964_v48  ;;  %v3537_v63 = vpop.f32.mrb[120].mxu0  ;;  %v7802_v53 = vadd.f32 %v5085_v14, %v4930_v19  ;;  %v3810_v54 = vpop.f32.mrb[185].mxu1 }
 0x346   :  { %v5089_v27 = vadd.f32 %v5088_v1, %v3537_v63  ;;  %v3539_v50 = vpop.f32.mrb[121].mxu0  ;;  %v7806_v15 = vadd.f32 %v5081_v4, %v3810_v54  ;;  %v4931_v33 = vpop.f32.mrb[186].mxu1 }
 0x347   :  { %9146 = vst [vmem:[#allocation13_spill] sm:$0xff] %v7802_v53  ;;  %v4028_v61 = vadd.f32 %v4027_v12, %v3965_v26  ;;  %v3895_v23 = vadd.f32 %v3894_v8, %v7786_v41  ;;  %v3540_v21 = vpop.f32.mrb[122].mxu0  ;;  %v7811_v48 = vadd.f32 %v5087_v36, %v4931_v33  ;;  %v3813_v14 = vpop.f32.mrb[187].mxu1  ;;  %v9151_v12 = vld [vmem:[#allocation15_spill] sm:$0xff]  ;;  %v3969_v50 = vmul.f32 %v7802_v53, %v7802_v53 }
 0x348   :  { %9148 = vst [vmem:[#allocation14_spill] sm:$0xff] %v7806_v15  ;;  %v3967_v55 = vmul.f32 %v7806_v15, %v7806_v15  ;;  %v5091_v19 = vadd.f32 %v5090_v45, %v3540_v21  ;;  %v3542_v32 = vpop.f32.mrb[123].mxu0  ;;  %v7815_v1 = vadd.f32 %v5083_v39, %v3813_v14  ;;  %v5092_v36 = vadd.f32 %v7689_v60, %v9151_v12 }
 0x349   :  { %9149 = vst [vmem:[#allocation25_spill] sm:$0xff] %v7811_v48  ;;  %v3896_v4 = vadd.f32 %v3895_v23, %v7806_v15  ;;  %v4029_v63 = vadd.f32 %v4028_v61, %v3966_v35  ;;  %v9152_v23 = vld [vmem:[#allocation16_spill] sm:$0xff] }
 0x34a   :  { %9150 = vst [vmem:[#allocation26_spill] sm:$0xff] %v7815_v1  ;;  %v3968_v54 = vmul.f32 %v7815_v1, %v7815_v1  ;;  %v5094_v61 = vadd.f32 %v7689_v60, %v9152_v23 }
 0x34b   :  { %v4030_v26 = vadd.f32 %v4029_v63, %v3967_v55  ;;  %v3897_v8 = vadd.f32 %v3896_v4, %v7815_v1  ;;  %v3970_v63 = vmul.f32 %v7811_v48, %v7811_v48 }
 0x34c   :  { %v4934_v33 = vpop.f32.mrb[188].mxu1 }
 0x34d   :  { %v3898_v45 = vadd.f32 %v3897_v8, %v7802_v53  ;;  %v4031_v39 = vadd.f32 %v4030_v26, %v3968_v54  ;;  %v3545_v21 = vpop.f32.mrb[124].mxu0  ;;  %v3826_v14 = vpop.f32.mrb[189].mxu1 }
 0x34e   :  { %v5093_v35 = vadd.f32 %v5092_v36, %v3545_v21  ;;  %v3547_v32 = vpop.f32.mrb[125].mxu0  ;;  %v7828_v55 = vadd.f32 %v5089_v27, %v3826_v14  ;;  %v4935_v4 = vpop.f32.mrb[190].mxu1 }
 0x34f   :  { %v4032_v12 = vadd.f32 %v4031_v39, %v3969_v50  ;;  %v3899_v1 = vadd.f32 %v3898_v45, %v7811_v48  ;;  %v3548_v15 = vpop.f32.mrb[126].mxu0  ;;  %v3829_v41 = vpop.f32.mrb[191].mxu1 }
 0x350   :  { %v7833_v8 = vadd.f32 %v5093_v35, %v4934_v33  ;;  %v3971_v54 = vmul.f32 %v7828_v55, %v7828_v55  ;;  %v5095_v26 = vadd.f32 %v5094_v61, %v3548_v15  ;;  %v3550_v60 = vpop.f32.mrb[127].mxu0  ;;  %v7837_v36 = vadd.f32 %v5091_v19, %v3829_v41 }
 0x351   :  { %v3900_v27 = vadd.f32 %v3899_v1, %v7828_v55  ;;  %v4033_v21 = vadd.f32 %v4032_v12, %v3970_v63 }
 0x352   :  { %9153 = vst [vmem:[#allocation15_spill] sm:$0xff] %v7833_v8  ;;  %v7840_v14 = vadd.f32 %v5095_v26, %v4935_v4  ;;  %v3972_v50 = vmul.f32 %v7837_v36, %v7837_v36  ;;  %v3973_v33 = vmul.f32 %v7833_v8, %v7833_v8 }
 0x353   :  { %v4034_v45 = vadd.f32 %v4033_v21, %v3971_v54  ;;  %v3901_v39 = vadd.f32 %v3900_v27, %v7837_v36 }
 0x354   :  { %v3974_v41 = vmul.f32 %v7840_v14, %v7840_v14 }
 0x355   :  { %v3902_v23 = vadd.f32 %v3901_v39, %v7833_v8  ;;  %v4035_v15 = vadd.f32 %v4034_v45, %v3972_v50 }
 0x357   :  { %v3903_v19 = vadd.f32 %v3902_v23, %v7840_v14  ;;  %v4036_v1 = vadd.f32 %v4035_v15, %v3973_v33  ;;  %v4056_v33 = vlaneseq }
 0x359   :  { %v3904_v61 = vrot.slane %v3903_v19, 4  ;;  %v4037_v35 = vadd.f32 %v4036_v1, %v3974_v41  ;;  %v7851_v15 = vshrl.u32 %v4056_v33, 7  ;;  %v4050_v41 = vld [vmem:[%s9045_s3] sm:$0x1] }
 0x35b   :  { %v3905_v32 = vadd.f32 %v3904_v61, %v3903_v19  ;;  %v4038_v4 = vrot.slane %v4037_v35, 4  ;;  %v9072_v19 = vsub.s32 0, %v7851_v15 }
 0x35d   :  { %v3906_v63 = vrot.slane %v3905_v32, 2  ;;  %v4039_v12 = vadd.f32 %v4038_v4, %v4037_v35  ;;  %v9154_v35 = vld [vmem:[#allocation18_spill] sm:$0xff]  ;;  %v9155_v4 = vld [vmem:[#allocation20_spill] sm:$0xff] }
 0x35f   :  { %v3907_v54 = vadd.f32 %v3906_v63, %v3905_v32  ;;  %v4040_v26 = vrot.slane %v4039_v12, 2 }
 0x361   :  { %v3908_v60 = vrot.slane %v3907_v54, 1  ;;  %v4041_v27 = vadd.f32 %v4040_v26, %v4039_v12  ;;  %v9156_v12 = vld [vmem:[#allocation17_spill] sm:$0xff] }
 0x363   :  { %v3909_v21 = vadd.f32 %v3908_v60, %v3907_v54  ;;  %v4042_v48 = vrot.slane %v4041_v27, 1 }
 0x365   :  { %v3910_v39 = vmul.f32 0.001953125, %v3909_v21  ;;  %v4043_v50 = vadd.f32 %v4042_v48, %v4041_v27  ;;  %v7860_v48 = vld [vmem:[%s9046_s4] sm:$0x1] }
 0x367   :  { %v4044_v45 = vmul.f32 0.001953125, %v4043_v50  ;;  %v4045_v53 = vmul.f32 %v3910_v39, %v3910_v39  ;;  %v9157_v50 = vld [vmem:[#allocation21_spill] sm:$0xff] }
 0x369   :  { %v4046_v17 = vsub.f32 %v4044_v45, %v4045_v53  ;;  %v9158_v45 = vld [vmem:[#allocation19_spill] sm:$0xff] }
 0x36b   :  { %v4047_v8 = vmax.f32 %v4046_v17, 0.0 }
 0x36d   :  { %v4048_v23 = vadd.f32 1e-05, %v4047_v8 }
 0x36f   :  { %5841 = vrsqrt.f32 %v4048_v23  ;;  %v9159_v23 = vld [vmem:[#allocation2_spill] sm:$0xff] }
 0x379   :  { %v5842_v1 = vpop.eup %5841 }
 0x37a   :  { %v4051_v61 = vmul.f32 %v5842_v1, %v4050_v41  ;;  %v9160_v41 = vld [vmem:[#allocation3_spill] sm:$0xff] }
 0x37c   :  { %v7862_v53 = vmul.f32 %v4051_v61, %v3910_v39  ;;  %v7866_v17 = vrot.slane %v4051_v61, %v9072_v19  ;;  %v9161_v61 = vld [vmem:[#allocation4_spill] sm:$0xff] }
 0x37d   :  { %v9174_v19 = vld [vmem:[#allocation12_spill] sm:$0xff] }
 0x37e   :  { %v4054_v8 = vsub.f32 %v7860_v48, %v7862_v53  ;;  %v7872_v32 = vmul.f32 %v7866_v17, %v9154_v35  ;;  %v7876_v63 = vmul.f32 %v7866_v17, %v9155_v4  ;;  %v7880_v54 = vmul.f32 %v7866_v17, %v9156_v12  ;;  %v9162_v48 = vld [vmem:[#allocation5_spill] sm:$0xff]  ;;  %v9163_v35 = vld [vmem:[#allocation6_spill] sm:$0xff]  ;;  %v9164_v12 = vld [vmem:[#allocation7_spill] sm:$0xff] }
 0x37f   :  { %v7884_v26 = vmul.f32 %v7866_v17, %v7377_v57  ;;  %v7888_v60 = vmul.f32 %v7866_v17, %v7405_v38  ;;  %v7892_v27 = vmul.f32 %v7866_v17, %v7417_v34  ;;  %v7896_v21 = vmul.f32 %v7866_v17, %v7400_v30 }
 0x380   :  { %v7900_v39 = vmul.f32 %v7866_v17, %v7409_v7  ;;  %v7904_v57 = vmul.f32 %v7866_v17, %v7435_v24  ;;  %v7908_v38 = vmul.f32 %v7866_v17, %v7448_v49  ;;  %v7912_v34 = vmul.f32 %v7866_v17, %v7428_v6 }
 0x381   :  { %v7916_v30 = vmul.f32 %v7866_v17, %v7441_v11  ;;  %v7920_v7 = vmul.f32 %v7866_v17, %v7467_v51  ;;  %v7924_v24 = vmul.f32 %v7866_v17, %v7480_v2  ;;  %v7928_v49 = vmul.f32 %v7866_v17, %v7460_v47 }
 0x382   :  { %v7932_v6 = vmul.f32 %v7866_v17, %v7473_v10  ;;  %v7936_v11 = vmul.f32 %v7866_v17, %v7499_v28  ;;  %v7940_v51 = vmul.f32 %v7866_v17, %v7512_v46  ;;  %v7944_v2 = vmul.f32 %v7866_v17, %v7492_v0 }
 0x383   :  { %v7948_v47 = vmul.f32 %v7866_v17, %v7505_v44  ;;  %v7952_v10 = vmul.f32 %v7866_v17, %v7531_v22  ;;  %v7956_v28 = vmul.f32 %v7866_v17, %v7544_v59  ;;  %v7960_v46 = vmul.f32 %v7866_v17, %v7524_v37 }
 0x384   :  { %v7964_v0 = vmul.f32 %v7866_v17, %v7537_v25  ;;  %v7968_v44 = vmul.f32 %v7866_v17, %v7563_v31  ;;  %v7972_v22 = vmul.f32 %v7866_v17, %v7576_v16  ;;  %v7976_v59 = vmul.f32 %v7866_v17, %v7556_v5 }
 0x385   :  { %v7980_v37 = vmul.f32 %v7866_v17, %v7569_v62  ;;  %v7984_v25 = vmul.f32 %v7866_v17, %v7595_v58  ;;  %v7988_v31 = vmul.f32 %v7866_v17, %v7608_v56  ;;  %v7992_v16 = vmul.f32 %v7866_v17, %v7588_v9 }
 0x386   :  { %v7996_v5 = vmul.f32 %v7866_v17, %v9157_v50  ;;  %v8000_v62 = vmul.f32 %v7866_v17, %v7627_v29  ;;  %v8004_v58 = vmul.f32 %v7866_v17, %v9158_v45  ;;  %v8008_v56 = vmul.f32 %v7866_v17, %v7620_v43  ;;  %v9165_v45 = vld [vmem:[#allocation8_spill] sm:$0xff] }
 0x387   :  { %v8012_v9 = vmul.f32 %v7866_v17, %v9159_v23  ;;  %v8016_v33 = vmul.f32 %v7866_v17, %v7659_v20  ;;  %v8020_v29 = vmul.f32 %v7866_v17, %v7672_v40  ;;  %v8024_v1 = vmul.f32 %v7866_v17, %v9160_v41 }
 0x388   :  { %v8028_v43 = vmul.f32 %v7866_v17, %v9161_v61  ;;  %v8032_v53 = vmul.f32 %v7866_v17, %v9162_v48  ;;  %v8036_v20 = vmul.f32 %v7866_v17, %v9163_v35  ;;  %v8040_v40 = vmul.f32 %v7866_v17, %v7684_v52  ;;  %v9167_v61 = vld [vmem:[#allocation9_spill] sm:$0xff]  ;;  %v9169_v48 = vld [vmem:[#allocation22_spill] sm:$0xff] }
 0x389   :  { %v8044_v4 = vmul.f32 %v7866_v17, %v7702_v18  ;;  %v8048_v50 = vmul.f32 %v7866_v17, %v9164_v12  ;;  %v8052_v23 = vmul.f32 %v7866_v17, %v9165_v45  ;;  %v8056_v41 = vmul.f32 %v7866_v17, %v7721_v13  ;;  %v9172_v45 = vld [vmem:[#allocation10_spill] sm:$0xff] }
 0x38a   :  { %v8060_v52 = vmul.f32 %v7866_v17, %v7732_v3  ;;  %v8064_v18 = vmul.f32 %v7866_v17, %v9167_v61  ;;  %v8068_v35 = vmul.f32 %v7866_v17, %v9169_v48  ;;  %v8072_v12 = vmul.f32 %v7866_v17, %v7749_v42 }
 0x38b   :  { %v8076_v13 = vmul.f32 %v7866_v17, %v9172_v45  ;;  %v8080_v3 = vmul.f32 %v7866_v17, %v9174_v19  ;;  %v8088_v48 = vmul.f32 %v7866_v17, %v7828_v55  ;;  %v8092_v42 = vmul.f32 %v7866_v17, %v7837_v36  ;;  %v9185_v36 = vld [vmem:[#allocation14_spill] sm:$0xff] }
 0x38c   :  { %9166 = vst [vmem:[#allocation16_spill] sm:$0xff] %v8060_v52  ;;  %9168 = vst [vmem:[#allocation18_spill] sm:$0xff] %v8064_v18  ;;  %v9176_v52 = vld [vmem:[#allocation24_spill] sm:$0xff]  ;;  %v9184_v55 = vsub.s32 0, %v7851_v15  ;;  %v9188_v18 = vld [vmem:[#allocation25_spill] sm:$0xff] }
 0x38d   :  { %9170 = vst [vmem:[#allocation20_spill] sm:$0xff] %v8068_v35  ;;  %9171 = vst [vmem:[#allocation17_spill] sm:$0xff] %v8072_v12  ;;  %v8084_v61 = vmul.f32 %v7866_v17, %v9176_v52  ;;  %v9180_v12 = vld [vmem:[#allocation15_spill] sm:$0xff]  ;;  %v8104_v52 = vmul.f32 %v7866_v17, %v7840_v14 }
 0x38e   :  { %9173 = vst [vmem:[#allocation21_spill] sm:$0xff] %v8076_v13  ;;  %9175 = vst [vmem:[#allocation19_spill] sm:$0xff] %v8080_v3  ;;  %v8096_v45 = vmul.f32 %v7866_v17, %v9180_v12  ;;  %v9182_v13 = vld [vmem:[#allocation11_spill] sm:$0xff] }
 0x38f   :  { %9177 = vst [vmem:[#allocation2_spill] sm:$0xff] %v8084_v61  ;;  %9178 = vst [vmem:[#allocation3_spill] sm:$0xff] %v8088_v48  ;;  %v4115_v19 = vmul.f32 %v7866_v17, %v9182_v13  ;;  %v9183_v3 = vld [vmem:[#allocation23_spill] sm:$0xff]  ;;  %v8108_v48 = vrot.slane %v4054_v8, %v9184_v55  ;;  %v9186_v61 = vld [vmem:[#allocation26_spill] sm:$0xff] }
 0x390   :  { %9179 = vst [vmem:[#allocation4_spill] sm:$0xff] %v8092_v42  ;;  %9181 = vst [vmem:[#allocation5_spill] sm:$0xff] %v8096_v45  ;;  %v4116_v35 = vmul.f32 %v7866_v17, %v9183_v3  ;;  %v4117_v42 = vmul.f32 %v7866_v17, %v9185_v36  ;;  %v4118_v12 = vmul.f32 %v7866_v17, %v9186_v61  ;;  %v9187_v45 = vld [vmem:[#allocation13_spill] sm:$0xff] }
 0x391   :  { %v4119_v13 = vmul.f32 %v7866_v17, %v9187_v45  ;;  %v4120_v3 = vmul.f32 %v7866_v17, %v9188_v18  ;;  %v8120_v14 = vadd.f32 %v8108_v48, %v7872_v32  ;;  %v8124_v15 = vadd.f32 %v8108_v48, %v7876_v63 }
 0x392   :  { %v8128_v8 = vadd.f32 %v8108_v48, %v7880_v54  ;;  %v8132_v61 = vadd.f32 %v8108_v48, %v7884_v26  ;;  %v8136_v45 = vadd.f32 %v8108_v48, %v7888_v60  ;;  %v8140_v17 = vadd.f32 %v8108_v48, %v7892_v27 }
 0x393   :  { %v8144_v32 = vadd.f32 %v8108_v48, %v7896_v21  ;;  %v8148_v63 = vadd.f32 %v8108_v48, %v7900_v39  ;;  %v8152_v54 = vadd.f32 %v8108_v48, %v7904_v57  ;;  %v8156_v26 = vadd.f32 %v8108_v48, %v7908_v38  ;;  %v9193_v18 = vld [vmem:[#allocation18_spill] sm:$0xff] }
 0x394   :  { %v8160_v60 = vadd.f32 %v8108_v48, %v7912_v34  ;;  %v8164_v27 = vadd.f32 %v8108_v48, %v7916_v30  ;;  %v8168_v21 = vadd.f32 %v8108_v48, %v7920_v7  ;;  %v8172_v39 = vadd.f32 %v8108_v48, %v7924_v24  ;;  %v9195_v55 = vld [vmem:[#allocation20_spill] sm:$0xff]  ;;  %v9197_v36 = vld [vmem:[#allocation17_spill] sm:$0xff] }
 0x395   :  { %v8176_v57 = vadd.f32 %v8108_v48, %v7928_v49  ;;  %v8180_v38 = vadd.f32 %v8108_v48, %v7932_v6  ;;  %v8184_v34 = vadd.f32 %v8108_v48, %v7936_v11  ;;  %v8188_v30 = vadd.f32 %v8108_v48, %v7940_v51 }
 0x396   :  { %v8192_v7 = vadd.f32 %v8108_v48, %v7944_v2  ;;  %v8196_v24 = vadd.f32 %v8108_v48, %v7948_v47  ;;  %v8200_v49 = vadd.f32 %v8108_v48, %v7952_v10  ;;  %v8204_v6 = vadd.f32 %v8108_v48, %v7956_v28 }
 0x397   :  { %v8208_v11 = vadd.f32 %v8108_v48, %v7960_v46  ;;  %v8212_v51 = vadd.f32 %v8108_v48, %v7964_v0  ;;  %v8216_v2 = vadd.f32 %v8108_v48, %v7968_v44  ;;  %v8220_v47 = vadd.f32 %v8108_v48, %v7972_v22 }
 0x398   :  { %v8224_v10 = vadd.f32 %v8108_v48, %v7976_v59  ;;  %v8228_v28 = vadd.f32 %v8108_v48, %v7980_v37  ;;  %v8232_v46 = vadd.f32 %v8108_v48, %v7984_v25  ;;  %v8236_v0 = vadd.f32 %v8108_v48, %v7988_v31 }
 0x399   :  { %v8240_v44 = vadd.f32 %v8108_v48, %v7992_v16  ;;  %v8244_v22 = vadd.f32 %v8108_v48, %v7996_v5  ;;  %v8248_v59 = vadd.f32 %v8108_v48, %v8000_v62  ;;  %v8252_v37 = vadd.f32 %v8108_v48, %v8004_v58 }
 0x39a   :  { %v8256_v25 = vadd.f32 %v8108_v48, %v8008_v56  ;;  %v8260_v31 = vadd.f32 %v8108_v48, %v8012_v9  ;;  %v8264_v16 = vadd.f32 %v8108_v48, %v8016_v33  ;;  %v8268_v5 = vadd.f32 %v8108_v48, %v8020_v29 }
 0x39b   :  { %v8272_v62 = vadd.f32 %v8108_v48, %v8024_v1  ;;  %v8276_v58 = vadd.f32 %v8108_v48, %v8028_v43  ;;  %v8280_v56 = vadd.f32 %v8108_v48, %v8032_v53  ;;  %v8284_v9 = vadd.f32 %v8108_v48, %v8036_v20  ;;  %v9191_v20 = vld [vmem:[#allocation16_spill] sm:$0xff] }
 0x39c   :  { %v8288_v33 = vadd.f32 %v8108_v48, %v8040_v40  ;;  %v8292_v29 = vadd.f32 %v8108_v48, %v8044_v4  ;;  %v8296_v1 = vadd.f32 %v8108_v48, %v8048_v50  ;;  %v8300_v43 = vadd.f32 %v8108_v48, %v8052_v23 }
 0x39d   :  { %v8304_v53 = vadd.f32 %v8108_v48, %v8056_v41  ;;  %v8308_v40 = vadd.f32 %v8108_v48, %v9191_v20  ;;  %v8312_v4 = vadd.f32 %v8108_v48, %v9193_v18  ;;  %v8316_v50 = vadd.f32 %v8108_v48, %v9195_v55 }
 0x39e   :  { %9189 = vst [vmem:[#allocation6_spill] sm:$0xff] %v8300_v43  ;;  %v8320_v23 = vadd.f32 %v8108_v48, %v9197_v36  ;;  %v9198_v43 = vld [vmem:[#allocation21_spill] sm:$0xff]  ;;  %v8338_v55 = vadd.f32 %v8108_v48, %v4116_v35  ;;  %v8341_v36 = vadd.f32 %v8108_v48, %v4117_v42  ;;  %vm4195_vm0 = vcmp.gt.f32.partialorder %v8120_v14, 0.0 }
 0x39f   :  { %9190 = vst [vmem:[#allocation7_spill] sm:$0xff] %v8304_v53  ;;  %9192 = vst [vmem:[#allocation8_spill] sm:$0xff] %v8308_v40  ;;  %v8324_v41 = vadd.f32 %v8108_v48, %v9198_v43  ;;  %v9200_v53 = vld [vmem:[#allocation19_spill] sm:$0xff]  ;;  %v9202_v40 = vld [vmem:[#allocation2_spill] sm:$0xff]  ;;  %v8344_v43 = vadd.f32 %v8108_v48, %v4118_v12  ;;  %v8366_v12 = vadd.f32 %v8108_v48, %v8104_v52  ;;  %vm4196_vm1 = vcmp.gt.f32.partialorder %v8124_v15, 0.0 }
 0x3a0   :  { %9194 = vst [vmem:[#allocation9_spill] sm:$0xff] %v8312_v4  ;;  %9196 = vst [vmem:[#allocation22_spill] sm:$0xff] %v8316_v50  ;;  %v8328_v20 = vadd.f32 %v8108_v48, %v9200_v53  ;;  %v8332_v18 = vadd.f32 %v8108_v48, %v9202_v40  ;;  %v8335_v4 = vadd.f32 %v8108_v48, %v4115_v19  ;;  %v9210_v40 = vld [vmem:[#allocation3_spill] sm:$0xff]  ;;  %v9212_v19 = vld [vmem:[#allocation4_spill] sm:$0xff]  ;;  %vm4197_vm2 = vcmp.gt.f32.partialorder %v8128_v8, 0.0 }
 0x3a1   :  { %9199 = vst [vmem:[#allocation10_spill] sm:$0xff] %v8324_v41  ;;  %9205 = vst [vmem:[#allocation11_spill] sm:$0xff] %v8338_v55  ;;  %v8347_v41 = vadd.f32 %v8108_v48, %v4119_v13  ;;  %v8350_v53 = vadd.f32 %v8108_v48, %v4120_v3  ;;  %v8358_v35 = vadd.f32 %v8108_v48, %v9212_v19  ;;  %v9214_v55 = vld [vmem:[#allocation5_spill] sm:$0xff]  ;;  %vm4198_vm3 = vcmp.gt.f32.partialorder %v8132_v61, 0.0 }
 0x3a2   :  { %9201 = vst [vmem:[#allocation12_spill] sm:$0xff] %v8328_v20  ;;  %9203 = vst [vmem:[#allocation24_spill] sm:$0xff] %v8332_v18  ;;  %v8354_v18 = vadd.f32 %v8108_v48, %v9210_v40  ;;  %v8362_v42 = vadd.f32 %v8108_v48, %v9214_v55  ;;  %vm4199_vm4 = vcmp.gt.f32.partialorder %v8136_v45, 0.0  ;;  %vm4200_vm5 = vcmp.gt.f32.partialorder %v8140_v17, 0.0 }
 0x3a3   :  { %9204 = vst [vmem:[#allocation15_spill] sm:$0xff] %v8335_v4  ;;  %9206 = vst [vmem:[#allocation23_spill] sm:$0xff] %v8341_v36  ;;  %vm4201_vm6 = vcmp.gt.f32.partialorder %v8144_v32, 0.0  ;;  %vm4202_vm7 = vcmp.gt.f32.partialorder %v8148_v63, 0.0  ;;  %vm4203_vm8 = vcmp.gt.f32.partialorder %v8152_v54, 0.0  ;;  %vm4204_vm9 = vcmp.gt.f32.partialorder %v8156_v26, 0.0 }
 0x3a4   :  { %9207 = vst [vmem:[#allocation14_spill] sm:$0xff] %v8344_v43  ;;  %9208 = vst [vmem:[#allocation26_spill] sm:$0xff] %v8347_v41  ;;  %v4259_v48 = vmul.f32 0.01, %v8120_v14  ;;  %v4260_v52 = vmul.f32 0.01, %v8124_v15 }
 0x3a5   :  { %9209 = vst [vmem:[#allocation13_spill] sm:$0xff] %v8350_v53  ;;  %9211 = vst [vmem:[#allocation25_spill] sm:$0xff] %v8354_v18  ;;  %v4261_v13 = vmul.f32 0.01, %v8128_v8  ;;  %vm4205_vm10 = vcmp.gt.f32.partialorder %v8160_v60, 0.0  ;;  %vm4206_vm11 = vcmp.gt.f32.partialorder %v8164_v27, 0.0 }
 0x3a6   :  { %9213 = vst [vmem:[#allocation16_spill] sm:$0xff] %v8358_v35  ;;  %9215 = vst [vmem:[#allocation18_spill] sm:$0xff] %v8362_v42  ;;  %v4262_v3 = vmul.f32 0.01, %v8132_v61  ;;  %v4263_v55 = vmul.f32 0.01, %v8136_v45  ;;  %v4323_v35 = vsel %vm4195_vm0, %v8120_v14, %v4259_v48  ;;  %v4324_v43 = vsel %vm4196_vm1, %v8124_v15, %v4260_v52 }
 0x3a7   :  { %9216 = vst [vmem:[#allocation20_spill] sm:$0xff] %v8366_v12  ;;  %v4264_v40 = vmul.f32 0.01, %v8140_v17  ;;  %v4265_v19 = vmul.f32 0.01, %v8144_v32  ;;  %vm4207_vm12 = vcmp.gt.f32.partialorder %v8168_v21, 0.0  ;;  %4387 = vst [vmem:[%s9047_s5] sm:$0xff] %v4323_v35  ;;  %v4325_v4 = vsel %vm4197_vm2, %v8128_v8, %v4261_v13 }
 0x3a8   :  { %v4266_v12 = vmul.f32 0.01, %v8148_v63  ;;  %v4267_v42 = vmul.f32 0.01, %v8152_v54  ;;  %v4268_v18 = vmul.f32 0.01, %v8156_v26  ;;  %v4326_v20 = vsel %vm4198_vm3, %v8132_v61, %v4262_v3 }
 0x3a9   :  { %v8395_v53 = vmul.f32 0.01, %v8160_v60  ;;  %v8398_v41 = vmul.f32 0.01, %v8164_v27  ;;  %vm4208_vm13 = vcmp.gt.f32.partialorder %v8172_v39, 0.0  ;;  %4388 = vst [vmem:[%s9047_s5 + $0x8] sm:$0xff] %v4324_v43 }
 0x3aa   :  { %v8408_v14 = vmul.f32 0.01, %v8168_v21  ;;  %v8411_v48 = vmul.f32 0.01, %v8172_v39  ;;  %v8414_v36 = vmul.f32 0.01, %v8176_v57 }
 0x3ab   :  { %vm4209_vm14 = vcmp.gt.f32.partialorder %v8176_v57, 0.0  ;;  %v8424_v15 = vmul.f32 0.01, %v8180_v38  ;;  %v8427_v35 = vmul.f32 0.01, %v8184_v34  ;;  %4389 = vst [vmem:[%s9047_s5 + $0x10] sm:$0xff] %v4325_v4 }
 0x3ac   :  { %v8430_v52 = vmul.f32 0.01, %v8188_v30  ;;  %vm4210_vm15 = vcmp.gt.f32.partialorder %v8180_v38, 0.0  ;;  %v8440_v8 = vmul.f32 0.01, %v8192_v7  ;;  %4390 = vst [vmem:[%s9047_s5 + $0x18] sm:$0xff] %v4326_v20 }
 0x3ad   :  { %v8443_v43 = vmul.f32 0.01, %v8196_v24  ;;  %v8446_v13 = vmul.f32 0.01, %v8200_v49  ;;  %vm4211_vm0 = vcmp.gt.f32.partialorder %v8184_v34, 0.0  ;;  %vm4212_vm1 = vcmp.gt.f32.partialorder %v8188_v30, 0.0 }
 0x3ae   :  { %9217 = vst [vmem:[#allocation17_spill] sm:$0xff] %v8430_v52  ;;  %v4327_v52 = vsel %vm4199_vm4, %v8136_v45, %v4263_v55  ;;  %v8456_v61 = vmul.f32 0.01, %v8204_v6  ;;  %v8459_v4 = vmul.f32 0.01, %v8208_v11  ;;  %vm4213_vm2 = vcmp.gt.f32.partialorder %v8192_v7, 0.0 }
 0x3af   :  { %9218 = vst [vmem:[#allocation21_spill] sm:$0xff] %v8446_v13  ;;  %v8462_v3 = vmul.f32 0.01, %v8212_v51  ;;  %v4328_v13 = vsel %vm4200_vm5, %v8140_v17, %v4264_v40  ;;  %4391 = vst [vmem:[%s9047_s5 + $0x20] sm:$0xff] %v4327_v52  ;;  %v8472_v45 = vmul.f32 0.01, %v8216_v2 }
 0x3b0   :  { %v8475_v20 = vmul.f32 0.01, %v8220_v47  ;;  %v8478_v55 = vmul.f32 0.01, %v8224_v10  ;;  %4392 = vst [vmem:[%s9047_s5 + $0x28] sm:$0xff] %v4328_v13  ;;  %vm4214_vm3 = vcmp.gt.f32.partialorder %v8196_v24, 0.0 }
 0x3b1   :  { %9219 = vst [vmem:[#allocation19_spill] sm:$0xff] %v8462_v3  ;;  %v4329_v3 = vsel %vm4201_vm6, %v8144_v32, %v4265_v19  ;;  %v8488_v17 = vmul.f32 0.01, %v8228_v28  ;;  %v8491_v40 = vmul.f32 0.01, %v8232_v46  ;;  %vm4217_vm6 = vcmp.gt.f32.partialorder %v8208_v11, 0.0 }
 0x3b2   :  { %9220 = vst [vmem:[#allocation2_spill] sm:$0xff] %v8478_v55  ;;  %v8494_v52 = vmul.f32 0.01, %v8236_v0  ;;  %v4330_v55 = vsel %vm4202_vm7, %v8148_v63, %v4266_v12  ;;  %4393 = vst [vmem:[%s9047_s5 + $0x30] sm:$0xff] %v4329_v3  ;;  %v8506_v32 = vmul.f32 0.01, %v8240_v44  ;;  %v4331_v63 = vsel %vm4203_vm8, %v8152_v54, %v4267_v42 }
 0x3b3   :  { %v8509_v19 = vmul.f32 0.01, %v8244_v22  ;;  %v8512_v13 = vmul.f32 0.01, %v8248_v59  ;;  %4394 = vst [vmem:[%s9047_s5 + $0x38] sm:$0xff] %v4330_v55  ;;  %v4332_v42 = vsel %vm4204_vm9, %v8156_v26, %v4268_v18  ;;  %4395 = vst [vmem:[%s9047_s5 + $0x40] sm:$0xff] %v4331_v63  ;;  %v4333_v18 = vsel %vm4205_vm10, %v8160_v60, %v8395_v53 }
 0x3b4   :  { %v8525_v12 = vmul.f32 0.01, %v8252_v37  ;;  %v8528_v3 = vmul.f32 0.01, %v8256_v25  ;;  %v8531_v54 = vmul.f32 0.01, %v8260_v31  ;;  %v4334_v53 = vsel %vm4206_vm11, %v8164_v27, %v8398_v41 }
 0x3b5   :  { %vm4221_vm8 = vcmp.gt.f32.partialorder %v8224_v10, 0.0  ;;  %v8544_v55 = vmul.f32 0.01, %v8264_v16  ;;  %v8550_v26 = vmul.f32 0.01, %v8272_v62  ;;  %4396 = vst [vmem:[%s9047_s5 + $0x48] sm:$0xff] %v4332_v42  ;;  %v4335_v41 = vsel %vm4207_vm12, %v8168_v21, %v8408_v14 }
 0x3b6   :  { %9221 = vst [vmem:[#allocation3_spill] sm:$0xff] %v8531_v54  ;;  %v8547_v54 = vmul.f32 0.01, %v8268_v5  ;;  %vm4225_vm9 = vcmp.gt.f32.partialorder %v8240_v44, 0.0  ;;  %v8564_v63 = vmul.f32 0.01, %v8276_v58  ;;  %v4336_v14 = vsel %vm4208_vm13, %v8172_v39, %v8411_v48 }
 0x3b7   :  { %9222 = vst [vmem:[#allocation4_spill] sm:$0xff] %v8550_v26  ;;  %v8567_v26 = vmul.f32 0.01, %v8280_v56  ;;  %v8570_v60 = vmul.f32 0.01, %v8284_v9  ;;  %4397 = vst [vmem:[%s9047_s5 + $0x50] sm:$0xff] %v4333_v18  ;;  %v4337_v48 = vsel %vm4209_vm14, %v8176_v57, %v8414_v36  ;;  %v4338_v36 = vsel %vm4210_vm15, %v8180_v38, %v8424_v15 }
 0x3b8   :  { %vm4229_vm10 = vcmp.gt.f32.partialorder %v8256_v25, 0.0  ;;  %v8584_v42 = vmul.f32 0.01, %v8288_v33  ;;  %v8590_v27 = vmul.f32 0.01, %v8296_v1  ;;  %4398 = vst [vmem:[%s9047_s5 + $0x58] sm:$0xff] %v4334_v53  ;;  %v4339_v15 = vsel %vm4211_vm0, %v8184_v34, %v8427_v35 }
 0x3b9   :  { %9223 = vst [vmem:[#allocation5_spill] sm:$0xff] %v8567_v26  ;;  %9224 = vst [vmem:[#allocation27_spill] sm:$0xff] %v8570_v60  ;;  %v8587_v60 = vmul.f32 0.01, %v8292_v29  ;;  %vm4233_vm11 = vcmp.gt.f32.partialorder %v8272_v62, 0.0  ;;  %v9228_v18 = vld [vmem:[#allocation6_spill] sm:$0xff] }
 0x3ba   :  { %9225 = vst [vmem:[#allocation28_spill] sm:$0xff] %v8584_v42  ;;  %9227 = vst [vmem:[#allocation30_spill] sm:$0xff] %v8590_v27  ;;  %v9229_v27 = vld [vmem:[#allocation7_spill] sm:$0xff]  ;;  %v9231_v26 = vld [vmem:[#allocation8_spill] sm:$0xff]  ;;  %vm4237_vm12 = vcmp.gt.f32.partialorder %v8288_v33, 0.0  ;;  %vm4245_vm14 = vcmp.gt.f32.partialorder %v8320_v23, 0.0 }
 0x3bb   :  { %9226 = vst [vmem:[#allocation29_spill] sm:$0xff] %v8587_v60  ;;  %v8604_v60 = vmul.f32 0.01, %v9228_v18  ;;  %v8607_v42 = vmul.f32 0.01, %v9229_v27  ;;  %4399 = vst [vmem:[%s9047_s5 + $0x60] sm:$0xff] %v4335_v41 }
 0x3bc   :  { %v8610_v21 = vmul.f32 0.01, %v9231_v26  ;;  %v9233_v53 = vld [vmem:[#allocation9_spill] sm:$0xff]  ;;  %v8630_v39 = vmul.f32 0.01, %v8320_v23  ;;  %4400 = vst [vmem:[%s9047_s5 + $0x68] sm:$0xff] %v4336_v14 }
 0x3bd   :  { %9230 = vst [vmem:[#allocation7_spill] sm:$0xff] %v8607_v42  ;;  %v8624_v42 = vmul.f32 0.01, %v9233_v53  ;;  %vm4241_vm13 = vcmp.gt.f32.partialorder %v9229_v27, 0.0  ;;  %v9237_v41 = vld [vmem:[#allocation10_spill] sm:$0xff]  ;;  %v9241_v18 = vld [vmem:[#allocation24_spill] sm:$0xff] }
 0x3be   :  { %9232 = vst [vmem:[#allocation8_spill] sm:$0xff] %v8610_v21  ;;  %v8627_v21 = vmul.f32 0.01, %v8316_v50  ;;  %9236 = vst [vmem:[#allocation32_spill] sm:$0xff] %v8630_v39  ;;  %v9239_v39 = vld [vmem:[#allocation12_spill] sm:$0xff]  ;;  %v9243_v14 = vld [vmem:[#allocation15_spill] sm:$0xff] }
 0x3bf   :  { %9234 = vst [vmem:[#allocation9_spill] sm:$0xff] %v8624_v42  ;;  %v8647_v42 = vmul.f32 0.01, %v9239_v39  ;;  %v8650_v57 = vmul.f32 0.01, %v9241_v18  ;;  %4401 = vst [vmem:[%s9047_s5 + $0x70] sm:$0xff] %v4337_v48 }
 0x3c0   :  { %9235 = vst [vmem:[#allocation31_spill] sm:$0xff] %v8627_v21  ;;  %v8644_v21 = vmul.f32 0.01, %v9237_v41  ;;  %v9247_v50 = vld [vmem:[#allocation23_spill] sm:$0xff]  ;;  %4402 = vst [vmem:[%s9047_s5 + $0x78] sm:$0xff] %v4338_v36  ;;  %vm4249_vm15 = vcmp.gt.f32.partialorder %v9243_v14, 0.0 }
 0x3c1   :  { %9240 = vst [vmem:[#allocation12_spill] sm:$0xff] %v8647_v42  ;;  %9242 = vst [vmem:[#allocation33_spill] sm:$0xff] %v8650_v57  ;;  %v8664_v42 = vmul.f32 0.01, %v9243_v14  ;;  %v9245_v57 = vld [vmem:[#allocation11_spill] sm:$0xff]  ;;  %v9249_v48 = vld [vmem:[#allocation14_spill] sm:$0xff] }
 0x3c2   :  { %9238 = vst [vmem:[#allocation10_spill] sm:$0xff] %v8644_v21  ;;  %v8667_v21 = vmul.f32 0.01, %v9245_v57  ;;  %v8670_v38 = vmul.f32 0.01, %v9247_v50  ;;  %v9253_v18 = vld [vmem:[#allocation13_spill] sm:$0xff] }
 0x3c3   :  { %9244 = vst [vmem:[#allocation15_spill] sm:$0xff] %v8664_v42  ;;  %v8690_v34 = vmul.f32 0.01, %v9253_v18  ;;  %v9255_v35 = vld [vmem:[#allocation17_spill] sm:$0xff]  ;;  %4403 = vst [vmem:[%s9047_s5 + $0x80] sm:$0xff] %v4339_v15  ;;  %vm4254_vm4 = vcmp.gt.f32.partialorder %v9253_v18, 0.0  ;;  %v4341_v15 = vsel %vm4213_vm2, %v8192_v7, %v8440_v8 }
 0x3c4   :  { %9246 = vst [vmem:[#allocation11_spill] sm:$0xff] %v8667_v21  ;;  %9248 = vst [vmem:[#allocation34_spill] sm:$0xff] %v8670_v38  ;;  %v8684_v21 = vmul.f32 0.01, %v9249_v48  ;;  %v9251_v38 = vld [vmem:[#allocation26_spill] sm:$0xff]  ;;  %v4340_v36 = vsel %vm4212_vm1, %v8188_v30, %v9255_v35  ;;  %v9256_v48 = vld [vmem:[#allocation25_spill] sm:$0xff] }
 0x3c5   :  { %v8687_v42 = vmul.f32 0.01, %v9251_v38  ;;  %9254 = vst [vmem:[#allocation13_spill] sm:$0xff] %v8690_v34  ;;  %vm4253_vm0 = vcmp.gt.f32.partialorder %v9251_v38, 0.0  ;;  %v9258_v50 = vld [vmem:[#allocation18_spill] sm:$0xff]  ;;  %4404 = vst [vmem:[%s9047_s5 + $0x88] sm:$0xff] %v4340_v36  ;;  %v4345_v36 = vsel %vm4217_vm6, %v8208_v11, %v8459_v4 }
 0x3c6   :  { %9250 = vst [vmem:[#allocation35_spill] sm:$0xff] %v8684_v21  ;;  %v9257_v21 = vld [vmem:[#allocation16_spill] sm:$0xff]  ;;  %v8710_v30 = vmul.f32 0.01, %v9258_v50  ;;  %vm4257_vm1 = vcmp.gt.f32.partialorder %v9258_v50, 0.0  ;;  %vm9262_vm2 = vcmp.gt.f32.partialorder %v8200_v49, 0.0 }
 0x3c7   :  { %9252 = vst [vmem:[#allocation26_spill] sm:$0xff] %v8687_v42  ;;  %v8704_v42 = vmul.f32 0.01, %v9256_v48  ;;  %v8707_v34 = vmul.f32 0.01, %v9257_v21  ;;  %v9260_v35 = vld [vmem:[#allocation20_spill] sm:$0xff] }
 0x3c8   :  { %9259 = vst [vmem:[#allocation17_spill] sm:$0xff] %v8710_v30  ;;  %vm4258_vm7 = vcmp.gt.f32.partialorder %v9260_v35, 0.0  ;;  %v8722_v48 = vmul.f32 0.01, %v9260_v35  ;;  %v4342_v30 = vsel %vm4214_vm3, %v8196_v24, %v8443_v43  ;;  %v9261_v21 = vld [vmem:[#allocation21_spill] sm:$0xff]  ;;  %vm9263_vm5 = vcmp.gt.f32.partialorder %v8204_v6, 0.0 }
 0x3c9   :  { %v4343_v7 = vsel %vm9262_vm2, %v8200_v49, %v9261_v21  ;;  %v4344_v8 = vsel %vm9263_vm5, %v8204_v6, %v8456_v61  ;;  %4405 = vst [vmem:[%s9047_s5 + $0x90] sm:$0xff] %v4341_v15  ;;  %v9264_v24 = vld [vmem:[#allocation19_spill] sm:$0xff]  ;;  %vm9265_vm3 = vcmp.gt.f32.partialorder %v8212_v51, 0.0  ;;  %vm9266_vm2 = vcmp.gt.f32.partialorder %v8216_v2, 0.0  ;;  %4406 = vst [vmem:[%s9047_s5 + $0x98] sm:$0xff] %v4342_v30  ;;  %v9268_v11 = vld [vmem:[#allocation2_spill] sm:$0xff] }
 0x3ca   :  { %v4346_v43 = vsel %vm9265_vm3, %v8212_v51, %v9264_v24  ;;  %v4347_v49 = vsel %vm9266_vm2, %v8216_v2, %v8472_v45  ;;  %vm9267_vm5 = vcmp.gt.f32.partialorder %v8220_v47, 0.0  ;;  %4407 = vst [vmem:[%s9047_s5 + $0xa0] sm:$0xff] %v4343_v7  ;;  %4408 = vst [vmem:[%s9047_s5 + $0xa8] sm:$0xff] %v4344_v8  ;;  %v4349_v51 = vsel %vm4221_vm8, %v8224_v10, %v9268_v11  ;;  %v9305_v15 = vld [vmem:[#allocation33_spill] sm:$0xff]  ;;  %v9306_v7 = vld [vmem:[#allocation24_spill] sm:$0xff] }
 0x3cb   :  { %v4348_v6 = vsel %vm9267_vm5, %v8220_v47, %v8475_v20  ;;  %vm9269_vm6 = vcmp.gt.f32.partialorder %v8228_v28, 0.0  ;;  %vm9270_vm3 = vcmp.gt.f32.partialorder %v8232_v46, 0.0  ;;  %vm9271_vm2 = vcmp.gt.f32.partialorder %v8236_v0, 0.0  ;;  %4409 = vst [vmem:[%s9047_s5 + $0xb0] sm:$0xff] %v4345_v36  ;;  %4410 = vst [vmem:[%s9047_s5 + $0xb8] sm:$0xff] %v4346_v43  ;;  %v9283_v20 = vld [vmem:[#allocation27_spill] sm:$0xff] }
 0x3cc   :  { %v4350_v2 = vsel %vm9269_vm6, %v8228_v28, %v8488_v17  ;;  %v4351_v47 = vsel %vm9270_vm3, %v8232_v46, %v8491_v40  ;;  %v4352_v61 = vsel %vm9271_vm2, %v8236_v0, %v8494_v52  ;;  %4411 = vst [vmem:[%s9047_s5 + $0xc0] sm:$0xff] %v4347_v49  ;;  %4412 = vst [vmem:[%s9047_s5 + $0xc8] sm:$0xff] %v4348_v6  ;;  %vm9272_vm8 = vcmp.gt.f32.partialorder %v8244_v22, 0.0  ;;  %v9288_v40 = vld [vmem:[#allocation30_spill] sm:$0xff]  ;;  %v9312_v43 = vld [vmem:[#allocation23_spill] sm:$0xff] }
 0x3cd   :  { %v4353_v10 = vsel %vm4225_vm9, %v8240_v44, %v8506_v32  ;;  %v4354_v28 = vsel %vm9272_vm8, %v8244_v22, %v8509_v19  ;;  %vm9273_vm5 = vcmp.gt.f32.partialorder %v8248_v59, 0.0  ;;  %vm9274_vm6 = vcmp.gt.f32.partialorder %v8252_v37, 0.0  ;;  %4413 = vst [vmem:[%s9047_s5 + $0xd0] sm:$0xff] %v4349_v51  ;;  %4414 = vst [vmem:[%s9047_s5 + $0xd8] sm:$0xff] %v4350_v2  ;;  %v9275_v22 = vld [vmem:[#allocation3_spill] sm:$0xff]  ;;  %v9290_v32 = vld [vmem:[#allocation6_spill] sm:$0xff] }
 0x3ce   :  { %v4355_v46 = vsel %vm9273_vm5, %v8248_v59, %v8512_v13  ;;  %v4356_v0 = vsel %vm9274_vm6, %v8252_v37, %v8525_v12  ;;  %4415 = vst [vmem:[%s9047_s5 + $0xe0] sm:$0xff] %v4351_v47  ;;  %4416 = vst [vmem:[%s9047_s5 + $0xe8] sm:$0xff] %v4352_v61  ;;  %v4357_v44 = vsel %vm4229_vm10, %v8256_v25, %v8528_v3  ;;  %vm9276_vm9 = vcmp.gt.f32.partialorder %v8260_v31, 0.0  ;;  %v9279_v25 = vld [vmem:[#allocation4_spill] sm:$0xff]  ;;  %v9295_v12 = vld [vmem:[#allocation9_spill] sm:$0xff] }
 0x3cf   :  { %v4358_v59 = vsel %vm9276_vm9, %v8260_v31, %v9275_v22  ;;  %vm9277_vm3 = vcmp.gt.f32.partialorder %v8264_v16, 0.0  ;;  %vm9278_vm2 = vcmp.gt.f32.partialorder %v8268_v5, 0.0  ;;  %4417 = vst [vmem:[%s9047_s5 + $0xf0] sm:$0xff] %v4353_v10  ;;  %4418 = vst [vmem:[%s9047_s5 + $0xf8] sm:$0xff] %v4354_v28  ;;  %v4361_v31 = vsel %vm4233_vm11, %v8272_v62, %v9279_v25  ;;  %v9285_v62 = vld [vmem:[#allocation28_spill] sm:$0xff]  ;;  %v9311_v24 = vld [vmem:[#allocation34_spill] sm:$0xff] }
 0x3d0   :  { %v4359_v37 = vsel %vm9277_vm3, %v8264_v16, %v8544_v55  ;;  %v4360_v4 = vsel %vm9278_vm2, %v8268_v5, %v8547_v54  ;;  %4419 = vst [vmem:[%s9047_s5 + $0x100] sm:$0xff] %v4355_v46  ;;  %4420 = vst [vmem:[%s9047_s5 + $0x108] sm:$0xff] %v4356_v0  ;;  %vm9280_vm10 = vcmp.gt.f32.partialorder %v8276_v58, 0.0  ;;  %v9281_v5 = vld [vmem:[#allocation5_spill] sm:$0xff]  ;;  %vm9282_vm8 = vcmp.gt.f32.partialorder %v8280_v56, 0.0  ;;  %v9297_v54 = vld [vmem:[#allocation31_spill] sm:$0xff] }
 0x3d1   :  { %v4362_v16 = vsel %vm9280_vm10, %v8276_v58, %v8564_v63  ;;  %v4363_v45 = vsel %vm9282_vm8, %v8280_v56, %v9281_v5  ;;  %vm9284_vm5 = vcmp.gt.f32.partialorder %v8284_v9, 0.0  ;;  %4421 = vst [vmem:[%s9047_s5 + $0x110] sm:$0xff] %v4357_v44  ;;  %4422 = vst [vmem:[%s9047_s5 + $0x118] sm:$0xff] %v4358_v59  ;;  %v4365_v58 = vsel %vm4237_vm12, %v8288_v33, %v9285_v62  ;;  %v9286_v56 = vld [vmem:[#allocation29_spill] sm:$0xff]  ;;  %v9292_v33 = vld [vmem:[#allocation7_spill] sm:$0xff] }
 0x3d2   :  { %v4364_v17 = vsel %vm9284_vm5, %v8284_v9, %v9283_v20  ;;  %4423 = vst [vmem:[%s9047_s5 + $0x120] sm:$0xff] %v4359_v37  ;;  %4424 = vst [vmem:[%s9047_s5 + $0x128] sm:$0xff] %v4360_v4  ;;  %vm9287_vm11 = vcmp.gt.f32.partialorder %v8292_v29, 0.0  ;;  %vm9289_vm6 = vcmp.gt.f32.partialorder %v8296_v1, 0.0  ;;  %vm9291_vm9 = vcmp.gt.f32.partialorder %v9290_v32, 0.0  ;;  %v9298_v55 = vld [vmem:[#allocation22_spill] sm:$0xff] }
 0x3d3   :  { %v4366_v9 = vsel %vm9287_vm11, %v8292_v29, %v9286_v56  ;;  %v4367_v52 = vsel %vm9289_vm6, %v8296_v1, %v9288_v40  ;;  %v4368_v19 = vsel %vm9291_vm9, %v9290_v32, %v8604_v60  ;;  %4425 = vst [vmem:[%s9047_s5 + $0x130] sm:$0xff] %v4361_v31  ;;  %4426 = vst [vmem:[%s9047_s5 + $0x138] sm:$0xff] %v4362_v16  ;;  %v9293_v1 = vld [vmem:[#allocation8_spill] sm:$0xff]  ;;  %vm9294_vm12 = vcmp.gt.f32.partialorder %v9231_v26, 0.0  ;;  %v9314_v6 = vld [vmem:[#allocation35_spill] sm:$0xff] }
 0x3d4   :  { %4427 = vst [vmem:[%s9047_s5 + $0x140] sm:$0xff] %v4363_v45  ;;  %4428 = vst [vmem:[%s9047_s5 + $0x148] sm:$0xff] %v4364_v17  ;;  %v4369_v29 = vsel %vm4241_vm13, %v9229_v27, %v9292_v33  ;;  %v4370_v13 = vsel %vm9294_vm12, %v9231_v26, %v9293_v1  ;;  %vm9296_vm3 = vcmp.gt.f32.partialorder %v9233_v53, 0.0  ;;  %vm9299_vm2 = vcmp.gt.f32.partialorder %v9298_v55, 0.0  ;;  %v9300_v26 = vld [vmem:[#allocation32_spill] sm:$0xff]  ;;  %v9301_v27 = vld [vmem:[#allocation10_spill] sm:$0xff] }
 0x3d5   :  { %v4371_v3 = vsel %vm9296_vm3, %v9233_v53, %v9295_v12  ;;  %v4372_v63 = vsel %vm9299_vm2, %v9298_v55, %v9297_v54  ;;  %4429 = vst [vmem:[%s9047_s5 + $0x150] sm:$0xff] %v4365_v58  ;;  %4430 = vst [vmem:[%s9047_s5 + $0x158] sm:$0xff] %v4366_v9  ;;  %v4373_v60 = vsel %vm4245_vm14, %v8320_v23, %v9300_v26  ;;  %vm9302_vm13 = vcmp.gt.f32.partialorder %v9237_v41, 0.0  ;;  %v9303_v53 = vld [vmem:[#allocation12_spill] sm:$0xff]  ;;  %v9308_v23 = vld [vmem:[#allocation15_spill] sm:$0xff] }
 0x3d6   :  { %4431 = vst [vmem:[%s9047_s5 + $0x160] sm:$0xff] %v4367_v52  ;;  %4432 = vst [vmem:[%s9047_s5 + $0x168] sm:$0xff] %v4368_v19  ;;  %v4374_v21 = vsel %vm9302_vm13, %v9237_v41, %v9301_v27  ;;  %vm9304_vm10 = vcmp.gt.f32.partialorder %v9239_v39, 0.0  ;;  %vm9307_vm8 = vcmp.gt.f32.partialorder %v9306_v7, 0.0  ;;  %v9309_v41 = vld [vmem:[#allocation11_spill] sm:$0xff]  ;;  %vm9310_vm14 = vcmp.gt.f32.partialorder %v9245_v57, 0.0 }
 0x3d7   :  { %v4375_v30 = vsel %vm9304_vm10, %v9239_v39, %v9303_v53  ;;  %v4376_v8 = vsel %vm9307_vm8, %v9306_v7, %v9305_v15  ;;  %4433 = vst [vmem:[%s9047_s5 + $0x170] sm:$0xff] %v4369_v29  ;;  %4434 = vst [vmem:[%s9047_s5 + $0x178] sm:$0xff] %v4370_v13  ;;  %v4377_v39 = vsel %vm4249_vm15, %v9243_v14, %v9308_v23  ;;  %vm9313_vm5 = vcmp.gt.f32.partialorder %v9312_v43, 0.0  ;;  %v9315_v11 = vld [vmem:[#allocation14_spill] sm:$0xff]  ;;  %v9318_v2 = vld [vmem:[#allocation13_spill] sm:$0xff] }
 0x3d8   :  { %4435 = vst [vmem:[%s9047_s5 + $0x180] sm:$0xff] %v4371_v3  ;;  %4436 = vst [vmem:[%s9047_s5 + $0x188] sm:$0xff] %v4372_v63  ;;  %v4378_v36 = vsel %vm9310_vm14, %v9245_v57, %v9309_v41  ;;  %v4379_v49 = vsel %vm9313_vm5, %v9312_v43, %v9311_v24  ;;  %vm9316_vm11 = vcmp.gt.f32.partialorder %v9315_v11, 0.0  ;;  %v9317_v57 = vld [vmem:[#allocation26_spill] sm:$0xff]  ;;  %v4382_v47 = vsel %vm4254_vm4, %v9253_v18, %v9318_v2  ;;  %v9319_v61 = vld [vmem:[#allocation25_spill] sm:$0xff] }
 0x3d9   :  { %v4380_v51 = vsel %vm9316_vm11, %v9315_v11, %v9314_v6  ;;  %4437 = vst [vmem:[%s9047_s5 + $0x190] sm:$0xff] %v4373_v60  ;;  %4438 = vst [vmem:[%s9047_s5 + $0x198] sm:$0xff] %v4374_v21  ;;  %v4381_v14 = vsel %vm4253_vm0, %v9251_v38, %v9317_v57  ;;  %vm9320_vm15 = vcmp.gt.f32.partialorder %v9319_v61, 0.0  ;;  %v9321_v28 = vld [vmem:[#allocation16_spill] sm:$0xff]  ;;  %v4386_v38 = vsel %vm4258_vm7, %v9260_v35, %v8722_v48 }
 0x3da   :  { %4439 = vst [vmem:[%s9047_s5 + $0x1a0] sm:$0xff] %v4375_v30  ;;  %4440 = vst [vmem:[%s9047_s5 + $0x1a8] sm:$0xff] %v4376_v8  ;;  %v4383_v10 = vsel %vm9320_vm15, %v9319_v61, %v8704_v42  ;;  %vm9322_vm6 = vcmp.gt.f32.partialorder %v9321_v28, 0.0  ;;  %v9323_v42 = vld [vmem:[#allocation17_spill] sm:$0xff] }
 0x3db   :  { %v4384_v46 = vsel %vm9322_vm6, %v9321_v28, %v8707_v34  ;;  %4441 = vst [vmem:[%s9047_s5 + $0x1b0] sm:$0xff] %v4377_v39  ;;  %4442 = vst [vmem:[%s9047_s5 + $0x1b8] sm:$0xff] %v4378_v36  ;;  %v4385_v18 = vsel %vm4257_vm1, %v9258_v50, %v9323_v42 }
 0x3dc   :  { %4443 = vst [vmem:[%s9047_s5 + $0x1c0] sm:$0xff] %v4379_v49  ;;  %4444 = vst [vmem:[%s9047_s5 + $0x1c8] sm:$0xff] %v4380_v51 }
 0x3dd   :  { %4445 = vst [vmem:[%s9047_s5 + $0x1d0] sm:$0xff] %v4381_v14  ;;  %4446 = vst [vmem:[%s9047_s5 + $0x1d8] sm:$0xff] %v4382_v47 }
 0x3de   :  { %4447 = vst [vmem:[%s9047_s5 + $0x1e0] sm:$0xff] %v4383_v10  ;;  %4448 = vst [vmem:[%s9047_s5 + $0x1e8] sm:$0xff] %v4384_v46 }
 0x3df   :  { %4449 = vst [vmem:[%s9047_s5 + $0x1f0] sm:$0xff] %v4385_v18  ;;  %4450 = vst [vmem:[%s9047_s5 + $0x1f8] sm:$0xff] %v4386_v38 }

// kernel: base_feature_extraction.5
= control target key start
LH: loop header
LB: loop body
LE: loop exit
PB: predicated region body
PF: predicated region fallthrough
CT: control target
= control target key end

     0   :  { %s2798_s0 = inlined_call_operand.vmem [shape: bf16[128,1152], index: 0, kind: input, shape index: {}]   ;;  %s2799_s1 = inlined_call_operand.vmem [shape: bf16[1152,128], index: 1, kind: input, shape index: {}]   ;;  %s2800_s2 = inlined_call_operand.vmem [shape: f32[1,128], index: 2, kind: input, shape index: {}]   ;;  %s2801_s3 = inlined_call_operand.hbm [shape: f32[128,128], index: 3, kind: output, shape index: {}]  }
   0x1   :  { %v2032_v0 = vld [vmem:[%s2799_s1 + $0x40] sm:$0xff]   ;;  %v2036_v4 = vld [vmem:[%s2799_s1 + $0x48] sm:$0xff]   ;;  %v2040_v8 = vld [vmem:[%s2799_s1 + $0x50] sm:$0xff]  }
   0x2   :  { %v2033_v1 = vld [vmem:[%s2799_s1 + $0xc0] sm:$0xff]   ;;  %1709 = vmatprep.subr.bf16.mxu0 %v2032_v0  ;;  %v2037_v5 = vld [vmem:[%s2799_s1 + $0xc8] sm:$0xff]   ;;  %v2041_v9 = vld [vmem:[%s2799_s1 + $0xd0] sm:$0xff]  }
   0x3   :  { %v2034_v2 = vld [vmem:[%s2799_s1] sm:$0xff]   ;;  %1773 = vmatprep.subr.bf16.mxu1 %v2033_v1  ;;  %v2038_v6 = vld [vmem:[%s2799_s1 + $0x8] sm:$0xff]   ;;  %v2042_v10 = vld [vmem:[%s2799_s1 + $0x10] sm:$0xff]  }
   0x4   :  { %v2035_v3 = vld [vmem:[%s2799_s1 + $0x80] sm:$0xff]   ;;  %1710 = vmatpush3.bf16.msra.mxu0 %v2034_v2  ;;  %v2039_v7 = vld [vmem:[%s2799_s1 + $0x88] sm:$0xff]   ;;  %v2043_v11 = vld [vmem:[%s2799_s1 + $0x90] sm:$0xff]  }
   0x5   :  { %1774 = vmatpush3.bf16.msra.mxu1 %v2035_v3  ;;  %1711 = vmatprep.subr.bf16.mxu0 %v2036_v4  ;;  %v2044_v12 = vld [vmem:[%s2799_s1 + $0x58] sm:$0xff]   ;;  %v2048_v16 = vld [vmem:[%s2799_s1 + $0x60] sm:$0xff]   ;;  %v2052_v20 = vld [vmem:[%s2799_s1 + $0x68] sm:$0xff]  }
   0x6   :  { %1775 = vmatprep.subr.bf16.mxu1 %v2037_v5  ;;  %v2045_v13 = vld [vmem:[%s2799_s1 + $0xd8] sm:$0xff]   ;;  %v2049_v17 = vld [vmem:[%s2799_s1 + $0xe0] sm:$0xff]   ;;  %v2053_v21 = vld [vmem:[%s2799_s1 + $0xe8] sm:$0xff]  }
   0x7   :  { %v2046_v14 = vld [vmem:[%s2799_s1 + $0x18] sm:$0xff]   ;;  %v2050_v18 = vld [vmem:[%s2799_s1 + $0x20] sm:$0xff]   ;;  %v2054_v22 = vld [vmem:[%s2799_s1 + $0x28] sm:$0xff]  }
   0x8   :  { %1712 = vmatpush3.bf16.msra.mxu0 %v2038_v6  ;;  %v2047_v15 = vld [vmem:[%s2799_s1 + $0x98] sm:$0xff]   ;;  %v2051_v19 = vld [vmem:[%s2799_s1 + $0xa0] sm:$0xff]   ;;  %v2055_v23 = vld [vmem:[%s2799_s1 + $0xa8] sm:$0xff]  }
   0x9   :  { %1776 = vmatpush3.bf16.msra.mxu1 %v2039_v7  ;;  %1713 = vmatprep.subr.bf16.mxu0 %v2040_v8  ;;  %v2056_v24 = vld [vmem:[%s2799_s1 + $0x70] sm:$0xff]   ;;  %v2060_v28 = vld [vmem:[%s2799_s1 + $0x78] sm:$0xff]   ;;  %v2064_v32 = vld [vmem:[%s2798_s0] ss:$36 sps:$4 sm:$0xff]  }
   0xa   :  { %1777 = vmatprep.subr.bf16.mxu1 %v2041_v9  ;;  %v2057_v25 = vld [vmem:[%s2799_s1 + $0xf0] sm:$0xff]   ;;  %v2061_v29 = vld [vmem:[%s2799_s1 + $0xf8] sm:$0xff]   ;;  %v2066_v33 = vld [vmem:[%s2798_s0 + $0x4] ss:$36 sps:$4 sm:$0xff]  }
   0xb   :  { %v2058_v26 = vld [vmem:[%s2799_s1 + $0x30] sm:$0xff]   ;;  %v2062_v30 = vld [vmem:[%s2799_s1 + $0x38] sm:$0xff]   ;;  %v2067_v34 = vld [vmem:[%s2798_s0 + $0x8] ss:$36 sps:$4 sm:$0xff]   ;;  %1079 = vmatprep.mubr.bf16.mxu0 %v2066_v33 }
   0xc   :  { %1714 = vmatpush3.bf16.msra.mxu0 %v2042_v10  ;;  %v2059_v27 = vld [vmem:[%s2799_s1 + $0xb0] sm:$0xff]   ;;  %v2063_v31 = vld [vmem:[%s2799_s1 + $0xb8] sm:$0xff]   ;;  %v2070_v36 = vld [vmem:[%s2799_s1 + $0x140] sm:$0xff]  }
   0xd   :  { %1778 = vmatpush3.bf16.msra.mxu1 %v2043_v11  ;;  %1715 = vmatprep.subr.bf16.mxu0 %v2044_v12  ;;  %v2069_v35 = vld [vmem:[%s2798_s0 + $0xc] ss:$36 sps:$4 sm:$0xff]   ;;  %v2071_v37 = vld [vmem:[%s2799_s1 + $0x1c0] sm:$0xff]   ;;  %v2076_v41 = vld [vmem:[%s2798_s0 + $0x54] ss:$36 sps:$4 sm:$0xff]  }
   0xe   :  { %1779 = vmatprep.subr.bf16.mxu1 %v2045_v13  ;;  %1176 = vmatprep.mubr.bf16.mxu1 %v2069_v35  ;;  %v2072_v38 = vld [vmem:[%s2799_s1 + $0x100] sm:$0xff]   ;;  %v2074_v40 = vld [vmem:[%s2798_s0 + $0x4c] ss:$36 sps:$4 sm:$0xff]   ;;  %v2084_v48 = vld [vmem:[%s2798_s0 + $0x94] ss:$36 sps:$4 sm:$0xff]  }
   0xf   :  { %v2073_v39 = vld [vmem:[%s2799_s1 + $0x180] sm:$0xff]   ;;  %v2078_v42 = vld [vmem:[%s2798_s0 + $0x48] ss:$36 sps:$4 sm:$0xff]   ;;  %v2079_v43 = vld [vmem:[%s2798_s0 + $0x50] ss:$36 sps:$4 sm:$0xff]  }
  0x10   :  { %1716 = vmatpush3.bf16.msra.mxu0 %v2046_v14  ;;  %v2080_v44 = vld [vmem:[%s2799_s1 + $0x148] sm:$0xff]   ;;  %v2086_v49 = vld [vmem:[%s2798_s0 + $0x9c] ss:$36 sps:$4 sm:$0xff]   ;;  %v2088_v50 = vld [vmem:[%s2798_s0 + $0x90] ss:$36 sps:$4 sm:$0xff]  }
  0x11   :  { %1780 = vmatpush3.bf16.msra.mxu1 %v2047_v15  ;;  %1717 = vmatprep.subr.bf16.mxu0 %v2048_v16  ;;  %v2081_v45 = vld [vmem:[%s2799_s1 + $0x1c8] sm:$0xff]   ;;  %v2089_v51 = vld [vmem:[%s2798_s0 + $0x98] ss:$36 sps:$4 sm:$0xff]   ;;  %v2090_v52 = vld [vmem:[%s2799_s1 + $0x150] sm:$0xff]  }
  0x12   :  { %1781 = vmatprep.subr.bf16.mxu1 %v2049_v17  ;;  %v2082_v46 = vld [vmem:[%s2799_s1 + $0x108] sm:$0xff]   ;;  %v2091_v53 = vld [vmem:[%s2799_s1 + $0x1d0] sm:$0xff]   ;;  %v2094_v56 = vld [vmem:[%s2798_s0 + $0xdc] ss:$36 sps:$4 sm:$0xff]  }
  0x13   :  { %v2083_v47 = vld [vmem:[%s2799_s1 + $0x188] sm:$0xff]   ;;  %v2092_v54 = vld [vmem:[%s2799_s1 + $0x110] sm:$0xff]   ;;  %v2098_v58 = vld [vmem:[%s2798_s0 + $0xd8] ss:$36 sps:$4 sm:$0xff]  }
  0x14   :  { %1718 = vmatpush3.bf16.msra.mxu0 %v2050_v18  ;;  %v2093_v55 = vld [vmem:[%s2799_s1 + $0x190] sm:$0xff]   ;;  %v2096_v57 = vld [vmem:[%s2798_s0 + $0xe4] ss:$36 sps:$4 sm:$0xff]   ;;  %v2100_v60 = vld [vmem:[%s2799_s1 + $0x158] sm:$0xff]  }
  0x15   :  { %1782 = vmatpush3.bf16.msra.mxu1 %v2051_v19  ;;  %1719 = vmatprep.subr.bf16.mxu0 %v2052_v20  ;;  %v2099_v59 = vld [vmem:[%s2798_s0 + $0xe0] ss:$36 sps:$4 sm:$0xff]   ;;  %v2101_v61 = vld [vmem:[%s2799_s1 + $0x1d8] sm:$0xff]   ;;  %v2106_v1 = vld [vmem:[%s2798_s0 + $0x12c] ss:$36 sps:$4 sm:$0xff]  }
  0x16   :  { %1783 = vmatprep.subr.bf16.mxu1 %v2053_v21  ;;  %v2102_v62 = vld [vmem:[%s2799_s1 + $0x118] sm:$0xff]   ;;  %v2104_v0 = vld [vmem:[%s2798_s0 + $0x124] ss:$36 sps:$4 sm:$0xff]   ;;  %v2114_v8 = vld [vmem:[%s2798_s0 + $0x16c] ss:$36 sps:$4 sm:$0xff]  }
  0x17   :  { %v2103_v63 = vld [vmem:[%s2799_s1 + $0x198] sm:$0xff]   ;;  %v2108_v2 = vld [vmem:[%s2798_s0 + $0x120] ss:$36 sps:$4 sm:$0xff]   ;;  %v2109_v4 = vld [vmem:[%s2798_s0 + $0x128] ss:$36 sps:$4 sm:$0xff]  }
  0x18   :  { %1720 = vmatpush3.bf16.msra.mxu0 %v2054_v22  ;;  %v2110_v3 = vld [vmem:[%s2799_s1 + $0x160] sm:$0xff]   ;;  %v2116_v9 = vld [vmem:[%s2798_s0 + $0x174] ss:$36 sps:$4 sm:$0xff]   ;;  %v2120_v10 = vld [vmem:[%s2799_s1 + $0x168] sm:$0xff]  }
  0x19   :  { %1784 = vmatpush3.bf16.msra.mxu1 %v2055_v23  ;;  %1721 = vmatprep.subr.bf16.mxu0 %v2056_v24  ;;  %v2111_v5 = vld [vmem:[%s2799_s1 + $0x1e0] sm:$0xff]   ;;  %v2121_v11 = vld [vmem:[%s2799_s1 + $0x1e8] sm:$0xff]   ;;  %v2119_v15 = vld [vmem:[%s2798_s0 + $0x170] ss:$36 sps:$4 sm:$0xff]  }
  0x1a   :  { %1785 = vmatprep.subr.bf16.mxu1 %v2057_v25  ;;  %v2112_v6 = vld [vmem:[%s2799_s1 + $0x120] sm:$0xff]   ;;  %v2118_v12 = vld [vmem:[%s2798_s0 + $0x168] ss:$36 sps:$4 sm:$0xff]   ;;  %v2124_v16 = vld [vmem:[%s2798_s0 + $0x1b4] ss:$36 sps:$4 sm:$0xff]  }
  0x1b   :  { %v2113_v7 = vld [vmem:[%s2799_s1 + $0x1a0] sm:$0xff]   ;;  %v2122_v13 = vld [vmem:[%s2799_s1 + $0x128] sm:$0xff]   ;;  %v2130_v18 = vld [vmem:[%s2799_s1 + $0x170] sm:$0xff]  }
  0x1c   :  { %1722 = vmatpush3.bf16.msra.mxu0 %v2058_v26  ;;  %v2123_v14 = vld [vmem:[%s2799_s1 + $0x1a8] sm:$0xff]   ;;  %v2126_v17 = vld [vmem:[%s2798_s0 + $0x1bc] ss:$36 sps:$4 sm:$0xff]   ;;  %v2131_v19 = vld [vmem:[%s2799_s1 + $0x1f0] sm:$0xff]  }
  0x1d   :  { %1786 = vmatpush3.bf16.msra.mxu1 %v2059_v27  ;;  %1723 = vmatprep.subr.bf16.mxu0 %v2060_v28  ;;  %v2132_v20 = vld [vmem:[%s2799_s1 + $0x130] sm:$0xff]   ;;  %v2129_v23 = vld [vmem:[%s2798_s0 + $0x1b8] ss:$36 sps:$4 sm:$0xff]   ;;  %v2136_v25 = vld [vmem:[%s2798_s0 + $0x204] ss:$36 sps:$4 sm:$0xff]  }
  0x1e   :  { %1787 = vmatprep.subr.bf16.mxu1 %v2061_v29  ;;  %v2133_v21 = vld [vmem:[%s2799_s1 + $0x1b0] sm:$0xff]   ;;  %v2134_v24 = vld [vmem:[%s2798_s0 + $0x1fc] ss:$36 sps:$4 sm:$0xff]  }
  0x1f   :  { %v2128_v22 = vld [vmem:[%s2798_s0 + $0x1b0] ss:$36 sps:$4 sm:$0xff]   ;;  %v2140_v26 = vld [vmem:[%s2799_s1 + $0x178] sm:$0xff]  }
  0x20   :  { %1724 = vmatpush3.bf16.msra.mxu0 %v2062_v30  ;;  %v2141_v27 = vld [vmem:[%s2799_s1 + $0x1f8] sm:$0xff]   ;;  %v2144_v35 = vld [vmem:[%s2798_s0 + $0x10] ss:$36 sps:$4 sm:$0xff]  }
  0x21   :  { %1788 = vmatpush3.bf16.msra.mxu1 %v2063_v31  ;;  %1837 = vmatprep.subr.bf16.mxu0 %v2070_v36  ;;  %v2142_v28 = vld [vmem:[%s2799_s1 + $0x138] sm:$0xff]   ;;  %v2139_v31 = vld [vmem:[%s2798_s0 + $0x200] ss:$36 sps:$4 sm:$0xff]  }
  0x22   :  { %1901 = vmatprep.subr.bf16.mxu1 %v2071_v37  ;;  %v2143_v29 = vld [vmem:[%s2799_s1 + $0x1b8] sm:$0xff]  }
  0x23   :  { %1080 = vmatmul.mubr.bf16.vlgmr.msra.gmra.mrb[0].mxu0 %v2064_v32  ;;  %v2138_v30 = vld [vmem:[%s2798_s0 + $0x1f8] ss:$36 sps:$4 sm:$0xff]   ;;  %v2150_v32 = vld [vmem:[%s2799_s1 + $0x200] sm:$0xff]  }
  0x24   :  { %1177 = vmatmul.mubr.bf16.vlgmr.msra.gmra.mrb[0].mxu1 %v2067_v34  ;;  %1838 = vmatpush3.bf16.msra.mxu0 %v2072_v38  ;;  %v2146_v33 = vld [vmem:[%s2798_s0 + $0x14] ss:$36 sps:$4 sm:$0xff]   ;;  %v2149_v34 = vld [vmem:[%s2798_s0 + $0x1c] ss:$36 sps:$4 sm:$0xff]   ;;  %v2153_v38 = vld [vmem:[%s2798_s0 + $0x64] ss:$36 sps:$4 sm:$0xff]  }
  0x25   :  { %1902 = vmatpush3.bf16.msra.mxu1 %v2073_v39  ;;  %1087 = vmatprep.mubr.bf16.mxu0 %v2074_v40  ;;  %v2147_v36 = vld [vmem:[%s2798_s0 + $0x18] ss:$36 sps:$4 sm:$0xff]   ;;  %v2157_v39 = vld [vmem:[%s2799_s1 + $0x208] sm:$0xff]   ;;  %v2164_v40 = vld [vmem:[%s2799_s1 + $0x210] sm:$0xff]  }
  0x26   :  { %1184 = vmatprep.mubr.bf16.mxu1 %v2076_v41  ;;  %1839 = vmatprep.subr.bf16.mxu0 %v2080_v44  ;;  %v2151_v37 = vld [vmem:[%s2798_s0 + $0x5c] ss:$36 sps:$4 sm:$0xff]   ;;  %v2160_v44 = vld [vmem:[%s2798_s0 + $0xac] ss:$36 sps:$4 sm:$0xff]  }
  0x27   :  { %1903 = vmatprep.subr.bf16.mxu1 %v2081_v45  ;;  %v2155_v41 = vld [vmem:[%s2798_s0 + $0x58] ss:$36 sps:$4 sm:$0xff]  }
  0x28   :  { %1840 = vmatpush3.bf16.msra.mxu0 %v2082_v46  ;;  %v2171_v45 = vld [vmem:[%s2799_s1 + $0x218] sm:$0xff]   ;;  %v2178_v46 = vld [vmem:[%s2799_s1 + $0x220] sm:$0xff]  }
  0x29   :  { %1904 = vmatpush3.bf16.msra.mxu1 %v2083_v47  ;;  %1841 = vmatprep.subr.bf16.mxu0 %v2090_v52  ;;  %v2162_v47 = vld [vmem:[%s2798_s0 + $0xa0] ss:$36 sps:$4 sm:$0xff]   ;;  %v2169_v52 = vld [vmem:[%s2798_s0 + $0xe8] ss:$36 sps:$4 sm:$0xff]  }
  0x2a   :  { %1905 = vmatprep.subr.bf16.mxu1 %v2091_v53  ;;  %v2192_v53 = vld [vmem:[%s2799_s1 + $0x230] sm:$0xff]  }
  0x2b   :  { %1088 = vmatmul.mubr.bf16.gmra.mrb[4].mxu0 %v2078_v42  ;;  %v2156_v42 = vld [vmem:[%s2798_s0 + $0x60] ss:$36 sps:$4 sm:$0xff]  }
  0x2c   :  { %1185 = vmatmul.mubr.bf16.gmra.mrb[4].mxu1 %v2079_v43  ;;  %1095 = vmatprep.mubr.bf16.mxu0 %v2084_v48  ;;  %v2158_v43 = vld [vmem:[%s2798_s0 + $0xa4] ss:$36 sps:$4 sm:$0xff]  }
  0x2d   :  { %1192 = vmatprep.mubr.bf16.mxu1 %v2086_v49  ;;  %1842 = vmatpush3.bf16.msra.mxu0 %v2092_v54  ;;  %v2163_v48 = vld [vmem:[%s2798_s0 + $0xa8] ss:$36 sps:$4 sm:$0xff]   ;;  %v2170_v54 = vld [vmem:[%s2798_s0 + $0xf0] ss:$36 sps:$4 sm:$0xff]  }
  0x2e   :  { %1906 = vmatpush3.bf16.msra.mxu1 %v2093_v55  ;;  %1843 = vmatprep.subr.bf16.mxu0 %v2100_v60  ;;  %v2165_v49 = vld [vmem:[%s2798_s0 + $0xec] ss:$36 sps:$4 sm:$0xff]   ;;  %v2172_v55 = vld [vmem:[%s2798_s0 + $0x134] ss:$36 sps:$4 sm:$0xff]  }
  0x2f   :  { %1907 = vmatprep.subr.bf16.mxu1 %v2101_v61 }
  0x31   :  { %1844 = vmatpush3.bf16.msra.mxu0 %v2102_v62 }
  0x32   :  { %1908 = vmatpush3.bf16.msra.mxu1 %v2103_v63  ;;  %1845 = vmatprep.subr.bf16.mxu0 %v2110_v3 }
  0x33   :  { %1096 = vmatmul.mubr.bf16.gmra.mrb[8].mxu0 %v2088_v50  ;;  %1909 = vmatprep.subr.bf16.mxu1 %v2111_v5  ;;  %v2167_v50 = vld [vmem:[%s2798_s0 + $0xf4] ss:$36 sps:$4 sm:$0xff]  }
  0x34   :  { %1193 = vmatmul.mubr.bf16.gmra.mrb[8].mxu1 %v2089_v51  ;;  %1103 = vmatprep.mubr.bf16.mxu0 %v2094_v56  ;;  %v2185_v51 = vld [vmem:[%s2799_s1 + $0x228] sm:$0xff]   ;;  %v2174_v56 = vld [vmem:[%s2798_s0 + $0x13c] ss:$36 sps:$4 sm:$0xff]  }
  0x35   :  { %1200 = vmatprep.mubr.bf16.mxu1 %v2096_v57  ;;  %1846 = vmatpush3.bf16.msra.mxu0 %v2112_v6  ;;  %v2199_v57 = vld [vmem:[%s2799_s1 + $0x238] sm:$0xff]  }
  0x36   :  { %1910 = vmatpush3.bf16.msra.mxu1 %v2113_v7  ;;  %1847 = vmatprep.subr.bf16.mxu0 %v2120_v10 }
  0x37   :  { %1911 = vmatprep.subr.bf16.mxu1 %v2121_v11 }
  0x39   :  { %1848 = vmatpush3.bf16.msra.mxu0 %v2122_v13 }
  0x3a   :  { %1912 = vmatpush3.bf16.msra.mxu1 %v2123_v14  ;;  %1849 = vmatprep.subr.bf16.mxu0 %v2130_v18 }
  0x3b   :  { %1104 = vmatmul.mubr.bf16.gmra.mrb[12].mxu0 %v2098_v58  ;;  %1913 = vmatprep.subr.bf16.mxu1 %v2131_v19 }
  0x3c   :  { %1201 = vmatmul.mubr.bf16.gmra.mrb[12].mxu1 %v2099_v59  ;;  %1111 = vmatprep.mubr.bf16.mxu0 %v2104_v0 }
  0x3d   :  { %1208 = vmatprep.mubr.bf16.mxu1 %v2106_v1  ;;  %1850 = vmatpush3.bf16.msra.mxu0 %v2132_v20 }
  0x3e   :  { %1914 = vmatpush3.bf16.msra.mxu1 %v2133_v21  ;;  %1851 = vmatprep.subr.bf16.mxu0 %v2140_v26 }
  0x3f   :  { %1915 = vmatprep.subr.bf16.mxu1 %v2141_v27 }
  0x41   :  { %1852 = vmatpush3.bf16.msra.mxu0 %v2142_v28 }
  0x42   :  { %1916 = vmatpush3.bf16.msra.mxu1 %v2143_v29  ;;  %1981 = vmatprep.subr.bf16.mxu0 %v2150_v32 }
  0x43   :  { %1112 = vmatmul.mubr.bf16.gmra.mrb[16].mxu0 %v2108_v2  ;;  %2013 = vmatprep.subr.bf16.mxu1 %v2150_v32 }
  0x44   :  { %1209 = vmatmul.mubr.bf16.gmra.mrb[16].mxu1 %v2109_v4  ;;  %1119 = vmatprep.mubr.bf16.mxu0 %v2114_v8 }
  0x45   :  { %1216 = vmatprep.mubr.bf16.mxu1 %v2116_v9 }
  0x4b   :  { %1120 = vmatmul.mubr.bf16.gmra.mrb[20].mxu0 %v2118_v12 }
  0x4c   :  { %1217 = vmatmul.mubr.bf16.gmra.mrb[20].mxu1 %v2119_v15  ;;  %1127 = vmatprep.mubr.bf16.mxu0 %v2124_v16 }
  0x4d   :  { %1224 = vmatprep.mubr.bf16.mxu1 %v2126_v17 }
  0x53   :  { %1128 = vmatmul.mubr.bf16.gmra.mrb[24].mxu0 %v2128_v22 }
  0x54   :  { %1225 = vmatmul.mubr.bf16.gmra.mrb[24].mxu1 %v2129_v23  ;;  %1135 = vmatprep.mubr.bf16.mxu0 %v2134_v24 }
  0x55   :  { %1232 = vmatprep.mubr.bf16.mxu1 %v2136_v25 }
  0x5b   :  { %1136 = vmatmul.mubr.bf16.gmra.mrb[28].mxu0 %v2138_v30 }
  0x5c   :  { %1233 = vmatmul.mubr.bf16.gmra.mrb[28].mxu1 %v2139_v31  ;;  %1273 = vmatprep.mubr.bf16.mxu0 %v2146_v33 }
  0x5d   :  { %1370 = vmatprep.mubr.bf16.mxu1 %v2149_v34 }
  0x63   :  { %1274 = vmatmul.mubr.bf16.vlgmr.msra.gmra.mrb[32].mxu0 %v2144_v35 }
  0x64   :  { %1371 = vmatmul.mubr.bf16.vlgmr.msra.gmra.mrb[32].mxu1 %v2147_v36  ;;  %1982 = vmatpush3.bf16.msra.mxu0 %v2150_v32 }
  0x65   :  { %2021 = vmatpush3.bf16.msra.mxu1 %v2150_v32  ;;  %1281 = vmatprep.mubr.bf16.mxu0 %v2151_v37 }
  0x66   :  { %1378 = vmatprep.mubr.bf16.mxu1 %v2153_v38  ;;  %1983 = vmatprep.subr.bf16.mxu0 %v2157_v39 }
  0x67   :  { %2014 = vmatprep.subr.bf16.mxu1 %v2157_v39 }
  0x68   :  { %1984 = vmatpush3.bf16.msra.mxu0 %v2157_v39 }
  0x69   :  { %2022 = vmatpush3.bf16.msra.mxu1 %v2157_v39  ;;  %1985 = vmatprep.subr.bf16.mxu0 %v2164_v40 }
  0x6a   :  { %2015 = vmatprep.subr.bf16.mxu1 %v2164_v40 }
  0x6b   :  { %1282 = vmatmul.mubr.bf16.gmra.mrb[36].mxu0 %v2155_v41 }
  0x6c   :  { %1379 = vmatmul.mubr.bf16.gmra.mrb[36].mxu1 %v2156_v42  ;;  %1289 = vmatprep.mubr.bf16.mxu0 %v2158_v43 }
  0x6d   :  { %1386 = vmatprep.mubr.bf16.mxu1 %v2160_v44  ;;  %1986 = vmatpush3.bf16.msra.mxu0 %v2164_v40 }
  0x6e   :  { %2023 = vmatpush3.bf16.msra.mxu1 %v2164_v40  ;;  %1987 = vmatprep.subr.bf16.mxu0 %v2171_v45 }
  0x6f   :  { %2016 = vmatprep.subr.bf16.mxu1 %v2171_v45 }
  0x71   :  { %1988 = vmatpush3.bf16.msra.mxu0 %v2171_v45 }
  0x72   :  { %2024 = vmatpush3.bf16.msra.mxu1 %v2171_v45  ;;  %1989 = vmatprep.subr.bf16.mxu0 %v2178_v46 }
  0x73   :  { %1290 = vmatmul.mubr.bf16.gmra.mrb[40].mxu0 %v2162_v47  ;;  %2017 = vmatprep.subr.bf16.mxu1 %v2178_v46 }
  0x74   :  { %1387 = vmatmul.mubr.bf16.gmra.mrb[40].mxu1 %v2163_v48  ;;  %1297 = vmatprep.mubr.bf16.mxu0 %v2165_v49 }
  0x75   :  { %1394 = vmatprep.mubr.bf16.mxu1 %v2167_v50  ;;  %1990 = vmatpush3.bf16.msra.mxu0 %v2178_v46 }
  0x76   :  { %2025 = vmatpush3.bf16.msra.mxu1 %v2178_v46  ;;  %1991 = vmatprep.subr.bf16.mxu0 %v2185_v51 }
  0x77   :  { %2018 = vmatprep.subr.bf16.mxu1 %v2185_v51 }
  0x79   :  { %1992 = vmatpush3.bf16.msra.mxu0 %v2185_v51 }
  0x7a   :  { %2026 = vmatpush3.bf16.msra.mxu1 %v2185_v51  ;;  %1993 = vmatprep.subr.bf16.mxu0 %v2192_v53 }
  0x7b   :  { %8 = vsyncpa [#allocation3], 0  ;;  %1298 = vmatmul.mubr.bf16.gmra.mrb[44].mxu0 %v2169_v52  ;;  %2019 = vmatprep.subr.bf16.mxu1 %v2192_v53  ;;  %v2176_v58 = vld [vmem:[%s2798_s0 + $0x130] ss:$36 sps:$4 sm:$0xff]   ;;  %v2177_v59 = vld [vmem:[%s2798_s0 + $0x138] ss:$36 sps:$4 sm:$0xff]  }
  0x7c   :  { %1395 = vmatmul.mubr.bf16.gmra.mrb[44].mxu1 %v2170_v54  ;;  %1305 = vmatprep.mubr.bf16.mxu0 %v2172_v55  ;;  %v2179_v60 = vld [vmem:[%s2798_s0 + $0x17c] ss:$36 sps:$4 sm:$0xff]   ;;  %v2181_v61 = vld [vmem:[%s2798_s0 + $0x184] ss:$36 sps:$4 sm:$0xff]   ;;  %v2188_v1 = vld [vmem:[%s2798_s0 + $0x1cc] ss:$36 sps:$4 sm:$0xff]  }
  0x7d   :  { %1402 = vmatprep.mubr.bf16.mxu1 %v2174_v56  ;;  %1994 = vmatpush3.bf16.msra.mxu0 %v2192_v53  ;;  %v2183_v62 = vld [vmem:[%s2798_s0 + $0x178] ss:$36 sps:$4 sm:$0xff]   ;;  %v2184_v63 = vld [vmem:[%s2798_s0 + $0x180] ss:$36 sps:$4 sm:$0xff]   ;;  %v2191_v3 = vld [vmem:[%s2798_s0 + $0x1c8] ss:$36 sps:$4 sm:$0xff]  }
  0x7e   :  { %2027 = vmatpush3.bf16.msra.mxu1 %v2192_v53  ;;  %1995 = vmatprep.subr.bf16.mxu0 %v2199_v57  ;;  %v2186_v0 = vld [vmem:[%s2798_s0 + $0x1c4] ss:$36 sps:$4 sm:$0xff]   ;;  %v2193_v4 = vld [vmem:[%s2798_s0 + $0x20c] ss:$36 sps:$4 sm:$0xff]   ;;  %v2195_v5 = vld [vmem:[%s2798_s0 + $0x214] ss:$36 sps:$4 sm:$0xff]  }
  0x7f   :  { %2020 = vmatprep.subr.bf16.mxu1 %v2199_v57  ;;  %v2190_v2 = vld [vmem:[%s2798_s0 + $0x1c0] ss:$36 sps:$4 sm:$0xff]   ;;  %v2197_v6 = vld [vmem:[%s2798_s0 + $0x208] ss:$36 sps:$4 sm:$0xff]   ;;  %v2198_v7 = vld [vmem:[%s2798_s0 + $0x210] ss:$36 sps:$4 sm:$0xff]  }
  0x80   :  { %v2200_v8 = vld [vmem:[%s2798_s0 + $0x20] ss:$36 sps:$4 sm:$0xff]   ;;  %v2202_v10 = vld [vmem:[%s2798_s0 + $0x68] ss:$36 sps:$4 sm:$0xff]   ;;  %v2204_v12 = vld [vmem:[%s2798_s0 + $0xb0] ss:$36 sps:$4 sm:$0xff]  }
  0x81   :  { %1996 = vmatpush3.bf16.msra.mxu0 %v2199_v57  ;;  %v2201_v9 = vld [vmem:[%s2798_s0 + $0x140] ss:$36 sps:$4 sm:$0xff]   ;;  %v2203_v11 = vld [vmem:[%s2798_s0 + $0x188] ss:$36 sps:$4 sm:$0xff]   ;;  %v2205_v13 = vld [vmem:[%s2798_s0 + $0x1d0] ss:$36 sps:$4 sm:$0xff]  }
  0x82   :  { %2028 = vmatpush3.bf16.msra.mxu1 %v2199_v57  ;;  %v2206_v14 = vld [vmem:[%s2798_s0 + $0xf8] ss:$36 sps:$4 sm:$0xff]   ;;  %v2690_v18 = vld [vmem:[%s2800_s2] ss:$0 sm:$0xff] }
  0x83   :  { %1306 = vmatmul.mubr.bf16.gmra.mrb[48].mxu0 %v2176_v58  ;;  %v2207_v15 = vld [vmem:[%s2798_s0 + $0x218] ss:$36 sps:$4 sm:$0xff]   ;;  %s2232_s0 = smov [#allocation2]  }
  0x84   :  { %1403 = vmatmul.mubr.bf16.gmra.mrb[48].mxu1 %v2177_v59  ;;  %1313 = vmatprep.mubr.bf16.mxu0 %v2179_v60  ;;  %s1553_s2 = sshll.u32 %s2232_s0, 4  ;;  %s1554_s2 = int_to_ptr.vmem [resolvable:$true] %s1553_s2 }
  0x85   :  { %1410 = vmatprep.mubr.bf16.mxu1 %v2181_v61  ;;  %s2208_s30 = scalar_lea.vmem %s1554_s2, 2048  ;;  %p2213_p1 = scmp.lt.s32.totalorder %s1554_s2, %s1554_s2 }
  0x86   :  { %p2209_p0 = scmp.ne.s32.totalorder %s1554_s2, %s2208_s30  ;;  %p2214_p2 = scmp.lt.s32.totalorder %s2208_s30, %s2208_s30 }
  0x88   :  { %p2215_p3 = por %p2214_p2, %p2213_p1 }
  0x8a   :  { %p2216_p4 = pnand %p2215_p3, %p2209_p0 }
  0x8b   :  { %1314 = vmatmul.mubr.bf16.gmra.mrb[52].mxu0 %v2183_v62 }
  0x8c   :  { %1411 = vmatmul.mubr.bf16.gmra.mrb[52].mxu1 %v2184_v63  ;;  %1321 = vmatprep.mubr.bf16.mxu0 %v2186_v0 }
  0x8d   :  { %1418 = vmatprep.mubr.bf16.mxu1 %v2188_v1 }
  0x93   :  { %1322 = vmatmul.mubr.bf16.gmra.mrb[56].mxu0 %v2190_v2 }
  0x94   :  { %1419 = vmatmul.mubr.bf16.gmra.mrb[56].mxu1 %v2191_v3  ;;  %1329 = vmatprep.mubr.bf16.mxu0 %v2193_v4 }
  0x95   :  { %1426 = vmatprep.mubr.bf16.mxu1 %v2195_v5 }
  0x9b   :  { %1330 = vmatmul.mubr.bf16.gmra.mrb[60].mxu0 %v2197_v6 }
  0x9c   :  { %1427 = vmatmul.mubr.bf16.gmra.mrb[60].mxu1 %v2198_v7  ;;  %1997 = vmatprep.mubr.bf16.mxu0 %v2200_v8 }
  0x9d   :  { %2005 = vmatprep.mubr.bf16.mxu1 %v2201_v9 }
  0xa3   :  { %1998 = vmatmul.mubr.bf16.vlgmr.msra.gmra.mrb[64].mxu0 %v2202_v10 }
  0xa4   :  { %2006 = vmatmul.mubr.bf16.vlgmr.msra.gmra.mrb[64].mxu1 %v2203_v11  ;;  %2001 = vmatprep.mubr.bf16.mxu0 %v2204_v12 }
  0xa5   :  { %2009 = vmatprep.mubr.bf16.mxu1 %v2205_v13 }
  0xab   :  { %2002 = vmatmul.mubr.bf16.gmra.mrb[68].mxu0 %v2206_v14 }
  0xac   :  { %2010 = vmatmul.mubr.bf16.gmra.mrb[68].mxu1 %v2207_v15 }
  0xf6   :  { %v1725_v16 = vpop.f32.mrb[0].mxu0 }
  0xf7   :  { %v1789_v17 = vpop.f32.mrb[0].mxu1  ;;  %v1726_v19 = vpop.f32.mrb[1].mxu0 }
  0xf8   :  { %v1727_v20 = vadd.f32 %v1726_v19, %v1725_v16  ;;  %v1790_v21 = vpop.f32.mrb[1].mxu1  ;;  %v1728_v22 = vpop.f32.mrb[2].mxu0 }
  0xf9   :  { %v1791_v23 = vadd.f32 %v1790_v21, %v1789_v17  ;;  %v1792_v24 = vpop.f32.mrb[2].mxu1  ;;  %v1729_v25 = vpop.f32.mrb[3].mxu0 }
  0xfa   :  { %v1082_v26 = vadd.f32 %v1727_v20, %v2690_v18  ;;  %v1730_v27 = vadd.f32 %v1729_v25, %v1728_v22  ;;  %v1793_v28 = vpop.f32.mrb[3].mxu1 }
  0xfb   :  { %v1794_v29 = vadd.f32 %v1793_v28, %v1792_v24 }
  0xfc   :  { %v2693_v30 = vadd.f32 %v1791_v23, %v1082_v26  ;;  %v1085_v31 = vadd.f32 %v1730_v27, %v2690_v18 }
  0xfe   :  { %v2696_v32 = vadd.f32 %v1794_v29, %v1085_v31  ;;  %v1731_v33 = vpop.f32.mrb[4].mxu0 }
  0xff   :  { %v1795_v34 = vpop.f32.mrb[4].mxu1  ;;  %v1732_v35 = vpop.f32.mrb[5].mxu0 }
 0x100   :  { %v1733_v36 = vadd.f32 %v1732_v35, %v1731_v33  ;;  %v1796_v37 = vpop.f32.mrb[5].mxu1  ;;  %v1734_v38 = vpop.f32.mrb[6].mxu0 }
 0x101   :  { %v1797_v39 = vadd.f32 %v1796_v37, %v1795_v34  ;;  %v1798_v40 = vpop.f32.mrb[6].mxu1  ;;  %v1735_v41 = vpop.f32.mrb[7].mxu0 }
 0x102   :  { %v1090_v42 = vadd.f32 %v1733_v36, %v2690_v18  ;;  %v1736_v43 = vadd.f32 %v1735_v41, %v1734_v38  ;;  %v1799_v44 = vpop.f32.mrb[7].mxu1 }
 0x103   :  { %v1800_v45 = vadd.f32 %v1799_v44, %v1798_v40 }
 0x104   :  { %v2699_v46 = vadd.f32 %v1797_v39, %v1090_v42  ;;  %v1093_v47 = vadd.f32 %v1736_v43, %v2690_v18 }
 0x106   :  { %v2702_v48 = vadd.f32 %v1800_v45, %v1093_v47  ;;  %v1737_v49 = vpop.f32.mrb[8].mxu0 }
 0x107   :  { %v1801_v50 = vpop.f32.mrb[8].mxu1  ;;  %v1738_v51 = vpop.f32.mrb[9].mxu0 }
 0x108   :  { %v1739_v52 = vadd.f32 %v1738_v51, %v1737_v49  ;;  %v1802_v53 = vpop.f32.mrb[9].mxu1  ;;  %v1740_v54 = vpop.f32.mrb[10].mxu0 }
 0x109   :  { %v1803_v55 = vadd.f32 %v1802_v53, %v1801_v50  ;;  %v1804_v56 = vpop.f32.mrb[10].mxu1  ;;  %v1741_v57 = vpop.f32.mrb[11].mxu0 }
 0x10a   :  { %v1098_v58 = vadd.f32 %v1739_v52, %v2690_v18  ;;  %v1742_v59 = vadd.f32 %v1741_v57, %v1740_v54  ;;  %v1805_v60 = vpop.f32.mrb[11].mxu1 }
 0x10b   :  { %v1806_v61 = vadd.f32 %v1805_v60, %v1804_v56 }
 0x10c   :  { %v2705_v62 = vadd.f32 %v1803_v55, %v1098_v58  ;;  %v1101_v63 = vadd.f32 %v1742_v59, %v2690_v18 }
 0x10e   :  { %v2708_v0 = vadd.f32 %v1806_v61, %v1101_v63  ;;  %v1743_v1 = vpop.f32.mrb[12].mxu0 }
 0x10f   :  { %v1807_v2 = vpop.f32.mrb[12].mxu1  ;;  %v1744_v3 = vpop.f32.mrb[13].mxu0 }
 0x110   :  { %v1745_v4 = vadd.f32 %v1744_v3, %v1743_v1  ;;  %v1808_v5 = vpop.f32.mrb[13].mxu1  ;;  %v1746_v6 = vpop.f32.mrb[14].mxu0 }
 0x111   :  { %v1809_v7 = vadd.f32 %v1808_v5, %v1807_v2  ;;  %v1810_v8 = vpop.f32.mrb[14].mxu1  ;;  %v1747_v9 = vpop.f32.mrb[15].mxu0 }
 0x112   :  { %v1106_v10 = vadd.f32 %v1745_v4, %v2690_v18  ;;  %v1748_v11 = vadd.f32 %v1747_v9, %v1746_v6  ;;  %v1811_v12 = vpop.f32.mrb[15].mxu1 }
 0x113   :  { %v1812_v13 = vadd.f32 %v1811_v12, %v1810_v8 }
 0x114   :  { %v2711_v14 = vadd.f32 %v1809_v7, %v1106_v10  ;;  %v1109_v15 = vadd.f32 %v1748_v11, %v2690_v18 }
 0x116   :  { %v2714_v16 = vadd.f32 %v1812_v13, %v1109_v15  ;;  %v1749_v17 = vpop.f32.mrb[16].mxu0 }
 0x117   :  { %v1813_v19 = vpop.f32.mrb[16].mxu1  ;;  %v1750_v20 = vpop.f32.mrb[17].mxu0 }
 0x118   :  { %v1751_v21 = vadd.f32 %v1750_v20, %v1749_v17  ;;  %v1814_v22 = vpop.f32.mrb[17].mxu1  ;;  %v1752_v23 = vpop.f32.mrb[18].mxu0 }
 0x119   :  { %v1815_v24 = vadd.f32 %v1814_v22, %v1813_v19  ;;  %v1816_v25 = vpop.f32.mrb[18].mxu1  ;;  %v1753_v26 = vpop.f32.mrb[19].mxu0 }
 0x11a   :  { %v1114_v27 = vadd.f32 %v1751_v21, %v2690_v18  ;;  %v1754_v28 = vadd.f32 %v1753_v26, %v1752_v23  ;;  %v1817_v29 = vpop.f32.mrb[19].mxu1 }
 0x11b   :  { %v1818_v31 = vadd.f32 %v1817_v29, %v1816_v25 }
 0x11c   :  { %v2717_v33 = vadd.f32 %v1815_v24, %v1114_v27  ;;  %v1117_v34 = vadd.f32 %v1754_v28, %v2690_v18 }
 0x11e   :  { %v2720_v35 = vadd.f32 %v1818_v31, %v1117_v34  ;;  %v1755_v36 = vpop.f32.mrb[20].mxu0 }
 0x11f   :  { %v1819_v37 = vpop.f32.mrb[20].mxu1  ;;  %v1756_v38 = vpop.f32.mrb[21].mxu0 }
 0x120   :  { %v1757_v39 = vadd.f32 %v1756_v38, %v1755_v36  ;;  %v1820_v40 = vpop.f32.mrb[21].mxu1  ;;  %v1758_v41 = vpop.f32.mrb[22].mxu0 }
 0x121   :  { %v1821_v42 = vadd.f32 %v1820_v40, %v1819_v37  ;;  %v1822_v43 = vpop.f32.mrb[22].mxu1  ;;  %v1759_v44 = vpop.f32.mrb[23].mxu0 }
 0x122   :  { %v1122_v45 = vadd.f32 %v1757_v39, %v2690_v18  ;;  %v1760_v47 = vadd.f32 %v1759_v44, %v1758_v41  ;;  %v1823_v49 = vpop.f32.mrb[23].mxu1 }
 0x123   :  { %v1824_v50 = vadd.f32 %v1823_v49, %v1822_v43 }
 0x124   :  { %v2723_v51 = vadd.f32 %v1821_v42, %v1122_v45  ;;  %v1125_v52 = vadd.f32 %v1760_v47, %v2690_v18 }
 0x126   :  { %v2726_v53 = vadd.f32 %v1824_v50, %v1125_v52  ;;  %v1761_v54 = vpop.f32.mrb[24].mxu0 }
 0x127   :  { %v1825_v55 = vpop.f32.mrb[24].mxu1  ;;  %v1762_v56 = vpop.f32.mrb[25].mxu0 }
 0x128   :  { %v1763_v57 = vadd.f32 %v1762_v56, %v1761_v54  ;;  %v1826_v58 = vpop.f32.mrb[25].mxu1  ;;  %v1764_v59 = vpop.f32.mrb[26].mxu0 }
 0x129   :  { %v1827_v60 = vadd.f32 %v1826_v58, %v1825_v55  ;;  %v1828_v61 = vpop.f32.mrb[26].mxu1  ;;  %v1765_v63 = vpop.f32.mrb[27].mxu0 }
 0x12a   :  { %v1130_v1 = vadd.f32 %v1763_v57, %v2690_v18  ;;  %v1766_v2 = vadd.f32 %v1765_v63, %v1764_v59  ;;  %v1829_v3 = vpop.f32.mrb[27].mxu1 }
 0x12b   :  { %v1830_v4 = vadd.f32 %v1829_v3, %v1828_v61 }
 0x12c   :  { %v2729_v5 = vadd.f32 %v1827_v60, %v1130_v1  ;;  %v1133_v6 = vadd.f32 %v1766_v2, %v2690_v18 }
 0x12e   :  { %v2732_v7 = vadd.f32 %v1830_v4, %v1133_v6  ;;  %v1767_v8 = vpop.f32.mrb[28].mxu0 }
 0x12f   :  { %v1831_v9 = vpop.f32.mrb[28].mxu1  ;;  %v1768_v10 = vpop.f32.mrb[29].mxu0 }
 0x130   :  { %v1769_v11 = vadd.f32 %v1768_v10, %v1767_v8  ;;  %v1832_v12 = vpop.f32.mrb[29].mxu1  ;;  %v1770_v13 = vpop.f32.mrb[30].mxu0 }
 0x131   :  { %v1833_v15 = vadd.f32 %v1832_v12, %v1831_v9  ;;  %v1834_v17 = vpop.f32.mrb[30].mxu1  ;;  %v1771_v19 = vpop.f32.mrb[31].mxu0 }
 0x132   :  { %v1138_v20 = vadd.f32 %v1769_v11, %v2690_v18  ;;  %v1772_v21 = vadd.f32 %v1771_v19, %v1770_v13  ;;  %v1835_v22 = vpop.f32.mrb[31].mxu1 }
 0x133   :  { %v1836_v23 = vadd.f32 %v1835_v22, %v1834_v17 }
 0x134   :  { %v2735_v24 = vadd.f32 %v1833_v15, %v1138_v20  ;;  %v1141_v25 = vadd.f32 %v1772_v21, %v2690_v18 }
 0x136   :  { %v2738_v26 = vadd.f32 %v1836_v23, %v1141_v25  ;;  %v1853_v27 = vpop.f32.mrb[32].mxu0 }
 0x137   :  { %v1917_v28 = vpop.f32.mrb[32].mxu1  ;;  %v1854_v29 = vpop.f32.mrb[33].mxu0 }
 0x138   :  { %v1855_v31 = vadd.f32 %v1854_v29, %v1853_v27  ;;  %v1918_v34 = vpop.f32.mrb[33].mxu1  ;;  %v1856_v36 = vpop.f32.mrb[34].mxu0 }
 0x139   :  { %v1919_v37 = vadd.f32 %v1918_v34, %v1917_v28  ;;  %v1920_v38 = vpop.f32.mrb[34].mxu1  ;;  %v1857_v39 = vpop.f32.mrb[35].mxu0 }
 0x13a   :  { %v1276_v40 = vadd.f32 %v1855_v31, %v2693_v30  ;;  %v1858_v41 = vadd.f32 %v1857_v39, %v1856_v36  ;;  %v1921_v42 = vpop.f32.mrb[35].mxu1 }
 0x13b   :  { %v1922_v43 = vadd.f32 %v1921_v42, %v1920_v38 }
 0x13c   :  { %v1279_v44 = vadd.f32 %v1858_v41, %v2696_v32  ;;  %v2742_v45 = vadd.f32 %v1919_v37, %v1276_v40 }
 0x13e   :  { %v1859_v18 = vpop.f32.mrb[36].mxu0  ;;  %v2744_v47 = vadd.f32 %v1922_v43, %v1279_v44 }
 0x13f   :  { %v1923_v49 = vpop.f32.mrb[36].mxu1  ;;  %v1860_v50 = vpop.f32.mrb[37].mxu0 }
 0x140   :  { %v1861_v52 = vadd.f32 %v1860_v50, %v1859_v18  ;;  %v1924_v54 = vpop.f32.mrb[37].mxu1  ;;  %v1862_v55 = vpop.f32.mrb[38].mxu0 }
 0x141   :  { %v1925_v56 = vadd.f32 %v1924_v54, %v1923_v49  ;;  %v1926_v57 = vpop.f32.mrb[38].mxu1  ;;  %v1863_v58 = vpop.f32.mrb[39].mxu0 }
 0x142   :  { %v1284_v30 = vadd.f32 %v1861_v52, %v2699_v46  ;;  %v1864_v59 = vadd.f32 %v1863_v58, %v1862_v55  ;;  %v1927_v60 = vpop.f32.mrb[39].mxu1 }
 0x143   :  { %v1928_v61 = vadd.f32 %v1927_v60, %v1926_v57 }
 0x144   :  { %v1287_v32 = vadd.f32 %v1864_v59, %v2702_v48  ;;  %v2748_v63 = vadd.f32 %v1925_v56, %v1284_v30 }
 0x146   :  { %v1865_v1 = vpop.f32.mrb[40].mxu0  ;;  %v2750_v2 = vadd.f32 %v1928_v61, %v1287_v32 }
 0x147   :  { %v1929_v3 = vpop.f32.mrb[40].mxu1  ;;  %v1866_v4 = vpop.f32.mrb[41].mxu0 }
 0x148   :  { %v1867_v6 = vadd.f32 %v1866_v4, %v1865_v1  ;;  %v1930_v8 = vpop.f32.mrb[41].mxu1  ;;  %v1868_v9 = vpop.f32.mrb[42].mxu0 }
 0x149   :  { %v1931_v10 = vadd.f32 %v1930_v8, %v1929_v3  ;;  %v1932_v11 = vpop.f32.mrb[42].mxu1  ;;  %v1869_v12 = vpop.f32.mrb[43].mxu0 }
 0x14a   :  { %v1292_v46 = vadd.f32 %v1867_v6, %v2705_v62  ;;  %v1870_v13 = vadd.f32 %v1869_v12, %v1868_v9  ;;  %v1933_v15 = vpop.f32.mrb[43].mxu1 }
 0x14b   :  { %v1934_v17 = vadd.f32 %v1933_v15, %v1932_v11 }
 0x14c   :  { %v1295_v48 = vadd.f32 %v1870_v13, %v2708_v0  ;;  %v2754_v19 = vadd.f32 %v1931_v10, %v1292_v46 }
 0x14e   :  { %v1871_v20 = vpop.f32.mrb[44].mxu0  ;;  %v2756_v21 = vadd.f32 %v1934_v17, %v1295_v48 }
 0x14f   :  { %v1935_v22 = vpop.f32.mrb[44].mxu1  ;;  %v1872_v23 = vpop.f32.mrb[45].mxu0 }
 0x150   :  { %v1873_v25 = vadd.f32 %v1872_v23, %v1871_v20  ;;  %v1936_v27 = vpop.f32.mrb[45].mxu1  ;;  %v1874_v28 = vpop.f32.mrb[46].mxu0 }
 0x151   :  { %v1937_v29 = vadd.f32 %v1936_v27, %v1935_v22  ;;  %v1938_v31 = vpop.f32.mrb[46].mxu1  ;;  %v1875_v34 = vpop.f32.mrb[47].mxu0 }
 0x152   :  { %v1300_v62 = vadd.f32 %v1873_v25, %v2711_v14  ;;  %v1876_v36 = vadd.f32 %v1875_v34, %v1874_v28  ;;  %v1939_v37 = vpop.f32.mrb[47].mxu1 }
 0x153   :  { %v1940_v38 = vadd.f32 %v1939_v37, %v1938_v31 }
 0x154   :  { %v1303_v0 = vadd.f32 %v1876_v36, %v2714_v16  ;;  %v2760_v39 = vadd.f32 %v1937_v29, %v1300_v62 }
 0x156   :  { %v1877_v40 = vpop.f32.mrb[48].mxu0  ;;  %v2762_v41 = vadd.f32 %v1940_v38, %v1303_v0 }
 0x157   :  { %v1941_v42 = vpop.f32.mrb[48].mxu1  ;;  %v1878_v43 = vpop.f32.mrb[49].mxu0 }
 0x158   :  { %v1879_v44 = vadd.f32 %v1878_v43, %v1877_v40  ;;  %v1942_v18 = vpop.f32.mrb[49].mxu1  ;;  %v1880_v49 = vpop.f32.mrb[50].mxu0 }
 0x159   :  { %v1943_v50 = vadd.f32 %v1942_v18, %v1941_v42  ;;  %v1944_v52 = vpop.f32.mrb[50].mxu1  ;;  %v1881_v54 = vpop.f32.mrb[51].mxu0 }
 0x15a   :  { %v1308_v14 = vadd.f32 %v1879_v44, %v2717_v33  ;;  %v1882_v55 = vadd.f32 %v1881_v54, %v1880_v49  ;;  %v1945_v56 = vpop.f32.mrb[51].mxu1 }
 0x15b   :  { %v1946_v57 = vadd.f32 %v1945_v56, %v1944_v52 }
 0x15c   :  { %v1311_v16 = vadd.f32 %v1882_v55, %v2720_v35  ;;  %v1405_v58 = vadd.f32 %v1943_v50, %v1308_v14 }
 0x15e   :  { %v1883_v30 = vpop.f32.mrb[52].mxu0  ;;  %v2766_v59 = vadd.f32 %v1946_v57, %v1311_v16 }
 0x15f   :  { %v1947_v60 = vpop.f32.mrb[52].mxu1  ;;  %v1884_v61 = vpop.f32.mrb[53].mxu0 }
 0x160   :  { %v1885_v32 = vadd.f32 %v1884_v61, %v1883_v30  ;;  %v1948_v1 = vpop.f32.mrb[53].mxu1  ;;  %v1886_v3 = vpop.f32.mrb[54].mxu0 }
 0x161   :  { %v1949_v4 = vadd.f32 %v1948_v1, %v1947_v60  ;;  %v1950_v6 = vpop.f32.mrb[54].mxu1  ;;  %v1887_v8 = vpop.f32.mrb[55].mxu0 }
 0x162   :  { %v1316_v9 = vadd.f32 %v1885_v32, %v2723_v51  ;;  %v1888_v33 = vadd.f32 %v1887_v8, %v1886_v3  ;;  %v1951_v10 = vpop.f32.mrb[55].mxu1 }
 0x163   :  { %v1952_v11 = vadd.f32 %v1951_v10, %v1950_v6 }
 0x164   :  { %v1319_v12 = vadd.f32 %v1888_v33, %v2726_v53  ;;  %v1413_v35 = vadd.f32 %v1949_v4, %v1316_v9 }
 0x166   :  { %v1889_v46 = vpop.f32.mrb[56].mxu0  ;;  %v1416_v13 = vadd.f32 %v1952_v11, %v1319_v12 }
 0x167   :  { %v1953_v15 = vpop.f32.mrb[56].mxu1  ;;  %v1890_v17 = vpop.f32.mrb[57].mxu0 }
 0x168   :  { %v1891_v48 = vadd.f32 %v1890_v17, %v1889_v46  ;;  %v1954_v20 = vpop.f32.mrb[57].mxu1  ;;  %v1892_v22 = vpop.f32.mrb[58].mxu0 }
 0x169   :  { %v1955_v23 = vadd.f32 %v1954_v20, %v1953_v15  ;;  %v1956_v25 = vpop.f32.mrb[58].mxu1  ;;  %v1893_v27 = vpop.f32.mrb[59].mxu0 }
 0x16a   :  { %v1324_v28 = vadd.f32 %v1891_v48, %v2729_v5  ;;  %v1894_v29 = vadd.f32 %v1893_v27, %v1892_v22  ;;  %v1957_v51 = vpop.f32.mrb[59].mxu1 }
 0x16b   :  { %v1958_v31 = vadd.f32 %v1957_v51, %v1956_v25 }
 0x16c   :  { %v1327_v34 = vadd.f32 %v1894_v29, %v2732_v7  ;;  %v1421_v62 = vadd.f32 %v1955_v23, %v1324_v28 }
 0x16e   :  { %v1895_v53 = vpop.f32.mrb[60].mxu0  ;;  %v2772_v36 = vadd.f32 %v1958_v31, %v1327_v34 }
 0x16f   :  { %v1959_v37 = vpop.f32.mrb[60].mxu1  ;;  %v1896_v38 = vpop.f32.mrb[61].mxu0 }
 0x170   :  { %v1897_v0 = vadd.f32 %v1896_v38, %v1895_v53  ;;  %v1960_v40 = vpop.f32.mrb[61].mxu1  ;;  %v1898_v42 = vpop.f32.mrb[62].mxu0 }
 0x171   :  { %v1961_v43 = vadd.f32 %v1960_v40, %v1959_v37  ;;  %v1962_v44 = vpop.f32.mrb[62].mxu1  ;;  %v1899_v18 = vpop.f32.mrb[63].mxu0 }
 0x172   :  { %v1332_v49 = vadd.f32 %v1897_v0, %v2735_v24  ;;  %v1900_v5 = vadd.f32 %v1899_v18, %v1898_v42  ;;  %v1963_v50 = vpop.f32.mrb[63].mxu1 }
 0x173   :  { %v1964_v52 = vadd.f32 %v1963_v50, %v1962_v44 }
 0x174   :  { %v1335_v54 = vadd.f32 %v1900_v5, %v2738_v26  ;;  %v1429_v7 = vadd.f32 %v1961_v43, %v1332_v49 }
 0x176   :  { %v1999_v14 = vpop.f32.mrb[64].mxu0  ;;  %v1432_v55 = vadd.f32 %v1964_v52, %v1335_v54 }
 0x177   :  { %v1478_v56 = vadd.f32 %v1999_v14, %v2748_v63  ;;  %v2007_v57 = vpop.f32.mrb[64].mxu1  ;;  %v1469_v16 = vpop.f32.mrb[65].mxu0 }
 0x178   :  { %v1510_v30 = vadd.f32 %v2007_v57, %v1413_v35  ;;  %v1470_v60 = vadd.f32 %v1469_v16, %v2742_v45  ;;  %v1501_v61 = vpop.f32.mrb[65].mxu1  ;;  %v2000_v32 = vpop.f32.mrb[66].mxu0 }
 0x179   :  { %1534 = vst [vmem:[#allocation2 + $0x10] sm:$0xff] %v1478_v56  ;;  %v1502_v1 = vadd.f32 %v1501_v61, %v1405_v58  ;;  %v1481_v24 = vadd.f32 %v2000_v32, %v2750_v2  ;;  %v2008_v3 = vpop.f32.mrb[66].mxu1  ;;  %v1472_v4 = vpop.f32.mrb[67].mxu0 }
 0x17a   :  { %1542 = vst [vmem:[#allocation2 + $0x50] sm:$0xff] %v1510_v30  ;;  %1532 = vst [vmem:[#allocation2] sm:$0xff] %v1470_v60  ;;  %v1513_v26 = vadd.f32 %v2008_v3, %v1416_v13  ;;  %v1473_v6 = vadd.f32 %v1472_v4, %v2744_v47  ;;  %v1504_v8 = vpop.f32.mrb[67].mxu1 }
 0x17b   :  { %1540 = vst [vmem:[#allocation2 + $0x40] sm:$0xff] %v1502_v1  ;;  %1535 = vst [vmem:[#allocation2 + $0x18] sm:$0xff] %v1481_v24  ;;  %v1505_v63 = vadd.f32 %v1504_v8, %v2766_v59 }
 0x17c   :  { %1543 = vst [vmem:[#allocation2 + $0x58] sm:$0xff] %v1513_v26  ;;  %1533 = vst [vmem:[#allocation2 + $0x8] sm:$0xff] %v1473_v6 }
 0x17d   :  { %1541 = vst [vmem:[#allocation2 + $0x48] sm:$0xff] %v1505_v63 }
 0x17e   :  { %v2003_v45 = vpop.f32.mrb[68].mxu0 }
 0x17f   :  { %v1494_v58 = vadd.f32 %v2003_v45, %v2760_v39  ;;  %v2011_v9 = vpop.f32.mrb[68].mxu1  ;;  %v1485_v2 = vpop.f32.mrb[69].mxu0 }
 0x180   :  { %v1526_v33 = vadd.f32 %v2011_v9, %v1429_v7  ;;  %v1486_v10 = vadd.f32 %v1485_v2, %v2754_v19  ;;  %v1517_v11 = vpop.f32.mrb[69].mxu1  ;;  %v2004_v47 = vpop.f32.mrb[70].mxu0 }
 0x181   :  { %1538 = vst [vmem:[#allocation2 + $0x30] sm:$0xff] %v1494_v58  ;;  %v1518_v12 = vadd.f32 %v1517_v11, %v1421_v62  ;;  %v1497_v35 = vadd.f32 %v2004_v47, %v2762_v41  ;;  %v2012_v59 = vpop.f32.mrb[70].mxu1  ;;  %v1488_v46 = vpop.f32.mrb[71].mxu0 }
 0x182   :  { %1546 = vst [vmem:[#allocation2 + $0x70] sm:$0xff] %v1526_v33  ;;  %1536 = vst [vmem:[#allocation2 + $0x20] sm:$0xff] %v1486_v10  ;;  %v1529_v13 = vadd.f32 %v2012_v59, %v1432_v55  ;;  %v1489_v39 = vadd.f32 %v1488_v46, %v2756_v21  ;;  %v1520_v15 = vpop.f32.mrb[71].mxu1 }
 0x183   :  { %1544 = vst [vmem:[#allocation2 + $0x60] sm:$0xff] %v1518_v12  ;;  %1539 = vst [vmem:[#allocation2 + $0x38] sm:$0xff] %v1497_v35  ;;  %v1521_v17 = vadd.f32 %v1520_v15, %v2772_v36 }
 0x184   :  { %1547 = vst [vmem:[#allocation2 + $0x78] sm:$0xff] %v1529_v13  ;;  %1537 = vst [vmem:[#allocation2 + $0x28] sm:$0xff] %v1489_v39 }
 0x185   :  { %1545 = vst [vmem:[#allocation2 + $0x68] sm:$0xff] %v1521_v17 }
 0x186   :  { %2219 = shalt.err (!%p2216_p4)
}
 0x187   :  { %s2220_s6 = scalar_lea.hbm %s2801_s3, 2048 }
 0x188   :  { %p2221_p5 = scmp.ne.s32.totalorder %s2801_s3, %s2220_s6  ;;  %p2224_p6 = scmp.lt.u32.totalorder %s2220_s6, %s2801_s3 }
 0x18a   :  { %p2226_p7 = pnand %p2224_p6, %p2221_p5 }
 0x18c   :  { %2229 = shalt.err (!%p2226_p7)
}
 0x18d   :  { %s2233_s11 = smov 128   ;;  %s2234_s12 = smov 8  }
 0x18e   :  { %1559 = dma.vmem_to_hbm [thread:$0]  %s1554_s2, 2048, %s2801_s3, [#allocation3], %s2233_s11, %s2233_s11, %s2234_s12  }
 0x18f   :  { %2230 = dma.done.wait [#allocation3], 2048  }
 0x190   :  { %2231 = vsyncadd [#allocation3], 4294965248 }
 0x191   :  { %1563 = vsyncpa [#allocation3], 1 }

</bundles_post_ra>
